<compile_context>
chip_gen: v7x
topology: tpu7x:2x2x1
jax: 0.10.0
libtpu: 0.0.40
codegen_flags: <defaults>
</compile_context>

<pallas_src>
import math
import functools

import jax
import jax.numpy as jnp
from jax.experimental import pallas as pl
from jax.experimental.pallas import tpu as pltpu

NEG = -1e30  # additive mask stand-in for -inf (exp underflows to exactly 0)

MAX_LENGTH = 72
D_MODEL = 32
NHEAD = 8
DIM_FF = 2048
N_ENC = 6
N_DEC = 6
SRC_VOCAB = 40
TGT_VOCAB = 45


# --------------------------- in-kernel helpers (traced inline) ---------------------------

def _layer_norm(x, g, b):
    """x: (N, D) f32; g, b: (1, D) f32."""
    mean = jnp.mean(x, axis=-1, keepdims=True)
    xc = x - mean
    var = jnp.mean(xc * xc, axis=-1, keepdims=True)
    return xc * jax.lax.rsqrt(var + 1e-5) * g + b


def _softmax_rows(s):
    s = s - jnp.max(s, axis=-1, keepdims=True)
    e = jnp.exp(s)
    return e * pl.reciprocal(jnp.sum(e, axis=-1, keepdims=True), approx=True)


def _attention_core(q2d, k2d, v2d, *, B, Tq, Tk, nhead, mask_fn):
    """q2d: (B*Tq, D), k2d/v2d: (B*Tk, D); mask_fn(b) -> additive mask broadcastable
    to (Tq, Tk), or None. Everything stays 2-D (feature axis on lanes), all in VMEM."""
    D = q2d.shape[-1]
    Dh = D // nhead
    scale = 1.0 / math.sqrt(Dh)
    out_rows = []
    for b in range(B):
        qb = q2d[b * Tq:(b + 1) * Tq, :]
        kb = k2d[b * Tk:(b + 1) * Tk, :]
        vb = v2d[b * Tk:(b + 1) * Tk, :]
        mask_b = mask_fn(b)
        heads = []
        for h in range(nhead):
            qh = qb[:, h * Dh:(h + 1) * Dh]
            kh = kb[:, h * Dh:(h + 1) * Dh]
            vh = vb[:, h * Dh:(h + 1) * Dh]
            s = jnp.dot(qh, kh.T, preferred_element_type=jnp.float32) * scale
            if mask_b is not None:
                s = s + mask_b
            p = _softmax_rows(s)
            heads.append(jnp.dot(p, vh, preferred_element_type=jnp.float32))
        out_rows.append(jnp.concatenate(heads, axis=-1))   # (Tq, D)
    return jnp.concatenate(out_rows, axis=0)                # (B*Tq, D)


def _ffn(x, w1_bf16, b1, w2_bf16, b2):
    """lin1 + relu + lin2; bf16 weights, f32 MXU accumulation; intermediate stays in VMEM."""
    h = jnp.dot(x.astype(jnp.bfloat16), w1_bf16, preferred_element_type=jnp.float32) + b1
    h = jnp.maximum(h, 0.0)
    return jnp.dot(h.astype(jnp.bfloat16), w2_bf16, preferred_element_type=jnp.float32) + b2


# --------------------------- fused encoder-stack kernel ---------------------------

def _encoder_stack_kernel(src_neg_ref, x_in_ref,
                          wqkv_ref, bqkv_ref, wo_ref, bo_ref,
                          n1g_ref, n1b_ref,
                          w1_ref, b1_ref, w2_ref, b2_ref,
                          n2g_ref, n2b_ref,
                          fng_ref, fnb_ref,
                          out_ref, x_scr,
                          *, B, S, nhead):
    layer = pl.program_id(0)

    @pl.when(layer == 0)
    def _():
        x_scr[...] = x_in_ref[...]

    x = x_scr[...]                      # (B*S, D) f32, carried across layers in VMEM
    D = x.shape[-1]
    src_neg = src_neg_ref[...]          # (B, S) additive key-padding mask rows

    # ---- self-attention (fused QKV projection) ----
    qkv = jnp.dot(x, wqkv_ref[0], preferred_element_type=jnp.float32) + bqkv_ref[0]
    attn = _attention_core(qkv[:, 0:D], qkv[:, D:2 * D], qkv[:, 2 * D:3 * D],
                           B=B, Tq=S, Tk=S, nhead=nhead,
                           mask_fn=lambda b: src_neg[b:b + 1, :])
    a = jnp.dot(attn, wo_ref[0], preferred_element_type=jnp.float32) + bo_ref[0]
    x = _layer_norm(x + a, n1g_ref[0], n1b_ref[0])

    # ---- feed-forward ----
    f = _ffn(x, w1_ref[0], b1_ref[0], w2_ref[0], b2_ref[0])
    x = _layer_norm(x + f, n2g_ref[0], n2b_ref[0])

    x_scr[...] = x

    @pl.when(layer == pl.num_programs(0) - 1)
    def _():
        out_ref[...] = _layer_norm(x, fng_ref[...], fnb_ref[...])   # final encoder norm


# --------------------------- fused decoder-stack kernel ---------------------------

def _decoder_stack_kernel(tgt_neg_ref, y_in_ref, mem_ref,
                          sa_wqkv_ref, sa_bqkv_ref, sa_wo_ref, sa_bo_ref,
                          n1g_ref, n1b_ref,
                          ca_wq_ref, ca_bq_ref, ca_wkv_ref, ca_bkv_ref,
                          ca_wo_ref, ca_bo_ref,
                          n2g_ref, n2b_ref,
                          w1_ref, b1_ref, w2_ref, b2_ref,
                          n3g_ref, n3b_ref,
                          fng_ref, fnb_ref,
                          out_ref, y_scr,
                          *, B, T, S, nhead):
    layer = pl.program_id(0)

    @pl.when(layer == 0)
    def _():
        y_scr[...] = y_in_ref[...]

    y = y_scr[...]                      # (B*T, D) f32
    D = y.shape[-1]
    mem = mem_ref[...]                  # (B*S, D) encoder memory (resident, constant block)
    tgt_neg = tgt_neg_ref[...]          # (B, T)

    # causal mask built in-kernel (no HBM mask tensor)
    rows = jax.lax.broadcasted_iota(jnp.int32, (T, T), 0)
    cols = jax.lax.broadcasted_iota(jnp.int32, (T, T), 1)
    causal_neg = jnp.where(cols > rows, NEG, 0.0).astype(jnp.float32)

    # ---- masked self-attention ----
    qkv = jnp.dot(y, sa_wqkv_ref[0], preferred_element_type=jnp.float32) + sa_bqkv_ref[0]
    attn = _attention_core(qkv[:, 0:D], qkv[:, D:2 * D], qkv[:, 2 * D:3 * D],
                           B=B, Tq=T, Tk=T, nhead=nhead,
                           mask_fn=lambda b: causal_neg + tgt_neg[b:b + 1, :])
    a = jnp.dot(attn, sa_wo_ref[0], preferred_element_type=jnp.float32) + sa_bo_ref[0]
    y = _layer_norm(y + a, n1g_ref[0], n1b_ref[0])

    # ---- cross-attention (memory_key_padding_mask=None, as in the PyTorch forward) ----
    q = jnp.dot(y, ca_wq_ref[0], preferred_element_type=jnp.float32) + ca_bq_ref[0]
    kv = jnp.dot(mem, ca_wkv_ref[0], preferred_element_type=jnp.float32) + ca_bkv_ref[0]
    attn = _attention_core(q, kv[:, 0:D], kv[:, D:2 * D],
                           B=B, Tq=T, Tk=S, nhead=nhead,
                           mask_fn=lambda b: None)
    c = jnp.dot(attn, ca_wo_ref[0], preferred_element_type=jnp.float32) + ca_bo_ref[0]
    y = _layer_norm(y + c, n2g_ref[0], n2b_ref[0])

    # ---- feed-forward ----
    f = _ffn(y, w1_ref[0], b1_ref[0], w2_ref[0], b2_ref[0])
    y = _layer_norm(y + f, n3g_ref[0], n3b_ref[0])

    y_scr[...] = y

    @pl.when(layer == pl.num_programs(0) - 1)
    def _():
        out_ref[...] = _layer_norm(y, fng_ref[...], fnb_ref[...])   # final decoder norm


# --------------------------- BlockSpec helpers & wrappers ---------------------------

def _stacked_spec(arr):
    """Per-layer slab: leading axis is the layer (grid) index."""
    n_tail = arr.ndim - 1
    return pl.BlockSpec((1,) + arr.shape[1:], lambda l: (l,) + (0,) * n_tail)


def _whole_spec(arr):
    """Full array, constant block index (stays VMEM-resident across the layer loop)."""
    nd = arr.ndim
    return pl.BlockSpec(arr.shape, lambda l: (0,) * nd)


_ENC_STACKED = ("wqkv", "bqkv", "wo", "bo", "n1g", "n1b",
                "w1", "b1", "w2", "b2", "n2g", "n2b")
_DEC_STACKED = ("sa_wqkv", "sa_bqkv", "sa_wo", "sa_bo", "n1g", "n1b",
                "ca_wq", "ca_bq", "ca_wkv", "ca_bkv", "ca_wo", "ca_bo",
                "n2g", "n2b", "w1", "b1", "w2", "b2", "n3g", "n3b")


def encoder_stack(x2d, src_neg, p, *, B, S, nhead):
    n_layers = p["wqkv"].shape[0]
    D = x2d.shape[-1]
    inputs = [src_neg, x2d] + [p[k] for k in _ENC_STACKED] + [p["fng"], p["fnb"]]
    in_specs = ([_whole_spec(src_neg), _whole_spec(x2d)]
                + [_stacked_spec(p[k]) for k in _ENC_STACKED]
                + [_whole_spec(p["fng"]), _whole_spec(p["fnb"])])
    return pl.pallas_call(
        functools.partial(_encoder_stack_kernel, B=B, S=S, nhead=nhead),
        out_shape=jax.ShapeDtypeStruct((B * S, D), jnp.float32),
        grid_spec=pltpu.PrefetchScalarGridSpec(
            num_scalar_prefetch=0,
            grid=(n_layers,),
            in_specs=in_specs,
            out_specs=pl.BlockSpec((B * S, D), lambda l: (0, 0)),
            scratch_shapes=[pltpu.VMEM((B * S, D), jnp.float32)]),
        compiler_params=pltpu.CompilerParams(dimension_semantics=("arbitrary",)),
    )(*inputs)


def decoder_stack(y2d, mem2d, tgt_neg, p, *, B, T, S, nhead):
    n_layers = p["sa_wqkv"].shape[0]
    D = y2d.shape[-1]
    inputs = [tgt_neg, y2d, mem2d] + [p[k] for k in _DEC_STACKED] + [p["fng"], p["fnb"]]
    in_specs = ([_whole_spec(tgt_neg), _whole_spec(y2d), _whole_spec(mem2d)]
                + [_stacked_spec(p[k]) for k in _DEC_STACKED]
                + [_whole_spec(p["fng"]), _whole_spec(p["fnb"])])
    return pl.pallas_call(
        functools.partial(_decoder_stack_kernel, B=B, T=T, S=S, nhead=nhead),
        out_shape=jax.ShapeDtypeStruct((B * T, D), jnp.float32),
        grid_spec=pltpu.PrefetchScalarGridSpec(
            num_scalar_prefetch=0,
            grid=(n_layers,),
            in_specs=in_specs,
            out_specs=pl.BlockSpec((B * T, D), lambda l: (0, 0)),
            scratch_shapes=[pltpu.VMEM((B * T, D), jnp.float32)]),
        compiler_params=pltpu.CompilerParams(dimension_semantics=("arbitrary",)),
    )(*inputs)


# --------------------------- model forward ---------------------------

def positional_encoding_table(max_len, d_model):
    position = jnp.arange(max_len, dtype=jnp.float32)[:, None]
    div_term = jnp.exp(jnp.arange(0, d_model, 2, dtype=jnp.float32)
                       * (-math.log(10000.0) / d_model))
    pe = jnp.zeros((max_len, d_model), jnp.float32)
    pe = pe.at[:, 0::2].set(jnp.sin(position * div_term))
    pe = pe.at[:, 1::2].set(jnp.cos(position * div_term))
    return pe


def translation_model_forward(params, src_tokens, tgt_tokens, *, nhead=NHEAD):
    B, S = src_tokens.shape
    T = tgt_tokens.shape[1]
    D = params["src_emb"].shape[1]

    # embedding (padding_idx=2 rows are zero) + positional encoding; dropout = identity (eval).
    pe = positional_encoding_table(MAX_LENGTH, D)
    src_x = (params["src_emb"][src_tokens] + pe[:S][None]).reshape(B * S, D)
    tgt_x = (params["tgt_emb"][tgt_tokens] + pe[:T][None]).reshape(B * T, D)

    # key-padding masks as compact (B, S)/(B, T) additive rows (expanded in-kernel)
    src_neg = jnp.where(src_tokens == 2, NEG, 0.0).astype(jnp.float32)
    tgt_neg = jnp.where(tgt_tokens == 2, NEG, 0.0).astype(jnp.float32)

    memory = encoder_stack(src_x, src_neg, params["enc"], B=B, S=S, nhead=nhead)
    out2d = decoder_stack(tgt_x, memory, tgt_neg, params["dec"], B=B, T=T, S=S, nhead=nhead)
    return out2d.reshape(B, T, D)


# --------------------------- deterministic parameter init ---------------------------

def _dense(key, shape, scale=0.02):
    return scale * jax.random.normal(key, shape, jnp.float32)


def _enc_layer_params(key, d, dff):
    ks = jax.random.split(key, 4)
    return dict(
        wqkv=_dense(ks[0], (d, 3 * d)), bqkv=jnp.zeros((1, 3 * d), jnp.float32),
        wo=_dense(ks[1], (d, d)), bo=jnp.zeros((1, d), jnp.float32),
        n1g=jnp.ones((1, d), jnp.float32), n1b=jnp.zeros((1, d), jnp.float32),
        w1=_dense(ks[2], (d, dff)), b1=jnp.zeros((1, dff), jnp.float32),
        w2=_dense(ks[3], (dff, d)), b2=jnp.zeros((1, d), jnp.float32),
        n2g=jnp.ones((1, d), jnp.float32), n2b=jnp.zeros((1, d), jnp.float32),
    )


def _dec_layer_params(key, d, dff):
    ks = jax.random.split(key, 7)
    return dict(
        sa_wqkv=_dense(ks[0], (d, 3 * d)), sa_bqkv=jnp.zeros((1, 3 * d), jnp.float32),
        sa_wo=_dense(ks[1], (d, d)), sa_bo=jnp.zeros((1, d), jnp.float32),
        n1g=jnp.ones((1, d), jnp.float32), n1b=jnp.zeros((1, d), jnp.float32),
        ca_wq=_dense(ks[2], (d, d)), ca_bq=jnp.zeros((1, d), jnp.float32),
        ca_wkv=_dense(ks[3], (d, 2 * d)), ca_bkv=jnp.zeros((1, 2 * d), jnp.float32),
        ca_wo=_dense(ks[4], (d, d)), ca_bo=jnp.zeros((1, d), jnp.float32),
        n2g=jnp.ones((1, d), jnp.float32), n2b=jnp.zeros((1, d), jnp.float32),
        w1=_dense(ks[5], (d, dff)), b1=jnp.zeros((1, dff), jnp.float32),
        w2=_dense(ks[6], (dff, d)), b2=jnp.zeros((1, d), jnp.float32),
        n3g=jnp.ones((1, d), jnp.float32), n3b=jnp.zeros((1, d), jnp.float32),
    )


def _stack_layers(layer_dicts):
    return {k: jnp.stack([ld[k] for ld in layer_dicts], axis=0) for k in layer_dicts[0]}


def init_params(key, d, dff, n_enc, n_dec, src_vocab, tgt_vocab):
    keys = jax.random.split(key, 2 + n_enc + n_dec)
    src_emb = _dense(keys[0], (src_vocab, d), scale=1.0).at[2].set(0.0)  # padding_idx=2
    tgt_emb = _dense(keys[1], (tgt_vocab, d), scale=1.0).at[2].set(0.0)

    enc = _stack_layers([_enc_layer_params(keys[2 + i], d, dff) for i in range(n_enc)])
    dec = _stack_layers([_dec_layer_params(keys[2 + n_enc + i], d, dff) for i in range(n_dec)])
    # FFN weights stored as bf16 (halves the dominant HBM weight traffic; f32 MXU accumulate)
    enc["w1"] = enc["w1"].astype(jnp.bfloat16); enc["w2"] = enc["w2"].astype(jnp.bfloat16)
    dec["w1"] = dec["w1"].astype(jnp.bfloat16); dec["w2"] = dec["w2"].astype(jnp.bfloat16)
    # final encoder/decoder LayerNorms
    enc["fng"] = jnp.ones((1, d), jnp.float32); enc["fnb"] = jnp.zeros((1, d), jnp.float32)
    dec["fng"] = jnp.ones((1, d), jnp.float32); dec["fnb"] = jnp.zeros((1, d), jnp.float32)
    return dict(src_emb=src_emb, tgt_emb=tgt_emb, enc=enc, dec=dec)
    # TODO(synk): self.predictor (Linear(d_model, len(tgt_vocab))) is unused in forward().


# --------------------------- main ---------------------------

if __name__ == "__main__":
    root = jax.random.PRNGKey(0)
    k_params, k_src, k_tgt = jax.random.split(root, 3)

    params = init_params(k_params, D_MODEL, DIM_FF, N_ENC, N_DEC, SRC_VOCAB, TGT_VOCAB)

    B, S, T = 2, 8, 8
    # random content tokens in [3, vocab); BOS=0 at position 0, PAD=2 tails
    src = jax.random.randint(k_src, (B, S), 3, SRC_VOCAB, dtype=jnp.int32)
    tgt = jax.random.randint(k_tgt, (B, T), 3, TGT_VOCAB, dtype=jnp.int32)
    src = src.at[:, 0].set(0).at[0, 6:].set(2).at[1, 4:].set(2)
    tgt = tgt.at[:, 0].set(0).at[0, 5:].set(2).at[1, 7:].set(2)

    fwd = jax.jit(functools.partial(translation_model_forward, nhead=NHEAD))
    out = jax.block_until_ready(fwd(params, src, tgt))

    assert out.shape == (B, T, D_MODEL), out.shape
    assert bool(jnp.all(jnp.isfinite(out)))
    print("KERNEL_OK")
</pallas_src>

<mosaic_0001>
module attributes {stable_mosaic.version = 11 : i64} {
  func.func @_encoder_stack_kernel(%arg0: i32, %arg1: memref<2x8xf32, #tpu.memory_space<vmem>>, %arg2: memref<16x32xf32, #tpu.memory_space<vmem>>, %arg3: memref<1x32x96xf32, #tpu.memory_space<vmem>>, %arg4: memref<1x1x96xf32, #tpu.memory_space<vmem>>, %arg5: memref<1x32x32xf32, #tpu.memory_space<vmem>>, %arg6: memref<1x1x32xf32, #tpu.memory_space<vmem>>, %arg7: memref<1x1x32xf32, #tpu.memory_space<vmem>>, %arg8: memref<1x1x32xf32, #tpu.memory_space<vmem>>, %arg9: memref<1x32x2048xbf16, #tpu.memory_space<vmem>>, %arg10: memref<1x1x2048xf32, #tpu.memory_space<vmem>>, %arg11: memref<1x2048x32xbf16, #tpu.memory_space<vmem>>, %arg12: memref<1x1x32xf32, #tpu.memory_space<vmem>>, %arg13: memref<1x1x32xf32, #tpu.memory_space<vmem>>, %arg14: memref<1x1x32xf32, #tpu.memory_space<vmem>>, %arg15: memref<1x32xf32, #tpu.memory_space<vmem>>, %arg16: memref<1x32xf32, #tpu.memory_space<vmem>>, %arg17: memref<16x32xf32, #tpu.memory_space<vmem>>, %arg18: memref<16x32xf32, #tpu.memory_space<vmem>>) attributes {dimension_semantics = [#tpu.dimension_semantics<arbitrary>], iteration_bounds = array<i64: 6>, scalar_prefetch = 0 : i64, scratch_operands = 1 : i64, tpu.core_type = #tpu.core_type<tc>, window_params = [{pipeline_mode = #tpu.pipeline_mode<synchronous>, transform_indices = @transform_0, window_bounds = array<i64: 2, 8>}, {pipeline_mode = #tpu.pipeline_mode<synchronous>, transform_indices = @transform_1, window_bounds = array<i64: 16, 32>}, {transform_indices = @transform_2, window_bounds = array<i64: 1, 32, 96>}, {transform_indices = @transform_3, window_bounds = array<i64: 1, 1, 96>}, {transform_indices = @transform_4, window_bounds = array<i64: 1, 32, 32>}, {transform_indices = @transform_5, window_bounds = array<i64: 1, 1, 32>}, {transform_indices = @transform_6, window_bounds = array<i64: 1, 1, 32>}, {transform_indices = @transform_7, window_bounds = array<i64: 1, 1, 32>}, {transform_indices = @transform_8, window_bounds = array<i64: 1, 32, 2048>}, {transform_indices = @transform_9, window_bounds = array<i64: 1, 1, 2048>}, {transform_indices = @transform_10, window_bounds = array<i64: 1, 2048, 32>}, {transform_indices = @transform_11, window_bounds = array<i64: 1, 1, 32>}, {transform_indices = @transform_12, window_bounds = array<i64: 1, 1, 32>}, {transform_indices = @transform_13, window_bounds = array<i64: 1, 1, 32>}, {pipeline_mode = #tpu.pipeline_mode<synchronous>, transform_indices = @transform_14, window_bounds = array<i64: 1, 32>}, {pipeline_mode = #tpu.pipeline_mode<synchronous>, transform_indices = @transform_15, window_bounds = array<i64: 1, 32>}, {pipeline_mode = #tpu.pipeline_mode<synchronous>, transform_indices = @transform_16, window_bounds = array<i64: 16, 32>}]} {
    %c0_i32 = arith.constant 0 : i32
    %0 = arith.cmpi eq, %arg0, %c0_i32 : i32
    %1 = arith.extui %0 : i1 to i32
    %c0_i32_0 = arith.constant 0 : i32
    %2 = arith.cmpi ne, %1, %c0_i32_0 : i32
    scf.if %2 {
      %c0_137 = arith.constant 0 : index
      %c0_138 = arith.constant 0 : index
      %425 = vector.load %arg2[%c0_137, %c0_138] : memref<16x32xf32, #tpu.memory_space<vmem>>, vector<16x32xf32>
      %c0_139 = arith.constant 0 : index
      %c0_140 = arith.constant 0 : index
      %426 = vector.load %arg18[%c0_139, %c0_140] : memref<16x32xf32, #tpu.memory_space<vmem>>, vector<16x32xf32>
      tpu.vector_store %arg18[%c0_139, %c0_140], %425 {strides = array<i32>} : memref<16x32xf32, #tpu.memory_space<vmem>>, vector<16x32xf32>,
    } else {
    }
    %c0 = arith.constant 0 : index
    %c0_1 = arith.constant 0 : index
    %3 = vector.load %arg18[%c0, %c0_1] : memref<16x32xf32, #tpu.memory_space<vmem>>, vector<16x32xf32>
    %c0_2 = arith.constant 0 : index
    %c0_3 = arith.constant 0 : index
    %4 = vector.load %arg1[%c0_2, %c0_3] : memref<2x8xf32, #tpu.memory_space<vmem>>, vector<2x8xf32>
    %c0_4 = arith.constant 0 : index
    %c0_5 = arith.constant 0 : index
    %c0_6 = arith.constant 0 : index
    %5 = vector.load %arg3[%c0_4, %c0_5, %c0_6] : memref<1x32x96xf32, #tpu.memory_space<vmem>>, vector<1x32x96xf32>
    %6 = vector.shape_cast %5 : vector<1x32x96xf32> to vector<32x96xf32>
    %cst = arith.constant dense<0.000000e+00> : vector<16x96xf32>
    %7 = tpu.matmul %3, %6, %cst {dimension_numbers = #tpu.dot_dimension_numbers<[1], [0], [0], [1], [0, 0, 1, 1], [], []>} : vector<16x32xf32>, vector<32x96xf32>, vector<16x96xf32> -> vector<16x96xf32>
    %c0_7 = arith.constant 0 : index
    %c0_8 = arith.constant 0 : index
    %c0_9 = arith.constant 0 : index
    %8 = vector.load %arg4[%c0_7, %c0_8, %c0_9] : memref<1x1x96xf32, #tpu.memory_space<vmem>>, vector<1x1x96xf32>
    %9 = vector.shape_cast %8 : vector<1x1x96xf32> to vector<1x96xf32>
    %10 = vector.broadcast %9 : vector<1x96xf32> to vector<16x96xf32>
    %11 = arith.addf %7, %10 : vector<16x96xf32>
    %12 = vector.extract_strided_slice %11 {offsets = [0, 0], sizes = [16, 32], strides = [1, 1]} : vector<16x96xf32> to vector<16x32xf32>
    %13 = vector.extract_strided_slice %11 {offsets = [0, 32], sizes = [16, 32], strides = [1, 1]} : vector<16x96xf32> to vector<16x32xf32>
    %14 = vector.extract_strided_slice %11 {offsets = [0, 64], sizes = [16, 32], strides = [1, 1]} : vector<16x96xf32> to vector<16x32xf32>
    %15 = vector.extract_strided_slice %12 {offsets = [0, 0], sizes = [8, 32], strides = [1, 1]} : vector<16x32xf32> to vector<8x32xf32>
    %16 = vector.extract_strided_slice %13 {offsets = [0, 0], sizes = [8, 32], strides = [1, 1]} : vector<16x32xf32> to vector<8x32xf32>
    %17 = vector.extract_strided_slice %14 {offsets = [0, 0], sizes = [8, 32], strides = [1, 1]} : vector<16x32xf32> to vector<8x32xf32>
    %18 = vector.extract_strided_slice %4 {offsets = [0, 0], sizes = [1, 8], strides = [1, 1]} : vector<2x8xf32> to vector<1x8xf32>
    %19 = vector.extract_strided_slice %15 {offsets = [0, 0], sizes = [8, 4], strides = [1, 1]} : vector<8x32xf32> to vector<8x4xf32>
    %20 = vector.extract_strided_slice %16 {offsets = [0, 0], sizes = [8, 4], strides = [1, 1]} : vector<8x32xf32> to vector<8x4xf32>
    %21 = vector.extract_strided_slice %17 {offsets = [0, 0], sizes = [8, 4], strides = [1, 1]} : vector<8x32xf32> to vector<8x4xf32>
    %22 = tpu.transpose %20, [1, 0] : vector<8x4xf32> -> vector<4x8xf32>
    %cst_10 = arith.constant dense<0.000000e+00> : vector<8x8xf32>
    %23 = tpu.matmul %19, %22, %cst_10 {dimension_numbers = #tpu.dot_dimension_numbers<[1], [0], [0], [1], [0, 0, 1, 1], [], []>} : vector<8x4xf32>, vector<4x8xf32>, vector<8x8xf32> -> vector<8x8xf32>
    %cst_11 = arith.constant 5.000000e-01 : f32
    %24 = vector.broadcast %cst_11 : f32 to vector<8x8xf32>
    %25 = arith.mulf %23, %24 : vector<8x8xf32>
    %26 = vector.broadcast %18 : vector<1x8xf32> to vector<8x8xf32>
    %27 = arith.addf %25, %26 : vector<8x8xf32>
    %cst_12 = arith.constant dense<0xFF800000> : vector<8xf32>
    %28 = vector.multi_reduction <maximumf>, %27, %cst_12 [1] : vector<8x8xf32> to vector<8xf32>
    %29 = vector.shape_cast %28 : vector<8xf32> to vector<8x1xf32>
    %30 = vector.broadcast %29 : vector<8x1xf32> to vector<8x8xf32>
    %31 = arith.subf %27, %30 : vector<8x8xf32>
    %32 = math.exp %31 : vector<8x8xf32>
    %cst_13 = arith.constant dense<0.000000e+00> : vector<8xf32>
    %33 = vector.multi_reduction <add>, %32, %cst_13 [1] : vector<8x8xf32> to vector<8xf32>
    %34 = vector.shape_cast %33 : vector<8xf32> to vector<8x1xf32>
    %35 = tpu.reciprocal %34 {approx = true} : vector<8x1xf32> -> vector<8x1xf32>
    %36 = vector.broadcast %35 : vector<8x1xf32> to vector<8x8xf32>
    %37 = arith.mulf %32, %36 : vector<8x8xf32>
    %cst_14 = arith.constant dense<0.000000e+00> : vector<8x4xf32>
    %38 = tpu.matmul %37, %21, %cst_14 {dimension_numbers = #tpu.dot_dimension_numbers<[1], [0], [0], [1], [0, 0, 1, 1], [], []>} : vector<8x8xf32>, vector<8x4xf32>, vector<8x4xf32> -> vector<8x4xf32>
    %39 = vector.extract_strided_slice %15 {offsets = [0, 4], sizes = [8, 4], strides = [1, 1]} : vector<8x32xf32> to vector<8x4xf32>
    %40 = vector.extract_strided_slice %16 {offsets = [0, 4], sizes = [8, 4], strides = [1, 1]} : vector<8x32xf32> to vector<8x4xf32>
    %41 = vector.extract_strided_slice %17 {offsets = [0, 4], sizes = [8, 4], strides = [1, 1]} : vector<8x32xf32> to vector<8x4xf32>
    %42 = tpu.transpose %40, [1, 0] : vector<8x4xf32> -> vector<4x8xf32>
    %cst_15 = arith.constant dense<0.000000e+00> : vector<8x8xf32>
    %43 = tpu.matmul %39, %42, %cst_15 {dimension_numbers = #tpu.dot_dimension_numbers<[1], [0], [0], [1], [0, 0, 1, 1], [], []>} : vector<8x4xf32>, vector<4x8xf32>, vector<8x8xf32> -> vector<8x8xf32>
    %cst_16 = arith.constant 5.000000e-01 : f32
    %44 = vector.broadcast %cst_16 : f32 to vector<8x8xf32>
    %45 = arith.mulf %43, %44 : vector<8x8xf32>
    %46 = vector.broadcast %18 : vector<1x8xf32> to vector<8x8xf32>
    %47 = arith.addf %45, %46 : vector<8x8xf32>
    %cst_17 = arith.constant dense<0xFF800000> : vector<8xf32>
    %48 = vector.multi_reduction <maximumf>, %47, %cst_17 [1] : vector<8x8xf32> to vector<8xf32>
    %49 = vector.shape_cast %48 : vector<8xf32> to vector<8x1xf32>
    %50 = vector.broadcast %49 : vector<8x1xf32> to vector<8x8xf32>
    %51 = arith.subf %47, %50 : vector<8x8xf32>
    %52 = math.exp %51 : vector<8x8xf32>
    %cst_18 = arith.constant dense<0.000000e+00> : vector<8xf32>
    %53 = vector.multi_reduction <add>, %52, %cst_18 [1] : vector<8x8xf32> to vector<8xf32>
    %54 = vector.shape_cast %53 : vector<8xf32> to vector<8x1xf32>
    %55 = tpu.reciprocal %54 {approx = true} : vector<8x1xf32> -> vector<8x1xf32>
    %56 = vector.broadcast %55 : vector<8x1xf32> to vector<8x8xf32>
    %57 = arith.mulf %52, %56 : vector<8x8xf32>
    %cst_19 = arith.constant dense<0.000000e+00> : vector<8x4xf32>
    %58 = tpu.matmul %57, %41, %cst_19 {dimension_numbers = #tpu.dot_dimension_numbers<[1], [0], [0], [1], [0, 0, 1, 1], [], []>} : vector<8x8xf32>, vector<8x4xf32>, vector<8x4xf32> -> vector<8x4xf32>
    %59 = vector.extract_strided_slice %15 {offsets = [0, 8], sizes = [8, 4], strides = [1, 1]} : vector<8x32xf32> to vector<8x4xf32>
    %60 = vector.extract_strided_slice %16 {offsets = [0, 8], sizes = [8, 4], strides = [1, 1]} : vector<8x32xf32> to vector<8x4xf32>
    %61 = vector.extract_strided_slice %17 {offsets = [0, 8], sizes = [8, 4], strides = [1, 1]} : vector<8x32xf32> to vector<8x4xf32>
    %62 = tpu.transpose %60, [1, 0] : vector<8x4xf32> -> vector<4x8xf32>
    %cst_20 = arith.constant dense<0.000000e+00> : vector<8x8xf32>
    %63 = tpu.matmul %59, %62, %cst_20 {dimension_numbers = #tpu.dot_dimension_numbers<[1], [0], [0], [1], [0, 0, 1, 1], [], []>} : vector<8x4xf32>, vector<4x8xf32>, vector<8x8xf32> -> vector<8x8xf32>
    %cst_21 = arith.constant 5.000000e-01 : f32
    %64 = vector.broadcast %cst_21 : f32 to vector<8x8xf32>
    %65 = arith.mulf %63, %64 : vector<8x8xf32>
    %66 = vector.broadcast %18 : vector<1x8xf32> to vector<8x8xf32>
    %67 = arith.addf %65, %66 : vector<8x8xf32>
    %cst_22 = arith.constant dense<0xFF800000> : vector<8xf32>
    %68 = vector.multi_reduction <maximumf>, %67, %cst_22 [1] : vector<8x8xf32> to vector<8xf32>
    %69 = vector.shape_cast %68 : vector<8xf32> to vector<8x1xf32>
    %70 = vector.broadcast %69 : vector<8x1xf32> to vector<8x8xf32>
    %71 = arith.subf %67, %70 : vector<8x8xf32>
    %72 = math.exp %71 : vector<8x8xf32>
    %cst_23 = arith.constant dense<0.000000e+00> : vector<8xf32>
    %73 = vector.multi_reduction <add>, %72, %cst_23 [1] : vector<8x8xf32> to vector<8xf32>
    %74 = vector.shape_cast %73 : vector<8xf32> to vector<8x1xf32>
    %75 = tpu.reciprocal %74 {approx = true} : vector<8x1xf32> -> vector<8x1xf32>
    %76 = vector.broadcast %75 : vector<8x1xf32> to vector<8x8xf32>
    %77 = arith.mulf %72, %76 : vector<8x8xf32>
    %cst_24 = arith.constant dense<0.000000e+00> : vector<8x4xf32>
    %78 = tpu.matmul %77, %61, %cst_24 {dimension_numbers = #tpu.dot_dimension_numbers<[1], [0], [0], [1], [0, 0, 1, 1], [], []>} : vector<8x8xf32>, vector<8x4xf32>, vector<8x4xf32> -> vector<8x4xf32>
    %79 = vector.extract_strided_slice %15 {offsets = [0, 12], sizes = [8, 4], strides = [1, 1]} : vector<8x32xf32> to vector<8x4xf32>
    %80 = vector.extract_strided_slice %16 {offsets = [0, 12], sizes = [8, 4], strides = [1, 1]} : vector<8x32xf32> to vector<8x4xf32>
    %81 = vector.extract_strided_slice %17 {offsets = [0, 12], sizes = [8, 4], strides = [1, 1]} : vector<8x32xf32> to vector<8x4xf32>
    %82 = tpu.transpose %80, [1, 0] : vector<8x4xf32> -> vector<4x8xf32>
    %cst_25 = arith.constant dense<0.000000e+00> : vector<8x8xf32>
    %83 = tpu.matmul %79, %82, %cst_25 {dimension_numbers = #tpu.dot_dimension_numbers<[1], [0], [0], [1], [0, 0, 1, 1], [], []>} : vector<8x4xf32>, vector<4x8xf32>, vector<8x8xf32> -> vector<8x8xf32>
    %cst_26 = arith.constant 5.000000e-01 : f32
    %84 = vector.broadcast %cst_26 : f32 to vector<8x8xf32>
    %85 = arith.mulf %83, %84 : vector<8x8xf32>
    %86 = vector.broadcast %18 : vector<1x8xf32> to vector<8x8xf32>
    %87 = arith.addf %85, %86 : vector<8x8xf32>
    %cst_27 = arith.constant dense<0xFF800000> : vector<8xf32>
    %88 = vector.multi_reduction <maximumf>, %87, %cst_27 [1] : vector<8x8xf32> to vector<8xf32>
    %89 = vector.shape_cast %88 : vector<8xf32> to vector<8x1xf32>
    %90 = vector.broadcast %89 : vector<8x1xf32> to vector<8x8xf32>
    %91 = arith.subf %87, %90 : vector<8x8xf32>
    %92 = math.exp %91 : vector<8x8xf32>
    %cst_28 = arith.constant dense<0.000000e+00> : vector<8xf32>
    %93 = vector.multi_reduction <add>, %92, %cst_28 [1] : vector<8x8xf32> to vector<8xf32>
    %94 = vector.shape_cast %93 : vector<8xf32> to vector<8x1xf32>
    %95 = tpu.reciprocal %94 {approx = true} : vector<8x1xf32> -> vector<8x1xf32>
    %96 = vector.broadcast %95 : vector<8x1xf32> to vector<8x8xf32>
    %97 = arith.mulf %92, %96 : vector<8x8xf32>
    %cst_29 = arith.constant dense<0.000000e+00> : vector<8x4xf32>
    %98 = tpu.matmul %97, %81, %cst_29 {dimension_numbers = #tpu.dot_dimension_numbers<[1], [0], [0], [1], [0, 0, 1, 1], [], []>} : vector<8x8xf32>, vector<8x4xf32>, vector<8x4xf32> -> vector<8x4xf32>
    %99 = vector.extract_strided_slice %15 {offsets = [0, 16], sizes = [8, 4], strides = [1, 1]} : vector<8x32xf32> to vector<8x4xf32>
    %100 = vector.extract_strided_slice %16 {offsets = [0, 16], sizes = [8, 4], strides = [1, 1]} : vector<8x32xf32> to vector<8x4xf32>
    %101 = vector.extract_strided_slice %17 {offsets = [0, 16], sizes = [8, 4], strides = [1, 1]} : vector<8x32xf32> to vector<8x4xf32>
    %102 = tpu.transpose %100, [1, 0] : vector<8x4xf32> -> vector<4x8xf32>
    %cst_30 = arith.constant dense<0.000000e+00> : vector<8x8xf32>
    %103 = tpu.matmul %99, %102, %cst_30 {dimension_numbers = #tpu.dot_dimension_numbers<[1], [0], [0], [1], [0, 0, 1, 1], [], []>} : vector<8x4xf32>, vector<4x8xf32>, vector<8x8xf32> -> vector<8x8xf32>
    %cst_31 = arith.constant 5.000000e-01 : f32
    %104 = vector.broadcast %cst_31 : f32 to vector<8x8xf32>
    %105 = arith.mulf %103, %104 : vector<8x8xf32>
    %106 = vector.broadcast %18 : vector<1x8xf32> to vector<8x8xf32>
    %107 = arith.addf %105, %106 : vector<8x8xf32>
    %cst_32 = arith.constant dense<0xFF800000> : vector<8xf32>
    %108 = vector.multi_reduction <maximumf>, %107, %cst_32 [1] : vector<8x8xf32> to vector<8xf32>
    %109 = vector.shape_cast %108 : vector<8xf32> to vector<8x1xf32>
    %110 = vector.broadcast %109 : vector<8x1xf32> to vector<8x8xf32>
    %111 = arith.subf %107, %110 : vector<8x8xf32>
    %112 = math.exp %111 : vector<8x8xf32>
    %cst_33 = arith.constant dense<0.000000e+00> : vector<8xf32>
    %113 = vector.multi_reduction <add>, %112, %cst_33 [1] : vector<8x8xf32> to vector<8xf32>
    %114 = vector.shape_cast %113 : vector<8xf32> to vector<8x1xf32>
    %115 = tpu.reciprocal %114 {approx = true} : vector<8x1xf32> -> vector<8x1xf32>
    %116 = vector.broadcast %115 : vector<8x1xf32> to vector<8x8xf32>
    %117 = arith.mulf %112, %116 : vector<8x8xf32>
    %cst_34 = arith.constant dense<0.000000e+00> : vector<8x4xf32>
    %118 = tpu.matmul %117, %101, %cst_34 {dimension_numbers = #tpu.dot_dimension_numbers<[1], [0], [0], [1], [0, 0, 1, 1], [], []>} : vector<8x8xf32>, vector<8x4xf32>, vector<8x4xf32> -> vector<8x4xf32>
    %119 = vector.extract_strided_slice %15 {offsets = [0, 20], sizes = [8, 4], strides = [1, 1]} : vector<8x32xf32> to vector<8x4xf32>
    %120 = vector.extract_strided_slice %16 {offsets = [0, 20], sizes = [8, 4], strides = [1, 1]} : vector<8x32xf32> to vector<8x4xf32>
    %121 = vector.extract_strided_slice %17 {offsets = [0, 20], sizes = [8, 4], strides = [1, 1]} : vector<8x32xf32> to vector<8x4xf32>
    %122 = tpu.transpose %120, [1, 0] : vector<8x4xf32> -> vector<4x8xf32>
    %cst_35 = arith.constant dense<0.000000e+00> : vector<8x8xf32>
    %123 = tpu.matmul %119, %122, %cst_35 {dimension_numbers = #tpu.dot_dimension_numbers<[1], [0], [0], [1], [0, 0, 1, 1], [], []>} : vector<8x4xf32>, vector<4x8xf32>, vector<8x8xf32> -> vector<8x8xf32>
    %cst_36 = arith.constant 5.000000e-01 : f32
    %124 = vector.broadcast %cst_36 : f32 to vector<8x8xf32>
    %125 = arith.mulf %123, %124 : vector<8x8xf32>
    %126 = vector.broadcast %18 : vector<1x8xf32> to vector<8x8xf32>
    %127 = arith.addf %125, %126 : vector<8x8xf32>
    %cst_37 = arith.constant dense<0xFF800000> : vector<8xf32>
    %128 = vector.multi_reduction <maximumf>, %127, %cst_37 [1] : vector<8x8xf32> to vector<8xf32>
    %129 = vector.shape_cast %128 : vector<8xf32> to vector<8x1xf32>
    %130 = vector.broadcast %129 : vector<8x1xf32> to vector<8x8xf32>
    %131 = arith.subf %127, %130 : vector<8x8xf32>
    %132 = math.exp %131 : vector<8x8xf32>
    %cst_38 = arith.constant dense<0.000000e+00> : vector<8xf32>
    %133 = vector.multi_reduction <add>, %132, %cst_38 [1] : vector<8x8xf32> to vector<8xf32>
    %134 = vector.shape_cast %133 : vector<8xf32> to vector<8x1xf32>
    %135 = tpu.reciprocal %134 {approx = true} : vector<8x1xf32> -> vector<8x1xf32>
    %136 = vector.broadcast %135 : vector<8x1xf32> to vector<8x8xf32>
    %137 = arith.mulf %132, %136 : vector<8x8xf32>
    %cst_39 = arith.constant dense<0.000000e+00> : vector<8x4xf32>
    %138 = tpu.matmul %137, %121, %cst_39 {dimension_numbers = #tpu.dot_dimension_numbers<[1], [0], [0], [1], [0, 0, 1, 1], [], []>} : vector<8x8xf32>, vector<8x4xf32>, vector<8x4xf32> -> vector<8x4xf32>
    %139 = vector.extract_strided_slice %15 {offsets = [0, 24], sizes = [8, 4], strides = [1, 1]} : vector<8x32xf32> to vector<8x4xf32>
    %140 = vector.extract_strided_slice %16 {offsets = [0, 24], sizes = [8, 4], strides = [1, 1]} : vector<8x32xf32> to vector<8x4xf32>
    %141 = vector.extract_strided_slice %17 {offsets = [0, 24], sizes = [8, 4], strides = [1, 1]} : vector<8x32xf32> to vector<8x4xf32>
    %142 = tpu.transpose %140, [1, 0] : vector<8x4xf32> -> vector<4x8xf32>
    %cst_40 = arith.constant dense<0.000000e+00> : vector<8x8xf32>
    %143 = tpu.matmul %139, %142, %cst_40 {dimension_numbers = #tpu.dot_dimension_numbers<[1], [0], [0], [1], [0, 0, 1, 1], [], []>} : vector<8x4xf32>, vector<4x8xf32>, vector<8x8xf32> -> vector<8x8xf32>
    %cst_41 = arith.constant 5.000000e-01 : f32
    %144 = vector.broadcast %cst_41 : f32 to vector<8x8xf32>
    %145 = arith.mulf %143, %144 : vector<8x8xf32>
    %146 = vector.broadcast %18 : vector<1x8xf32> to vector<8x8xf32>
    %147 = arith.addf %145, %146 : vector<8x8xf32>
    %cst_42 = arith.constant dense<0xFF800000> : vector<8xf32>
    %148 = vector.multi_reduction <maximumf>, %147, %cst_42 [1] : vector<8x8xf32> to vector<8xf32>
    %149 = vector.shape_cast %148 : vector<8xf32> to vector<8x1xf32>
    %150 = vector.broadcast %149 : vector<8x1xf32> to vector<8x8xf32>
    %151 = arith.subf %147, %150 : vector<8x8xf32>
    %152 = math.exp %151 : vector<8x8xf32>
    %cst_43 = arith.constant dense<0.000000e+00> : vector<8xf32>
    %153 = vector.multi_reduction <add>, %152, %cst_43 [1] : vector<8x8xf32> to vector<8xf32>
    %154 = vector.shape_cast %153 : vector<8xf32> to vector<8x1xf32>
    %155 = tpu.reciprocal %154 {approx = true} : vector<8x1xf32> -> vector<8x1xf32>
    %156 = vector.broadcast %155 : vector<8x1xf32> to vector<8x8xf32>
    %157 = arith.mulf %152, %156 : vector<8x8xf32>
    %cst_44 = arith.constant dense<0.000000e+00> : vector<8x4xf32>
    %158 = tpu.matmul %157, %141, %cst_44 {dimension_numbers = #tpu.dot_dimension_numbers<[1], [0], [0], [1], [0, 0, 1, 1], [], []>} : vector<8x8xf32>, vector<8x4xf32>, vector<8x4xf32> -> vector<8x4xf32>
    %159 = vector.extract_strided_slice %15 {offsets = [0, 28], sizes = [8, 4], strides = [1, 1]} : vector<8x32xf32> to vector<8x4xf32>
    %160 = vector.extract_strided_slice %16 {offsets = [0, 28], sizes = [8, 4], strides = [1, 1]} : vector<8x32xf32> to vector<8x4xf32>
    %161 = vector.extract_strided_slice %17 {offsets = [0, 28], sizes = [8, 4], strides = [1, 1]} : vector<8x32xf32> to vector<8x4xf32>
    %162 = tpu.transpose %160, [1, 0] : vector<8x4xf32> -> vector<4x8xf32>
    %cst_45 = arith.constant dense<0.000000e+00> : vector<8x8xf32>
    %163 = tpu.matmul %159, %162, %cst_45 {dimension_numbers = #tpu.dot_dimension_numbers<[1], [0], [0], [1], [0, 0, 1, 1], [], []>} : vector<8x4xf32>, vector<4x8xf32>, vector<8x8xf32> -> vector<8x8xf32>
    %cst_46 = arith.constant 5.000000e-01 : f32
    %164 = vector.broadcast %cst_46 : f32 to vector<8x8xf32>
    %165 = arith.mulf %163, %164 : vector<8x8xf32>
    %166 = vector.broadcast %18 : vector<1x8xf32> to vector<8x8xf32>
    %167 = arith.addf %165, %166 : vector<8x8xf32>
    %cst_47 = arith.constant dense<0xFF800000> : vector<8xf32>
    %168 = vector.multi_reduction <maximumf>, %167, %cst_47 [1] : vector<8x8xf32> to vector<8xf32>
    %169 = vector.shape_cast %168 : vector<8xf32> to vector<8x1xf32>
    %170 = vector.broadcast %169 : vector<8x1xf32> to vector<8x8xf32>
    %171 = arith.subf %167, %170 : vector<8x8xf32>
    %172 = math.exp %171 : vector<8x8xf32>
    %cst_48 = arith.constant dense<0.000000e+00> : vector<8xf32>
    %173 = vector.multi_reduction <add>, %172, %cst_48 [1] : vector<8x8xf32> to vector<8xf32>
    %174 = vector.shape_cast %173 : vector<8xf32> to vector<8x1xf32>
    %175 = tpu.reciprocal %174 {approx = true} : vector<8x1xf32> -> vector<8x1xf32>
    %176 = vector.broadcast %175 : vector<8x1xf32> to vector<8x8xf32>
    %177 = arith.mulf %172, %176 : vector<8x8xf32>
    %cst_49 = arith.constant dense<0.000000e+00> : vector<8x4xf32>
    %178 = tpu.matmul %177, %161, %cst_49 {dimension_numbers = #tpu.dot_dimension_numbers<[1], [0], [0], [1], [0, 0, 1, 1], [], []>} : vector<8x8xf32>, vector<8x4xf32>, vector<8x4xf32> -> vector<8x4xf32>
    %179 = tpu.concatenate %38, %58, %78, %98, %118, %138, %158, %178 in 1 : vector<8x4xf32>, vector<8x4xf32>, vector<8x4xf32>, vector<8x4xf32>, vector<8x4xf32>, vector<8x4xf32>, vector<8x4xf32>, vector<8x4xf32> -> vector<8x32xf32>
    %180 = vector.extract_strided_slice %12 {offsets = [8, 0], sizes = [8, 32], strides = [1, 1]} : vector<16x32xf32> to vector<8x32xf32>
    %181 = vector.extract_strided_slice %13 {offsets = [8, 0], sizes = [8, 32], strides = [1, 1]} : vector<16x32xf32> to vector<8x32xf32>
    %182 = vector.extract_strided_slice %14 {offsets = [8, 0], sizes = [8, 32], strides = [1, 1]} : vector<16x32xf32> to vector<8x32xf32>
    %183 = vector.extract_strided_slice %4 {offsets = [1, 0], sizes = [1, 8], strides = [1, 1]} : vector<2x8xf32> to vector<1x8xf32>
    %184 = vector.extract_strided_slice %180 {offsets = [0, 0], sizes = [8, 4], strides = [1, 1]} : vector<8x32xf32> to vector<8x4xf32>
    %185 = vector.extract_strided_slice %181 {offsets = [0, 0], sizes = [8, 4], strides = [1, 1]} : vector<8x32xf32> to vector<8x4xf32>
    %186 = vector.extract_strided_slice %182 {offsets = [0, 0], sizes = [8, 4], strides = [1, 1]} : vector<8x32xf32> to vector<8x4xf32>
    %187 = tpu.transpose %185, [1, 0] : vector<8x4xf32> -> vector<4x8xf32>
    %cst_50 = arith.constant dense<0.000000e+00> : vector<8x8xf32>
    %188 = tpu.matmul %184, %187, %cst_50 {dimension_numbers = #tpu.dot_dimension_numbers<[1], [0], [0], [1], [0, 0, 1, 1], [], []>} : vector<8x4xf32>, vector<4x8xf32>, vector<8x8xf32> -> vector<8x8xf32>
    %cst_51 = arith.constant 5.000000e-01 : f32
    %189 = vector.broadcast %cst_51 : f32 to vector<8x8xf32>
    %190 = arith.mulf %188, %189 : vector<8x8xf32>
    %191 = vector.broadcast %183 : vector<1x8xf32> to vector<8x8xf32>
    %192 = arith.addf %190, %191 : vector<8x8xf32>
    %cst_52 = arith.constant dense<0xFF800000> : vector<8xf32>
    %193 = vector.multi_reduction <maximumf>, %192, %cst_52 [1] : vector<8x8xf32> to vector<8xf32>
    %194 = vector.shape_cast %193 : vector<8xf32> to vector<8x1xf32>
    %195 = vector.broadcast %194 : vector<8x1xf32> to vector<8x8xf32>
    %196 = arith.subf %192, %195 : vector<8x8xf32>
    %197 = math.exp %196 : vector<8x8xf32>
    %cst_53 = arith.constant dense<0.000000e+00> : vector<8xf32>
    %198 = vector.multi_reduction <add>, %197, %cst_53 [1] : vector<8x8xf32> to vector<8xf32>
    %199 = vector.shape_cast %198 : vector<8xf32> to vector<8x1xf32>
    %200 = tpu.reciprocal %199 {approx = true} : vector<8x1xf32> -> vector<8x1xf32>
    %201 = vector.broadcast %200 : vector<8x1xf32> to vector<8x8xf32>
    %202 = arith.mulf %197, %201 : vector<8x8xf32>
    %cst_54 = arith.constant dense<0.000000e+00> : vector<8x4xf32>
    %203 = tpu.matmul %202, %186, %cst_54 {dimension_numbers = #tpu.dot_dimension_numbers<[1], [0], [0], [1], [0, 0, 1, 1], [], []>} : vector<8x8xf32>, vector<8x4xf32>, vector<8x4xf32> -> vector<8x4xf32>
    %204 = vector.extract_strided_slice %180 {offsets = [0, 4], sizes = [8, 4], strides = [1, 1]} : vector<8x32xf32> to vector<8x4xf32>
    %205 = vector.extract_strided_slice %181 {offsets = [0, 4], sizes = [8, 4], strides = [1, 1]} : vector<8x32xf32> to vector<8x4xf32>
    %206 = vector.extract_strided_slice %182 {offsets = [0, 4], sizes = [8, 4], strides = [1, 1]} : vector<8x32xf32> to vector<8x4xf32>
    %207 = tpu.transpose %205, [1, 0] : vector<8x4xf32> -> vector<4x8xf32>
    %cst_55 = arith.constant dense<0.000000e+00> : vector<8x8xf32>
    %208 = tpu.matmul %204, %207, %cst_55 {dimension_numbers = #tpu.dot_dimension_numbers<[1], [0], [0], [1], [0, 0, 1, 1], [], []>} : vector<8x4xf32>, vector<4x8xf32>, vector<8x8xf32> -> vector<8x8xf32>
    %cst_56 = arith.constant 5.000000e-01 : f32
    %209 = vector.broadcast %cst_56 : f32 to vector<8x8xf32>
    %210 = arith.mulf %208, %209 : vector<8x8xf32>
    %211 = vector.broadcast %183 : vector<1x8xf32> to vector<8x8xf32>
    %212 = arith.addf %210, %211 : vector<8x8xf32>
    %cst_57 = arith.constant dense<0xFF800000> : vector<8xf32>
    %213 = vector.multi_reduction <maximumf>, %212, %cst_57 [1] : vector<8x8xf32> to vector<8xf32>
    %214 = vector.shape_cast %213 : vector<8xf32> to vector<8x1xf32>
    %215 = vector.broadcast %214 : vector<8x1xf32> to vector<8x8xf32>
    %216 = arith.subf %212, %215 : vector<8x8xf32>
    %217 = math.exp %216 : vector<8x8xf32>
    %cst_58 = arith.constant dense<0.000000e+00> : vector<8xf32>
    %218 = vector.multi_reduction <add>, %217, %cst_58 [1] : vector<8x8xf32> to vector<8xf32>
    %219 = vector.shape_cast %218 : vector<8xf32> to vector<8x1xf32>
    %220 = tpu.reciprocal %219 {approx = true} : vector<8x1xf32> -> vector<8x1xf32>
    %221 = vector.broadcast %220 : vector<8x1xf32> to vector<8x8xf32>
    %222 = arith.mulf %217, %221 : vector<8x8xf32>
    %cst_59 = arith.constant dense<0.000000e+00> : vector<8x4xf32>
    %223 = tpu.matmul %222, %206, %cst_59 {dimension_numbers = #tpu.dot_dimension_numbers<[1], [0], [0], [1], [0, 0, 1, 1], [], []>} : vector<8x8xf32>, vector<8x4xf32>, vector<8x4xf32> -> vector<8x4xf32>
    %224 = vector.extract_strided_slice %180 {offsets = [0, 8], sizes = [8, 4], strides = [1, 1]} : vector<8x32xf32> to vector<8x4xf32>
    %225 = vector.extract_strided_slice %181 {offsets = [0, 8], sizes = [8, 4], strides = [1, 1]} : vector<8x32xf32> to vector<8x4xf32>
    %226 = vector.extract_strided_slice %182 {offsets = [0, 8], sizes = [8, 4], strides = [1, 1]} : vector<8x32xf32> to vector<8x4xf32>
    %227 = tpu.transpose %225, [1, 0] : vector<8x4xf32> -> vector<4x8xf32>
    %cst_60 = arith.constant dense<0.000000e+00> : vector<8x8xf32>
    %228 = tpu.matmul %224, %227, %cst_60 {dimension_numbers = #tpu.dot_dimension_numbers<[1], [0], [0], [1], [0, 0, 1, 1], [], []>} : vector<8x4xf32>, vector<4x8xf32>, vector<8x8xf32> -> vector<8x8xf32>
    %cst_61 = arith.constant 5.000000e-01 : f32
    %229 = vector.broadcast %cst_61 : f32 to vector<8x8xf32>
    %230 = arith.mulf %228, %229 : vector<8x8xf32>
    %231 = vector.broadcast %183 : vector<1x8xf32> to vector<8x8xf32>
    %232 = arith.addf %230, %231 : vector<8x8xf32>
    %cst_62 = arith.constant dense<0xFF800000> : vector<8xf32>
    %233 = vector.multi_reduction <maximumf>, %232, %cst_62 [1] : vector<8x8xf32> to vector<8xf32>
    %234 = vector.shape_cast %233 : vector<8xf32> to vector<8x1xf32>
    %235 = vector.broadcast %234 : vector<8x1xf32> to vector<8x8xf32>
    %236 = arith.subf %232, %235 : vector<8x8xf32>
    %237 = math.exp %236 : vector<8x8xf32>
    %cst_63 = arith.constant dense<0.000000e+00> : vector<8xf32>
    %238 = vector.multi_reduction <add>, %237, %cst_63 [1] : vector<8x8xf32> to vector<8xf32>
    %239 = vector.shape_cast %238 : vector<8xf32> to vector<8x1xf32>
    %240 = tpu.reciprocal %239 {approx = true} : vector<8x1xf32> -> vector<8x1xf32>
    %241 = vector.broadcast %240 : vector<8x1xf32> to vector<8x8xf32>
    %242 = arith.mulf %237, %241 : vector<8x8xf32>
    %cst_64 = arith.constant dense<0.000000e+00> : vector<8x4xf32>
    %243 = tpu.matmul %242, %226, %cst_64 {dimension_numbers = #tpu.dot_dimension_numbers<[1], [0], [0], [1], [0, 0, 1, 1], [], []>} : vector<8x8xf32>, vector<8x4xf32>, vector<8x4xf32> -> vector<8x4xf32>
    %244 = vector.extract_strided_slice %180 {offsets = [0, 12], sizes = [8, 4], strides = [1, 1]} : vector<8x32xf32> to vector<8x4xf32>
    %245 = vector.extract_strided_slice %181 {offsets = [0, 12], sizes = [8, 4], strides = [1, 1]} : vector<8x32xf32> to vector<8x4xf32>
    %246 = vector.extract_strided_slice %182 {offsets = [0, 12], sizes = [8, 4], strides = [1, 1]} : vector<8x32xf32> to vector<8x4xf32>
    %247 = tpu.transpose %245, [1, 0] : vector<8x4xf32> -> vector<4x8xf32>
    %cst_65 = arith.constant dense<0.000000e+00> : vector<8x8xf32>
    %248 = tpu.matmul %244, %247, %cst_65 {dimension_numbers = #tpu.dot_dimension_numbers<[1], [0], [0], [1], [0, 0, 1, 1], [], []>} : vector<8x4xf32>, vector<4x8xf32>, vector<8x8xf32> -> vector<8x8xf32>
    %cst_66 = arith.constant 5.000000e-01 : f32
    %249 = vector.broadcast %cst_66 : f32 to vector<8x8xf32>
    %250 = arith.mulf %248, %249 : vector<8x8xf32>
    %251 = vector.broadcast %183 : vector<1x8xf32> to vector<8x8xf32>
    %252 = arith.addf %250, %251 : vector<8x8xf32>
    %cst_67 = arith.constant dense<0xFF800000> : vector<8xf32>
    %253 = vector.multi_reduction <maximumf>, %252, %cst_67 [1] : vector<8x8xf32> to vector<8xf32>
    %254 = vector.shape_cast %253 : vector<8xf32> to vector<8x1xf32>
    %255 = vector.broadcast %254 : vector<8x1xf32> to vector<8x8xf32>
    %256 = arith.subf %252, %255 : vector<8x8xf32>
    %257 = math.exp %256 : vector<8x8xf32>
    %cst_68 = arith.constant dense<0.000000e+00> : vector<8xf32>
    %258 = vector.multi_reduction <add>, %257, %cst_68 [1] : vector<8x8xf32> to vector<8xf32>
    %259 = vector.shape_cast %258 : vector<8xf32> to vector<8x1xf32>
    %260 = tpu.reciprocal %259 {approx = true} : vector<8x1xf32> -> vector<8x1xf32>
    %261 = vector.broadcast %260 : vector<8x1xf32> to vector<8x8xf32>
    %262 = arith.mulf %257, %261 : vector<8x8xf32>
    %cst_69 = arith.constant dense<0.000000e+00> : vector<8x4xf32>
    %263 = tpu.matmul %262, %246, %cst_69 {dimension_numbers = #tpu.dot_dimension_numbers<[1], [0], [0], [1], [0, 0, 1, 1], [], []>} : vector<8x8xf32>, vector<8x4xf32>, vector<8x4xf32> -> vector<8x4xf32>
    %264 = vector.extract_strided_slice %180 {offsets = [0, 16], sizes = [8, 4], strides = [1, 1]} : vector<8x32xf32> to vector<8x4xf32>
    %265 = vector.extract_strided_slice %181 {offsets = [0, 16], sizes = [8, 4], strides = [1, 1]} : vector<8x32xf32> to vector<8x4xf32>
    %266 = vector.extract_strided_slice %182 {offsets = [0, 16], sizes = [8, 4], strides = [1, 1]} : vector<8x32xf32> to vector<8x4xf32>
    %267 = tpu.transpose %265, [1, 0] : vector<8x4xf32> -> vector<4x8xf32>
    %cst_70 = arith.constant dense<0.000000e+00> : vector<8x8xf32>
    %268 = tpu.matmul %264, %267, %cst_70 {dimension_numbers = #tpu.dot_dimension_numbers<[1], [0], [0], [1], [0, 0, 1, 1], [], []>} : vector<8x4xf32>, vector<4x8xf32>, vector<8x8xf32> -> vector<8x8xf32>
    %cst_71 = arith.constant 5.000000e-01 : f32
    %269 = vector.broadcast %cst_71 : f32 to vector<8x8xf32>
    %270 = arith.mulf %268, %269 : vector<8x8xf32>
    %271 = vector.broadcast %183 : vector<1x8xf32> to vector<8x8xf32>
    %272 = arith.addf %270, %271 : vector<8x8xf32>
    %cst_72 = arith.constant dense<0xFF800000> : vector<8xf32>
    %273 = vector.multi_reduction <maximumf>, %272, %cst_72 [1] : vector<8x8xf32> to vector<8xf32>
    %274 = vector.shape_cast %273 : vector<8xf32> to vector<8x1xf32>
    %275 = vector.broadcast %274 : vector<8x1xf32> to vector<8x8xf32>
    %276 = arith.subf %272, %275 : vector<8x8xf32>
    %277 = math.exp %276 : vector<8x8xf32>
    %cst_73 = arith.constant dense<0.000000e+00> : vector<8xf32>
    %278 = vector.multi_reduction <add>, %277, %cst_73 [1] : vector<8x8xf32> to vector<8xf32>
    %279 = vector.shape_cast %278 : vector<8xf32> to vector<8x1xf32>
    %280 = tpu.reciprocal %279 {approx = true} : vector<8x1xf32> -> vector<8x1xf32>
    %281 = vector.broadcast %280 : vector<8x1xf32> to vector<8x8xf32>
    %282 = arith.mulf %277, %281 : vector<8x8xf32>
    %cst_74 = arith.constant dense<0.000000e+00> : vector<8x4xf32>
    %283 = tpu.matmul %282, %266, %cst_74 {dimension_numbers = #tpu.dot_dimension_numbers<[1], [0], [0], [1], [0, 0, 1, 1], [], []>} : vector<8x8xf32>, vector<8x4xf32>, vector<8x4xf32> -> vector<8x4xf32>
    %284 = vector.extract_strided_slice %180 {offsets = [0, 20], sizes = [8, 4], strides = [1, 1]} : vector<8x32xf32> to vector<8x4xf32>
    %285 = vector.extract_strided_slice %181 {offsets = [0, 20], sizes = [8, 4], strides = [1, 1]} : vector<8x32xf32> to vector<8x4xf32>
    %286 = vector.extract_strided_slice %182 {offsets = [0, 20], sizes = [8, 4], strides = [1, 1]} : vector<8x32xf32> to vector<8x4xf32>
    %287 = tpu.transpose %285, [1, 0] : vector<8x4xf32> -> vector<4x8xf32>
    %cst_75 = arith.constant dense<0.000000e+00> : vector<8x8xf32>
    %288 = tpu.matmul %284, %287, %cst_75 {dimension_numbers = #tpu.dot_dimension_numbers<[1], [0], [0], [1], [0, 0, 1, 1], [], []>} : vector<8x4xf32>, vector<4x8xf32>, vector<8x8xf32> -> vector<8x8xf32>
    %cst_76 = arith.constant 5.000000e-01 : f32
    %289 = vector.broadcast %cst_76 : f32 to vector<8x8xf32>
    %290 = arith.mulf %288, %289 : vector<8x8xf32>
    %291 = vector.broadcast %183 : vector<1x8xf32> to vector<8x8xf32>
    %292 = arith.addf %290, %291 : vector<8x8xf32>
    %cst_77 = arith.constant dense<0xFF800000> : vector<8xf32>
    %293 = vector.multi_reduction <maximumf>, %292, %cst_77 [1] : vector<8x8xf32> to vector<8xf32>
    %294 = vector.shape_cast %293 : vector<8xf32> to vector<8x1xf32>
    %295 = vector.broadcast %294 : vector<8x1xf32> to vector<8x8xf32>
    %296 = arith.subf %292, %295 : vector<8x8xf32>
    %297 = math.exp %296 : vector<8x8xf32>
    %cst_78 = arith.constant dense<0.000000e+00> : vector<8xf32>
    %298 = vector.multi_reduction <add>, %297, %cst_78 [1] : vector<8x8xf32> to vector<8xf32>
    %299 = vector.shape_cast %298 : vector<8xf32> to vector<8x1xf32>
    %300 = tpu.reciprocal %299 {approx = true} : vector<8x1xf32> -> vector<8x1xf32>
    %301 = vector.broadcast %300 : vector<8x1xf32> to vector<8x8xf32>
    %302 = arith.mulf %297, %301 : vector<8x8xf32>
    %cst_79 = arith.constant dense<0.000000e+00> : vector<8x4xf32>
    %303 = tpu.matmul %302, %286, %cst_79 {dimension_numbers = #tpu.dot_dimension_numbers<[1], [0], [0], [1], [0, 0, 1, 1], [], []>} : vector<8x8xf32>, vector<8x4xf32>, vector<8x4xf32> -> vector<8x4xf32>
    %304 = vector.extract_strided_slice %180 {offsets = [0, 24], sizes = [8, 4], strides = [1, 1]} : vector<8x32xf32> to vector<8x4xf32>
    %305 = vector.extract_strided_slice %181 {offsets = [0, 24], sizes = [8, 4], strides = [1, 1]} : vector<8x32xf32> to vector<8x4xf32>
    %306 = vector.extract_strided_slice %182 {offsets = [0, 24], sizes = [8, 4], strides = [1, 1]} : vector<8x32xf32> to vector<8x4xf32>
    %307 = tpu.transpose %305, [1, 0] : vector<8x4xf32> -> vector<4x8xf32>
    %cst_80 = arith.constant dense<0.000000e+00> : vector<8x8xf32>
    %308 = tpu.matmul %304, %307, %cst_80 {dimension_numbers = #tpu.dot_dimension_numbers<[1], [0], [0], [1], [0, 0, 1, 1], [], []>} : vector<8x4xf32>, vector<4x8xf32>, vector<8x8xf32> -> vector<8x8xf32>
    %cst_81 = arith.constant 5.000000e-01 : f32
    %309 = vector.broadcast %cst_81 : f32 to vector<8x8xf32>
    %310 = arith.mulf %308, %309 : vector<8x8xf32>
    %311 = vector.broadcast %183 : vector<1x8xf32> to vector<8x8xf32>
    %312 = arith.addf %310, %311 : vector<8x8xf32>
    %cst_82 = arith.constant dense<0xFF800000> : vector<8xf32>
    %313 = vector.multi_reduction <maximumf>, %312, %cst_82 [1] : vector<8x8xf32> to vector<8xf32>
    %314 = vector.shape_cast %313 : vector<8xf32> to vector<8x1xf32>
    %315 = vector.broadcast %314 : vector<8x1xf32> to vector<8x8xf32>
    %316 = arith.subf %312, %315 : vector<8x8xf32>
    %317 = math.exp %316 : vector<8x8xf32>
    %cst_83 = arith.constant dense<0.000000e+00> : vector<8xf32>
    %318 = vector.multi_reduction <add>, %317, %cst_83 [1] : vector<8x8xf32> to vector<8xf32>
    %319 = vector.shape_cast %318 : vector<8xf32> to vector<8x1xf32>
    %320 = tpu.reciprocal %319 {approx = true} : vector<8x1xf32> -> vector<8x1xf32>
    %321 = vector.broadcast %320 : vector<8x1xf32> to vector<8x8xf32>
    %322 = arith.mulf %317, %321 : vector<8x8xf32>
    %cst_84 = arith.constant dense<0.000000e+00> : vector<8x4xf32>
    %323 = tpu.matmul %322, %306, %cst_84 {dimension_numbers = #tpu.dot_dimension_numbers<[1], [0], [0], [1], [0, 0, 1, 1], [], []>} : vector<8x8xf32>, vector<8x4xf32>, vector<8x4xf32> -> vector<8x4xf32>
    %324 = vector.extract_strided_slice %180 {offsets = [0, 28], sizes = [8, 4], strides = [1, 1]} : vector<8x32xf32> to vector<8x4xf32>
    %325 = vector.extract_strided_slice %181 {offsets = [0, 28], sizes = [8, 4], strides = [1, 1]} : vector<8x32xf32> to vector<8x4xf32>
    %326 = vector.extract_strided_slice %182 {offsets = [0, 28], sizes = [8, 4], strides = [1, 1]} : vector<8x32xf32> to vector<8x4xf32>
    %327 = tpu.transpose %325, [1, 0] : vector<8x4xf32> -> vector<4x8xf32>
    %cst_85 = arith.constant dense<0.000000e+00> : vector<8x8xf32>
    %328 = tpu.matmul %324, %327, %cst_85 {dimension_numbers = #tpu.dot_dimension_numbers<[1], [0], [0], [1], [0, 0, 1, 1], [], []>} : vector<8x4xf32>, vector<4x8xf32>, vector<8x8xf32> -> vector<8x8xf32>
    %cst_86 = arith.constant 5.000000e-01 : f32
    %329 = vector.broadcast %cst_86 : f32 to vector<8x8xf32>
    %330 = arith.mulf %328, %329 : vector<8x8xf32>
    %331 = vector.broadcast %183 : vector<1x8xf32> to vector<8x8xf32>
    %332 = arith.addf %330, %331 : vector<8x8xf32>
    %cst_87 = arith.constant dense<0xFF800000> : vector<8xf32>
    %333 = vector.multi_reduction <maximumf>, %332, %cst_87 [1] : vector<8x8xf32> to vector<8xf32>
    %334 = vector.shape_cast %333 : vector<8xf32> to vector<8x1xf32>
    %335 = vector.broadcast %334 : vector<8x1xf32> to vector<8x8xf32>
    %336 = arith.subf %332, %335 : vector<8x8xf32>
    %337 = math.exp %336 : vector<8x8xf32>
    %cst_88 = arith.constant dense<0.000000e+00> : vector<8xf32>
    %338 = vector.multi_reduction <add>, %337, %cst_88 [1] : vector<8x8xf32> to vector<8xf32>
    %339 = vector.shape_cast %338 : vector<8xf32> to vector<8x1xf32>
    %340 = tpu.reciprocal %339 {approx = true} : vector<8x1xf32> -> vector<8x1xf32>
    %341 = vector.broadcast %340 : vector<8x1xf32> to vector<8x8xf32>
    %342 = arith.mulf %337, %341 : vector<8x8xf32>
    %cst_89 = arith.constant dense<0.000000e+00> : vector<8x4xf32>
    %343 = tpu.matmul %342, %326, %cst_89 {dimension_numbers = #tpu.dot_dimension_numbers<[1], [0], [0], [1], [0, 0, 1, 1], [], []>} : vector<8x8xf32>, vector<8x4xf32>, vector<8x4xf32> -> vector<8x4xf32>
    %344 = tpu.concatenate %203, %223, %243, %263, %283, %303, %323, %343 in 1 : vector<8x4xf32>, vector<8x4xf32>, vector<8x4xf32>, vector<8x4xf32>, vector<8x4xf32>, vector<8x4xf32>, vector<8x4xf32>, vector<8x4xf32> -> vector<8x32xf32>
    %345 = tpu.concatenate %179, %344 in 0 : vector<8x32xf32>, vector<8x32xf32> -> vector<16x32xf32>
    %c0_90 = arith.constant 0 : index
    %c0_91 = arith.constant 0 : index
    %c0_92 = arith.constant 0 : index
    %346 = vector.load %arg5[%c0_90, %c0_91, %c0_92] : memref<1x32x32xf32, #tpu.memory_space<vmem>>, vector<1x32x32xf32>
    %347 = vector.shape_cast %346 : vector<1x32x32xf32> to vector<32x32xf32>
    %cst_93 = arith.constant dense<0.000000e+00> : vector<16x32xf32>
    %348 = tpu.matmul %345, %347, %cst_93 {dimension_numbers = #tpu.dot_dimension_numbers<[1], [0], [0], [1], [0, 0, 1, 1], [], []>} : vector<16x32xf32>, vector<32x32xf32>, vector<16x32xf32> -> vector<16x32xf32>
    %c0_94 = arith.constant 0 : index
    %c0_95 = arith.constant 0 : index
    %c0_96 = arith.constant 0 : index
    %349 = vector.load %arg6[%c0_94, %c0_95, %c0_96] : memref<1x1x32xf32, #tpu.memory_space<vmem>>, vector<1x1x32xf32>
    %350 = vector.shape_cast %349 : vector<1x1x32xf32> to vector<1x32xf32>
    %351 = vector.broadcast %350 : vector<1x32xf32> to vector<16x32xf32>
    %352 = arith.addf %348, %351 : vector<16x32xf32>
    %353 = arith.addf %3, %352 : vector<16x32xf32>
    %c0_97 = arith.constant 0 : index
    %c0_98 = arith.constant 0 : index
    %c0_99 = arith.constant 0 : index
    %354 = vector.load %arg7[%c0_97, %c0_98, %c0_99] : memref<1x1x32xf32, #tpu.memory_space<vmem>>, vector<1x1x32xf32>
    %355 = vector.shape_cast %354 : vector<1x1x32xf32> to vector<1x32xf32>
    %c0_100 = arith.constant 0 : index
    %c0_101 = arith.constant 0 : index
    %c0_102 = arith.constant 0 : index
    %356 = vector.load %arg8[%c0_100, %c0_101, %c0_102] : memref<1x1x32xf32, #tpu.memory_space<vmem>>, vector<1x1x32xf32>
    %357 = vector.shape_cast %356 : vector<1x1x32xf32> to vector<1x32xf32>
    %cst_103 = arith.constant dense<0.000000e+00> : vector<16xf32>
    %358 = vector.multi_reduction <add>, %353, %cst_103 [1] : vector<16x32xf32> to vector<16xf32>
    %359 = vector.shape_cast %358 : vector<16xf32> to vector<16x1xf32>
    %cst_104 = arith.constant 3.200000e+01 : f32
    %360 = vector.broadcast %cst_104 : f32 to vector<16x1xf32>
    %361 = arith.divf %359, %360 : vector<16x1xf32>
    %362 = vector.broadcast %361 : vector<16x1xf32> to vector<16x32xf32>
    %363 = arith.subf %353, %362 : vector<16x32xf32>
    %364 = arith.mulf %363, %363 : vector<16x32xf32>
    %cst_105 = arith.constant dense<0.000000e+00> : vector<16xf32>
    %365 = vector.multi_reduction <add>, %364, %cst_105 [1] : vector<16x32xf32> to vector<16xf32>
    %366 = vector.shape_cast %365 : vector<16xf32> to vector<16x1xf32>
    %cst_106 = arith.constant 3.200000e+01 : f32
    %367 = vector.broadcast %cst_106 : f32 to vector<16x1xf32>
    %368 = arith.divf %366, %367 : vector<16x1xf32>
    %cst_107 = arith.constant 9.99999974E-6 : f32
    %369 = vector.broadcast %cst_107 : f32 to vector<16x1xf32>
    %370 = arith.addf %368, %369 : vector<16x1xf32>
    %371 = math.rsqrt %370 : vector<16x1xf32>
    %372 = vector.broadcast %371 : vector<16x1xf32> to vector<16x32xf32>
    %373 = arith.mulf %363, %372 : vector<16x32xf32>
    %374 = vector.broadcast %355 : vector<1x32xf32> to vector<16x32xf32>
    %375 = arith.mulf %373, %374 : vector<16x32xf32>
    %376 = vector.broadcast %357 : vector<1x32xf32> to vector<16x32xf32>
    %377 = arith.addf %375, %376 : vector<16x32xf32>
    %c0_108 = arith.constant 0 : index
    %c0_109 = arith.constant 0 : index
    %c0_110 = arith.constant 0 : index
    %378 = vector.load %arg9[%c0_108, %c0_109, %c0_110] : memref<1x32x2048xbf16, #tpu.memory_space<vmem>>, vector<1x32x2048xbf16>
    %379 = vector.shape_cast %378 : vector<1x32x2048xbf16> to vector<32x2048xbf16>
    %c0_111 = arith.constant 0 : index
    %c0_112 = arith.constant 0 : index
    %c0_113 = arith.constant 0 : index
    %380 = vector.load %arg10[%c0_111, %c0_112, %c0_113] : memref<1x1x2048xf32, #tpu.memory_space<vmem>>, vector<1x1x2048xf32>
    %381 = vector.shape_cast %380 : vector<1x1x2048xf32> to vector<1x2048xf32>
    %c0_114 = arith.constant 0 : index
    %c0_115 = arith.constant 0 : index
    %c0_116 = arith.constant 0 : index
    %382 = vector.load %arg11[%c0_114, %c0_115, %c0_116] : memref<1x2048x32xbf16, #tpu.memory_space<vmem>>, vector<1x2048x32xbf16>
    %383 = vector.shape_cast %382 : vector<1x2048x32xbf16> to vector<2048x32xbf16>
    %c0_117 = arith.constant 0 : index
    %c0_118 = arith.constant 0 : index
    %c0_119 = arith.constant 0 : index
    %384 = vector.load %arg12[%c0_117, %c0_118, %c0_119] : memref<1x1x32xf32, #tpu.memory_space<vmem>>, vector<1x1x32xf32>
    %385 = vector.shape_cast %384 : vector<1x1x32xf32> to vector<1x32xf32>
    %386 = arith.truncf %377 : vector<16x32xf32> to vector<16x32xbf16>
    %cst_120 = arith.constant dense<0.000000e+00> : vector<16x2048xf32>
    %387 = tpu.matmul %386, %379, %cst_120 {dimension_numbers = #tpu.dot_dimension_numbers<[1], [0], [0], [1], [0, 0, 1, 1], [], []>} : vector<16x32xbf16>, vector<32x2048xbf16>, vector<16x2048xf32> -> vector<16x2048xf32>
    %388 = vector.broadcast %381 : vector<1x2048xf32> to vector<16x2048xf32>
    %389 = arith.addf %387, %388 : vector<16x2048xf32>
    %cst_121 = arith.constant 0.000000e+00 : f32
    %390 = vector.broadcast %cst_121 : f32 to vector<16x2048xf32>
    %391 = arith.maximumf %389, %390 : vector<16x2048xf32>
    %392 = arith.truncf %391 : vector<16x2048xf32> to vector<16x2048xbf16>
    %cst_122 = arith.constant dense<0.000000e+00> : vector<16x32xf32>
    %393 = tpu.matmul %392, %383, %cst_122 {dimension_numbers = #tpu.dot_dimension_numbers<[1], [0], [0], [1], [0, 0, 1, 1], [], []>} : vector<16x2048xbf16>, vector<2048x32xbf16>, vector<16x32xf32> -> vector<16x32xf32>
    %394 = vector.broadcast %385 : vector<1x32xf32> to vector<16x32xf32>
    %395 = arith.addf %393, %394 : vector<16x32xf32>
    %396 = arith.addf %377, %395 : vector<16x32xf32>
    %c0_123 = arith.constant 0 : index
    %c0_124 = arith.constant 0 : index
    %c0_125 = arith.constant 0 : index
    %397 = vector.load %arg13[%c0_123, %c0_124, %c0_125] : memref<1x1x32xf32, #tpu.memory_space<vmem>>, vector<1x1x32xf32>
    %398 = vector.shape_cast %397 : vector<1x1x32xf32> to vector<1x32xf32>
    %c0_126 = arith.constant 0 : index
    %c0_127 = arith.constant 0 : index
    %c0_128 = arith.constant 0 : index
    %399 = vector.load %arg14[%c0_126, %c0_127, %c0_128] : memref<1x1x32xf32, #tpu.memory_space<vmem>>, vector<1x1x32xf32>
    %400 = vector.shape_cast %399 : vector<1x1x32xf32> to vector<1x32xf32>
    %cst_129 = arith.constant dense<0.000000e+00> : vector<16xf32>
    %401 = vector.multi_reduction <add>, %396, %cst_129 [1] : vector<16x32xf32> to vector<16xf32>
    %402 = vector.shape_cast %401 : vector<16xf32> to vector<16x1xf32>
    %cst_130 = arith.constant 3.200000e+01 : f32
    %403 = vector.broadcast %cst_130 : f32 to vector<16x1xf32>
    %404 = arith.divf %402, %403 : vector<16x1xf32>
    %405 = vector.broadcast %404 : vector<16x1xf32> to vector<16x32xf32>
    %406 = arith.subf %396, %405 : vector<16x32xf32>
    %407 = arith.mulf %406, %406 : vector<16x32xf32>
    %cst_131 = arith.constant dense<0.000000e+00> : vector<16xf32>
    %408 = vector.multi_reduction <add>, %407, %cst_131 [1] : vector<16x32xf32> to vector<16xf32>
    %409 = vector.shape_cast %408 : vector<16xf32> to vector<16x1xf32>
    %cst_132 = arith.constant 3.200000e+01 : f32
    %410 = vector.broadcast %cst_132 : f32 to vector<16x1xf32>
    %411 = arith.divf %409, %410 : vector<16x1xf32>
    %cst_133 = arith.constant 9.99999974E-6 : f32
    %412 = vector.broadcast %cst_133 : f32 to vector<16x1xf32>
    %413 = arith.addf %411, %412 : vector<16x1xf32>
    %414 = math.rsqrt %413 : vector<16x1xf32>
    %415 = vector.broadcast %414 : vector<16x1xf32> to vector<16x32xf32>
    %416 = arith.mulf %406, %415 : vector<16x32xf32>
    %417 = vector.broadcast %398 : vector<1x32xf32> to vector<16x32xf32>
    %418 = arith.mulf %416, %417 : vector<16x32xf32>
    %419 = vector.broadcast %400 : vector<1x32xf32> to vector<16x32xf32>
    %420 = arith.addf %418, %419 : vector<16x32xf32>
    %c0_134 = arith.constant 0 : index
    %c0_135 = arith.constant 0 : index
    %421 = vector.load %arg18[%c0_134, %c0_135] : memref<16x32xf32, #tpu.memory_space<vmem>>, vector<16x32xf32>
    tpu.vector_store %arg18[%c0_134, %c0_135], %420 {strides = array<i32>} : memref<16x32xf32, #tpu.memory_space<vmem>>, vector<16x32xf32>,
    %c5_i32 = arith.constant 5 : i32
    %422 = arith.cmpi eq, %arg0, %c5_i32 : i32
    %423 = arith.extui %422 : i1 to i32
    %c0_i32_136 = arith.constant 0 : i32
    %424 = arith.cmpi ne, %423, %c0_i32_136 : i32
    scf.if %424 {
      %c0_137 = arith.constant 0 : index
      %c0_138 = arith.constant 0 : index
      %425 = vector.load %arg15[%c0_137, %c0_138] : memref<1x32xf32, #tpu.memory_space<vmem>>, vector<1x32xf32>
      %c0_139 = arith.constant 0 : index
      %c0_140 = arith.constant 0 : index
      %426 = vector.load %arg16[%c0_139, %c0_140] : memref<1x32xf32, #tpu.memory_space<vmem>>, vector<1x32xf32>
      %cst_141 = arith.constant dense<0.000000e+00> : vector<16xf32>
      %427 = vector.multi_reduction <add>, %420, %cst_141 [1] : vector<16x32xf32> to vector<16xf32>
      %428 = vector.shape_cast %427 : vector<16xf32> to vector<16x1xf32>
      %cst_142 = arith.constant 3.200000e+01 : f32
      %429 = vector.broadcast %cst_142 : f32 to vector<16x1xf32>
      %430 = arith.divf %428, %429 : vector<16x1xf32>
      %431 = vector.broadcast %430 : vector<16x1xf32> to vector<16x32xf32>
      %432 = arith.subf %420, %431 : vector<16x32xf32>
      %433 = arith.mulf %432, %432 : vector<16x32xf32>
      %cst_143 = arith.constant dense<0.000000e+00> : vector<16xf32>
      %434 = vector.multi_reduction <add>, %433, %cst_143 [1] : vector<16x32xf32> to vector<16xf32>
      %435 = vector.shape_cast %434 : vector<16xf32> to vector<16x1xf32>
      %cst_144 = arith.constant 3.200000e+01 : f32
      %436 = vector.broadcast %cst_144 : f32 to vector<16x1xf32>
      %437 = arith.divf %435, %436 : vector<16x1xf32>
      %cst_145 = arith.constant 9.99999974E-6 : f32
      %438 = vector.broadcast %cst_145 : f32 to vector<16x1xf32>
      %439 = arith.addf %437, %438 : vector<16x1xf32>
      %440 = math.rsqrt %439 : vector<16x1xf32>
      %441 = vector.broadcast %440 : vector<16x1xf32> to vector<16x32xf32>
      %442 = arith.mulf %432, %441 : vector<16x32xf32>
      %443 = vector.broadcast %425 : vector<1x32xf32> to vector<16x32xf32>
      %444 = arith.mulf %442, %443 : vector<16x32xf32>
      %445 = vector.broadcast %426 : vector<1x32xf32> to vector<16x32xf32>
      %446 = arith.addf %444, %445 : vector<16x32xf32>
      %c0_146 = arith.constant 0 : index
      %c0_147 = arith.constant 0 : index
      %447 = vector.load %arg17[%c0_146, %c0_147] : memref<16x32xf32, #tpu.memory_space<vmem>>, vector<16x32xf32>
      tpu.vector_store %arg17[%c0_146, %c0_147], %446 {strides = array<i32>} : memref<16x32xf32, #tpu.memory_space<vmem>>, vector<16x32xf32>,
    } else {
    }
    return
  }
  func.func @transform_0(%arg0: i32) -> (i32, i32) {
    %c0_i32 = arith.constant 0 : i32
    %c0_i32_0 = arith.constant 0 : i32
    %c0_i32_1 = arith.constant 0 : i32
    return %c0_i32, %c0_i32_0 : i32, i32
  }
  func.func @transform_1(%arg0: i32) -> (i32, i32) {
    %c0_i32 = arith.constant 0 : i32
    %c0_i32_0 = arith.constant 0 : i32
    %c0_i32_1 = arith.constant 0 : i32
    return %c0_i32, %c0_i32_0 : i32, i32
  }
  func.func @transform_2(%arg0: i32) -> (i32, i32, i32) {
    %c0_i32 = arith.constant 0 : i32
    %c0_i32_0 = arith.constant 0 : i32
    %c0_i32_1 = arith.constant 0 : i32
    return %arg0, %c0_i32, %c0_i32_0 : i32, i32, i32
  }
  func.func @transform_3(%arg0: i32) -> (i32, i32, i32) {
    %c0_i32 = arith.constant 0 : i32
    %c0_i32_0 = arith.constant 0 : i32
    %c0_i32_1 = arith.constant 0 : i32
    return %arg0, %c0_i32, %c0_i32_0 : i32, i32, i32
  }
  func.func @transform_4(%arg0: i32) -> (i32, i32, i32) {
    %c0_i32 = arith.constant 0 : i32
    %c0_i32_0 = arith.constant 0 : i32
    %c0_i32_1 = arith.constant 0 : i32
    return %arg0, %c0_i32, %c0_i32_0 : i32, i32, i32
  }
  func.func @transform_5(%arg0: i32) -> (i32, i32, i32) {
    %c0_i32 = arith.constant 0 : i32
    %c0_i32_0 = arith.constant 0 : i32
    %c0_i32_1 = arith.constant 0 : i32
    return %arg0, %c0_i32, %c0_i32_0 : i32, i32, i32
  }
  func.func @transform_6(%arg0: i32) -> (i32, i32, i32) {
    %c0_i32 = arith.constant 0 : i32
    %c0_i32_0 = arith.constant 0 : i32
    %c0_i32_1 = arith.constant 0 : i32
    return %arg0, %c0_i32, %c0_i32_0 : i32, i32, i32
  }
  func.func @transform_7(%arg0: i32) -> (i32, i32, i32) {
    %c0_i32 = arith.constant 0 : i32
    %c0_i32_0 = arith.constant 0 : i32
    %c0_i32_1 = arith.constant 0 : i32
    return %arg0, %c0_i32, %c0_i32_0 : i32, i32, i32
  }
  func.func @transform_8(%arg0: i32) -> (i32, i32, i32) {
    %c0_i32 = arith.constant 0 : i32
    %c0_i32_0 = arith.constant 0 : i32
    %c0_i32_1 = arith.constant 0 : i32
    return %arg0, %c0_i32, %c0_i32_0 : i32, i32, i32
  }
  func.func @transform_9(%arg0: i32) -> (i32, i32, i32) {
    %c0_i32 = arith.constant 0 : i32
    %c0_i32_0 = arith.constant 0 : i32
    %c0_i32_1 = arith.constant 0 : i32
    return %arg0, %c0_i32, %c0_i32_0 : i32, i32, i32
  }
  func.func @transform_10(%arg0: i32) -> (i32, i32, i32) {
    %c0_i32 = arith.constant 0 : i32
    %c0_i32_0 = arith.constant 0 : i32
    %c0_i32_1 = arith.constant 0 : i32
    return %arg0, %c0_i32, %c0_i32_0 : i32, i32, i32
  }
  func.func @transform_11(%arg0: i32) -> (i32, i32, i32) {
    %c0_i32 = arith.constant 0 : i32
    %c0_i32_0 = arith.constant 0 : i32
    %c0_i32_1 = arith.constant 0 : i32
    return %arg0, %c0_i32, %c0_i32_0 : i32, i32, i32
  }
  func.func @transform_12(%arg0: i32) -> (i32, i32, i32) {
    %c0_i32 = arith.constant 0 : i32
    %c0_i32_0 = arith.constant 0 : i32
    %c0_i32_1 = arith.constant 0 : i32
    return %arg0, %c0_i32, %c0_i32_0 : i32, i32, i32
  }
  func.func @transform_13(%arg0: i32) -> (i32, i32, i32) {
    %c0_i32 = arith.constant 0 : i32
    %c0_i32_0 = arith.constant 0 : i32
    %c0_i32_1 = arith.constant 0 : i32
    return %arg0, %c0_i32, %c0_i32_0 : i32, i32, i32
  }
  func.func @transform_14(%arg0: i32) -> (i32, i32) {
    %c0_i32 = arith.constant 0 : i32
    %c0_i32_0 = arith.constant 0 : i32
    %c0_i32_1 = arith.constant 0 : i32
    return %c0_i32, %c0_i32_0 : i32, i32
  }
  func.func @transform_15(%arg0: i32) -> (i32, i32) {
    %c0_i32 = arith.constant 0 : i32
    %c0_i32_0 = arith.constant 0 : i32
    %c0_i32_1 = arith.constant 0 : i32
    return %c0_i32, %c0_i32_0 : i32, i32
  }
  func.func @transform_16(%arg0: i32) -> (i32, i32) {
    %c0_i32 = arith.constant 0 : i32
    %c0_i32_0 = arith.constant 0 : i32
    %c0_i32_1 = arith.constant 0 : i32
    return %c0_i32, %c0_i32_0 : i32, i32
  }
}

module attributes {stable_mosaic.version = 11 : i64} {
  func.func @_decoder_stack_kernel(%arg0: i32, %arg1: memref<2x8xf32, #tpu.memory_space<vmem>>, %arg2: memref<16x32xf32, #tpu.memory_space<vmem>>, %arg3: memref<16x32xf32, #tpu.memory_space<vmem>>, %arg4: memref<1x32x96xf32, #tpu.memory_space<vmem>>, %arg5: memref<1x1x96xf32, #tpu.memory_space<vmem>>, %arg6: memref<1x32x32xf32, #tpu.memory_space<vmem>>, %arg7: memref<1x1x32xf32, #tpu.memory_space<vmem>>, %arg8: memref<1x1x32xf32, #tpu.memory_space<vmem>>, %arg9: memref<1x1x32xf32, #tpu.memory_space<vmem>>, %arg10: memref<1x32x32xf32, #tpu.memory_space<vmem>>, %arg11: memref<1x1x32xf32, #tpu.memory_space<vmem>>, %arg12: memref<1x32x64xf32, #tpu.memory_space<vmem>>, %arg13: memref<1x1x64xf32, #tpu.memory_space<vmem>>, %arg14: memref<1x32x32xf32, #tpu.memory_space<vmem>>, %arg15: memref<1x1x32xf32, #tpu.memory_space<vmem>>, %arg16: memref<1x1x32xf32, #tpu.memory_space<vmem>>, %arg17: memref<1x1x32xf32, #tpu.memory_space<vmem>>, %arg18: memref<1x32x2048xbf16, #tpu.memory_space<vmem>>, %arg19: memref<1x1x2048xf32, #tpu.memory_space<vmem>>, %arg20: memref<1x2048x32xbf16, #tpu.memory_space<vmem>>, %arg21: memref<1x1x32xf32, #tpu.memory_space<vmem>>, %arg22: memref<1x1x32xf32, #tpu.memory_space<vmem>>, %arg23: memref<1x1x32xf32, #tpu.memory_space<vmem>>, %arg24: memref<1x32xf32, #tpu.memory_space<vmem>>, %arg25: memref<1x32xf32, #tpu.memory_space<vmem>>, %arg26: memref<16x32xf32, #tpu.memory_space<vmem>>, %arg27: memref<16x32xf32, #tpu.memory_space<vmem>>) attributes {dimension_semantics = [#tpu.dimension_semantics<arbitrary>], iteration_bounds = array<i64: 6>, scalar_prefetch = 0 : i64, scratch_operands = 1 : i64, tpu.core_type = #tpu.core_type<tc>, window_params = [{pipeline_mode = #tpu.pipeline_mode<synchronous>, transform_indices = @transform_0, window_bounds = array<i64: 2, 8>}, {pipeline_mode = #tpu.pipeline_mode<synchronous>, transform_indices = @transform_1, window_bounds = array<i64: 16, 32>}, {pipeline_mode = #tpu.pipeline_mode<synchronous>, transform_indices = @transform_2, window_bounds = array<i64: 16, 32>}, {transform_indices = @transform_3, window_bounds = array<i64: 1, 32, 96>}, {transform_indices = @transform_4, window_bounds = array<i64: 1, 1, 96>}, {transform_indices = @transform_5, window_bounds = array<i64: 1, 32, 32>}, {transform_indices = @transform_6, window_bounds = array<i64: 1, 1, 32>}, {transform_indices = @transform_7, window_bounds = array<i64: 1, 1, 32>}, {transform_indices = @transform_8, window_bounds = array<i64: 1, 1, 32>}, {transform_indices = @transform_9, window_bounds = array<i64: 1, 32, 32>}, {transform_indices = @transform_10, window_bounds = array<i64: 1, 1, 32>}, {transform_indices = @transform_11, window_bounds = array<i64: 1, 32, 64>}, {transform_indices = @transform_12, window_bounds = array<i64: 1, 1, 64>}, {transform_indices = @transform_13, window_bounds = array<i64: 1, 32, 32>}, {transform_indices = @transform_14, window_bounds = array<i64: 1, 1, 32>}, {transform_indices = @transform_15, window_bounds = array<i64: 1, 1, 32>}, {transform_indices = @transform_16, window_bounds = array<i64: 1, 1, 32>}, {transform_indices = @transform_17, window_bounds = array<i64: 1, 32, 2048>}, {transform_indices = @transform_18, window_bounds = array<i64: 1, 1, 2048>}, {transform_indices = @transform_19, window_bounds = array<i64: 1, 2048, 32>}, {transform_indices = @transform_20, window_bounds = array<i64: 1, 1, 32>}, {transform_indices = @transform_21, window_bounds = array<i64: 1, 1, 32>}, {transform_indices = @transform_22, window_bounds = array<i64: 1, 1, 32>}, {pipeline_mode = #tpu.pipeline_mode<synchronous>, transform_indices = @transform_23, window_bounds = array<i64: 1, 32>}, {pipeline_mode = #tpu.pipeline_mode<synchronous>, transform_indices = @transform_24, window_bounds = array<i64: 1, 32>}, {pipeline_mode = #tpu.pipeline_mode<synchronous>, transform_indices = @transform_25, window_bounds = array<i64: 16, 32>}]} {
    %c0_i32 = arith.constant 0 : i32
    %0 = arith.cmpi eq, %arg0, %c0_i32 : i32
    %1 = arith.extui %0 : i1 to i32
    %c0_i32_0 = arith.constant 0 : i32
    %2 = arith.cmpi ne, %1, %c0_i32_0 : i32
    scf.if %2 {
      %c0_253 = arith.constant 0 : index
      %c0_254 = arith.constant 0 : index
      %765 = vector.load %arg2[%c0_253, %c0_254] : memref<16x32xf32, #tpu.memory_space<vmem>>, vector<16x32xf32>
      %c0_255 = arith.constant 0 : index
      %c0_256 = arith.constant 0 : index
      %766 = vector.load %arg27[%c0_255, %c0_256] : memref<16x32xf32, #tpu.memory_space<vmem>>, vector<16x32xf32>
      tpu.vector_store %arg27[%c0_255, %c0_256], %765 {strides = array<i32>} : memref<16x32xf32, #tpu.memory_space<vmem>>, vector<16x32xf32>,
    } else {
    }
    %c0 = arith.constant 0 : index
    %c0_1 = arith.constant 0 : index
    %3 = vector.load %arg27[%c0, %c0_1] : memref<16x32xf32, #tpu.memory_space<vmem>>, vector<16x32xf32>
    %c0_2 = arith.constant 0 : index
    %c0_3 = arith.constant 0 : index
    %4 = vector.load %arg3[%c0_2, %c0_3] : memref<16x32xf32, #tpu.memory_space<vmem>>, vector<16x32xf32>
    %c0_4 = arith.constant 0 : index
    %c0_5 = arith.constant 0 : index
    %5 = vector.load %arg1[%c0_4, %c0_5] : memref<2x8xf32, #tpu.memory_space<vmem>>, vector<2x8xf32>
    %6 = tpu.iota {dimensions = array<i32: 0>} : vector<8x8xi32>
    %7 = tpu.iota {dimensions = array<i32: 1>} : vector<8x8xi32>
    %8 = arith.cmpi sgt, %7, %6 : vector<8x8xi32>
    %cst = arith.constant -1.000000e+30 : f32
    %cst_6 = arith.constant 0.000000e+00 : f32
    %9 = vector.broadcast %cst : f32 to vector<8x8xf32>
    %10 = vector.broadcast %cst_6 : f32 to vector<8x8xf32>
    %11 = arith.select %8, %9, %10 : vector<8x8xi1>, vector<8x8xf32>
    %c0_7 = arith.constant 0 : index
    %c0_8 = arith.constant 0 : index
    %c0_9 = arith.constant 0 : index
    %12 = vector.load %arg4[%c0_7, %c0_8, %c0_9] : memref<1x32x96xf32, #tpu.memory_space<vmem>>, vector<1x32x96xf32>
    %13 = vector.shape_cast %12 : vector<1x32x96xf32> to vector<32x96xf32>
    %cst_10 = arith.constant dense<0.000000e+00> : vector<16x96xf32>
    %14 = tpu.matmul %3, %13, %cst_10 {dimension_numbers = #tpu.dot_dimension_numbers<[1], [0], [0], [1], [0, 0, 1, 1], [], []>} : vector<16x32xf32>, vector<32x96xf32>, vector<16x96xf32> -> vector<16x96xf32>
    %c0_11 = arith.constant 0 : index
    %c0_12 = arith.constant 0 : index
    %c0_13 = arith.constant 0 : index
    %15 = vector.load %arg5[%c0_11, %c0_12, %c0_13] : memref<1x1x96xf32, #tpu.memory_space<vmem>>, vector<1x1x96xf32>
    %16 = vector.shape_cast %15 : vector<1x1x96xf32> to vector<1x96xf32>
    %17 = vector.broadcast %16 : vector<1x96xf32> to vector<16x96xf32>
    %18 = arith.addf %14, %17 : vector<16x96xf32>
    %19 = vector.extract_strided_slice %18 {offsets = [0, 0], sizes = [16, 32], strides = [1, 1]} : vector<16x96xf32> to vector<16x32xf32>
    %20 = vector.extract_strided_slice %18 {offsets = [0, 32], sizes = [16, 32], strides = [1, 1]} : vector<16x96xf32> to vector<16x32xf32>
    %21 = vector.extract_strided_slice %18 {offsets = [0, 64], sizes = [16, 32], strides = [1, 1]} : vector<16x96xf32> to vector<16x32xf32>
    %22 = vector.extract_strided_slice %19 {offsets = [0, 0], sizes = [8, 32], strides = [1, 1]} : vector<16x32xf32> to vector<8x32xf32>
    %23 = vector.extract_strided_slice %20 {offsets = [0, 0], sizes = [8, 32], strides = [1, 1]} : vector<16x32xf32> to vector<8x32xf32>
    %24 = vector.extract_strided_slice %21 {offsets = [0, 0], sizes = [8, 32], strides = [1, 1]} : vector<16x32xf32> to vector<8x32xf32>
    %25 = vector.extract_strided_slice %5 {offsets = [0, 0], sizes = [1, 8], strides = [1, 1]} : vector<2x8xf32> to vector<1x8xf32>
    %26 = vector.broadcast %25 : vector<1x8xf32> to vector<8x8xf32>
    %27 = arith.addf %11, %26 : vector<8x8xf32>
    %28 = vector.extract_strided_slice %22 {offsets = [0, 0], sizes = [8, 4], strides = [1, 1]} : vector<8x32xf32> to vector<8x4xf32>
    %29 = vector.extract_strided_slice %23 {offsets = [0, 0], sizes = [8, 4], strides = [1, 1]} : vector<8x32xf32> to vector<8x4xf32>
    %30 = vector.extract_strided_slice %24 {offsets = [0, 0], sizes = [8, 4], strides = [1, 1]} : vector<8x32xf32> to vector<8x4xf32>
    %31 = tpu.transpose %29, [1, 0] : vector<8x4xf32> -> vector<4x8xf32>
    %cst_14 = arith.constant dense<0.000000e+00> : vector<8x8xf32>
    %32 = tpu.matmul %28, %31, %cst_14 {dimension_numbers = #tpu.dot_dimension_numbers<[1], [0], [0], [1], [0, 0, 1, 1], [], []>} : vector<8x4xf32>, vector<4x8xf32>, vector<8x8xf32> -> vector<8x8xf32>
    %cst_15 = arith.constant 5.000000e-01 : f32
    %33 = vector.broadcast %cst_15 : f32 to vector<8x8xf32>
    %34 = arith.mulf %32, %33 : vector<8x8xf32>
    %35 = arith.addf %34, %27 : vector<8x8xf32>
    %cst_16 = arith.constant dense<0xFF800000> : vector<8xf32>
    %36 = vector.multi_reduction <maximumf>, %35, %cst_16 [1] : vector<8x8xf32> to vector<8xf32>
    %37 = vector.shape_cast %36 : vector<8xf32> to vector<8x1xf32>
    %38 = vector.broadcast %37 : vector<8x1xf32> to vector<8x8xf32>
    %39 = arith.subf %35, %38 : vector<8x8xf32>
    %40 = math.exp %39 : vector<8x8xf32>
    %cst_17 = arith.constant dense<0.000000e+00> : vector<8xf32>
    %41 = vector.multi_reduction <add>, %40, %cst_17 [1] : vector<8x8xf32> to vector<8xf32>
    %42 = vector.shape_cast %41 : vector<8xf32> to vector<8x1xf32>
    %43 = tpu.reciprocal %42 {approx = true} : vector<8x1xf32> -> vector<8x1xf32>
    %44 = vector.broadcast %43 : vector<8x1xf32> to vector<8x8xf32>
    %45 = arith.mulf %40, %44 : vector<8x8xf32>
    %cst_18 = arith.constant dense<0.000000e+00> : vector<8x4xf32>
    %46 = tpu.matmul %45, %30, %cst_18 {dimension_numbers = #tpu.dot_dimension_numbers<[1], [0], [0], [1], [0, 0, 1, 1], [], []>} : vector<8x8xf32>, vector<8x4xf32>, vector<8x4xf32> -> vector<8x4xf32>
    %47 = vector.extract_strided_slice %22 {offsets = [0, 4], sizes = [8, 4], strides = [1, 1]} : vector<8x32xf32> to vector<8x4xf32>
    %48 = vector.extract_strided_slice %23 {offsets = [0, 4], sizes = [8, 4], strides = [1, 1]} : vector<8x32xf32> to vector<8x4xf32>
    %49 = vector.extract_strided_slice %24 {offsets = [0, 4], sizes = [8, 4], strides = [1, 1]} : vector<8x32xf32> to vector<8x4xf32>
    %50 = tpu.transpose %48, [1, 0] : vector<8x4xf32> -> vector<4x8xf32>
    %cst_19 = arith.constant dense<0.000000e+00> : vector<8x8xf32>
    %51 = tpu.matmul %47, %50, %cst_19 {dimension_numbers = #tpu.dot_dimension_numbers<[1], [0], [0], [1], [0, 0, 1, 1], [], []>} : vector<8x4xf32>, vector<4x8xf32>, vector<8x8xf32> -> vector<8x8xf32>
    %cst_20 = arith.constant 5.000000e-01 : f32
    %52 = vector.broadcast %cst_20 : f32 to vector<8x8xf32>
    %53 = arith.mulf %51, %52 : vector<8x8xf32>
    %54 = arith.addf %53, %27 : vector<8x8xf32>
    %cst_21 = arith.constant dense<0xFF800000> : vector<8xf32>
    %55 = vector.multi_reduction <maximumf>, %54, %cst_21 [1] : vector<8x8xf32> to vector<8xf32>
    %56 = vector.shape_cast %55 : vector<8xf32> to vector<8x1xf32>
    %57 = vector.broadcast %56 : vector<8x1xf32> to vector<8x8xf32>
    %58 = arith.subf %54, %57 : vector<8x8xf32>
    %59 = math.exp %58 : vector<8x8xf32>
    %cst_22 = arith.constant dense<0.000000e+00> : vector<8xf32>
    %60 = vector.multi_reduction <add>, %59, %cst_22 [1] : vector<8x8xf32> to vector<8xf32>
    %61 = vector.shape_cast %60 : vector<8xf32> to vector<8x1xf32>
    %62 = tpu.reciprocal %61 {approx = true} : vector<8x1xf32> -> vector<8x1xf32>
    %63 = vector.broadcast %62 : vector<8x1xf32> to vector<8x8xf32>
    %64 = arith.mulf %59, %63 : vector<8x8xf32>
    %cst_23 = arith.constant dense<0.000000e+00> : vector<8x4xf32>
    %65 = tpu.matmul %64, %49, %cst_23 {dimension_numbers = #tpu.dot_dimension_numbers<[1], [0], [0], [1], [0, 0, 1, 1], [], []>} : vector<8x8xf32>, vector<8x4xf32>, vector<8x4xf32> -> vector<8x4xf32>
    %66 = vector.extract_strided_slice %22 {offsets = [0, 8], sizes = [8, 4], strides = [1, 1]} : vector<8x32xf32> to vector<8x4xf32>
    %67 = vector.extract_strided_slice %23 {offsets = [0, 8], sizes = [8, 4], strides = [1, 1]} : vector<8x32xf32> to vector<8x4xf32>
    %68 = vector.extract_strided_slice %24 {offsets = [0, 8], sizes = [8, 4], strides = [1, 1]} : vector<8x32xf32> to vector<8x4xf32>
    %69 = tpu.transpose %67, [1, 0] : vector<8x4xf32> -> vector<4x8xf32>
    %cst_24 = arith.constant dense<0.000000e+00> : vector<8x8xf32>
    %70 = tpu.matmul %66, %69, %cst_24 {dimension_numbers = #tpu.dot_dimension_numbers<[1], [0], [0], [1], [0, 0, 1, 1], [], []>} : vector<8x4xf32>, vector<4x8xf32>, vector<8x8xf32> -> vector<8x8xf32>
    %cst_25 = arith.constant 5.000000e-01 : f32
    %71 = vector.broadcast %cst_25 : f32 to vector<8x8xf32>
    %72 = arith.mulf %70, %71 : vector<8x8xf32>
    %73 = arith.addf %72, %27 : vector<8x8xf32>
    %cst_26 = arith.constant dense<0xFF800000> : vector<8xf32>
    %74 = vector.multi_reduction <maximumf>, %73, %cst_26 [1] : vector<8x8xf32> to vector<8xf32>
    %75 = vector.shape_cast %74 : vector<8xf32> to vector<8x1xf32>
    %76 = vector.broadcast %75 : vector<8x1xf32> to vector<8x8xf32>
    %77 = arith.subf %73, %76 : vector<8x8xf32>
    %78 = math.exp %77 : vector<8x8xf32>
    %cst_27 = arith.constant dense<0.000000e+00> : vector<8xf32>
    %79 = vector.multi_reduction <add>, %78, %cst_27 [1] : vector<8x8xf32> to vector<8xf32>
    %80 = vector.shape_cast %79 : vector<8xf32> to vector<8x1xf32>
    %81 = tpu.reciprocal %80 {approx = true} : vector<8x1xf32> -> vector<8x1xf32>
    %82 = vector.broadcast %81 : vector<8x1xf32> to vector<8x8xf32>
    %83 = arith.mulf %78, %82 : vector<8x8xf32>
    %cst_28 = arith.constant dense<0.000000e+00> : vector<8x4xf32>
    %84 = tpu.matmul %83, %68, %cst_28 {dimension_numbers = #tpu.dot_dimension_numbers<[1], [0], [0], [1], [0, 0, 1, 1], [], []>} : vector<8x8xf32>, vector<8x4xf32>, vector<8x4xf32> -> vector<8x4xf32>
    %85 = vector.extract_strided_slice %22 {offsets = [0, 12], sizes = [8, 4], strides = [1, 1]} : vector<8x32xf32> to vector<8x4xf32>
    %86 = vector.extract_strided_slice %23 {offsets = [0, 12], sizes = [8, 4], strides = [1, 1]} : vector<8x32xf32> to vector<8x4xf32>
    %87 = vector.extract_strided_slice %24 {offsets = [0, 12], sizes = [8, 4], strides = [1, 1]} : vector<8x32xf32> to vector<8x4xf32>
    %88 = tpu.transpose %86, [1, 0] : vector<8x4xf32> -> vector<4x8xf32>
    %cst_29 = arith.constant dense<0.000000e+00> : vector<8x8xf32>
    %89 = tpu.matmul %85, %88, %cst_29 {dimension_numbers = #tpu.dot_dimension_numbers<[1], [0], [0], [1], [0, 0, 1, 1], [], []>} : vector<8x4xf32>, vector<4x8xf32>, vector<8x8xf32> -> vector<8x8xf32>
    %cst_30 = arith.constant 5.000000e-01 : f32
    %90 = vector.broadcast %cst_30 : f32 to vector<8x8xf32>
    %91 = arith.mulf %89, %90 : vector<8x8xf32>
    %92 = arith.addf %91, %27 : vector<8x8xf32>
    %cst_31 = arith.constant dense<0xFF800000> : vector<8xf32>
    %93 = vector.multi_reduction <maximumf>, %92, %cst_31 [1] : vector<8x8xf32> to vector<8xf32>
    %94 = vector.shape_cast %93 : vector<8xf32> to vector<8x1xf32>
    %95 = vector.broadcast %94 : vector<8x1xf32> to vector<8x8xf32>
    %96 = arith.subf %92, %95 : vector<8x8xf32>
    %97 = math.exp %96 : vector<8x8xf32>
    %cst_32 = arith.constant dense<0.000000e+00> : vector<8xf32>
    %98 = vector.multi_reduction <add>, %97, %cst_32 [1] : vector<8x8xf32> to vector<8xf32>
    %99 = vector.shape_cast %98 : vector<8xf32> to vector<8x1xf32>
    %100 = tpu.reciprocal %99 {approx = true} : vector<8x1xf32> -> vector<8x1xf32>
    %101 = vector.broadcast %100 : vector<8x1xf32> to vector<8x8xf32>
    %102 = arith.mulf %97, %101 : vector<8x8xf32>
    %cst_33 = arith.constant dense<0.000000e+00> : vector<8x4xf32>
    %103 = tpu.matmul %102, %87, %cst_33 {dimension_numbers = #tpu.dot_dimension_numbers<[1], [0], [0], [1], [0, 0, 1, 1], [], []>} : vector<8x8xf32>, vector<8x4xf32>, vector<8x4xf32> -> vector<8x4xf32>
    %104 = vector.extract_strided_slice %22 {offsets = [0, 16], sizes = [8, 4], strides = [1, 1]} : vector<8x32xf32> to vector<8x4xf32>
    %105 = vector.extract_strided_slice %23 {offsets = [0, 16], sizes = [8, 4], strides = [1, 1]} : vector<8x32xf32> to vector<8x4xf32>
    %106 = vector.extract_strided_slice %24 {offsets = [0, 16], sizes = [8, 4], strides = [1, 1]} : vector<8x32xf32> to vector<8x4xf32>
    %107 = tpu.transpose %105, [1, 0] : vector<8x4xf32> -> vector<4x8xf32>
    %cst_34 = arith.constant dense<0.000000e+00> : vector<8x8xf32>
    %108 = tpu.matmul %104, %107, %cst_34 {dimension_numbers = #tpu.dot_dimension_numbers<[1], [0], [0], [1], [0, 0, 1, 1], [], []>} : vector<8x4xf32>, vector<4x8xf32>, vector<8x8xf32> -> vector<8x8xf32>
    %cst_35 = arith.constant 5.000000e-01 : f32
    %109 = vector.broadcast %cst_35 : f32 to vector<8x8xf32>
    %110 = arith.mulf %108, %109 : vector<8x8xf32>
    %111 = arith.addf %110, %27 : vector<8x8xf32>
    %cst_36 = arith.constant dense<0xFF800000> : vector<8xf32>
    %112 = vector.multi_reduction <maximumf>, %111, %cst_36 [1] : vector<8x8xf32> to vector<8xf32>
    %113 = vector.shape_cast %112 : vector<8xf32> to vector<8x1xf32>
    %114 = vector.broadcast %113 : vector<8x1xf32> to vector<8x8xf32>
    %115 = arith.subf %111, %114 : vector<8x8xf32>
    %116 = math.exp %115 : vector<8x8xf32>
    %cst_37 = arith.constant dense<0.000000e+00> : vector<8xf32>
    %117 = vector.multi_reduction <add>, %116, %cst_37 [1] : vector<8x8xf32> to vector<8xf32>
    %118 = vector.shape_cast %117 : vector<8xf32> to vector<8x1xf32>
    %119 = tpu.reciprocal %118 {approx = true} : vector<8x1xf32> -> vector<8x1xf32>
    %120 = vector.broadcast %119 : vector<8x1xf32> to vector<8x8xf32>
    %121 = arith.mulf %116, %120 : vector<8x8xf32>
    %cst_38 = arith.constant dense<0.000000e+00> : vector<8x4xf32>
    %122 = tpu.matmul %121, %106, %cst_38 {dimension_numbers = #tpu.dot_dimension_numbers<[1], [0], [0], [1], [0, 0, 1, 1], [], []>} : vector<8x8xf32>, vector<8x4xf32>, vector<8x4xf32> -> vector<8x4xf32>
    %123 = vector.extract_strided_slice %22 {offsets = [0, 20], sizes = [8, 4], strides = [1, 1]} : vector<8x32xf32> to vector<8x4xf32>
    %124 = vector.extract_strided_slice %23 {offsets = [0, 20], sizes = [8, 4], strides = [1, 1]} : vector<8x32xf32> to vector<8x4xf32>
    %125 = vector.extract_strided_slice %24 {offsets = [0, 20], sizes = [8, 4], strides = [1, 1]} : vector<8x32xf32> to vector<8x4xf32>
    %126 = tpu.transpose %124, [1, 0] : vector<8x4xf32> -> vector<4x8xf32>
    %cst_39 = arith.constant dense<0.000000e+00> : vector<8x8xf32>
    %127 = tpu.matmul %123, %126, %cst_39 {dimension_numbers = #tpu.dot_dimension_numbers<[1], [0], [0], [1], [0, 0, 1, 1], [], []>} : vector<8x4xf32>, vector<4x8xf32>, vector<8x8xf32> -> vector<8x8xf32>
    %cst_40 = arith.constant 5.000000e-01 : f32
    %128 = vector.broadcast %cst_40 : f32 to vector<8x8xf32>
    %129 = arith.mulf %127, %128 : vector<8x8xf32>
    %130 = arith.addf %129, %27 : vector<8x8xf32>
    %cst_41 = arith.constant dense<0xFF800000> : vector<8xf32>
    %131 = vector.multi_reduction <maximumf>, %130, %cst_41 [1] : vector<8x8xf32> to vector<8xf32>
    %132 = vector.shape_cast %131 : vector<8xf32> to vector<8x1xf32>
    %133 = vector.broadcast %132 : vector<8x1xf32> to vector<8x8xf32>
    %134 = arith.subf %130, %133 : vector<8x8xf32>
    %135 = math.exp %134 : vector<8x8xf32>
    %cst_42 = arith.constant dense<0.000000e+00> : vector<8xf32>
    %136 = vector.multi_reduction <add>, %135, %cst_42 [1] : vector<8x8xf32> to vector<8xf32>
    %137 = vector.shape_cast %136 : vector<8xf32> to vector<8x1xf32>
    %138 = tpu.reciprocal %137 {approx = true} : vector<8x1xf32> -> vector<8x1xf32>
    %139 = vector.broadcast %138 : vector<8x1xf32> to vector<8x8xf32>
    %140 = arith.mulf %135, %139 : vector<8x8xf32>
    %cst_43 = arith.constant dense<0.000000e+00> : vector<8x4xf32>
    %141 = tpu.matmul %140, %125, %cst_43 {dimension_numbers = #tpu.dot_dimension_numbers<[1], [0], [0], [1], [0, 0, 1, 1], [], []>} : vector<8x8xf32>, vector<8x4xf32>, vector<8x4xf32> -> vector<8x4xf32>
    %142 = vector.extract_strided_slice %22 {offsets = [0, 24], sizes = [8, 4], strides = [1, 1]} : vector<8x32xf32> to vector<8x4xf32>
    %143 = vector.extract_strided_slice %23 {offsets = [0, 24], sizes = [8, 4], strides = [1, 1]} : vector<8x32xf32> to vector<8x4xf32>
    %144 = vector.extract_strided_slice %24 {offsets = [0, 24], sizes = [8, 4], strides = [1, 1]} : vector<8x32xf32> to vector<8x4xf32>
    %145 = tpu.transpose %143, [1, 0] : vector<8x4xf32> -> vector<4x8xf32>
    %cst_44 = arith.constant dense<0.000000e+00> : vector<8x8xf32>
    %146 = tpu.matmul %142, %145, %cst_44 {dimension_numbers = #tpu.dot_dimension_numbers<[1], [0], [0], [1], [0, 0, 1, 1], [], []>} : vector<8x4xf32>, vector<4x8xf32>, vector<8x8xf32> -> vector<8x8xf32>
    %cst_45 = arith.constant 5.000000e-01 : f32
    %147 = vector.broadcast %cst_45 : f32 to vector<8x8xf32>
    %148 = arith.mulf %146, %147 : vector<8x8xf32>
    %149 = arith.addf %148, %27 : vector<8x8xf32>
    %cst_46 = arith.constant dense<0xFF800000> : vector<8xf32>
    %150 = vector.multi_reduction <maximumf>, %149, %cst_46 [1] : vector<8x8xf32> to vector<8xf32>
    %151 = vector.shape_cast %150 : vector<8xf32> to vector<8x1xf32>
    %152 = vector.broadcast %151 : vector<8x1xf32> to vector<8x8xf32>
    %153 = arith.subf %149, %152 : vector<8x8xf32>
    %154 = math.exp %153 : vector<8x8xf32>
    %cst_47 = arith.constant dense<0.000000e+00> : vector<8xf32>
    %155 = vector.multi_reduction <add>, %154, %cst_47 [1] : vector<8x8xf32> to vector<8xf32>
    %156 = vector.shape_cast %155 : vector<8xf32> to vector<8x1xf32>
    %157 = tpu.reciprocal %156 {approx = true} : vector<8x1xf32> -> vector<8x1xf32>
    %158 = vector.broadcast %157 : vector<8x1xf32> to vector<8x8xf32>
    %159 = arith.mulf %154, %158 : vector<8x8xf32>
    %cst_48 = arith.constant dense<0.000000e+00> : vector<8x4xf32>
    %160 = tpu.matmul %159, %144, %cst_48 {dimension_numbers = #tpu.dot_dimension_numbers<[1], [0], [0], [1], [0, 0, 1, 1], [], []>} : vector<8x8xf32>, vector<8x4xf32>, vector<8x4xf32> -> vector<8x4xf32>
    %161 = vector.extract_strided_slice %22 {offsets = [0, 28], sizes = [8, 4], strides = [1, 1]} : vector<8x32xf32> to vector<8x4xf32>
    %162 = vector.extract_strided_slice %23 {offsets = [0, 28], sizes = [8, 4], strides = [1, 1]} : vector<8x32xf32> to vector<8x4xf32>
    %163 = vector.extract_strided_slice %24 {offsets = [0, 28], sizes = [8, 4], strides = [1, 1]} : vector<8x32xf32> to vector<8x4xf32>
    %164 = tpu.transpose %162, [1, 0] : vector<8x4xf32> -> vector<4x8xf32>
    %cst_49 = arith.constant dense<0.000000e+00> : vector<8x8xf32>
    %165 = tpu.matmul %161, %164, %cst_49 {dimension_numbers = #tpu.dot_dimension_numbers<[1], [0], [0], [1], [0, 0, 1, 1], [], []>} : vector<8x4xf32>, vector<4x8xf32>, vector<8x8xf32> -> vector<8x8xf32>
    %cst_50 = arith.constant 5.000000e-01 : f32
    %166 = vector.broadcast %cst_50 : f32 to vector<8x8xf32>
    %167 = arith.mulf %165, %166 : vector<8x8xf32>
    %168 = arith.addf %167, %27 : vector<8x8xf32>
    %cst_51 = arith.constant dense<0xFF800000> : vector<8xf32>
    %169 = vector.multi_reduction <maximumf>, %168, %cst_51 [1] : vector<8x8xf32> to vector<8xf32>
    %170 = vector.shape_cast %169 : vector<8xf32> to vector<8x1xf32>
    %171 = vector.broadcast %170 : vector<8x1xf32> to vector<8x8xf32>
    %172 = arith.subf %168, %171 : vector<8x8xf32>
    %173 = math.exp %172 : vector<8x8xf32>
    %cst_52 = arith.constant dense<0.000000e+00> : vector<8xf32>
    %174 = vector.multi_reduction <add>, %173, %cst_52 [1] : vector<8x8xf32> to vector<8xf32>
    %175 = vector.shape_cast %174 : vector<8xf32> to vector<8x1xf32>
    %176 = tpu.reciprocal %175 {approx = true} : vector<8x1xf32> -> vector<8x1xf32>
    %177 = vector.broadcast %176 : vector<8x1xf32> to vector<8x8xf32>
    %178 = arith.mulf %173, %177 : vector<8x8xf32>
    %cst_53 = arith.constant dense<0.000000e+00> : vector<8x4xf32>
    %179 = tpu.matmul %178, %163, %cst_53 {dimension_numbers = #tpu.dot_dimension_numbers<[1], [0], [0], [1], [0, 0, 1, 1], [], []>} : vector<8x8xf32>, vector<8x4xf32>, vector<8x4xf32> -> vector<8x4xf32>
    %180 = tpu.concatenate %46, %65, %84, %103, %122, %141, %160, %179 in 1 : vector<8x4xf32>, vector<8x4xf32>, vector<8x4xf32>, vector<8x4xf32>, vector<8x4xf32>, vector<8x4xf32>, vector<8x4xf32>, vector<8x4xf32> -> vector<8x32xf32>
    %181 = vector.extract_strided_slice %19 {offsets = [8, 0], sizes = [8, 32], strides = [1, 1]} : vector<16x32xf32> to vector<8x32xf32>
    %182 = vector.extract_strided_slice %20 {offsets = [8, 0], sizes = [8, 32], strides = [1, 1]} : vector<16x32xf32> to vector<8x32xf32>
    %183 = vector.extract_strided_slice %21 {offsets = [8, 0], sizes = [8, 32], strides = [1, 1]} : vector<16x32xf32> to vector<8x32xf32>
    %184 = vector.extract_strided_slice %5 {offsets = [1, 0], sizes = [1, 8], strides = [1, 1]} : vector<2x8xf32> to vector<1x8xf32>
    %185 = vector.broadcast %184 : vector<1x8xf32> to vector<8x8xf32>
    %186 = arith.addf %11, %185 : vector<8x8xf32>
    %187 = vector.extract_strided_slice %181 {offsets = [0, 0], sizes = [8, 4], strides = [1, 1]} : vector<8x32xf32> to vector<8x4xf32>
    %188 = vector.extract_strided_slice %182 {offsets = [0, 0], sizes = [8, 4], strides = [1, 1]} : vector<8x32xf32> to vector<8x4xf32>
    %189 = vector.extract_strided_slice %183 {offsets = [0, 0], sizes = [8, 4], strides = [1, 1]} : vector<8x32xf32> to vector<8x4xf32>
    %190 = tpu.transpose %188, [1, 0] : vector<8x4xf32> -> vector<4x8xf32>
    %cst_54 = arith.constant dense<0.000000e+00> : vector<8x8xf32>
    %191 = tpu.matmul %187, %190, %cst_54 {dimension_numbers = #tpu.dot_dimension_numbers<[1], [0], [0], [1], [0, 0, 1, 1], [], []>} : vector<8x4xf32>, vector<4x8xf32>, vector<8x8xf32> -> vector<8x8xf32>
    %cst_55 = arith.constant 5.000000e-01 : f32
    %192 = vector.broadcast %cst_55 : f32 to vector<8x8xf32>
    %193 = arith.mulf %191, %192 : vector<8x8xf32>
    %194 = arith.addf %193, %186 : vector<8x8xf32>
    %cst_56 = arith.constant dense<0xFF800000> : vector<8xf32>
    %195 = vector.multi_reduction <maximumf>, %194, %cst_56 [1] : vector<8x8xf32> to vector<8xf32>
    %196 = vector.shape_cast %195 : vector<8xf32> to vector<8x1xf32>
    %197 = vector.broadcast %196 : vector<8x1xf32> to vector<8x8xf32>
    %198 = arith.subf %194, %197 : vector<8x8xf32>
    %199 = math.exp %198 : vector<8x8xf32>
    %cst_57 = arith.constant dense<0.000000e+00> : vector<8xf32>
    %200 = vector.multi_reduction <add>, %199, %cst_57 [1] : vector<8x8xf32> to vector<8xf32>
    %201 = vector.shape_cast %200 : vector<8xf32> to vector<8x1xf32>
    %202 = tpu.reciprocal %201 {approx = true} : vector<8x1xf32> -> vector<8x1xf32>
    %203 = vector.broadcast %202 : vector<8x1xf32> to vector<8x8xf32>
    %204 = arith.mulf %199, %203 : vector<8x8xf32>
    %cst_58 = arith.constant dense<0.000000e+00> : vector<8x4xf32>
    %205 = tpu.matmul %204, %189, %cst_58 {dimension_numbers = #tpu.dot_dimension_numbers<[1], [0], [0], [1], [0, 0, 1, 1], [], []>} : vector<8x8xf32>, vector<8x4xf32>, vector<8x4xf32> -> vector<8x4xf32>
    %206 = vector.extract_strided_slice %181 {offsets = [0, 4], sizes = [8, 4], strides = [1, 1]} : vector<8x32xf32> to vector<8x4xf32>
    %207 = vector.extract_strided_slice %182 {offsets = [0, 4], sizes = [8, 4], strides = [1, 1]} : vector<8x32xf32> to vector<8x4xf32>
    %208 = vector.extract_strided_slice %183 {offsets = [0, 4], sizes = [8, 4], strides = [1, 1]} : vector<8x32xf32> to vector<8x4xf32>
    %209 = tpu.transpose %207, [1, 0] : vector<8x4xf32> -> vector<4x8xf32>
    %cst_59 = arith.constant dense<0.000000e+00> : vector<8x8xf32>
    %210 = tpu.matmul %206, %209, %cst_59 {dimension_numbers = #tpu.dot_dimension_numbers<[1], [0], [0], [1], [0, 0, 1, 1], [], []>} : vector<8x4xf32>, vector<4x8xf32>, vector<8x8xf32> -> vector<8x8xf32>
    %cst_60 = arith.constant 5.000000e-01 : f32
    %211 = vector.broadcast %cst_60 : f32 to vector<8x8xf32>
    %212 = arith.mulf %210, %211 : vector<8x8xf32>
    %213 = arith.addf %212, %186 : vector<8x8xf32>
    %cst_61 = arith.constant dense<0xFF800000> : vector<8xf32>
    %214 = vector.multi_reduction <maximumf>, %213, %cst_61 [1] : vector<8x8xf32> to vector<8xf32>
    %215 = vector.shape_cast %214 : vector<8xf32> to vector<8x1xf32>
    %216 = vector.broadcast %215 : vector<8x1xf32> to vector<8x8xf32>
    %217 = arith.subf %213, %216 : vector<8x8xf32>
    %218 = math.exp %217 : vector<8x8xf32>
    %cst_62 = arith.constant dense<0.000000e+00> : vector<8xf32>
    %219 = vector.multi_reduction <add>, %218, %cst_62 [1] : vector<8x8xf32> to vector<8xf32>
    %220 = vector.shape_cast %219 : vector<8xf32> to vector<8x1xf32>
    %221 = tpu.reciprocal %220 {approx = true} : vector<8x1xf32> -> vector<8x1xf32>
    %222 = vector.broadcast %221 : vector<8x1xf32> to vector<8x8xf32>
    %223 = arith.mulf %218, %222 : vector<8x8xf32>
    %cst_63 = arith.constant dense<0.000000e+00> : vector<8x4xf32>
    %224 = tpu.matmul %223, %208, %cst_63 {dimension_numbers = #tpu.dot_dimension_numbers<[1], [0], [0], [1], [0, 0, 1, 1], [], []>} : vector<8x8xf32>, vector<8x4xf32>, vector<8x4xf32> -> vector<8x4xf32>
    %225 = vector.extract_strided_slice %181 {offsets = [0, 8], sizes = [8, 4], strides = [1, 1]} : vector<8x32xf32> to vector<8x4xf32>
    %226 = vector.extract_strided_slice %182 {offsets = [0, 8], sizes = [8, 4], strides = [1, 1]} : vector<8x32xf32> to vector<8x4xf32>
    %227 = vector.extract_strided_slice %183 {offsets = [0, 8], sizes = [8, 4], strides = [1, 1]} : vector<8x32xf32> to vector<8x4xf32>
    %228 = tpu.transpose %226, [1, 0] : vector<8x4xf32> -> vector<4x8xf32>
    %cst_64 = arith.constant dense<0.000000e+00> : vector<8x8xf32>
    %229 = tpu.matmul %225, %228, %cst_64 {dimension_numbers = #tpu.dot_dimension_numbers<[1], [0], [0], [1], [0, 0, 1, 1], [], []>} : vector<8x4xf32>, vector<4x8xf32>, vector<8x8xf32> -> vector<8x8xf32>
    %cst_65 = arith.constant 5.000000e-01 : f32
    %230 = vector.broadcast %cst_65 : f32 to vector<8x8xf32>
    %231 = arith.mulf %229, %230 : vector<8x8xf32>
    %232 = arith.addf %231, %186 : vector<8x8xf32>
    %cst_66 = arith.constant dense<0xFF800000> : vector<8xf32>
    %233 = vector.multi_reduction <maximumf>, %232, %cst_66 [1] : vector<8x8xf32> to vector<8xf32>
    %234 = vector.shape_cast %233 : vector<8xf32> to vector<8x1xf32>
    %235 = vector.broadcast %234 : vector<8x1xf32> to vector<8x8xf32>
    %236 = arith.subf %232, %235 : vector<8x8xf32>
    %237 = math.exp %236 : vector<8x8xf32>
    %cst_67 = arith.constant dense<0.000000e+00> : vector<8xf32>
    %238 = vector.multi_reduction <add>, %237, %cst_67 [1] : vector<8x8xf32> to vector<8xf32>
    %239 = vector.shape_cast %238 : vector<8xf32> to vector<8x1xf32>
    %240 = tpu.reciprocal %239 {approx = true} : vector<8x1xf32> -> vector<8x1xf32>
    %241 = vector.broadcast %240 : vector<8x1xf32> to vector<8x8xf32>
    %242 = arith.mulf %237, %241 : vector<8x8xf32>
    %cst_68 = arith.constant dense<0.000000e+00> : vector<8x4xf32>
    %243 = tpu.matmul %242, %227, %cst_68 {dimension_numbers = #tpu.dot_dimension_numbers<[1], [0], [0], [1], [0, 0, 1, 1], [], []>} : vector<8x8xf32>, vector<8x4xf32>, vector<8x4xf32> -> vector<8x4xf32>
    %244 = vector.extract_strided_slice %181 {offsets = [0, 12], sizes = [8, 4], strides = [1, 1]} : vector<8x32xf32> to vector<8x4xf32>
    %245 = vector.extract_strided_slice %182 {offsets = [0, 12], sizes = [8, 4], strides = [1, 1]} : vector<8x32xf32> to vector<8x4xf32>
    %246 = vector.extract_strided_slice %183 {offsets = [0, 12], sizes = [8, 4], strides = [1, 1]} : vector<8x32xf32> to vector<8x4xf32>
    %247 = tpu.transpose %245, [1, 0] : vector<8x4xf32> -> vector<4x8xf32>
    %cst_69 = arith.constant dense<0.000000e+00> : vector<8x8xf32>
    %248 = tpu.matmul %244, %247, %cst_69 {dimension_numbers = #tpu.dot_dimension_numbers<[1], [0], [0], [1], [0, 0, 1, 1], [], []>} : vector<8x4xf32>, vector<4x8xf32>, vector<8x8xf32> -> vector<8x8xf32>
    %cst_70 = arith.constant 5.000000e-01 : f32
    %249 = vector.broadcast %cst_70 : f32 to vector<8x8xf32>
    %250 = arith.mulf %248, %249 : vector<8x8xf32>
    %251 = arith.addf %250, %186 : vector<8x8xf32>
    %cst_71 = arith.constant dense<0xFF800000> : vector<8xf32>
    %252 = vector.multi_reduction <maximumf>, %251, %cst_71 [1] : vector<8x8xf32> to vector<8xf32>
    %253 = vector.shape_cast %252 : vector<8xf32> to vector<8x1xf32>
    %254 = vector.broadcast %253 : vector<8x1xf32> to vector<8x8xf32>
    %255 = arith.subf %251, %254 : vector<8x8xf32>
    %256 = math.exp %255 : vector<8x8xf32>
    %cst_72 = arith.constant dense<0.000000e+00> : vector<8xf32>
    %257 = vector.multi_reduction <add>, %256, %cst_72 [1] : vector<8x8xf32> to vector<8xf32>
    %258 = vector.shape_cast %257 : vector<8xf32> to vector<8x1xf32>
    %259 = tpu.reciprocal %258 {approx = true} : vector<8x1xf32> -> vector<8x1xf32>
    %260 = vector.broadcast %259 : vector<8x1xf32> to vector<8x8xf32>
    %261 = arith.mulf %256, %260 : vector<8x8xf32>
    %cst_73 = arith.constant dense<0.000000e+00> : vector<8x4xf32>
    %262 = tpu.matmul %261, %246, %cst_73 {dimension_numbers = #tpu.dot_dimension_numbers<[1], [0], [0], [1], [0, 0, 1, 1], [], []>} : vector<8x8xf32>, vector<8x4xf32>, vector<8x4xf32> -> vector<8x4xf32>
    %263 = vector.extract_strided_slice %181 {offsets = [0, 16], sizes = [8, 4], strides = [1, 1]} : vector<8x32xf32> to vector<8x4xf32>
    %264 = vector.extract_strided_slice %182 {offsets = [0, 16], sizes = [8, 4], strides = [1, 1]} : vector<8x32xf32> to vector<8x4xf32>
    %265 = vector.extract_strided_slice %183 {offsets = [0, 16], sizes = [8, 4], strides = [1, 1]} : vector<8x32xf32> to vector<8x4xf32>
    %266 = tpu.transpose %264, [1, 0] : vector<8x4xf32> -> vector<4x8xf32>
    %cst_74 = arith.constant dense<0.000000e+00> : vector<8x8xf32>
    %267 = tpu.matmul %263, %266, %cst_74 {dimension_numbers = #tpu.dot_dimension_numbers<[1], [0], [0], [1], [0, 0, 1, 1], [], []>} : vector<8x4xf32>, vector<4x8xf32>, vector<8x8xf32> -> vector<8x8xf32>
    %cst_75 = arith.constant 5.000000e-01 : f32
    %268 = vector.broadcast %cst_75 : f32 to vector<8x8xf32>
    %269 = arith.mulf %267, %268 : vector<8x8xf32>
    %270 = arith.addf %269, %186 : vector<8x8xf32>
    %cst_76 = arith.constant dense<0xFF800000> : vector<8xf32>
    %271 = vector.multi_reduction <maximumf>, %270, %cst_76 [1] : vector<8x8xf32> to vector<8xf32>
    %272 = vector.shape_cast %271 : vector<8xf32> to vector<8x1xf32>
    %273 = vector.broadcast %272 : vector<8x1xf32> to vector<8x8xf32>
    %274 = arith.subf %270, %273 : vector<8x8xf32>
    %275 = math.exp %274 : vector<8x8xf32>
    %cst_77 = arith.constant dense<0.000000e+00> : vector<8xf32>
    %276 = vector.multi_reduction <add>, %275, %cst_77 [1] : vector<8x8xf32> to vector<8xf32>
    %277 = vector.shape_cast %276 : vector<8xf32> to vector<8x1xf32>
    %278 = tpu.reciprocal %277 {approx = true} : vector<8x1xf32> -> vector<8x1xf32>
    %279 = vector.broadcast %278 : vector<8x1xf32> to vector<8x8xf32>
    %280 = arith.mulf %275, %279 : vector<8x8xf32>
    %cst_78 = arith.constant dense<0.000000e+00> : vector<8x4xf32>
    %281 = tpu.matmul %280, %265, %cst_78 {dimension_numbers = #tpu.dot_dimension_numbers<[1], [0], [0], [1], [0, 0, 1, 1], [], []>} : vector<8x8xf32>, vector<8x4xf32>, vector<8x4xf32> -> vector<8x4xf32>
    %282 = vector.extract_strided_slice %181 {offsets = [0, 20], sizes = [8, 4], strides = [1, 1]} : vector<8x32xf32> to vector<8x4xf32>
    %283 = vector.extract_strided_slice %182 {offsets = [0, 20], sizes = [8, 4], strides = [1, 1]} : vector<8x32xf32> to vector<8x4xf32>
    %284 = vector.extract_strided_slice %183 {offsets = [0, 20], sizes = [8, 4], strides = [1, 1]} : vector<8x32xf32> to vector<8x4xf32>
    %285 = tpu.transpose %283, [1, 0] : vector<8x4xf32> -> vector<4x8xf32>
    %cst_79 = arith.constant dense<0.000000e+00> : vector<8x8xf32>
    %286 = tpu.matmul %282, %285, %cst_79 {dimension_numbers = #tpu.dot_dimension_numbers<[1], [0], [0], [1], [0, 0, 1, 1], [], []>} : vector<8x4xf32>, vector<4x8xf32>, vector<8x8xf32> -> vector<8x8xf32>
    %cst_80 = arith.constant 5.000000e-01 : f32
    %287 = vector.broadcast %cst_80 : f32 to vector<8x8xf32>
    %288 = arith.mulf %286, %287 : vector<8x8xf32>
    %289 = arith.addf %288, %186 : vector<8x8xf32>
    %cst_81 = arith.constant dense<0xFF800000> : vector<8xf32>
    %290 = vector.multi_reduction <maximumf>, %289, %cst_81 [1] : vector<8x8xf32> to vector<8xf32>
    %291 = vector.shape_cast %290 : vector<8xf32> to vector<8x1xf32>
    %292 = vector.broadcast %291 : vector<8x1xf32> to vector<8x8xf32>
    %293 = arith.subf %289, %292 : vector<8x8xf32>
    %294 = math.exp %293 : vector<8x8xf32>
    %cst_82 = arith.constant dense<0.000000e+00> : vector<8xf32>
    %295 = vector.multi_reduction <add>, %294, %cst_82 [1] : vector<8x8xf32> to vector<8xf32>
    %296 = vector.shape_cast %295 : vector<8xf32> to vector<8x1xf32>
    %297 = tpu.reciprocal %296 {approx = true} : vector<8x1xf32> -> vector<8x1xf32>
    %298 = vector.broadcast %297 : vector<8x1xf32> to vector<8x8xf32>
    %299 = arith.mulf %294, %298 : vector<8x8xf32>
    %cst_83 = arith.constant dense<0.000000e+00> : vector<8x4xf32>
    %300 = tpu.matmul %299, %284, %cst_83 {dimension_numbers = #tpu.dot_dimension_numbers<[1], [0], [0], [1], [0, 0, 1, 1], [], []>} : vector<8x8xf32>, vector<8x4xf32>, vector<8x4xf32> -> vector<8x4xf32>
    %301 = vector.extract_strided_slice %181 {offsets = [0, 24], sizes = [8, 4], strides = [1, 1]} : vector<8x32xf32> to vector<8x4xf32>
    %302 = vector.extract_strided_slice %182 {offsets = [0, 24], sizes = [8, 4], strides = [1, 1]} : vector<8x32xf32> to vector<8x4xf32>
    %303 = vector.extract_strided_slice %183 {offsets = [0, 24], sizes = [8, 4], strides = [1, 1]} : vector<8x32xf32> to vector<8x4xf32>
    %304 = tpu.transpose %302, [1, 0] : vector<8x4xf32> -> vector<4x8xf32>
    %cst_84 = arith.constant dense<0.000000e+00> : vector<8x8xf32>
    %305 = tpu.matmul %301, %304, %cst_84 {dimension_numbers = #tpu.dot_dimension_numbers<[1], [0], [0], [1], [0, 0, 1, 1], [], []>} : vector<8x4xf32>, vector<4x8xf32>, vector<8x8xf32> -> vector<8x8xf32>
    %cst_85 = arith.constant 5.000000e-01 : f32
    %306 = vector.broadcast %cst_85 : f32 to vector<8x8xf32>
    %307 = arith.mulf %305, %306 : vector<8x8xf32>
    %308 = arith.addf %307, %186 : vector<8x8xf32>
    %cst_86 = arith.constant dense<0xFF800000> : vector<8xf32>
    %309 = vector.multi_reduction <maximumf>, %308, %cst_86 [1] : vector<8x8xf32> to vector<8xf32>
    %310 = vector.shape_cast %309 : vector<8xf32> to vector<8x1xf32>
    %311 = vector.broadcast %310 : vector<8x1xf32> to vector<8x8xf32>
    %312 = arith.subf %308, %311 : vector<8x8xf32>
    %313 = math.exp %312 : vector<8x8xf32>
    %cst_87 = arith.constant dense<0.000000e+00> : vector<8xf32>
    %314 = vector.multi_reduction <add>, %313, %cst_87 [1] : vector<8x8xf32> to vector<8xf32>
    %315 = vector.shape_cast %314 : vector<8xf32> to vector<8x1xf32>
    %316 = tpu.reciprocal %315 {approx = true} : vector<8x1xf32> -> vector<8x1xf32>
    %317 = vector.broadcast %316 : vector<8x1xf32> to vector<8x8xf32>
    %318 = arith.mulf %313, %317 : vector<8x8xf32>
    %cst_88 = arith.constant dense<0.000000e+00> : vector<8x4xf32>
    %319 = tpu.matmul %318, %303, %cst_88 {dimension_numbers = #tpu.dot_dimension_numbers<[1], [0], [0], [1], [0, 0, 1, 1], [], []>} : vector<8x8xf32>, vector<8x4xf32>, vector<8x4xf32> -> vector<8x4xf32>
    %320 = vector.extract_strided_slice %181 {offsets = [0, 28], sizes = [8, 4], strides = [1, 1]} : vector<8x32xf32> to vector<8x4xf32>
    %321 = vector.extract_strided_slice %182 {offsets = [0, 28], sizes = [8, 4], strides = [1, 1]} : vector<8x32xf32> to vector<8x4xf32>
    %322 = vector.extract_strided_slice %183 {offsets = [0, 28], sizes = [8, 4], strides = [1, 1]} : vector<8x32xf32> to vector<8x4xf32>
    %323 = tpu.transpose %321, [1, 0] : vector<8x4xf32> -> vector<4x8xf32>
    %cst_89 = arith.constant dense<0.000000e+00> : vector<8x8xf32>
    %324 = tpu.matmul %320, %323, %cst_89 {dimension_numbers = #tpu.dot_dimension_numbers<[1], [0], [0], [1], [0, 0, 1, 1], [], []>} : vector<8x4xf32>, vector<4x8xf32>, vector<8x8xf32> -> vector<8x8xf32>
    %cst_90 = arith.constant 5.000000e-01 : f32
    %325 = vector.broadcast %cst_90 : f32 to vector<8x8xf32>
    %326 = arith.mulf %324, %325 : vector<8x8xf32>
    %327 = arith.addf %326, %186 : vector<8x8xf32>
    %cst_91 = arith.constant dense<0xFF800000> : vector<8xf32>
    %328 = vector.multi_reduction <maximumf>, %327, %cst_91 [1] : vector<8x8xf32> to vector<8xf32>
    %329 = vector.shape_cast %328 : vector<8xf32> to vector<8x1xf32>
    %330 = vector.broadcast %329 : vector<8x1xf32> to vector<8x8xf32>
    %331 = arith.subf %327, %330 : vector<8x8xf32>
    %332 = math.exp %331 : vector<8x8xf32>
    %cst_92 = arith.constant dense<0.000000e+00> : vector<8xf32>
    %333 = vector.multi_reduction <add>, %332, %cst_92 [1] : vector<8x8xf32> to vector<8xf32>
    %334 = vector.shape_cast %333 : vector<8xf32> to vector<8x1xf32>
    %335 = tpu.reciprocal %334 {approx = true} : vector<8x1xf32> -> vector<8x1xf32>
    %336 = vector.broadcast %335 : vector<8x1xf32> to vector<8x8xf32>
    %337 = arith.mulf %332, %336 : vector<8x8xf32>
    %cst_93 = arith.constant dense<0.000000e+00> : vector<8x4xf32>
    %338 = tpu.matmul %337, %322, %cst_93 {dimension_numbers = #tpu.dot_dimension_numbers<[1], [0], [0], [1], [0, 0, 1, 1], [], []>} : vector<8x8xf32>, vector<8x4xf32>, vector<8x4xf32> -> vector<8x4xf32>
    %339 = tpu.concatenate %205, %224, %243, %262, %281, %300, %319, %338 in 1 : vector<8x4xf32>, vector<8x4xf32>, vector<8x4xf32>, vector<8x4xf32>, vector<8x4xf32>, vector<8x4xf32>, vector<8x4xf32>, vector<8x4xf32> -> vector<8x32xf32>
    %340 = tpu.concatenate %180, %339 in 0 : vector<8x32xf32>, vector<8x32xf32> -> vector<16x32xf32>
    %c0_94 = arith.constant 0 : index
    %c0_95 = arith.constant 0 : index
    %c0_96 = arith.constant 0 : index
    %341 = vector.load %arg6[%c0_94, %c0_95, %c0_96] : memref<1x32x32xf32, #tpu.memory_space<vmem>>, vector<1x32x32xf32>
    %342 = vector.shape_cast %341 : vector<1x32x32xf32> to vector<32x32xf32>
    %cst_97 = arith.constant dense<0.000000e+00> : vector<16x32xf32>
    %343 = tpu.matmul %340, %342, %cst_97 {dimension_numbers = #tpu.dot_dimension_numbers<[1], [0], [0], [1], [0, 0, 1, 1], [], []>} : vector<16x32xf32>, vector<32x32xf32>, vector<16x32xf32> -> vector<16x32xf32>
    %c0_98 = arith.constant 0 : index
    %c0_99 = arith.constant 0 : index
    %c0_100 = arith.constant 0 : index
    %344 = vector.load %arg7[%c0_98, %c0_99, %c0_100] : memref<1x1x32xf32, #tpu.memory_space<vmem>>, vector<1x1x32xf32>
    %345 = vector.shape_cast %344 : vector<1x1x32xf32> to vector<1x32xf32>
    %346 = vector.broadcast %345 : vector<1x32xf32> to vector<16x32xf32>
    %347 = arith.addf %343, %346 : vector<16x32xf32>
    %348 = arith.addf %3, %347 : vector<16x32xf32>
    %c0_101 = arith.constant 0 : index
    %c0_102 = arith.constant 0 : index
    %c0_103 = arith.constant 0 : index
    %349 = vector.load %arg8[%c0_101, %c0_102, %c0_103] : memref<1x1x32xf32, #tpu.memory_space<vmem>>, vector<1x1x32xf32>
    %350 = vector.shape_cast %349 : vector<1x1x32xf32> to vector<1x32xf32>
    %c0_104 = arith.constant 0 : index
    %c0_105 = arith.constant 0 : index
    %c0_106 = arith.constant 0 : index
    %351 = vector.load %arg9[%c0_104, %c0_105, %c0_106] : memref<1x1x32xf32, #tpu.memory_space<vmem>>, vector<1x1x32xf32>
    %352 = vector.shape_cast %351 : vector<1x1x32xf32> to vector<1x32xf32>
    %cst_107 = arith.constant dense<0.000000e+00> : vector<16xf32>
    %353 = vector.multi_reduction <add>, %348, %cst_107 [1] : vector<16x32xf32> to vector<16xf32>
    %354 = vector.shape_cast %353 : vector<16xf32> to vector<16x1xf32>
    %cst_108 = arith.constant 3.200000e+01 : f32
    %355 = vector.broadcast %cst_108 : f32 to vector<16x1xf32>
    %356 = arith.divf %354, %355 : vector<16x1xf32>
    %357 = vector.broadcast %356 : vector<16x1xf32> to vector<16x32xf32>
    %358 = arith.subf %348, %357 : vector<16x32xf32>
    %359 = arith.mulf %358, %358 : vector<16x32xf32>
    %cst_109 = arith.constant dense<0.000000e+00> : vector<16xf32>
    %360 = vector.multi_reduction <add>, %359, %cst_109 [1] : vector<16x32xf32> to vector<16xf32>
    %361 = vector.shape_cast %360 : vector<16xf32> to vector<16x1xf32>
    %cst_110 = arith.constant 3.200000e+01 : f32
    %362 = vector.broadcast %cst_110 : f32 to vector<16x1xf32>
    %363 = arith.divf %361, %362 : vector<16x1xf32>
    %cst_111 = arith.constant 9.99999974E-6 : f32
    %364 = vector.broadcast %cst_111 : f32 to vector<16x1xf32>
    %365 = arith.addf %363, %364 : vector<16x1xf32>
    %366 = math.rsqrt %365 : vector<16x1xf32>
    %367 = vector.broadcast %366 : vector<16x1xf32> to vector<16x32xf32>
    %368 = arith.mulf %358, %367 : vector<16x32xf32>
    %369 = vector.broadcast %350 : vector<1x32xf32> to vector<16x32xf32>
    %370 = arith.mulf %368, %369 : vector<16x32xf32>
    %371 = vector.broadcast %352 : vector<1x32xf32> to vector<16x32xf32>
    %372 = arith.addf %370, %371 : vector<16x32xf32>
    %c0_112 = arith.constant 0 : index
    %c0_113 = arith.constant 0 : index
    %c0_114 = arith.constant 0 : index
    %373 = vector.load %arg10[%c0_112, %c0_113, %c0_114] : memref<1x32x32xf32, #tpu.memory_space<vmem>>, vector<1x32x32xf32>
    %374 = vector.shape_cast %373 : vector<1x32x32xf32> to vector<32x32xf32>
    %cst_115 = arith.constant dense<0.000000e+00> : vector<16x32xf32>
    %375 = tpu.matmul %372, %374, %cst_115 {dimension_numbers = #tpu.dot_dimension_numbers<[1], [0], [0], [1], [0, 0, 1, 1], [], []>} : vector<16x32xf32>, vector<32x32xf32>, vector<16x32xf32> -> vector<16x32xf32>
    %c0_116 = arith.constant 0 : index
    %c0_117 = arith.constant 0 : index
    %c0_118 = arith.constant 0 : index
    %376 = vector.load %arg11[%c0_116, %c0_117, %c0_118] : memref<1x1x32xf32, #tpu.memory_space<vmem>>, vector<1x1x32xf32>
    %377 = vector.shape_cast %376 : vector<1x1x32xf32> to vector<1x32xf32>
    %378 = vector.broadcast %377 : vector<1x32xf32> to vector<16x32xf32>
    %379 = arith.addf %375, %378 : vector<16x32xf32>
    %c0_119 = arith.constant 0 : index
    %c0_120 = arith.constant 0 : index
    %c0_121 = arith.constant 0 : index
    %380 = vector.load %arg12[%c0_119, %c0_120, %c0_121] : memref<1x32x64xf32, #tpu.memory_space<vmem>>, vector<1x32x64xf32>
    %381 = vector.shape_cast %380 : vector<1x32x64xf32> to vector<32x64xf32>
    %cst_122 = arith.constant dense<0.000000e+00> : vector<16x64xf32>
    %382 = tpu.matmul %4, %381, %cst_122 {dimension_numbers = #tpu.dot_dimension_numbers<[1], [0], [0], [1], [0, 0, 1, 1], [], []>} : vector<16x32xf32>, vector<32x64xf32>, vector<16x64xf32> -> vector<16x64xf32>
    %c0_123 = arith.constant 0 : index
    %c0_124 = arith.constant 0 : index
    %c0_125 = arith.constant 0 : index
    %383 = vector.load %arg13[%c0_123, %c0_124, %c0_125] : memref<1x1x64xf32, #tpu.memory_space<vmem>>, vector<1x1x64xf32>
    %384 = vector.shape_cast %383 : vector<1x1x64xf32> to vector<1x64xf32>
    %385 = vector.broadcast %384 : vector<1x64xf32> to vector<16x64xf32>
    %386 = arith.addf %382, %385 : vector<16x64xf32>
    %387 = vector.extract_strided_slice %386 {offsets = [0, 0], sizes = [16, 32], strides = [1, 1]} : vector<16x64xf32> to vector<16x32xf32>
    %388 = vector.extract_strided_slice %386 {offsets = [0, 32], sizes = [16, 32], strides = [1, 1]} : vector<16x64xf32> to vector<16x32xf32>
    %389 = vector.extract_strided_slice %379 {offsets = [0, 0], sizes = [8, 32], strides = [1, 1]} : vector<16x32xf32> to vector<8x32xf32>
    %390 = vector.extract_strided_slice %387 {offsets = [0, 0], sizes = [8, 32], strides = [1, 1]} : vector<16x32xf32> to vector<8x32xf32>
    %391 = vector.extract_strided_slice %388 {offsets = [0, 0], sizes = [8, 32], strides = [1, 1]} : vector<16x32xf32> to vector<8x32xf32>
    %392 = vector.extract_strided_slice %389 {offsets = [0, 0], sizes = [8, 4], strides = [1, 1]} : vector<8x32xf32> to vector<8x4xf32>
    %393 = vector.extract_strided_slice %390 {offsets = [0, 0], sizes = [8, 4], strides = [1, 1]} : vector<8x32xf32> to vector<8x4xf32>
    %394 = vector.extract_strided_slice %391 {offsets = [0, 0], sizes = [8, 4], strides = [1, 1]} : vector<8x32xf32> to vector<8x4xf32>
    %395 = tpu.transpose %393, [1, 0] : vector<8x4xf32> -> vector<4x8xf32>
    %cst_126 = arith.constant dense<0.000000e+00> : vector<8x8xf32>
    %396 = tpu.matmul %392, %395, %cst_126 {dimension_numbers = #tpu.dot_dimension_numbers<[1], [0], [0], [1], [0, 0, 1, 1], [], []>} : vector<8x4xf32>, vector<4x8xf32>, vector<8x8xf32> -> vector<8x8xf32>
    %cst_127 = arith.constant 5.000000e-01 : f32
    %397 = vector.broadcast %cst_127 : f32 to vector<8x8xf32>
    %398 = arith.mulf %396, %397 : vector<8x8xf32>
    %cst_128 = arith.constant dense<0xFF800000> : vector<8xf32>
    %399 = vector.multi_reduction <maximumf>, %398, %cst_128 [1] : vector<8x8xf32> to vector<8xf32>
    %400 = vector.shape_cast %399 : vector<8xf32> to vector<8x1xf32>
    %401 = vector.broadcast %400 : vector<8x1xf32> to vector<8x8xf32>
    %402 = arith.subf %398, %401 : vector<8x8xf32>
    %403 = math.exp %402 : vector<8x8xf32>
    %cst_129 = arith.constant dense<0.000000e+00> : vector<8xf32>
    %404 = vector.multi_reduction <add>, %403, %cst_129 [1] : vector<8x8xf32> to vector<8xf32>
    %405 = vector.shape_cast %404 : vector<8xf32> to vector<8x1xf32>
    %406 = tpu.reciprocal %405 {approx = true} : vector<8x1xf32> -> vector<8x1xf32>
    %407 = vector.broadcast %406 : vector<8x1xf32> to vector<8x8xf32>
    %408 = arith.mulf %403, %407 : vector<8x8xf32>
    %cst_130 = arith.constant dense<0.000000e+00> : vector<8x4xf32>
    %409 = tpu.matmul %408, %394, %cst_130 {dimension_numbers = #tpu.dot_dimension_numbers<[1], [0], [0], [1], [0, 0, 1, 1], [], []>} : vector<8x8xf32>, vector<8x4xf32>, vector<8x4xf32> -> vector<8x4xf32>
    %410 = vector.extract_strided_slice %389 {offsets = [0, 4], sizes = [8, 4], strides = [1, 1]} : vector<8x32xf32> to vector<8x4xf32>
    %411 = vector.extract_strided_slice %390 {offsets = [0, 4], sizes = [8, 4], strides = [1, 1]} : vector<8x32xf32> to vector<8x4xf32>
    %412 = vector.extract_strided_slice %391 {offsets = [0, 4], sizes = [8, 4], strides = [1, 1]} : vector<8x32xf32> to vector<8x4xf32>
    %413 = tpu.transpose %411, [1, 0] : vector<8x4xf32> -> vector<4x8xf32>
    %cst_131 = arith.constant dense<0.000000e+00> : vector<8x8xf32>
    %414 = tpu.matmul %410, %413, %cst_131 {dimension_numbers = #tpu.dot_dimension_numbers<[1], [0], [0], [1], [0, 0, 1, 1], [], []>} : vector<8x4xf32>, vector<4x8xf32>, vector<8x8xf32> -> vector<8x8xf32>
    %cst_132 = arith.constant 5.000000e-01 : f32
    %415 = vector.broadcast %cst_132 : f32 to vector<8x8xf32>
    %416 = arith.mulf %414, %415 : vector<8x8xf32>
    %cst_133 = arith.constant dense<0xFF800000> : vector<8xf32>
    %417 = vector.multi_reduction <maximumf>, %416, %cst_133 [1] : vector<8x8xf32> to vector<8xf32>
    %418 = vector.shape_cast %417 : vector<8xf32> to vector<8x1xf32>
    %419 = vector.broadcast %418 : vector<8x1xf32> to vector<8x8xf32>
    %420 = arith.subf %416, %419 : vector<8x8xf32>
    %421 = math.exp %420 : vector<8x8xf32>
    %cst_134 = arith.constant dense<0.000000e+00> : vector<8xf32>
    %422 = vector.multi_reduction <add>, %421, %cst_134 [1] : vector<8x8xf32> to vector<8xf32>
    %423 = vector.shape_cast %422 : vector<8xf32> to vector<8x1xf32>
    %424 = tpu.reciprocal %423 {approx = true} : vector<8x1xf32> -> vector<8x1xf32>
    %425 = vector.broadcast %424 : vector<8x1xf32> to vector<8x8xf32>
    %426 = arith.mulf %421, %425 : vector<8x8xf32>
    %cst_135 = arith.constant dense<0.000000e+00> : vector<8x4xf32>
    %427 = tpu.matmul %426, %412, %cst_135 {dimension_numbers = #tpu.dot_dimension_numbers<[1], [0], [0], [1], [0, 0, 1, 1], [], []>} : vector<8x8xf32>, vector<8x4xf32>, vector<8x4xf32> -> vector<8x4xf32>
    %428 = vector.extract_strided_slice %389 {offsets = [0, 8], sizes = [8, 4], strides = [1, 1]} : vector<8x32xf32> to vector<8x4xf32>
    %429 = vector.extract_strided_slice %390 {offsets = [0, 8], sizes = [8, 4], strides = [1, 1]} : vector<8x32xf32> to vector<8x4xf32>
    %430 = vector.extract_strided_slice %391 {offsets = [0, 8], sizes = [8, 4], strides = [1, 1]} : vector<8x32xf32> to vector<8x4xf32>
    %431 = tpu.transpose %429, [1, 0] : vector<8x4xf32> -> vector<4x8xf32>
    %cst_136 = arith.constant dense<0.000000e+00> : vector<8x8xf32>
    %432 = tpu.matmul %428, %431, %cst_136 {dimension_numbers = #tpu.dot_dimension_numbers<[1], [0], [0], [1], [0, 0, 1, 1], [], []>} : vector<8x4xf32>, vector<4x8xf32>, vector<8x8xf32> -> vector<8x8xf32>
    %cst_137 = arith.constant 5.000000e-01 : f32
    %433 = vector.broadcast %cst_137 : f32 to vector<8x8xf32>
    %434 = arith.mulf %432, %433 : vector<8x8xf32>
    %cst_138 = arith.constant dense<0xFF800000> : vector<8xf32>
    %435 = vector.multi_reduction <maximumf>, %434, %cst_138 [1] : vector<8x8xf32> to vector<8xf32>
    %436 = vector.shape_cast %435 : vector<8xf32> to vector<8x1xf32>
    %437 = vector.broadcast %436 : vector<8x1xf32> to vector<8x8xf32>
    %438 = arith.subf %434, %437 : vector<8x8xf32>
    %439 = math.exp %438 : vector<8x8xf32>
    %cst_139 = arith.constant dense<0.000000e+00> : vector<8xf32>
    %440 = vector.multi_reduction <add>, %439, %cst_139 [1] : vector<8x8xf32> to vector<8xf32>
    %441 = vector.shape_cast %440 : vector<8xf32> to vector<8x1xf32>
    %442 = tpu.reciprocal %441 {approx = true} : vector<8x1xf32> -> vector<8x1xf32>
    %443 = vector.broadcast %442 : vector<8x1xf32> to vector<8x8xf32>
    %444 = arith.mulf %439, %443 : vector<8x8xf32>
    %cst_140 = arith.constant dense<0.000000e+00> : vector<8x4xf32>
    %445 = tpu.matmul %444, %430, %cst_140 {dimension_numbers = #tpu.dot_dimension_numbers<[1], [0], [0], [1], [0, 0, 1, 1], [], []>} : vector<8x8xf32>, vector<8x4xf32>, vector<8x4xf32> -> vector<8x4xf32>
    %446 = vector.extract_strided_slice %389 {offsets = [0, 12], sizes = [8, 4], strides = [1, 1]} : vector<8x32xf32> to vector<8x4xf32>
    %447 = vector.extract_strided_slice %390 {offsets = [0, 12], sizes = [8, 4], strides = [1, 1]} : vector<8x32xf32> to vector<8x4xf32>
    %448 = vector.extract_strided_slice %391 {offsets = [0, 12], sizes = [8, 4], strides = [1, 1]} : vector<8x32xf32> to vector<8x4xf32>
    %449 = tpu.transpose %447, [1, 0] : vector<8x4xf32> -> vector<4x8xf32>
    %cst_141 = arith.constant dense<0.000000e+00> : vector<8x8xf32>
    %450 = tpu.matmul %446, %449, %cst_141 {dimension_numbers = #tpu.dot_dimension_numbers<[1], [0], [0], [1], [0, 0, 1, 1], [], []>} : vector<8x4xf32>, vector<4x8xf32>, vector<8x8xf32> -> vector<8x8xf32>
    %cst_142 = arith.constant 5.000000e-01 : f32
    %451 = vector.broadcast %cst_142 : f32 to vector<8x8xf32>
    %452 = arith.mulf %450, %451 : vector<8x8xf32>
    %cst_143 = arith.constant dense<0xFF800000> : vector<8xf32>
    %453 = vector.multi_reduction <maximumf>, %452, %cst_143 [1] : vector<8x8xf32> to vector<8xf32>
    %454 = vector.shape_cast %453 : vector<8xf32> to vector<8x1xf32>
    %455 = vector.broadcast %454 : vector<8x1xf32> to vector<8x8xf32>
    %456 = arith.subf %452, %455 : vector<8x8xf32>
    %457 = math.exp %456 : vector<8x8xf32>
    %cst_144 = arith.constant dense<0.000000e+00> : vector<8xf32>
    %458 = vector.multi_reduction <add>, %457, %cst_144 [1] : vector<8x8xf32> to vector<8xf32>
    %459 = vector.shape_cast %458 : vector<8xf32> to vector<8x1xf32>
    %460 = tpu.reciprocal %459 {approx = true} : vector<8x1xf32> -> vector<8x1xf32>
    %461 = vector.broadcast %460 : vector<8x1xf32> to vector<8x8xf32>
    %462 = arith.mulf %457, %461 : vector<8x8xf32>
    %cst_145 = arith.constant dense<0.000000e+00> : vector<8x4xf32>
    %463 = tpu.matmul %462, %448, %cst_145 {dimension_numbers = #tpu.dot_dimension_numbers<[1], [0], [0], [1], [0, 0, 1, 1], [], []>} : vector<8x8xf32>, vector<8x4xf32>, vector<8x4xf32> -> vector<8x4xf32>
    %464 = vector.extract_strided_slice %389 {offsets = [0, 16], sizes = [8, 4], strides = [1, 1]} : vector<8x32xf32> to vector<8x4xf32>
    %465 = vector.extract_strided_slice %390 {offsets = [0, 16], sizes = [8, 4], strides = [1, 1]} : vector<8x32xf32> to vector<8x4xf32>
    %466 = vector.extract_strided_slice %391 {offsets = [0, 16], sizes = [8, 4], strides = [1, 1]} : vector<8x32xf32> to vector<8x4xf32>
    %467 = tpu.transpose %465, [1, 0] : vector<8x4xf32> -> vector<4x8xf32>
    %cst_146 = arith.constant dense<0.000000e+00> : vector<8x8xf32>
    %468 = tpu.matmul %464, %467, %cst_146 {dimension_numbers = #tpu.dot_dimension_numbers<[1], [0], [0], [1], [0, 0, 1, 1], [], []>} : vector<8x4xf32>, vector<4x8xf32>, vector<8x8xf32> -> vector<8x8xf32>
    %cst_147 = arith.constant 5.000000e-01 : f32
    %469 = vector.broadcast %cst_147 : f32 to vector<8x8xf32>
    %470 = arith.mulf %468, %469 : vector<8x8xf32>
    %cst_148 = arith.constant dense<0xFF800000> : vector<8xf32>
    %471 = vector.multi_reduction <maximumf>, %470, %cst_148 [1] : vector<8x8xf32> to vector<8xf32>
    %472 = vector.shape_cast %471 : vector<8xf32> to vector<8x1xf32>
    %473 = vector.broadcast %472 : vector<8x1xf32> to vector<8x8xf32>
    %474 = arith.subf %470, %473 : vector<8x8xf32>
    %475 = math.exp %474 : vector<8x8xf32>
    %cst_149 = arith.constant dense<0.000000e+00> : vector<8xf32>
    %476 = vector.multi_reduction <add>, %475, %cst_149 [1] : vector<8x8xf32> to vector<8xf32>
    %477 = vector.shape_cast %476 : vector<8xf32> to vector<8x1xf32>
    %478 = tpu.reciprocal %477 {approx = true} : vector<8x1xf32> -> vector<8x1xf32>
    %479 = vector.broadcast %478 : vector<8x1xf32> to vector<8x8xf32>
    %480 = arith.mulf %475, %479 : vector<8x8xf32>
    %cst_150 = arith.constant dense<0.000000e+00> : vector<8x4xf32>
    %481 = tpu.matmul %480, %466, %cst_150 {dimension_numbers = #tpu.dot_dimension_numbers<[1], [0], [0], [1], [0, 0, 1, 1], [], []>} : vector<8x8xf32>, vector<8x4xf32>, vector<8x4xf32> -> vector<8x4xf32>
    %482 = vector.extract_strided_slice %389 {offsets = [0, 20], sizes = [8, 4], strides = [1, 1]} : vector<8x32xf32> to vector<8x4xf32>
    %483 = vector.extract_strided_slice %390 {offsets = [0, 20], sizes = [8, 4], strides = [1, 1]} : vector<8x32xf32> to vector<8x4xf32>
    %484 = vector.extract_strided_slice %391 {offsets = [0, 20], sizes = [8, 4], strides = [1, 1]} : vector<8x32xf32> to vector<8x4xf32>
    %485 = tpu.transpose %483, [1, 0] : vector<8x4xf32> -> vector<4x8xf32>
    %cst_151 = arith.constant dense<0.000000e+00> : vector<8x8xf32>
    %486 = tpu.matmul %482, %485, %cst_151 {dimension_numbers = #tpu.dot_dimension_numbers<[1], [0], [0], [1], [0, 0, 1, 1], [], []>} : vector<8x4xf32>, vector<4x8xf32>, vector<8x8xf32> -> vector<8x8xf32>
    %cst_152 = arith.constant 5.000000e-01 : f32
    %487 = vector.broadcast %cst_152 : f32 to vector<8x8xf32>
    %488 = arith.mulf %486, %487 : vector<8x8xf32>
    %cst_153 = arith.constant dense<0xFF800000> : vector<8xf32>
    %489 = vector.multi_reduction <maximumf>, %488, %cst_153 [1] : vector<8x8xf32> to vector<8xf32>
    %490 = vector.shape_cast %489 : vector<8xf32> to vector<8x1xf32>
    %491 = vector.broadcast %490 : vector<8x1xf32> to vector<8x8xf32>
    %492 = arith.subf %488, %491 : vector<8x8xf32>
    %493 = math.exp %492 : vector<8x8xf32>
    %cst_154 = arith.constant dense<0.000000e+00> : vector<8xf32>
    %494 = vector.multi_reduction <add>, %493, %cst_154 [1] : vector<8x8xf32> to vector<8xf32>
    %495 = vector.shape_cast %494 : vector<8xf32> to vector<8x1xf32>
    %496 = tpu.reciprocal %495 {approx = true} : vector<8x1xf32> -> vector<8x1xf32>
    %497 = vector.broadcast %496 : vector<8x1xf32> to vector<8x8xf32>
    %498 = arith.mulf %493, %497 : vector<8x8xf32>
    %cst_155 = arith.constant dense<0.000000e+00> : vector<8x4xf32>
    %499 = tpu.matmul %498, %484, %cst_155 {dimension_numbers = #tpu.dot_dimension_numbers<[1], [0], [0], [1], [0, 0, 1, 1], [], []>} : vector<8x8xf32>, vector<8x4xf32>, vector<8x4xf32> -> vector<8x4xf32>
    %500 = vector.extract_strided_slice %389 {offsets = [0, 24], sizes = [8, 4], strides = [1, 1]} : vector<8x32xf32> to vector<8x4xf32>
    %501 = vector.extract_strided_slice %390 {offsets = [0, 24], sizes = [8, 4], strides = [1, 1]} : vector<8x32xf32> to vector<8x4xf32>
    %502 = vector.extract_strided_slice %391 {offsets = [0, 24], sizes = [8, 4], strides = [1, 1]} : vector<8x32xf32> to vector<8x4xf32>
    %503 = tpu.transpose %501, [1, 0] : vector<8x4xf32> -> vector<4x8xf32>
    %cst_156 = arith.constant dense<0.000000e+00> : vector<8x8xf32>
    %504 = tpu.matmul %500, %503, %cst_156 {dimension_numbers = #tpu.dot_dimension_numbers<[1], [0], [0], [1], [0, 0, 1, 1], [], []>} : vector<8x4xf32>, vector<4x8xf32>, vector<8x8xf32> -> vector<8x8xf32>
    %cst_157 = arith.constant 5.000000e-01 : f32
    %505 = vector.broadcast %cst_157 : f32 to vector<8x8xf32>
    %506 = arith.mulf %504, %505 : vector<8x8xf32>
    %cst_158 = arith.constant dense<0xFF800000> : vector<8xf32>
    %507 = vector.multi_reduction <maximumf>, %506, %cst_158 [1] : vector<8x8xf32> to vector<8xf32>
    %508 = vector.shape_cast %507 : vector<8xf32> to vector<8x1xf32>
    %509 = vector.broadcast %508 : vector<8x1xf32> to vector<8x8xf32>
    %510 = arith.subf %506, %509 : vector<8x8xf32>
    %511 = math.exp %510 : vector<8x8xf32>
    %cst_159 = arith.constant dense<0.000000e+00> : vector<8xf32>
    %512 = vector.multi_reduction <add>, %511, %cst_159 [1] : vector<8x8xf32> to vector<8xf32>
    %513 = vector.shape_cast %512 : vector<8xf32> to vector<8x1xf32>
    %514 = tpu.reciprocal %513 {approx = true} : vector<8x1xf32> -> vector<8x1xf32>
    %515 = vector.broadcast %514 : vector<8x1xf32> to vector<8x8xf32>
    %516 = arith.mulf %511, %515 : vector<8x8xf32>
    %cst_160 = arith.constant dense<0.000000e+00> : vector<8x4xf32>
    %517 = tpu.matmul %516, %502, %cst_160 {dimension_numbers = #tpu.dot_dimension_numbers<[1], [0], [0], [1], [0, 0, 1, 1], [], []>} : vector<8x8xf32>, vector<8x4xf32>, vector<8x4xf32> -> vector<8x4xf32>
    %518 = vector.extract_strided_slice %389 {offsets = [0, 28], sizes = [8, 4], strides = [1, 1]} : vector<8x32xf32> to vector<8x4xf32>
    %519 = vector.extract_strided_slice %390 {offsets = [0, 28], sizes = [8, 4], strides = [1, 1]} : vector<8x32xf32> to vector<8x4xf32>
    %520 = vector.extract_strided_slice %391 {offsets = [0, 28], sizes = [8, 4], strides = [1, 1]} : vector<8x32xf32> to vector<8x4xf32>
    %521 = tpu.transpose %519, [1, 0] : vector<8x4xf32> -> vector<4x8xf32>
    %cst_161 = arith.constant dense<0.000000e+00> : vector<8x8xf32>
    %522 = tpu.matmul %518, %521, %cst_161 {dimension_numbers = #tpu.dot_dimension_numbers<[1], [0], [0], [1], [0, 0, 1, 1], [], []>} : vector<8x4xf32>, vector<4x8xf32>, vector<8x8xf32> -> vector<8x8xf32>
    %cst_162 = arith.constant 5.000000e-01 : f32
    %523 = vector.broadcast %cst_162 : f32 to vector<8x8xf32>
    %524 = arith.mulf %522, %523 : vector<8x8xf32>
    %cst_163 = arith.constant dense<0xFF800000> : vector<8xf32>
    %525 = vector.multi_reduction <maximumf>, %524, %cst_163 [1] : vector<8x8xf32> to vector<8xf32>
    %526 = vector.shape_cast %525 : vector<8xf32> to vector<8x1xf32>
    %527 = vector.broadcast %526 : vector<8x1xf32> to vector<8x8xf32>
    %528 = arith.subf %524, %527 : vector<8x8xf32>
    %529 = math.exp %528 : vector<8x8xf32>
    %cst_164 = arith.constant dense<0.000000e+00> : vector<8xf32>
    %530 = vector.multi_reduction <add>, %529, %cst_164 [1] : vector<8x8xf32> to vector<8xf32>
    %531 = vector.shape_cast %530 : vector<8xf32> to vector<8x1xf32>
    %532 = tpu.reciprocal %531 {approx = true} : vector<8x1xf32> -> vector<8x1xf32>
    %533 = vector.broadcast %532 : vector<8x1xf32> to vector<8x8xf32>
    %534 = arith.mulf %529, %533 : vector<8x8xf32>
    %cst_165 = arith.constant dense<0.000000e+00> : vector<8x4xf32>
    %535 = tpu.matmul %534, %520, %cst_165 {dimension_numbers = #tpu.dot_dimension_numbers<[1], [0], [0], [1], [0, 0, 1, 1], [], []>} : vector<8x8xf32>, vector<8x4xf32>, vector<8x4xf32> -> vector<8x4xf32>
    %536 = tpu.concatenate %409, %427, %445, %463, %481, %499, %517, %535 in 1 : vector<8x4xf32>, vector<8x4xf32>, vector<8x4xf32>, vector<8x4xf32>, vector<8x4xf32>, vector<8x4xf32>, vector<8x4xf32>, vector<8x4xf32> -> vector<8x32xf32>
    %537 = vector.extract_strided_slice %379 {offsets = [8, 0], sizes = [8, 32], strides = [1, 1]} : vector<16x32xf32> to vector<8x32xf32>
    %538 = vector.extract_strided_slice %387 {offsets = [8, 0], sizes = [8, 32], strides = [1, 1]} : vector<16x32xf32> to vector<8x32xf32>
    %539 = vector.extract_strided_slice %388 {offsets = [8, 0], sizes = [8, 32], strides = [1, 1]} : vector<16x32xf32> to vector<8x32xf32>
    %540 = vector.extract_strided_slice %537 {offsets = [0, 0], sizes = [8, 4], strides = [1, 1]} : vector<8x32xf32> to vector<8x4xf32>
    %541 = vector.extract_strided_slice %538 {offsets = [0, 0], sizes = [8, 4], strides = [1, 1]} : vector<8x32xf32> to vector<8x4xf32>
    %542 = vector.extract_strided_slice %539 {offsets = [0, 0], sizes = [8, 4], strides = [1, 1]} : vector<8x32xf32> to vector<8x4xf32>
    %543 = tpu.transpose %541, [1, 0] : vector<8x4xf32> -> vector<4x8xf32>
    %cst_166 = arith.constant dense<0.000000e+00> : vector<8x8xf32>
    %544 = tpu.matmul %540, %543, %cst_166 {dimension_numbers = #tpu.dot_dimension_numbers<[1], [0], [0], [1], [0, 0, 1, 1], [], []>} : vector<8x4xf32>, vector<4x8xf32>, vector<8x8xf32> -> vector<8x8xf32>
    %cst_167 = arith.constant 5.000000e-01 : f32
    %545 = vector.broadcast %cst_167 : f32 to vector<8x8xf32>
    %546 = arith.mulf %544, %545 : vector<8x8xf32>
    %cst_168 = arith.constant dense<0xFF800000> : vector<8xf32>
    %547 = vector.multi_reduction <maximumf>, %546, %cst_168 [1] : vector<8x8xf32> to vector<8xf32>
    %548 = vector.shape_cast %547 : vector<8xf32> to vector<8x1xf32>
    %549 = vector.broadcast %548 : vector<8x1xf32> to vector<8x8xf32>
    %550 = arith.subf %546, %549 : vector<8x8xf32>
    %551 = math.exp %550 : vector<8x8xf32>
    %cst_169 = arith.constant dense<0.000000e+00> : vector<8xf32>
    %552 = vector.multi_reduction <add>, %551, %cst_169 [1] : vector<8x8xf32> to vector<8xf32>
    %553 = vector.shape_cast %552 : vector<8xf32> to vector<8x1xf32>
    %554 = tpu.reciprocal %553 {approx = true} : vector<8x1xf32> -> vector<8x1xf32>
    %555 = vector.broadcast %554 : vector<8x1xf32> to vector<8x8xf32>
    %556 = arith.mulf %551, %555 : vector<8x8xf32>
    %cst_170 = arith.constant dense<0.000000e+00> : vector<8x4xf32>
    %557 = tpu.matmul %556, %542, %cst_170 {dimension_numbers = #tpu.dot_dimension_numbers<[1], [0], [0], [1], [0, 0, 1, 1], [], []>} : vector<8x8xf32>, vector<8x4xf32>, vector<8x4xf32> -> vector<8x4xf32>
    %558 = vector.extract_strided_slice %537 {offsets = [0, 4], sizes = [8, 4], strides = [1, 1]} : vector<8x32xf32> to vector<8x4xf32>
    %559 = vector.extract_strided_slice %538 {offsets = [0, 4], sizes = [8, 4], strides = [1, 1]} : vector<8x32xf32> to vector<8x4xf32>
    %560 = vector.extract_strided_slice %539 {offsets = [0, 4], sizes = [8, 4], strides = [1, 1]} : vector<8x32xf32> to vector<8x4xf32>
    %561 = tpu.transpose %559, [1, 0] : vector<8x4xf32> -> vector<4x8xf32>
    %cst_171 = arith.constant dense<0.000000e+00> : vector<8x8xf32>
    %562 = tpu.matmul %558, %561, %cst_171 {dimension_numbers = #tpu.dot_dimension_numbers<[1], [0], [0], [1], [0, 0, 1, 1], [], []>} : vector<8x4xf32>, vector<4x8xf32>, vector<8x8xf32> -> vector<8x8xf32>
    %cst_172 = arith.constant 5.000000e-01 : f32
    %563 = vector.broadcast %cst_172 : f32 to vector<8x8xf32>
    %564 = arith.mulf %562, %563 : vector<8x8xf32>
    %cst_173 = arith.constant dense<0xFF800000> : vector<8xf32>
    %565 = vector.multi_reduction <maximumf>, %564, %cst_173 [1] : vector<8x8xf32> to vector<8xf32>
    %566 = vector.shape_cast %565 : vector<8xf32> to vector<8x1xf32>
    %567 = vector.broadcast %566 : vector<8x1xf32> to vector<8x8xf32>
    %568 = arith.subf %564, %567 : vector<8x8xf32>
    %569 = math.exp %568 : vector<8x8xf32>
    %cst_174 = arith.constant dense<0.000000e+00> : vector<8xf32>
    %570 = vector.multi_reduction <add>, %569, %cst_174 [1] : vector<8x8xf32> to vector<8xf32>
    %571 = vector.shape_cast %570 : vector<8xf32> to vector<8x1xf32>
    %572 = tpu.reciprocal %571 {approx = true} : vector<8x1xf32> -> vector<8x1xf32>
    %573 = vector.broadcast %572 : vector<8x1xf32> to vector<8x8xf32>
    %574 = arith.mulf %569, %573 : vector<8x8xf32>
    %cst_175 = arith.constant dense<0.000000e+00> : vector<8x4xf32>
    %575 = tpu.matmul %574, %560, %cst_175 {dimension_numbers = #tpu.dot_dimension_numbers<[1], [0], [0], [1], [0, 0, 1, 1], [], []>} : vector<8x8xf32>, vector<8x4xf32>, vector<8x4xf32> -> vector<8x4xf32>
    %576 = vector.extract_strided_slice %537 {offsets = [0, 8], sizes = [8, 4], strides = [1, 1]} : vector<8x32xf32> to vector<8x4xf32>
    %577 = vector.extract_strided_slice %538 {offsets = [0, 8], sizes = [8, 4], strides = [1, 1]} : vector<8x32xf32> to vector<8x4xf32>
    %578 = vector.extract_strided_slice %539 {offsets = [0, 8], sizes = [8, 4], strides = [1, 1]} : vector<8x32xf32> to vector<8x4xf32>
    %579 = tpu.transpose %577, [1, 0] : vector<8x4xf32> -> vector<4x8xf32>
    %cst_176 = arith.constant dense<0.000000e+00> : vector<8x8xf32>
    %580 = tpu.matmul %576, %579, %cst_176 {dimension_numbers = #tpu.dot_dimension_numbers<[1], [0], [0], [1], [0, 0, 1, 1], [], []>} : vector<8x4xf32>, vector<4x8xf32>, vector<8x8xf32> -> vector<8x8xf32>
    %cst_177 = arith.constant 5.000000e-01 : f32
    %581 = vector.broadcast %cst_177 : f32 to vector<8x8xf32>
    %582 = arith.mulf %580, %581 : vector<8x8xf32>
    %cst_178 = arith.constant dense<0xFF800000> : vector<8xf32>
    %583 = vector.multi_reduction <maximumf>, %582, %cst_178 [1] : vector<8x8xf32> to vector<8xf32>
    %584 = vector.shape_cast %583 : vector<8xf32> to vector<8x1xf32>
    %585 = vector.broadcast %584 : vector<8x1xf32> to vector<8x8xf32>
    %586 = arith.subf %582, %585 : vector<8x8xf32>
    %587 = math.exp %586 : vector<8x8xf32>
    %cst_179 = arith.constant dense<0.000000e+00> : vector<8xf32>
    %588 = vector.multi_reduction <add>, %587, %cst_179 [1] : vector<8x8xf32> to vector<8xf32>
    %589 = vector.shape_cast %588 : vector<8xf32> to vector<8x1xf32>
    %590 = tpu.reciprocal %589 {approx = true} : vector<8x1xf32> -> vector<8x1xf32>
    %591 = vector.broadcast %590 : vector<8x1xf32> to vector<8x8xf32>
    %592 = arith.mulf %587, %591 : vector<8x8xf32>
    %cst_180 = arith.constant dense<0.000000e+00> : vector<8x4xf32>
    %593 = tpu.matmul %592, %578, %cst_180 {dimension_numbers = #tpu.dot_dimension_numbers<[1], [0], [0], [1], [0, 0, 1, 1], [], []>} : vector<8x8xf32>, vector<8x4xf32>, vector<8x4xf32> -> vector<8x4xf32>
    %594 = vector.extract_strided_slice %537 {offsets = [0, 12], sizes = [8, 4], strides = [1, 1]} : vector<8x32xf32> to vector<8x4xf32>
    %595 = vector.extract_strided_slice %538 {offsets = [0, 12], sizes = [8, 4], strides = [1, 1]} : vector<8x32xf32> to vector<8x4xf32>
    %596 = vector.extract_strided_slice %539 {offsets = [0, 12], sizes = [8, 4], strides = [1, 1]} : vector<8x32xf32> to vector<8x4xf32>
    %597 = tpu.transpose %595, [1, 0] : vector<8x4xf32> -> vector<4x8xf32>
    %cst_181 = arith.constant dense<0.000000e+00> : vector<8x8xf32>
    %598 = tpu.matmul %594, %597, %cst_181 {dimension_numbers = #tpu.dot_dimension_numbers<[1], [0], [0], [1], [0, 0, 1, 1], [], []>} : vector<8x4xf32>, vector<4x8xf32>, vector<8x8xf32> -> vector<8x8xf32>
    %cst_182 = arith.constant 5.000000e-01 : f32
    %599 = vector.broadcast %cst_182 : f32 to vector<8x8xf32>
    %600 = arith.mulf %598, %599 : vector<8x8xf32>
    %cst_183 = arith.constant dense<0xFF800000> : vector<8xf32>
    %601 = vector.multi_reduction <maximumf>, %600, %cst_183 [1] : vector<8x8xf32> to vector<8xf32>
    %602 = vector.shape_cast %601 : vector<8xf32> to vector<8x1xf32>
    %603 = vector.broadcast %602 : vector<8x1xf32> to vector<8x8xf32>
    %604 = arith.subf %600, %603 : vector<8x8xf32>
    %605 = math.exp %604 : vector<8x8xf32>
    %cst_184 = arith.constant dense<0.000000e+00> : vector<8xf32>
    %606 = vector.multi_reduction <add>, %605, %cst_184 [1] : vector<8x8xf32> to vector<8xf32>
    %607 = vector.shape_cast %606 : vector<8xf32> to vector<8x1xf32>
    %608 = tpu.reciprocal %607 {approx = true} : vector<8x1xf32> -> vector<8x1xf32>
    %609 = vector.broadcast %608 : vector<8x1xf32> to vector<8x8xf32>
    %610 = arith.mulf %605, %609 : vector<8x8xf32>
    %cst_185 = arith.constant dense<0.000000e+00> : vector<8x4xf32>
    %611 = tpu.matmul %610, %596, %cst_185 {dimension_numbers = #tpu.dot_dimension_numbers<[1], [0], [0], [1], [0, 0, 1, 1], [], []>} : vector<8x8xf32>, vector<8x4xf32>, vector<8x4xf32> -> vector<8x4xf32>
    %612 = vector.extract_strided_slice %537 {offsets = [0, 16], sizes = [8, 4], strides = [1, 1]} : vector<8x32xf32> to vector<8x4xf32>
    %613 = vector.extract_strided_slice %538 {offsets = [0, 16], sizes = [8, 4], strides = [1, 1]} : vector<8x32xf32> to vector<8x4xf32>
    %614 = vector.extract_strided_slice %539 {offsets = [0, 16], sizes = [8, 4], strides = [1, 1]} : vector<8x32xf32> to vector<8x4xf32>
    %615 = tpu.transpose %613, [1, 0] : vector<8x4xf32> -> vector<4x8xf32>
    %cst_186 = arith.constant dense<0.000000e+00> : vector<8x8xf32>
    %616 = tpu.matmul %612, %615, %cst_186 {dimension_numbers = #tpu.dot_dimension_numbers<[1], [0], [0], [1], [0, 0, 1, 1], [], []>} : vector<8x4xf32>, vector<4x8xf32>, vector<8x8xf32> -> vector<8x8xf32>
    %cst_187 = arith.constant 5.000000e-01 : f32
    %617 = vector.broadcast %cst_187 : f32 to vector<8x8xf32>
    %618 = arith.mulf %616, %617 : vector<8x8xf32>
    %cst_188 = arith.constant dense<0xFF800000> : vector<8xf32>
    %619 = vector.multi_reduction <maximumf>, %618, %cst_188 [1] : vector<8x8xf32> to vector<8xf32>
    %620 = vector.shape_cast %619 : vector<8xf32> to vector<8x1xf32>
    %621 = vector.broadcast %620 : vector<8x1xf32> to vector<8x8xf32>
    %622 = arith.subf %618, %621 : vector<8x8xf32>
    %623 = math.exp %622 : vector<8x8xf32>
    %cst_189 = arith.constant dense<0.000000e+00> : vector<8xf32>
    %624 = vector.multi_reduction <add>, %623, %cst_189 [1] : vector<8x8xf32> to vector<8xf32>
    %625 = vector.shape_cast %624 : vector<8xf32> to vector<8x1xf32>
    %626 = tpu.reciprocal %625 {approx = true} : vector<8x1xf32> -> vector<8x1xf32>
    %627 = vector.broadcast %626 : vector<8x1xf32> to vector<8x8xf32>
    %628 = arith.mulf %623, %627 : vector<8x8xf32>
    %cst_190 = arith.constant dense<0.000000e+00> : vector<8x4xf32>
    %629 = tpu.matmul %628, %614, %cst_190 {dimension_numbers = #tpu.dot_dimension_numbers<[1], [0], [0], [1], [0, 0, 1, 1], [], []>} : vector<8x8xf32>, vector<8x4xf32>, vector<8x4xf32> -> vector<8x4xf32>
    %630 = vector.extract_strided_slice %537 {offsets = [0, 20], sizes = [8, 4], strides = [1, 1]} : vector<8x32xf32> to vector<8x4xf32>
    %631 = vector.extract_strided_slice %538 {offsets = [0, 20], sizes = [8, 4], strides = [1, 1]} : vector<8x32xf32> to vector<8x4xf32>
    %632 = vector.extract_strided_slice %539 {offsets = [0, 20], sizes = [8, 4], strides = [1, 1]} : vector<8x32xf32> to vector<8x4xf32>
    %633 = tpu.transpose %631, [1, 0] : vector<8x4xf32> -> vector<4x8xf32>
    %cst_191 = arith.constant dense<0.000000e+00> : vector<8x8xf32>
    %634 = tpu.matmul %630, %633, %cst_191 {dimension_numbers = #tpu.dot_dimension_numbers<[1], [0], [0], [1], [0, 0, 1, 1], [], []>} : vector<8x4xf32>, vector<4x8xf32>, vector<8x8xf32> -> vector<8x8xf32>
    %cst_192 = arith.constant 5.000000e-01 : f32
    %635 = vector.broadcast %cst_192 : f32 to vector<8x8xf32>
    %636 = arith.mulf %634, %635 : vector<8x8xf32>
    %cst_193 = arith.constant dense<0xFF800000> : vector<8xf32>
    %637 = vector.multi_reduction <maximumf>, %636, %cst_193 [1] : vector<8x8xf32> to vector<8xf32>
    %638 = vector.shape_cast %637 : vector<8xf32> to vector<8x1xf32>
    %639 = vector.broadcast %638 : vector<8x1xf32> to vector<8x8xf32>
    %640 = arith.subf %636, %639 : vector<8x8xf32>
    %641 = math.exp %640 : vector<8x8xf32>
    %cst_194 = arith.constant dense<0.000000e+00> : vector<8xf32>
    %642 = vector.multi_reduction <add>, %641, %cst_194 [1] : vector<8x8xf32> to vector<8xf32>
    %643 = vector.shape_cast %642 : vector<8xf32> to vector<8x1xf32>
    %644 = tpu.reciprocal %643 {approx = true} : vector<8x1xf32> -> vector<8x1xf32>
    %645 = vector.broadcast %644 : vector<8x1xf32> to vector<8x8xf32>
    %646 = arith.mulf %641, %645 : vector<8x8xf32>
    %cst_195 = arith.constant dense<0.000000e+00> : vector<8x4xf32>
    %647 = tpu.matmul %646, %632, %cst_195 {dimension_numbers = #tpu.dot_dimension_numbers<[1], [0], [0], [1], [0, 0, 1, 1], [], []>} : vector<8x8xf32>, vector<8x4xf32>, vector<8x4xf32> -> vector<8x4xf32>
    %648 = vector.extract_strided_slice %537 {offsets = [0, 24], sizes = [8, 4], strides = [1, 1]} : vector<8x32xf32> to vector<8x4xf32>
    %649 = vector.extract_strided_slice %538 {offsets = [0, 24], sizes = [8, 4], strides = [1, 1]} : vector<8x32xf32> to vector<8x4xf32>
    %650 = vector.extract_strided_slice %539 {offsets = [0, 24], sizes = [8, 4], strides = [1, 1]} : vector<8x32xf32> to vector<8x4xf32>
    %651 = tpu.transpose %649, [1, 0] : vector<8x4xf32> -> vector<4x8xf32>
    %cst_196 = arith.constant dense<0.000000e+00> : vector<8x8xf32>
    %652 = tpu.matmul %648, %651, %cst_196 {dimension_numbers = #tpu.dot_dimension_numbers<[1], [0], [0], [1], [0, 0, 1, 1], [], []>} : vector<8x4xf32>, vector<4x8xf32>, vector<8x8xf32> -> vector<8x8xf32>
    %cst_197 = arith.constant 5.000000e-01 : f32
    %653 = vector.broadcast %cst_197 : f32 to vector<8x8xf32>
    %654 = arith.mulf %652, %653 : vector<8x8xf32>
    %cst_198 = arith.constant dense<0xFF800000> : vector<8xf32>
    %655 = vector.multi_reduction <maximumf>, %654, %cst_198 [1] : vector<8x8xf32> to vector<8xf32>
    %656 = vector.shape_cast %655 : vector<8xf32> to vector<8x1xf32>
    %657 = vector.broadcast %656 : vector<8x1xf32> to vector<8x8xf32>
    %658 = arith.subf %654, %657 : vector<8x8xf32>
    %659 = math.exp %658 : vector<8x8xf32>
    %cst_199 = arith.constant dense<0.000000e+00> : vector<8xf32>
    %660 = vector.multi_reduction <add>, %659, %cst_199 [1] : vector<8x8xf32> to vector<8xf32>
    %661 = vector.shape_cast %660 : vector<8xf32> to vector<8x1xf32>
    %662 = tpu.reciprocal %661 {approx = true} : vector<8x1xf32> -> vector<8x1xf32>
    %663 = vector.broadcast %662 : vector<8x1xf32> to vector<8x8xf32>
    %664 = arith.mulf %659, %663 : vector<8x8xf32>
    %cst_200 = arith.constant dense<0.000000e+00> : vector<8x4xf32>
    %665 = tpu.matmul %664, %650, %cst_200 {dimension_numbers = #tpu.dot_dimension_numbers<[1], [0], [0], [1], [0, 0, 1, 1], [], []>} : vector<8x8xf32>, vector<8x4xf32>, vector<8x4xf32> -> vector<8x4xf32>
    %666 = vector.extract_strided_slice %537 {offsets = [0, 28], sizes = [8, 4], strides = [1, 1]} : vector<8x32xf32> to vector<8x4xf32>
    %667 = vector.extract_strided_slice %538 {offsets = [0, 28], sizes = [8, 4], strides = [1, 1]} : vector<8x32xf32> to vector<8x4xf32>
    %668 = vector.extract_strided_slice %539 {offsets = [0, 28], sizes = [8, 4], strides = [1, 1]} : vector<8x32xf32> to vector<8x4xf32>
    %669 = tpu.transpose %667, [1, 0] : vector<8x4xf32> -> vector<4x8xf32>
    %cst_201 = arith.constant dense<0.000000e+00> : vector<8x8xf32>
    %670 = tpu.matmul %666, %669, %cst_201 {dimension_numbers = #tpu.dot_dimension_numbers<[1], [0], [0], [1], [0, 0, 1, 1], [], []>} : vector<8x4xf32>, vector<4x8xf32>, vector<8x8xf32> -> vector<8x8xf32>
    %cst_202 = arith.constant 5.000000e-01 : f32
    %671 = vector.broadcast %cst_202 : f32 to vector<8x8xf32>
    %672 = arith.mulf %670, %671 : vector<8x8xf32>
    %cst_203 = arith.constant dense<0xFF800000> : vector<8xf32>
    %673 = vector.multi_reduction <maximumf>, %672, %cst_203 [1] : vector<8x8xf32> to vector<8xf32>
    %674 = vector.shape_cast %673 : vector<8xf32> to vector<8x1xf32>
    %675 = vector.broadcast %674 : vector<8x1xf32> to vector<8x8xf32>
    %676 = arith.subf %672, %675 : vector<8x8xf32>
    %677 = math.exp %676 : vector<8x8xf32>
    %cst_204 = arith.constant dense<0.000000e+00> : vector<8xf32>
    %678 = vector.multi_reduction <add>, %677, %cst_204 [1] : vector<8x8xf32> to vector<8xf32>
    %679 = vector.shape_cast %678 : vector<8xf32> to vector<8x1xf32>
    %680 = tpu.reciprocal %679 {approx = true} : vector<8x1xf32> -> vector<8x1xf32>
    %681 = vector.broadcast %680 : vector<8x1xf32> to vector<8x8xf32>
    %682 = arith.mulf %677, %681 : vector<8x8xf32>
    %cst_205 = arith.constant dense<0.000000e+00> : vector<8x4xf32>
    %683 = tpu.matmul %682, %668, %cst_205 {dimension_numbers = #tpu.dot_dimension_numbers<[1], [0], [0], [1], [0, 0, 1, 1], [], []>} : vector<8x8xf32>, vector<8x4xf32>, vector<8x4xf32> -> vector<8x4xf32>
    %684 = tpu.concatenate %557, %575, %593, %611, %629, %647, %665, %683 in 1 : vector<8x4xf32>, vector<8x4xf32>, vector<8x4xf32>, vector<8x4xf32>, vector<8x4xf32>, vector<8x4xf32>, vector<8x4xf32>, vector<8x4xf32> -> vector<8x32xf32>
    %685 = tpu.concatenate %536, %684 in 0 : vector<8x32xf32>, vector<8x32xf32> -> vector<16x32xf32>
    %c0_206 = arith.constant 0 : index
    %c0_207 = arith.constant 0 : index
    %c0_208 = arith.constant 0 : index
    %686 = vector.load %arg14[%c0_206, %c0_207, %c0_208] : memref<1x32x32xf32, #tpu.memory_space<vmem>>, vector<1x32x32xf32>
    %687 = vector.shape_cast %686 : vector<1x32x32xf32> to vector<32x32xf32>
    %cst_209 = arith.constant dense<0.000000e+00> : vector<16x32xf32>
    %688 = tpu.matmul %685, %687, %cst_209 {dimension_numbers = #tpu.dot_dimension_numbers<[1], [0], [0], [1], [0, 0, 1, 1], [], []>} : vector<16x32xf32>, vector<32x32xf32>, vector<16x32xf32> -> vector<16x32xf32>
    %c0_210 = arith.constant 0 : index
    %c0_211 = arith.constant 0 : index
    %c0_212 = arith.constant 0 : index
    %689 = vector.load %arg15[%c0_210, %c0_211, %c0_212] : memref<1x1x32xf32, #tpu.memory_space<vmem>>, vector<1x1x32xf32>
    %690 = vector.shape_cast %689 : vector<1x1x32xf32> to vector<1x32xf32>
    %691 = vector.broadcast %690 : vector<1x32xf32> to vector<16x32xf32>
    %692 = arith.addf %688, %691 : vector<16x32xf32>
    %693 = arith.addf %372, %692 : vector<16x32xf32>
    %c0_213 = arith.constant 0 : index
    %c0_214 = arith.constant 0 : index
    %c0_215 = arith.constant 0 : index
    %694 = vector.load %arg16[%c0_213, %c0_214, %c0_215] : memref<1x1x32xf32, #tpu.memory_space<vmem>>, vector<1x1x32xf32>
    %695 = vector.shape_cast %694 : vector<1x1x32xf32> to vector<1x32xf32>
    %c0_216 = arith.constant 0 : index
    %c0_217 = arith.constant 0 : index
    %c0_218 = arith.constant 0 : index
    %696 = vector.load %arg17[%c0_216, %c0_217, %c0_218] : memref<1x1x32xf32, #tpu.memory_space<vmem>>, vector<1x1x32xf32>
    %697 = vector.shape_cast %696 : vector<1x1x32xf32> to vector<1x32xf32>
    %cst_219 = arith.constant dense<0.000000e+00> : vector<16xf32>
    %698 = vector.multi_reduction <add>, %693, %cst_219 [1] : vector<16x32xf32> to vector<16xf32>
    %699 = vector.shape_cast %698 : vector<16xf32> to vector<16x1xf32>
    %cst_220 = arith.constant 3.200000e+01 : f32
    %700 = vector.broadcast %cst_220 : f32 to vector<16x1xf32>
    %701 = arith.divf %699, %700 : vector<16x1xf32>
    %702 = vector.broadcast %701 : vector<16x1xf32> to vector<16x32xf32>
    %703 = arith.subf %693, %702 : vector<16x32xf32>
    %704 = arith.mulf %703, %703 : vector<16x32xf32>
    %cst_221 = arith.constant dense<0.000000e+00> : vector<16xf32>
    %705 = vector.multi_reduction <add>, %704, %cst_221 [1] : vector<16x32xf32> to vector<16xf32>
    %706 = vector.shape_cast %705 : vector<16xf32> to vector<16x1xf32>
    %cst_222 = arith.constant 3.200000e+01 : f32
    %707 = vector.broadcast %cst_222 : f32 to vector<16x1xf32>
    %708 = arith.divf %706, %707 : vector<16x1xf32>
    %cst_223 = arith.constant 9.99999974E-6 : f32
    %709 = vector.broadcast %cst_223 : f32 to vector<16x1xf32>
    %710 = arith.addf %708, %709 : vector<16x1xf32>
    %711 = math.rsqrt %710 : vector<16x1xf32>
    %712 = vector.broadcast %711 : vector<16x1xf32> to vector<16x32xf32>
    %713 = arith.mulf %703, %712 : vector<16x32xf32>
    %714 = vector.broadcast %695 : vector<1x32xf32> to vector<16x32xf32>
    %715 = arith.mulf %713, %714 : vector<16x32xf32>
    %716 = vector.broadcast %697 : vector<1x32xf32> to vector<16x32xf32>
    %717 = arith.addf %715, %716 : vector<16x32xf32>
    %c0_224 = arith.constant 0 : index
    %c0_225 = arith.constant 0 : index
    %c0_226 = arith.constant 0 : index
    %718 = vector.load %arg18[%c0_224, %c0_225, %c0_226] : memref<1x32x2048xbf16, #tpu.memory_space<vmem>>, vector<1x32x2048xbf16>
    %719 = vector.shape_cast %718 : vector<1x32x2048xbf16> to vector<32x2048xbf16>
    %c0_227 = arith.constant 0 : index
    %c0_228 = arith.constant 0 : index
    %c0_229 = arith.constant 0 : index
    %720 = vector.load %arg19[%c0_227, %c0_228, %c0_229] : memref<1x1x2048xf32, #tpu.memory_space<vmem>>, vector<1x1x2048xf32>
    %721 = vector.shape_cast %720 : vector<1x1x2048xf32> to vector<1x2048xf32>
    %c0_230 = arith.constant 0 : index
    %c0_231 = arith.constant 0 : index
    %c0_232 = arith.constant 0 : index
    %722 = vector.load %arg20[%c0_230, %c0_231, %c0_232] : memref<1x2048x32xbf16, #tpu.memory_space<vmem>>, vector<1x2048x32xbf16>
    %723 = vector.shape_cast %722 : vector<1x2048x32xbf16> to vector<2048x32xbf16>
    %c0_233 = arith.constant 0 : index
    %c0_234 = arith.constant 0 : index
    %c0_235 = arith.constant 0 : index
    %724 = vector.load %arg21[%c0_233, %c0_234, %c0_235] : memref<1x1x32xf32, #tpu.memory_space<vmem>>, vector<1x1x32xf32>
    %725 = vector.shape_cast %724 : vector<1x1x32xf32> to vector<1x32xf32>
    %726 = arith.truncf %717 : vector<16x32xf32> to vector<16x32xbf16>
    %cst_236 = arith.constant dense<0.000000e+00> : vector<16x2048xf32>
    %727 = tpu.matmul %726, %719, %cst_236 {dimension_numbers = #tpu.dot_dimension_numbers<[1], [0], [0], [1], [0, 0, 1, 1], [], []>} : vector<16x32xbf16>, vector<32x2048xbf16>, vector<16x2048xf32> -> vector<16x2048xf32>
    %728 = vector.broadcast %721 : vector<1x2048xf32> to vector<16x2048xf32>
    %729 = arith.addf %727, %728 : vector<16x2048xf32>
    %cst_237 = arith.constant 0.000000e+00 : f32
    %730 = vector.broadcast %cst_237 : f32 to vector<16x2048xf32>
    %731 = arith.maximumf %729, %730 : vector<16x2048xf32>
    %732 = arith.truncf %731 : vector<16x2048xf32> to vector<16x2048xbf16>
    %cst_238 = arith.constant dense<0.000000e+00> : vector<16x32xf32>
    %733 = tpu.matmul %732, %723, %cst_238 {dimension_numbers = #tpu.dot_dimension_numbers<[1], [0], [0], [1], [0, 0, 1, 1], [], []>} : vector<16x2048xbf16>, vector<2048x32xbf16>, vector<16x32xf32> -> vector<16x32xf32>
    %734 = vector.broadcast %725 : vector<1x32xf32> to vector<16x32xf32>
    %735 = arith.addf %733, %734 : vector<16x32xf32>
    %736 = arith.addf %717, %735 : vector<16x32xf32>
    %c0_239 = arith.constant 0 : index
    %c0_240 = arith.constant 0 : index
    %c0_241 = arith.constant 0 : index
    %737 = vector.load %arg22[%c0_239, %c0_240, %c0_241] : memref<1x1x32xf32, #tpu.memory_space<vmem>>, vector<1x1x32xf32>
    %738 = vector.shape_cast %737 : vector<1x1x32xf32> to vector<1x32xf32>
    %c0_242 = arith.constant 0 : index
    %c0_243 = arith.constant 0 : index
    %c0_244 = arith.constant 0 : index
    %739 = vector.load %arg23[%c0_242, %c0_243, %c0_244] : memref<1x1x32xf32, #tpu.memory_space<vmem>>, vector<1x1x32xf32>
    %740 = vector.shape_cast %739 : vector<1x1x32xf32> to vector<1x32xf32>
    %cst_245 = arith.constant dense<0.000000e+00> : vector<16xf32>
    %741 = vector.multi_reduction <add>, %736, %cst_245 [1] : vector<16x32xf32> to vector<16xf32>
    %742 = vector.shape_cast %741 : vector<16xf32> to vector<16x1xf32>
    %cst_246 = arith.constant 3.200000e+01 : f32
    %743 = vector.broadcast %cst_246 : f32 to vector<16x1xf32>
    %744 = arith.divf %742, %743 : vector<16x1xf32>
    %745 = vector.broadcast %744 : vector<16x1xf32> to vector<16x32xf32>
    %746 = arith.subf %736, %745 : vector<16x32xf32>
    %747 = arith.mulf %746, %746 : vector<16x32xf32>
    %cst_247 = arith.constant dense<0.000000e+00> : vector<16xf32>
    %748 = vector.multi_reduction <add>, %747, %cst_247 [1] : vector<16x32xf32> to vector<16xf32>
    %749 = vector.shape_cast %748 : vector<16xf32> to vector<16x1xf32>
    %cst_248 = arith.constant 3.200000e+01 : f32
    %750 = vector.broadcast %cst_248 : f32 to vector<16x1xf32>
    %751 = arith.divf %749, %750 : vector<16x1xf32>
    %cst_249 = arith.constant 9.99999974E-6 : f32
    %752 = vector.broadcast %cst_249 : f32 to vector<16x1xf32>
    %753 = arith.addf %751, %752 : vector<16x1xf32>
    %754 = math.rsqrt %753 : vector<16x1xf32>
    %755 = vector.broadcast %754 : vector<16x1xf32> to vector<16x32xf32>
    %756 = arith.mulf %746, %755 : vector<16x32xf32>
    %757 = vector.broadcast %738 : vector<1x32xf32> to vector<16x32xf32>
    %758 = arith.mulf %756, %757 : vector<16x32xf32>
    %759 = vector.broadcast %740 : vector<1x32xf32> to vector<16x32xf32>
    %760 = arith.addf %758, %759 : vector<16x32xf32>
    %c0_250 = arith.constant 0 : index
    %c0_251 = arith.constant 0 : index
    %761 = vector.load %arg27[%c0_250, %c0_251] : memref<16x32xf32, #tpu.memory_space<vmem>>, vector<16x32xf32>
    tpu.vector_store %arg27[%c0_250, %c0_251], %760 {strides = array<i32>} : memref<16x32xf32, #tpu.memory_space<vmem>>, vector<16x32xf32>,
    %c5_i32 = arith.constant 5 : i32
    %762 = arith.cmpi eq, %arg0, %c5_i32 : i32
    %763 = arith.extui %762 : i1 to i32
    %c0_i32_252 = arith.constant 0 : i32
    %764 = arith.cmpi ne, %763, %c0_i32_252 : i32
    scf.if %764 {
      %c0_253 = arith.constant 0 : index
      %c0_254 = arith.constant 0 : index
      %765 = vector.load %arg24[%c0_253, %c0_254] : memref<1x32xf32, #tpu.memory_space<vmem>>, vector<1x32xf32>
      %c0_255 = arith.constant 0 : index
      %c0_256 = arith.constant 0 : index
      %766 = vector.load %arg25[%c0_255, %c0_256] : memref<1x32xf32, #tpu.memory_space<vmem>>, vector<1x32xf32>
      %cst_257 = arith.constant dense<0.000000e+00> : vector<16xf32>
      %767 = vector.multi_reduction <add>, %760, %cst_257 [1] : vector<16x32xf32> to vector<16xf32>
      %768 = vector.shape_cast %767 : vector<16xf32> to vector<16x1xf32>
      %cst_258 = arith.constant 3.200000e+01 : f32
      %769 = vector.broadcast %cst_258 : f32 to vector<16x1xf32>
      %770 = arith.divf %768, %769 : vector<16x1xf32>
      %771 = vector.broadcast %770 : vector<16x1xf32> to vector<16x32xf32>
      %772 = arith.subf %760, %771 : vector<16x32xf32>
      %773 = arith.mulf %772, %772 : vector<16x32xf32>
      %cst_259 = arith.constant dense<0.000000e+00> : vector<16xf32>
      %774 = vector.multi_reduction <add>, %773, %cst_259 [1] : vector<16x32xf32> to vector<16xf32>
      %775 = vector.shape_cast %774 : vector<16xf32> to vector<16x1xf32>
      %cst_260 = arith.constant 3.200000e+01 : f32
      %776 = vector.broadcast %cst_260 : f32 to vector<16x1xf32>
      %777 = arith.divf %775, %776 : vector<16x1xf32>
      %cst_261 = arith.constant 9.99999974E-6 : f32
      %778 = vector.broadcast %cst_261 : f32 to vector<16x1xf32>
      %779 = arith.addf %777, %778 : vector<16x1xf32>
      %780 = math.rsqrt %779 : vector<16x1xf32>
      %781 = vector.broadcast %780 : vector<16x1xf32> to vector<16x32xf32>
      %782 = arith.mulf %772, %781 : vector<16x32xf32>
      %783 = vector.broadcast %765 : vector<1x32xf32> to vector<16x32xf32>
      %784 = arith.mulf %782, %783 : vector<16x32xf32>
      %785 = vector.broadcast %766 : vector<1x32xf32> to vector<16x32xf32>
      %786 = arith.addf %784, %785 : vector<16x32xf32>
      %c0_262 = arith.constant 0 : index
      %c0_263 = arith.constant 0 : index
      %787 = vector.load %arg26[%c0_262, %c0_263] : memref<16x32xf32, #tpu.memory_space<vmem>>, vector<16x32xf32>
      tpu.vector_store %arg26[%c0_262, %c0_263], %786 {strides = array<i32>} : memref<16x32xf32, #tpu.memory_space<vmem>>, vector<16x32xf32>,
    } else {
    }
    return
  }
  func.func @transform_0(%arg0: i32) -> (i32, i32) {
    %c0_i32 = arith.constant 0 : i32
    %c0_i32_0 = arith.constant 0 : i32
    %c0_i32_1 = arith.constant 0 : i32
    return %c0_i32, %c0_i32_0 : i32, i32
  }
  func.func @transform_1(%arg0: i32) -> (i32, i32) {
    %c0_i32 = arith.constant 0 : i32
    %c0_i32_0 = arith.constant 0 : i32
    %c0_i32_1 = arith.constant 0 : i32
    return %c0_i32, %c0_i32_0 : i32, i32
  }
  func.func @transform_2(%arg0: i32) -> (i32, i32) {
    %c0_i32 = arith.constant 0 : i32
    %c0_i32_0 = arith.constant 0 : i32
    %c0_i32_1 = arith.constant 0 : i32
    return %c0_i32, %c0_i32_0 : i32, i32
  }
  func.func @transform_3(%arg0: i32) -> (i32, i32, i32) {
    %c0_i32 = arith.constant 0 : i32
    %c0_i32_0 = arith.constant 0 : i32
    %c0_i32_1 = arith.constant 0 : i32
    return %arg0, %c0_i32, %c0_i32_0 : i32, i32, i32
  }
  func.func @transform_4(%arg0: i32) -> (i32, i32, i32) {
    %c0_i32 = arith.constant 0 : i32
    %c0_i32_0 = arith.constant 0 : i32
    %c0_i32_1 = arith.constant 0 : i32
    return %arg0, %c0_i32, %c0_i32_0 : i32, i32, i32
  }
  func.func @transform_5(%arg0: i32) -> (i32, i32, i32) {
    %c0_i32 = arith.constant 0 : i32
    %c0_i32_0 = arith.constant 0 : i32
    %c0_i32_1 = arith.constant 0 : i32
    return %arg0, %c0_i32, %c0_i32_0 : i32, i32, i32
  }
  func.func @transform_6(%arg0: i32) -> (i32, i32, i32) {
    %c0_i32 = arith.constant 0 : i32
    %c0_i32_0 = arith.constant 0 : i32
    %c0_i32_1 = arith.constant 0 : i32
    return %arg0, %c0_i32, %c0_i32_0 : i32, i32, i32
  }
  func.func @transform_7(%arg0: i32) -> (i32, i32, i32) {
    %c0_i32 = arith.constant 0 : i32
    %c0_i32_0 = arith.constant 0 : i32
    %c0_i32_1 = arith.constant 0 : i32
    return %arg0, %c0_i32, %c0_i32_0 : i32, i32, i32
  }
  func.func @transform_8(%arg0: i32) -> (i32, i32, i32) {
    %c0_i32 = arith.constant 0 : i32
    %c0_i32_0 = arith.constant 0 : i32
    %c0_i32_1 = arith.constant 0 : i32
    return %arg0, %c0_i32, %c0_i32_0 : i32, i32, i32
  }
  func.func @transform_9(%arg0: i32) -> (i32, i32, i32) {
    %c0_i32 = arith.constant 0 : i32
    %c0_i32_0 = arith.constant 0 : i32
    %c0_i32_1 = arith.constant 0 : i32
    return %arg0, %c0_i32, %c0_i32_0 : i32, i32, i32
  }
  func.func @transform_10(%arg0: i32) -> (i32, i32, i32) {
    %c0_i32 = arith.constant 0 : i32
    %c0_i32_0 = arith.constant 0 : i32
    %c0_i32_1 = arith.constant 0 : i32
    return %arg0, %c0_i32, %c0_i32_0 : i32, i32, i32
  }
  func.func @transform_11(%arg0: i32) -> (i32, i32, i32) {
    %c0_i32 = arith.constant 0 : i32
    %c0_i32_0 = arith.constant 0 : i32
    %c0_i32_1 = arith.constant 0 : i32
    return %arg0, %c0_i32, %c0_i32_0 : i32, i32, i32
  }
  func.func @transform_12(%arg0: i32) -> (i32, i32, i32) {
    %c0_i32 = arith.constant 0 : i32
    %c0_i32_0 = arith.constant 0 : i32
    %c0_i32_1 = arith.constant 0 : i32
    return %arg0, %c0_i32, %c0_i32_0 : i32, i32, i32
  }
  func.func @transform_13(%arg0: i32) -> (i32, i32, i32) {
    %c0_i32 = arith.constant 0 : i32
    %c0_i32_0 = arith.constant 0 : i32
    %c0_i32_1 = arith.constant 0 : i32
    return %arg0, %c0_i32, %c0_i32_0 : i32, i32, i32
  }
  func.func @transform_14(%arg0: i32) -> (i32, i32, i32) {
    %c0_i32 = arith.constant 0 : i32
    %c0_i32_0 = arith.constant 0 : i32
    %c0_i32_1 = arith.constant 0 : i32
    return %arg0, %c0_i32, %c0_i32_0 : i32, i32, i32
  }
  func.func @transform_15(%arg0: i32) -> (i32, i32, i32) {
    %c0_i32 = arith.constant 0 : i32
    %c0_i32_0 = arith.constant 0 : i32
    %c0_i32_1 = arith.constant 0 : i32
    return %arg0, %c0_i32, %c0_i32_0 : i32, i32, i32
  }
  func.func @transform_16(%arg0: i32) -> (i32, i32, i32) {
    %c0_i32 = arith.constant 0 : i32
    %c0_i32_0 = arith.constant 0 : i32
    %c0_i32_1 = arith.constant 0 : i32
    return %arg0, %c0_i32, %c0_i32_0 : i32, i32, i32
  }
  func.func @transform_17(%arg0: i32) -> (i32, i32, i32) {
    %c0_i32 = arith.constant 0 : i32
    %c0_i32_0 = arith.constant 0 : i32
    %c0_i32_1 = arith.constant 0 : i32
    return %arg0, %c0_i32, %c0_i32_0 : i32, i32, i32
  }
  func.func @transform_18(%arg0: i32) -> (i32, i32, i32) {
    %c0_i32 = arith.constant 0 : i32
    %c0_i32_0 = arith.constant 0 : i32
    %c0_i32_1 = arith.constant 0 : i32
    return %arg0, %c0_i32, %c0_i32_0 : i32, i32, i32
  }
  func.func @transform_19(%arg0: i32) -> (i32, i32, i32) {
    %c0_i32 = arith.constant 0 : i32
    %c0_i32_0 = arith.constant 0 : i32
    %c0_i32_1 = arith.constant 0 : i32
    return %arg0, %c0_i32, %c0_i32_0 : i32, i32, i32
  }
  func.func @transform_20(%arg0: i32) -> (i32, i32, i32) {
    %c0_i32 = arith.constant 0 : i32
    %c0_i32_0 = arith.constant 0 : i32
    %c0_i32_1 = arith.constant 0 : i32
    return %arg0, %c0_i32, %c0_i32_0 : i32, i32, i32
  }
  func.func @transform_21(%arg0: i32) -> (i32, i32, i32) {
    %c0_i32 = arith.constant 0 : i32
    %c0_i32_0 = arith.constant 0 : i32
    %c0_i32_1 = arith.constant 0 : i32
    return %arg0, %c0_i32, %c0_i32_0 : i32, i32, i32
  }
  func.func @transform_22(%arg0: i32) -> (i32, i32, i32) {
    %c0_i32 = arith.constant 0 : i32
    %c0_i32_0 = arith.constant 0 : i32
    %c0_i32_1 = arith.constant 0 : i32
    return %arg0, %c0_i32, %c0_i32_0 : i32, i32, i32
  }
  func.func @transform_23(%arg0: i32) -> (i32, i32) {
    %c0_i32 = arith.constant 0 : i32
    %c0_i32_0 = arith.constant 0 : i32
    %c0_i32_1 = arith.constant 0 : i32
    return %c0_i32, %c0_i32_0 : i32, i32
  }
  func.func @transform_24(%arg0: i32) -> (i32, i32) {
    %c0_i32 = arith.constant 0 : i32
    %c0_i32_0 = arith.constant 0 : i32
    %c0_i32_1 = arith.constant 0 : i32
    return %c0_i32, %c0_i32_0 : i32, i32
  }
  func.func @transform_25(%arg0: i32) -> (i32, i32) {
    %c0_i32 = arith.constant 0 : i32
    %c0_i32_0 = arith.constant 0 : i32
    %c0_i32_1 = arith.constant 0 : i32
    return %c0_i32, %c0_i32_0 : i32, i32
  }
}

</mosaic_0001>

<bundles_post_ra>
// kernel: translation_model_forward.2
= control target key start
LH: loop header
LB: loop body
LE: loop exit
PB: predicated region body
PF: predicated region fallthrough
CT: control target
= control target key end

     0   :  { %s7023_s21 = smov 0   ;;  %s7882_s0 = inlined_call_operand.vmem [shape: f32[2,8], index: 0, kind: input, shape index: {}]   ;;  %s7883_s1 = inlined_call_operand.vmem [shape: f32[16,32], index: 1, kind: input, shape index: {}]   ;;  %s7884_s2 = inlined_call_operand.vmem [shape: f32[6,32,96], index: 2, kind: input, shape index: {}]   ;;  %s7885_s3 = inlined_call_operand.vmem [shape: f32[6,1,96], index: 3, kind: input, shape index: {}]   ;;  %s7886_s4 = inlined_call_operand.vmem [shape: f32[6,32,32], index: 4, kind: input, shape index: {}]   ;;  %s7887_s5 = inlined_call_operand.vmem [shape: f32[6,1,32], index: 5, kind: input, shape index: {}]   ;;  %s7888_s6 = inlined_call_operand.vmem [shape: f32[6,1,32], index: 6, kind: input, shape index: {}]   ;;  %s7889_s7 = inlined_call_operand.vmem [shape: f32[6,1,32], index: 7, kind: input, shape index: {}]   ;;  %s7890_s8 = inlined_call_operand.vmem [shape: bf16[6,32,2048], index: 8, kind: input, shape index: {}]   ;;  %s7891_s9 = inlined_call_operand.vmem [shape: f32[6,1,2048], index: 9, kind: input, shape index: {}]   ;;  %s7892_s10 = inlined_call_operand.vmem [shape: bf16[6,2048,32], index: 10, kind: input, shape index: {}]   ;;  %s7893_s11 = inlined_call_operand.vmem [shape: f32[6,1,32], index: 11, kind: input, shape index: {}]   ;;  %s7894_s12 = inlined_call_operand.vmem [shape: f32[6,1,32], index: 12, kind: input, shape index: {}]   ;;  %s7895_s13 = inlined_call_operand.vmem [shape: f32[6,1,32], index: 13, kind: input, shape index: {}]   ;;  %s7896_s14 = inlined_call_operand.vmem [shape: f32[1,32], index: 14, kind: input, shape index: {}]   ;;  %s7897_s15 = inlined_call_operand.vmem [shape: f32[1,32], index: 15, kind: input, shape index: {}]   ;;  %s7898_s16 = inlined_call_operand.vmem [shape: f32[16,32], index: 16, kind: output, shape index: {}]  }
   0x1   :  { %7902 = sst [smem:[#allocation4_spill]] %s7882_s0 }
   0x2   :  { %7903 = sst [smem:[#allocation5_spill]] %s7883_s1 }
   0x3   :  { %7904 = sst [smem:[#allocation6_spill]] %s7884_s2 }
   0x4   :  { %7905 = sst [smem:[#allocation7_spill]] %s7886_s4 }
   0x5   :  { %7906 = sst [smem:[#allocation8_spill]] %s7890_s8 }
   0x6   :  { %7907 = sst [smem:[#allocation9_spill]] %s7896_s14 }
   0x7   :  { %7908 = sst [smem:[#allocation10_spill]] %s7897_s15 }
   0x8   :  { %7909 = sst [smem:[#allocation11_spill]] %s7898_s16 }
   0x9 LB: > { %7910 = sst [smem:[#allocation3_spill]] %s6903_s21  ;;  %s7029_s22 = sadd.s32 4294967295, %s6903_s21   ;;  %s6903_s21 = sphi %s7023_s21, %s26_s21  }
   0xa   : > { %p5953_p0 = scmp.ge.s32.totalorder %s6903_s21, 1  ;;  %p552_p1 = scmp.lt.s32.totalorder %s6903_s21, 7 }
   0xc   : > { %p553_p2 = pnand %p5953_p0, %p552_p1 }
   0xd   : > { %p637_p3 = scmp.lt.s32.totalorder (!%p553_p2), %s7029_s22, 5  ;;  %s7911_s2 = sld [smem:[#allocation6_spill]] (!%p553_p2) }
   0xe   : > { %556 = sbr.rel (%p553_p2) target bundleno = 3736 (0xe98), region = 84  ;;  %s7912_s4 = sld [smem:[#allocation7_spill]] (!%p553_p2) }
   0xf   : > { %s7913_s8 = sld [smem:[#allocation8_spill]] (!%p553_p2)  ;;  %p5963_p4 = scmp.ne.s32.totalorder (!%p553_p2), %s7029_s22, 0 }
  0x15   : > { %s7035_s23 = scalar_select %p637_p3, %s7029_s22, 5 }
  0x16   : > { %686 = sbr.rel (%p5963_p4) target bundleno = 31 (0x1f), region = 88  ;;  %s7914_s21 = sld [smem:[#allocation5_spill]] (!%p5963_p4)  ;;  %vm689_vm0 = vcmask (!%p5963_p4), 261120  }
  0x17   : > { %s6196_s24 = sshll.u32 %s7035_s23, 5  ;;  %s6198_s27 = sshll.u32 %s7035_s23, 8 }
  0x18   : > { %s641_s30 = scalar_lea.vmem %s7911_s2, %s6196_s24  ;;  %s7048_s18 = scalar_lea.vmem %s7912_s4, %s6196_s24 }
  0x19   : > { %s7066_s2 = scalar_lea.vmem %s7913_s8, %s6198_s27  ;;  %s5960_s24 = sshll.u32 %s7035_s23, 4 }
  0x1a   : > { %s7072_s19 = scalar_lea.vmem %s7891_s9, %s5960_s24  ;;  %s6199_s20 = sshll.u32 %s7035_s23, 10 }
  0x1b   : > { %s7078_s16 = scalar_lea.vmem %s7892_s10, %s6199_s20  ;;  %s675_s26 = scalar_lea.vmem %s7893_s11, %s7035_s23 }
  0x1c   : > { %s7915_s15 = smov (!%p5963_p4), %s7914_s21  ;;  %v687_v0 = vld [vmem:[%s7914_s21] sm:$0xff] (!%p5963_p4) }
  0x1d   : > { %v688_v1 = vld [vmem:[%s7915_s15 + $0x8] sm:$0xff]  ;;  %690 = vst.msk [vmem:[#allocation2] sm:$0xff] %vm689_vm0, %v687_v0 }
  0x1e   : > { %691 = vst.msk [vmem:[#allocation2 + $0x8] sm:$0xff] %vm689_vm0, %v688_v1 }
  0x1f PF: > { %v695_v2 = vld [vmem:[%s641_s30] sm:$0xff]  ;;  %v696_v3 = vld [vmem:[%s641_s30 + $0x8] sm:$0xff]  ;;  %v697_v4 = vld [vmem:[%s641_s30 + $0x10] sm:$0xff]  ;;  %vm706_vm1 = vcmask 261120   ;;  %v6905_v10 = vmov 0.0   ;;  %vm6906_vm2 = vmmov 0   ;;  %s7916_s14 = scalar_lea.vmem %s7885_s3, %s7035_s23  ;;  %v867_v22 = vlaneseq }
  0x20   : > { %v6634_v5 = vpack.c.bf16 %v696_v3, %v695_v2  ;;  %v698_v6 = vld [vmem:[%s641_s30 + $0x18] sm:$0xff]  ;;  %6463 = vmatprep.subr.mxu1 %v6905_v10  ;;  %6465 = vmatprep.mubr.msk.f32.mxu1 %vm6906_vm2, %v6905_v10  ;;  %v5964_v11 = vld [vmem:[%s7916_s14] ss:$0 sm:$0xff]  ;;  %s6907_s30 = smov 64   ;;  %s6908_s1 = smov 96   ;;  %vm791_vm3 = vcmask 31744  }
  0x21   : > { %v6638_v8 = vpack.c.bf16 %v698_v6, %v697_v4  ;;  %s6909_s25 = smov 92   ;;  %s6910_s28 = smov 124   ;;  %v7146_v23 = vshrl.u32 %v867_v22, 7  ;;  %vm872_vm4 = vcmask 64512   ;;  %vm2159_vm5 = vcmask 97280  }
  0x22   : > { %6635 = vmatprep.subr.bf16.mxu0 %v6634_v5  ;;  %s6911_s29 = smov 88   ;;  %s6912_s24 = smov 120   ;;  %vm2161_vm6 = vcmask 130048   ;;  %vm2163_vm7 = vcmask 162816   ;;  %vm2165_vm8 = vcmask 195584   ;;  %vm2167_vm9 = vcmask 228352  }
  0x23   : > { %6637 = vmatpush3.bf16.msra.mxu0 %v6634_v5  ;;  %s6913_s17 = smov 116   ;;  %v7149_v24 = vsub.s32 0, %v7146_v23  ;;  %s7917_s4 = sld [smem:[#allocation4_spill]] }
  0x24   : > { %6639 = vmatprep.subr.bf16.mxu0 %v6638_v8  ;;  %s6914_s8 = smov 84   ;;  %s6915_s14 = smov 72  }
  0x25   : > { %v693_v9 = vld [vmem:[#allocation2 + $0x8] sm:$0xff]  ;;  %s6916_s21 = smov 68   ;;  %s6917_s20 = smov 112  }
  0x26   : > { %v692_v7 = vld [vmem:[#allocation2] sm:$0xff]  ;;  %s6919_s0 = smov 104   ;;  %s6920_s27 = smov 100  }
  0x27   : > { %6460 = vmatprep.mubr.msk.f32.mxu0 %vm706_vm1, %v692_v7  ;;  %6641 = vmatpush3.bf16.msra.mxu0 %v6638_v8  ;;  %p6191_p5 = scmp.ne.s32.totalorder %s7029_s22, 5 }
  0x28   : > { %6483 = vmatprep.subr.mxu0 %v6905_v10 }
  0x29   : > { %v7154_v25 = vld [vmem:[%s7917_s4] sm:$0x3]  ;;  %s6918_s4 = smov 108  }
  0x2a   : > { %6461 = vmatmul.mubr.msk.f32.vlgmr.msra.gmra.mrb[0].mxu0 %vm706_vm1, %v693_v9  ;;  %v7158_v26 = vrot.slane %v7154_v25, %v7149_v24 }
  0x2b   : > { %6485 = vmatprep.mubr.msk.f32.mxu0 %vm6906_vm2, %v6905_v10 }
  0xfd   : > { %v6462_v12 = vpop.f32.mrb[0].mxu0 }
  0xfe   : > { %v7112_v13 = vadd.f32 %v6462_v12, %v5964_v11  ;;  %v779_v14 = vpop.f32.mrb[1].mxu0 }
  0xff   : > { %v7114_v15 = vadd.f32 %v5964_v11, %v779_v14 }
 0x101   : > { %884 = vrot.lane.b32.xlu1 %v7114_v15, %s6907_s30  ;;  %789 = vrot.lane.b32.xlu0 %v7114_v15, %s6908_s1 }
 0x105   : > { %962 = vrot.lane.b32.xlu1 %v7114_v15, %s6909_s25 }
 0x109   : > { %960 = vrot.lane.b32.xlu1 %v7114_v15, %s6910_s28 }
 0x10d   : > { %1129 = vrot.lane.b32.xlu1 %v7114_v15, %s6911_s29 }
 0x111   : > { %1127 = vrot.lane.b32.xlu1 %v7114_v15, %s6912_s24 }
 0x115   : > { %1294 = vrot.lane.b32.xlu1 %v7114_v15, %s6913_s17 }
 0x173   : > { %v885_v16 = vpop.permute.xlu1 %884  ;;  %v790_v17 = vpop.permute.xlu0 %789 }
 0x174   : > { %6464 = vmatpush3.xpose.msk.msra.mxu1 %vm791_vm3, %v790_v17 }
 0x175   : > { %6468 = vmatprep.subr.mxu1 %v6905_v10 }
 0x177   : > { %v7132_v18 = vpop.permute.xlu1 %962  ;;  %6466 = vmatmul.mubr.msk.f32.vlgmr.msra.gmra.mrb[0].mxu1 %vm791_vm3, %v7114_v15 }
 0x178   : > { %6469 = vmatpush3.msra.mxu1 %v885_v16  ;;  %6470 = vmatprep.mubr.msk.f32.mxu1 %vm6906_vm2, %v6905_v10 }
 0x179   : > { %6473 = vmatprep.subr.mxu1 %v6905_v10 }
 0x17b   : > { %v7139_v19 = vpop.permute.xlu1 %960 }
 0x17f   : > { %v1130_v20 = vpop.permute.xlu1 %1129 }
 0x180   : > { %6484 = vmatpush3.xpose.msk.msra.mxu0 %vm791_vm3, %v1130_v20 }
 0x181   : > { %6493 = vmatprep.subr.mxu0 %v6905_v10 }
 0x183   : > { %v1128_v21 = vpop.permute.xlu1 %1127 }
 0x184   : > { %6486 = vmatmul.mubr.msk.f32.vlgmr.msra.gmra.mrb[2].mxu0 %vm791_vm3, %v1128_v21 }
 0x185   : > { %6495 = vmatprep.mubr.msk.f32.mxu0 %vm6906_vm2, %v6905_v10 }
 0x187   : > { %v1295_v41 = vpop.permute.xlu1 %1294 }
 0x24a   : > { %v862_v27 = vpop.f32.mrb[0].mxu1 }
 0x24b   : > { %v866_v28 = vmul.f32 0.5, %v862_v27  ;;  %v6467_v29 = vpop.f32.mrb[1].mxu1 }
 0x24d   : > { %v871_v30 = vadd.f32 %v7158_v26, %v866_v28 }
 0x24f   : > { %v873_v31 = vsel %vm872_vm4, %v871_v30, -inf }
 0x250   : > { %874 = vmax.xlane.f32.xlu0 %v873_v31 }
 0x257   : > { %v1201_v32 = vpop.f32.mrb[2].mxu0 }
 0x258   : > { %v6487_v33 = vpop.f32.mrb[3].mxu0  ;;  %v1205_v34 = vmul.f32 0.5, %v1201_v32 }
 0x25a   : > { %v7181_v35 = vadd.f32 %v1205_v34, %v7158_v26 }
 0x25c   : > { %v1207_v36 = vsel %vm872_vm4, %v7181_v35, -inf }
 0x266   : > { %1296 = vrot.lane.b32.xlu0 %v7114_v15, %s6914_s8 }
 0x26a   : > { %1797 = vrot.lane.b32.xlu0 %v7114_v15, %s6915_s14 }
 0x26e   : > { %1964 = vrot.lane.b32.xlu0 %v7114_v15, %s6916_s21 }
 0x272   : > { %2170 = vrot.lane.b32.xlu0 %v7112_v13, %s6908_s1  ;;  %s6921_s1 = smov 80  }
 0x276   : > { %2339 = vrot.lane.b32.xlu0 %v7112_v13, %s6910_s28  ;;  %s6922_s28 = smov 76  }
 0x27a   : > { %2506 = vrot.lane.b32.xlu0 %v7112_v13, %s6912_s24  ;;  %s6927_s24 = smov 44  }
 0x27e   : > { %2673 = vrot.lane.b32.xlu0 %v7112_v13, %s6913_s17  ;;  %s6928_s17 = smov 36  }
 0x282   : > { %2840 = vrot.lane.b32.xlu0 %v7112_v13, %s6917_s20 }
 0x286   : > { %3007 = vrot.lane.b32.xlu0 %v7112_v13, %s6918_s4 }
 0x28a   : > { %3174 = vrot.lane.b32.xlu0 %v7112_v13, %s6919_s0 }
 0x28e   : > { %3341 = vrot.lane.b32.xlu0 %v7112_v13, %s6920_s27 }
 0x2ad   : > { %1208 = vmax.xlane.f32.xlu0 %v1207_v36 }
 0x2dd   : > { %v875_v37 = vpop.xlane.xlu0 %874 }
 0x2de   : > { %v876_v38 = vsub.f32 %v871_v30, %v875_v37  ;;  %v7300_v37 = vsub.s32 1, %v7146_v23 }
 0x2e0   : > { %v877_v39 = vmul.f32 1.442695, %v876_v38 }
 0x2e1   : > { %v1297_v40 = vpop.permute.xlu0 %1296 }
 0x2e2   : > { %6819 = vpow2.f32 %v877_v39  ;;  %6494 = vmatpush3.xpose.msk.msra.mxu0 %vm791_vm3, %v1297_v40 }
 0x2e3   : > { %6503 = vmatprep.subr.mxu0 %v6905_v10 }
 0x2e5   : > { %6496 = vmatmul.mubr.msk.f32.vlgmr.msra.gmra.mrb[4].mxu0 %vm791_vm3, %v1295_v41  ;;  %v1798_v45 = vpop.permute.xlu0 %1797 }
 0x2e6   : > { %6505 = vmatprep.mubr.msk.f32.mxu0 %vm6906_vm2, %v6905_v10 }
 0x2e9   : > { %v1965_v47 = vpop.permute.xlu0 %1964 }
 0x2ec   : > { %v6820_v42 = vpop.eup %6819 }
 0x2ed   : > { %v879_v43 = vsel %vm872_vm4, %v6820_v42, 0.0  ;;  %v2171_v52 = vpop.permute.xlu0 %2170 }
 0x2ee   : > { %880 = vadd.xlane.f32.xlu1 %v879_v43  ;;  %v2250_v43 = vrot.slane %v7154_v25, %v7300_v37 }
 0x2f1   : > { %v2340_v54 = vpop.permute.xlu0 %2339 }
 0x2f5   : > { %v2507_v57 = vpop.permute.xlu0 %2506 }
 0x2f9   : > { %v2674_v59 = vpop.permute.xlu0 %2673 }
 0x2fd   : > { %v2841_v62 = vpop.permute.xlu0 %2840 }
 0x2ff   : > { %1463 = vrot.lane.b32.xlu1 %v7114_v15, %s6921_s1 }
 0x301   : > { %v3008_v0 = vpop.permute.xlu0 %3007 }
 0x303   : > { %1461 = vrot.lane.b32.xlu1 %v7114_v15, %s6917_s20  ;;  %s6933_s20 = smov 16  }
 0x305   : > { %v3175_v3 = vpop.permute.xlu0 %3174 }
 0x307   : > { %1630 = vrot.lane.b32.xlu1 %v7114_v15, %s6922_s28 }
 0x309   : > { %v3342_v5 = vpop.permute.xlu0 %3341 }
 0x30b   : > { %1628 = vrot.lane.b32.xlu1 %v7114_v15, %s6918_s4  ;;  %s6934_s4 = smov 20  }
 0x30f   : > { %1795 = vrot.lane.b32.xlu1 %v7114_v15, %s6919_s0  ;;  %s6924_s0 = smov 52  }
 0x313   : > { %1962 = vrot.lane.b32.xlu1 %v7114_v15, %s6920_s27  ;;  %s6923_s27 = smov 56  }
 0x317   : > { %2341 = vrot.lane.b32.xlu1 %v7112_v13, %s6909_s25  ;;  %s6925_s25 = smov 60  }
 0x31b   : > { %2508 = vrot.lane.b32.xlu1 %v7112_v13, %s6911_s29  ;;  %s6926_s29 = smov 48  }
 0x31f   : > { %2675 = vrot.lane.b32.xlu1 %v7112_v13, %s6914_s8  ;;  %s6929_s8 = smov 40  }
 0x323   : > { %2842 = vrot.lane.b32.xlu1 %v7112_v13, %s6921_s1  ;;  %s6935_s1 = smov 24  }
 0x327   : > { %3009 = vrot.lane.b32.xlu1 %v7112_v13, %s6922_s28  ;;  %s6936_s28 = smov 28  }
 0x32b   : > { %3176 = vrot.lane.b32.xlu1 %v7112_v13, %s6915_s14  ;;  %s6931_s14 = smov 8  }
 0x32f   : > { %3343 = vrot.lane.b32.xlu1 %v7112_v13, %s6916_s21  ;;  %s6932_s21 = smov 12  }
 0x37b   : > { %v881_v44 = vpop.xlane.xlu1 %880 }
 0x37c   : > { %6821 = vrcp.f32 %v881_v44 }
 0x37f   : > { %v1464_v46 = vpop.permute.xlu1 %1463 }
 0x380   : > { %6504 = vmatpush3.xpose.msk.msra.mxu0 %vm791_vm3, %v1464_v46 }
 0x381   : > { %6513 = vmatprep.subr.mxu0 %v6905_v10 }
 0x383   : > { %v1462_v48 = vpop.permute.xlu1 %1461 }
 0x384   : > { %6506 = vmatmul.mubr.msk.f32.vlgmr.msra.gmra.mrb[6].mxu0 %vm791_vm3, %v1462_v48 }
 0x385   : > { %6515 = vmatprep.mubr.msk.f32.mxu0 %vm6906_vm2, %v6905_v10 }
 0x386   : > { %v6822_v49 = vpop.eup %6821 }
 0x387   : > { %v1631_v50 = vpop.permute.xlu1 %1630  ;;  %v883_v51 = vmul.f32 %v6822_v49, %v6820_v42 }
 0x388   : > { %6514 = vmatpush3.xpose.msk.msra.mxu0 %vm791_vm3, %v1631_v50 }
 0x389   : > { %6471 = vmatmul.mubr.msk.f32.vlgmr.msra.gmra.mrb[2].mxu1 %vm872_vm4, %v883_v51  ;;  %6523 = vmatprep.subr.mxu0 %v6905_v10 }
 0x38a   : > { %6474 = vmatpush3.xpose.msk.msra.mxu1 %vm791_vm3, %v7132_v18  ;;  %6475 = vmatprep.mubr.msk.f32.mxu1 %vm6906_vm2, %v6905_v10 }
 0x38b   : > { %v1629_v53 = vpop.permute.xlu1 %1628  ;;  %6478 = vmatprep.subr.mxu1 %v6905_v10 }
 0x38c   : > { %6516 = vmatmul.mubr.msk.f32.vlgmr.msra.gmra.mrb[8].mxu0 %vm791_vm3, %v1629_v53 }
 0x38d   : > { %6524 = vmatpush3.xpose.msk.msra.mxu0 %vm791_vm3, %v1798_v45  ;;  %6476 = vmatmul.mubr.msk.f32.vlgmr.msra.gmra.mrb[4].mxu1 %vm791_vm3, %v7139_v19 }
 0x38e   : > { %6525 = vmatprep.mubr.msk.f32.mxu0 %vm6906_vm2, %v6905_v10  ;;  %6533 = vmatprep.subr.mxu0 %v6905_v10 }
 0x38f   : > { %v1796_v55 = vpop.permute.xlu1 %1795  ;;  %6480 = vmatprep.mubr.msk.f32.mxu1 %vm6906_vm2, %v6905_v10 }
 0x390   : > { %6526 = vmatmul.mubr.msk.f32.vlgmr.msra.gmra.mrb[10].mxu0 %vm791_vm3, %v1796_v55 }
 0x391   : > { %6534 = vmatpush3.xpose.msk.msra.mxu0 %vm791_vm3, %v1965_v47  ;;  %6535 = vmatprep.mubr.msk.f32.mxu0 %vm6906_vm2, %v6905_v10 }
 0x392   : > { %6543 = vmatprep.subr.mxu0 %v6905_v10 }
 0x393   : > { %v1963_v56 = vpop.permute.xlu1 %1962 }
 0x394   : > { %6536 = vmatmul.mubr.msk.f32.vlgmr.msra.gmra.mrb[12].mxu0 %vm791_vm3, %v1963_v56 }
 0x395   : > { %6544 = vmatpush3.xpose.msk.msra.mxu0 %vm791_vm3, %v2171_v52  ;;  %6545 = vmatprep.mubr.msk.f32.mxu0 %vm6906_vm2, %v6905_v10 }
 0x396   : > { %6553 = vmatprep.subr.mxu0 %v6905_v10 }
 0x397   : > { %v2342_v58 = vpop.permute.xlu1 %2341 }
 0x398   : > { %6546 = vmatmul.mubr.msk.f32.vlgmr.msra.gmra.mrb[14].mxu0 %vm791_vm3, %v7112_v13 }
 0x399   : > { %6554 = vmatpush3.xpose.msk.msra.mxu0 %vm791_vm3, %v2342_v58  ;;  %6555 = vmatprep.mubr.msk.f32.mxu0 %vm6906_vm2, %v6905_v10 }
 0x39a   : > { %6563 = vmatprep.subr.mxu0 %v6905_v10 }
 0x39b   : > { %v2509_v60 = vpop.permute.xlu1 %2508 }
 0x39c   : > { %6556 = vmatmul.mubr.msk.f32.vlgmr.msra.gmra.mrb[16].mxu0 %vm791_vm3, %v2340_v54 }
 0x39d   : > { %6564 = vmatpush3.xpose.msk.msra.mxu0 %vm791_vm3, %v2509_v60  ;;  %6565 = vmatprep.mubr.msk.f32.mxu0 %vm6906_vm2, %v6905_v10 }
 0x39e   : > { %6573 = vmatprep.subr.mxu0 %v6905_v10 }
 0x39f   : > { %v2676_v61 = vpop.permute.xlu1 %2675 }
 0x3a0   : > { %6566 = vmatmul.mubr.msk.f32.vlgmr.msra.gmra.mrb[18].mxu0 %vm791_vm3, %v2507_v57 }
 0x3a1   : > { %6574 = vmatpush3.xpose.msk.msra.mxu0 %vm791_vm3, %v2676_v61  ;;  %6575 = vmatprep.mubr.msk.f32.mxu0 %vm6906_vm2, %v6905_v10 }
 0x3a2   : > { %6583 = vmatprep.subr.mxu0 %v6905_v10 }
 0x3a3   : > { %v2843_v63 = vpop.permute.xlu1 %2842 }
 0x3a4   : > { %6576 = vmatmul.mubr.msk.f32.vlgmr.msra.gmra.mrb[20].mxu0 %vm791_vm3, %v2674_v59 }
 0x3a5   : > { %6584 = vmatpush3.xpose.msk.msra.mxu0 %vm791_vm3, %v2843_v63  ;;  %6585 = vmatprep.mubr.msk.f32.mxu0 %vm6906_vm2, %v6905_v10 }
 0x3a6   : > { %6593 = vmatprep.subr.mxu0 %v6905_v10 }
 0x3a7   : > { %v3010_v1 = vpop.permute.xlu1 %3009 }
 0x3a8   : > { %6586 = vmatmul.mubr.msk.f32.vlgmr.msra.gmra.mrb[22].mxu0 %vm791_vm3, %v2841_v62 }
 0x3a9   : > { %6594 = vmatpush3.xpose.msk.msra.mxu0 %vm791_vm3, %v3010_v1  ;;  %6595 = vmatprep.mubr.msk.f32.mxu0 %vm6906_vm2, %v6905_v10 }
 0x3aa   : > { %6603 = vmatprep.subr.mxu0 %v6905_v10 }
 0x3ab   : > { %v3177_v2 = vpop.permute.xlu1 %3176 }
 0x3ac   : > { %6596 = vmatmul.mubr.msk.f32.vlgmr.msra.gmra.mrb[24].mxu0 %vm791_vm3, %v3008_v0 }
 0x3ad   : > { %6604 = vmatpush3.xpose.msk.msra.mxu0 %vm791_vm3, %v3177_v2  ;;  %6605 = vmatprep.mubr.msk.f32.mxu0 %vm6906_vm2, %v6905_v10 }
 0x3ae   : > { %6613 = vmatprep.subr.mxu0 %v6905_v10 }
 0x3af   : > { %v3344_v4 = vpop.permute.xlu1 %3343 }
 0x3b0   : > { %6606 = vmatmul.mubr.msk.f32.vlgmr.msra.gmra.mrb[26].mxu0 %vm791_vm3, %v3175_v3 }
 0x3b1   : > { %6614 = vmatpush3.xpose.msk.msra.mxu0 %vm791_vm3, %v3344_v4  ;;  %6615 = vmatprep.mubr.msk.f32.mxu0 %vm6906_vm2, %v6905_v10 }
 0x3b4   : > { %6616 = vmatmul.mubr.msk.f32.vlgmr.msra.gmra.mrb[28].mxu0 %vm791_vm3, %v3342_v5 }
 0x3b8   : > { %v1368_v6 = vpop.f32.mrb[4].mxu0 }
 0x3b9   : > { %v1372_v7 = vmul.f32 0.5, %v1368_v6  ;;  %v6497_v8 = vpop.f32.mrb[5].mxu0 }
 0x3bb   : > { %v7278_v9 = vadd.f32 %v1372_v7, %v7158_v26 }
 0x3bd   : > { %v1374_v11 = vsel %vm872_vm4, %v7278_v9, -inf }
 0x3be   : > { %1375 = vmax.xlane.f32.xlu0 %v1374_v11 }
 0x457   : > { %v1535_v12 = vpop.f32.mrb[6].mxu0 }
 0x458   : > { %v1539_v14 = vmul.f32 0.5, %v1535_v12  ;;  %v6507_v16 = vpop.f32.mrb[7].mxu0 }
 0x45a   : > { %v7283_v17 = vadd.f32 %v1539_v14, %v7158_v26 }
 0x45c   : > { %v7285_v18 = vpop.f32.mrb[2].mxu1  ;;  %v1541_v19 = vsel %vm872_vm4, %v7283_v17, -inf }
 0x45d   : > { %1542 = vmax.xlane.f32.xlu1 %v1541_v19  ;;  %v6472_v20 = vpop.f32.mrb[3].mxu1 }
 0x45f   : > { %v1702_v21 = vpop.f32.mrb[8].mxu0 }
 0x460   : > { %v1706_v22 = vmul.f32 0.5, %v1702_v21  ;;  %v7289_v27 = vpop.f32.mrb[4].mxu1  ;;  %v6517_v28 = vpop.f32.mrb[9].mxu0 }
 0x461   : > { %v6477_v29 = vpop.f32.mrb[5].mxu1 }
 0x462   : > { %v7292_v30 = vadd.f32 %v1706_v22, %v7158_v26 }
 0x463   : > { %v1869_v31 = vpop.f32.mrb[10].mxu0 }
 0x464   : > { %v1873_v32 = vmul.f32 0.5, %v1869_v31  ;;  %v6527_v33 = vpop.f32.mrb[11].mxu0  ;;  %v1708_v34 = vsel %vm872_vm4, %v7292_v30, -inf }
 0x465   : > { %1709 = vmax.xlane.f32.xlu0 %v1708_v34 }
 0x466   : > { %v7297_v36 = vadd.f32 %v1873_v32, %v7158_v26  ;;  %v1209_v32 = vpop.xlane.xlu0 %1208 }
 0x467   : > { %v2036_v38 = vpop.f32.mrb[12].mxu0 }
 0x468   : > { %v2040_v39 = vmul.f32 0.5, %v2036_v38  ;;  %v6537_v40 = vpop.f32.mrb[13].mxu0  ;;  %v1875_v41 = vsel %vm872_vm4, %v7297_v36, -inf  ;;  %v1210_v38 = vsub.f32 %v7181_v35, %v1209_v32 }
 0x469   : > { %1876 = vmax.xlane.f32.xlu1 %v1875_v41 }
 0x46a   : > { %v7305_v42 = vadd.f32 %v2040_v39, %v7158_v26  ;;  %v1376_v33 = vpop.xlane.xlu0 %1375  ;;  %v1211_v40 = vmul.f32 1.442695, %v1210_v38 }
 0x46b   : > { %v2242_v44 = vpop.f32.mrb[14].mxu0  ;;  %v1377_v34 = vsub.f32 %v7278_v9, %v1376_v33  ;;  %v1038_v33 = vmul.f32 0.5, %v7289_v27 }
 0x46c   : > { %v2246_v45 = vmul.f32 0.5, %v2242_v44  ;;  %v6547_v46 = vpop.f32.mrb[15].mxu0  ;;  %v2042_v47 = vsel %vm872_vm4, %v7305_v42, -inf }
 0x46d   : > { %2043 = vmax.xlane.f32.xlu0 %v2042_v47  ;;  %v1378_v39 = vmul.f32 1.442695, %v1377_v34 }
 0x46e   : > { %v7311_v48 = vadd.f32 %v2250_v43, %v2246_v45 }
 0x46f   : > { %v2413_v49 = vpop.f32.mrb[16].mxu0  ;;  %6823 = vpow2.f32 %v1378_v39  ;;  %v1039_v39 = vadd.f32 %v1038_v33, %v7158_v26 }
 0x470   : > { %v2417_v50 = vmul.f32 0.5, %v2413_v49  ;;  %v6557_v51 = vpop.f32.mrb[17].mxu0  ;;  %v2252_v52 = vsel %vm872_vm4, %v7311_v48, -inf  ;;  %6825 = vpow2.f32 %v1211_v40 }
 0x471   : > { %2253 = vmax.xlane.f32.xlu1 %v2252_v52  ;;  %v1040_v27 = vsel %vm872_vm4, %v1039_v39, -inf }
 0x472   : > { %v7315_v53 = vadd.f32 %v2417_v50, %v2250_v43 }
 0x473   : > { %v2580_v54 = vpop.f32.mrb[18].mxu0 }
 0x474   : > { %v2584_v25 = vmul.f32 0.5, %v2580_v54  ;;  %v6567_v55 = vpop.f32.mrb[19].mxu0  ;;  %v2419_v56 = vsel %vm872_vm4, %v7315_v53, -inf }
 0x475   : > { %2420 = vmax.xlane.f32.xlu0 %v2419_v56 }
 0x476   : > { %v7319_v57 = vadd.f32 %v2584_v25, %v2250_v43 }
 0x477   : > { %v2747_v58 = vpop.f32.mrb[20].mxu0 }
 0x478   : > { %v2751_v59 = vmul.f32 0.5, %v2747_v58  ;;  %v6577_v60 = vpop.f32.mrb[21].mxu0  ;;  %v2586_v61 = vsel %vm872_vm4, %v7319_v57, -inf }
 0x479   : > { %2587 = vmax.xlane.f32.xlu1 %v2586_v61  ;;  %v7353_v41 = vpop.eup %6823 }
 0x47a   : > { %v7323_v62 = vadd.f32 %v2751_v59, %v2250_v43  ;;  %v7357_v44 = vpop.eup %6825 }
 0x47b   : > { %v2914_v63 = vpop.f32.mrb[22].mxu0  ;;  %v1213_v45 = vsel %vm872_vm4, %v7357_v44, 0.0 }
 0x47c   : > { %v2918_v0 = vmul.f32 0.5, %v2914_v63  ;;  %v6587_v1 = vpop.f32.mrb[23].mxu0  ;;  %v2753_v2 = vsel %vm872_vm4, %v7323_v62, -inf }
 0x47d   : > { %2754 = vmax.xlane.f32.xlu0 %v2753_v2 }
 0x47e   : > { %v7327_v3 = vadd.f32 %v2918_v0, %v2250_v43 }
 0x47f   : > { %v3081_v4 = vpop.f32.mrb[24].mxu0 }
 0x480   : > { %v3085_v5 = vmul.f32 0.5, %v3081_v4  ;;  %v6597_v6 = vpop.f32.mrb[25].mxu0  ;;  %v2920_v7 = vsel %vm872_vm4, %v7327_v3, -inf }
 0x481   : > { %2921 = vmax.xlane.f32.xlu1 %v2920_v7 }
 0x482   : > { %v7331_v8 = vadd.f32 %v3085_v5, %v2250_v43 }
 0x483   : > { %v3248_v11 = vpop.f32.mrb[26].mxu0 }
 0x484   : > { %v3252_v12 = vmul.f32 0.5, %v3248_v11  ;;  %v6607_v14 = vpop.f32.mrb[27].mxu0  ;;  %v3087_v16 = vsel %vm872_vm4, %v7331_v8, -inf }
 0x485   : > { %3088 = vmax.xlane.f32.xlu0 %v3087_v16 }
 0x486   : > { %v7335_v19 = vadd.f32 %v3252_v12, %v2250_v43 }
 0x487   : > { %v3415_v20 = vpop.f32.mrb[28].mxu0 }
 0x488   : > { %v3419_v21 = vmul.f32 0.5, %v3415_v20  ;;  %v6617_v22 = vpop.f32.mrb[29].mxu0  ;;  %v3254_v28 = vsel %vm872_vm4, %v7335_v19, -inf }
 0x489   : > { %3255 = vmax.xlane.f32.xlu1 %v3254_v28 }
 0x48a   : > { %v7339_v29 = vadd.f32 %v3419_v21, %v2250_v43  ;;  %v1380_v43 = vsel %vm872_vm4, %v7353_v41, 0.0 }
 0x48c   : > { %v3421_v31 = vsel %vm872_vm4, %v7339_v29, -inf }
 0x48d   : > { %3422 = vmax.xlane.f32.xlu0 %v3421_v31 }
 0x49a   : > { %1218 = vrot.lane.b32.xlu1 %v7114_v15, %s6923_s27 }
 0x49e   : > { %1385 = vrot.lane.b32.xlu1 %v7114_v15, %s6924_s0 }
 0x4a3   : > { %1051 = vrot.lane.b32.xlu0 %v7114_v15, %s6925_s25 }
 0x4a7   : > { %1552 = vrot.lane.b32.xlu0 %v7114_v15, %s6926_s29 }
 0x4c2   : > { %1381 = vadd.xlane.f32.xlu1 %v1380_v43 }
 0x4c6   : > { %1214 = vadd.xlane.f32.xlu0 %v1213_v45 }
 0x4ea   : > { %v1543_v46 = vpop.xlane.xlu1 %1542 }
 0x4eb   : > { %v1544_v9 = vsub.f32 %v7283_v17, %v1543_v46 }
 0x4ed   : > { %v1545_v35 = vmul.f32 1.442695, %v1544_v9 }
 0x4ef   : > { %6827 = vpow2.f32 %v1545_v35 }
 0x4f2   : > { %v1710_v47 = vpop.xlane.xlu0 %1709 }
 0x4f3   : > { %v1711_v49 = vsub.f32 %v7292_v30, %v1710_v47 }
 0x4f5   : > { %v1712_v50 = vmul.f32 1.442695, %v1711_v49 }
 0x4f6   : > { %v1877_v51 = vpop.xlane.xlu1 %1876 }
 0x4f7   : > { %6829 = vpow2.f32 %v1712_v50  ;;  %v1878_v52 = vsub.f32 %v7297_v36, %v1877_v51 }
 0x4f9   : > { %v7364_v54 = vpop.eup %6827  ;;  %v1879_v25 = vmul.f32 1.442695, %v1878_v52 }
 0x4fa   : > { %v2044_v55 = vpop.xlane.xlu0 %2043  ;;  %v1547_v56 = vsel %vm872_vm4, %v7364_v54, 0.0 }
 0x4fb   : > { %6831 = vpow2.f32 %v1879_v25  ;;  %v2045_v17 = vsub.f32 %v7305_v42, %v2044_v55  ;;  %1548 = vadd.xlane.f32.xlu0 %v1547_v56 }
 0x4fd   : > { %v2046_v58 = vmul.f32 1.442695, %v2045_v17 }
 0x4fe   : > { %v2254_v59 = vpop.xlane.xlu1 %2253 }
 0x4ff   : > { %6833 = vpow2.f32 %v2046_v58  ;;  %v2255_v30 = vsub.f32 %v7311_v48, %v2254_v59 }
 0x501   : > { %v7370_v60 = vpop.eup %6829  ;;  %v2256_v61 = vmul.f32 1.442695, %v2255_v30 }
 0x502   : > { %v2421_v36 = vpop.xlane.xlu0 %2420  ;;  %v1714_v63 = vsel %vm872_vm4, %v7370_v60, 0.0 }
 0x503   : > { %6835 = vpow2.f32 %v2256_v61  ;;  %v2422_v0 = vsub.f32 %v7315_v53, %v2421_v36  ;;  %1715 = vadd.xlane.f32.xlu1 %v1714_v63 }
 0x505   : > { %v7375_v1 = vpop.eup %6831  ;;  %v2423_v42 = vmul.f32 1.442695, %v2422_v0 }
 0x506   : > { %v2588_v2 = vpop.xlane.xlu1 %2587  ;;  %v1881_v4 = vsel %vm872_vm4, %v7375_v1, 0.0 }
 0x507   : > { %6837 = vpow2.f32 %v2423_v42  ;;  %v2589_v48 = vsub.f32 %v7319_v57, %v2588_v2  ;;  %1882 = vadd.xlane.f32.xlu0 %v1881_v4 }
 0x509   : > { %v7380_v5 = vpop.eup %6833  ;;  %v2590_v6 = vmul.f32 1.442695, %v2589_v48 }
 0x50a   : > { %v2755_v7 = vpop.xlane.xlu0 %2754  ;;  %v2048_v11 = vsel %vm872_vm4, %v7380_v5, 0.0 }
 0x50b   : > { %6839 = vpow2.f32 %v2590_v6  ;;  %v2756_v53 = vsub.f32 %v7323_v62, %v2755_v7  ;;  %2049 = vadd.xlane.f32.xlu1 %v2048_v11 }
 0x50d   : > { %v7385_v12 = vpop.eup %6835  ;;  %v2757_v14 = vmul.f32 1.442695, %v2756_v53 }
 0x50e   : > { %v2922_v16 = vpop.xlane.xlu1 %2921  ;;  %v2258_v20 = vsel %vm872_vm4, %v7385_v12, 0.0 }
 0x50f   : > { %6841 = vpow2.f32 %v2757_v14  ;;  %v2923_v57 = vsub.f32 %v7327_v3, %v2922_v16  ;;  %2259 = vadd.xlane.f32.xlu1 %v2258_v20 }
 0x511   : > { %v7390_v21 = vpop.eup %6837  ;;  %v2924_v22 = vmul.f32 1.442695, %v2923_v57 }
 0x512   : > { %v2425_v28 = vsel %vm872_vm4, %v7390_v21, 0.0  ;;  %v3089_v31 = vpop.xlane.xlu0 %3088 }
 0x513   : > { %6843 = vpow2.f32 %v2924_v22  ;;  %2426 = vadd.xlane.f32.xlu0 %v2425_v28  ;;  %v3090_v36 = vsub.f32 %v7331_v8, %v3089_v31 }
 0x515   : > { %v7394_v62 = vpop.eup %6839  ;;  %v3091_v63 = vmul.f32 1.442695, %v3090_v36 }
 0x516   : > { %v2592_v32 = vsel %vm872_vm4, %v7394_v62, 0.0  ;;  %v3256_v47 = vpop.xlane.xlu1 %3255 }
 0x517   : > { %2593 = vadd.xlane.f32.xlu1 %v2592_v32  ;;  %v3257_v0 = vsub.f32 %v7335_v19, %v3256_v47 }
 0x519   : > { %v7399_v34 = vpop.eup %6841  ;;  %v3258_v42 = vmul.f32 1.442695, %v3257_v0 }
 0x51a   : > { %v3423_v3 = vpop.xlane.xlu0 %3422  ;;  %v2759_v38 = vsel %vm872_vm4, %v7399_v34, 0.0  ;;  %v1219_v49 = vpop.permute.xlu1 %1218 }
 0x51b   : > { %2760 = vadd.xlane.f32.xlu1 %v2759_v38  ;;  %v3424_v26 = vsub.f32 %v7339_v29, %v3423_v3 }
 0x51d   : > { %v7404_v40 = vpop.eup %6843  ;;  %v3425_v46 = vmul.f32 1.442695, %v3424_v26 }
 0x51e   : > { %v1052_v43 = vpop.permute.xlu0 %1051  ;;  %v2926_v45 = vsel %vm872_vm4, %v7404_v40, 0.0  ;;  %v1386_v50 = vpop.permute.xlu1 %1385 }
 0x51f   : > { %2927 = vadd.xlane.f32.xlu0 %v2926_v45  ;;  %6479 = vmatpush3.msra.mxu1 %v1052_v43  ;;  %6845 = vpow2.f32 %v3425_v46 }
 0x520   : > { %1041 = vmax.xlane.f32.xlu1 %v1040_v27  ;;  %6488 = vmatprep.subr.mxu1 %v6905_v10 }
 0x529   : > { %v7414_v9 = vpop.eup %6845 }
 0x52a   : > { %v3427_v35 = vsel %vm872_vm4, %v7414_v9, 0.0 }
 0x531   : > { %1719 = vrot.lane.b32.xlu1 %v7114_v15, %s6927_s24 }
 0x535   : > { %2053 = vrot.lane.b32.xlu0 %v7114_v15, %s6928_s17 }
 0x54f   : > { %v1382_v51 = vpop.xlane.xlu1 %1381 }
 0x554   : > { %3428 = vadd.xlane.f32.xlu0 %v3427_v35 }
 0x56a   : > { %3098 = vrot.lane.b32.xlu0 %v7112_v13, %s6927_s24  ;;  %s7919_s24 = scalar_lea.vmem %s7888_s6, %s7035_s23 }
 0x590   : > { %v1716_v52 = vpop.xlane.xlu1 %1715 }
 0x598   : > { %v2050_v25 = vpop.xlane.xlu1 %2049 }
 0x59c   : > { %v7419_v55 = vpop.xlane.xlu1 %2259 }
 0x5a4   : > { %v7421_v56 = vpop.xlane.xlu1 %2593 }
 0x5a8   : > { %v7423_v29 = vpop.xlane.xlu1 %2760 }
 0x5ad   : > { %v1042_v17 = vpop.xlane.xlu1 %1041 }
 0x5ae   : > { %v1043_v58 = vsub.f32 %v1039_v39, %v1042_v17 }
 0x5b0   : > { %v1044_v59 = vmul.f32 1.442695, %v1043_v58 }
 0x5b1   : > { %v1720_v8 = vpop.permute.xlu1 %1719 }
 0x5b2   : > { %6847 = vpow2.f32 %v1044_v59 }
 0x5b3   : > { %6849 = vpow2.f32 %v3091_v63 }
 0x5b4   : > { %6851 = vpow2.f32 %v3258_v42 }
 0x5bc   : > { %v6848_v30 = vpop.eup %6847 }
 0x5bd   : > { %v1046_v61 = vsel %vm872_vm4, %v6848_v30, 0.0  ;;  %v7429_v2 = vpop.eup %6849 }
 0x5be   : > { %1047 = vadd.xlane.f32.xlu1 %v1046_v61  ;;  %v3093_v4 = vsel %vm872_vm4, %v7429_v2, 0.0  ;;  %v7433_v48 = vpop.eup %6851 }
 0x5bf   : > { %v3260_v6 = vsel %vm872_vm4, %v7433_v48, 0.0 }
 0x5cf   : > { %1886 = vrot.lane.b32.xlu1 %v7114_v15, %s6929_s8  ;;  %v1553_v15 = vpop.permute.xlu0 %1552 }
 0x5d3   : > { %v1215_v19 = vpop.xlane.xlu0 %1214 }
 0x5d7   : > { %v1549_v11 = vpop.xlane.xlu0 %1548 }
 0x5db   : > { %v1883_v20 = vpop.xlane.xlu0 %1882 }
 0x5df   : > { %v2427_v31 = vpop.xlane.xlu0 %2426 }
 0x5e3   : > { %v2928_v33 = vpop.xlane.xlu0 %2927 }
 0x5e7   : > { %v2054_v43 = vpop.permute.xlu0 %2053 }
 0x5f3   : > { %3094 = vadd.xlane.f32.xlu1 %v3093_v4 }
 0x5f7   : > { %3261 = vadd.xlane.f32.xlu1 %v3260_v6 }
 0x608   : > { %2263 = vrot.lane.b32.xlu1 %v7112_v13, %s6907_s30  ;;  %s6930_s30 = smov 4  }
 0x60c   : > { %2430 = vrot.lane.b32.xlu1 %v7112_v13, %s6925_s25 }
 0x610   : > { %2597 = vrot.lane.b32.xlu1 %v7112_v13, %s6923_s27  ;;  %s7924_s27 = sld [smem:[#allocation10_spill]] (!%p6191_p5) }
 0x614   : > { %2764 = vrot.lane.b32.xlu1 %v7112_v13, %s6924_s0  ;;  %s7918_s0 = scalar_lea.vmem %s7887_s5, %s7035_s23 }
 0x618   : > { %2931 = vrot.lane.b32.xlu1 %v7112_v13, %s6926_s29  ;;  %s7925_s29 = sld [smem:[#allocation11_spill]] (!%p6191_p5) }
 0x61c   : > { %3265 = vrot.lane.b32.xlu1 %v7112_v13, %s6929_s8 }
 0x620   : > { %3432 = vrot.lane.b32.xlu1 %v7112_v13, %s6928_s17 }
 0x64b   : > { %v1048_v7 = vpop.xlane.xlu1 %1047 }
 0x64c   : > { %6853 = vrcp.f32 %v1048_v7 }
 0x64d   : > { %6855 = vrcp.f32 %v1215_v19 }
 0x64e   : > { %6857 = vrcp.f32 %v1382_v51 }
 0x64f   : > { %6859 = vrcp.f32 %v1549_v11  ;;  %v1887_v38 = vpop.permute.xlu1 %1886 }
 0x650   : > { %6861 = vrcp.f32 %v1716_v52  ;;  %v3429_v52 = vpop.xlane.xlu0 %3428 }
 0x651   : > { %6863 = vrcp.f32 %v1883_v20  ;;  %v3543_v20 = vld [vmem:[%s7048_s18] sm:$0xff] }
 0x652   : > { %6865 = vrcp.f32 %v2050_v25 }
 0x653   : > { %6867 = vrcp.f32 %v7419_v55 }
 0x654   : > { %6869 = vrcp.f32 %v2427_v31  ;;  %v3099_v17 = vpop.permute.xlu0 %3098  ;;  %v3545_v31 = vld [vmem:[%s7048_s18 + $0x10] sm:$0xff] }
 0x655   : > { %6871 = vrcp.f32 %v7421_v56 }
 0x656   : > { %v6854_v53 = vpop.eup %6853  ;;  %6873 = vrcp.f32 %v7423_v29 }
 0x657   : > { %v1050_v14 = vmul.f32 %v6854_v53, %v6848_v30  ;;  %v6856_v16 = vpop.eup %6855  ;;  %6875 = vrcp.f32 %v2928_v33 }
 0x658   : > { %v1217_v13 = vmul.f32 %v6856_v16, %v7357_v44  ;;  %v6858_v57 = vpop.eup %6857 }
 0x659   : > { %6481 = vmatmul.mubr.msk.f32.vlgmr.msra.gmra.mrb[6].mxu1 %vm872_vm4, %v1050_v14  ;;  %v1384_v22 = vmul.f32 %v6858_v57, %v7353_v41  ;;  %v6860_v28 = vpop.eup %6859  ;;  %v3544_v57 = vld [vmem:[%s7048_s18 + $0x8] sm:$0xff] }
 0x65a   : > { %6489 = vmatpush3.msra.mxu1 %v1219_v49  ;;  %6490 = vmatprep.mubr.msk.f32.mxu1 %vm6906_vm2, %v6905_v10  ;;  %v1551_v44 = vmul.f32 %v6860_v28, %v7364_v54  ;;  %v6862_v32 = vpop.eup %6861  ;;  %v6642_v28 = vpack.c.bf16 %v3544_v57, %v3543_v20 }
 0x65b   : > { %6498 = vmatprep.subr.mxu1 %v6905_v10  ;;  %v1718_v41 = vmul.f32 %v6862_v32, %v7370_v60  ;;  %v6864_v3 = vpop.eup %6863  ;;  %v3546_v32 = vld [vmem:[%s7048_s18 + $0x18] sm:$0xff] }
 0x65c   : > { %v1885_v54 = vmul.f32 %v6864_v3, %v7375_v1  ;;  %v6866_v39 = vpop.eup %6865  ;;  %6643 = vmatprep.subr.bf16.mxu0 %v6642_v28  ;;  %v6646_v33 = vpack.c.bf16 %v3546_v32, %v3545_v31  ;;  %v3682_v32 = vld [vmem:[%s7066_s2] sm:$0xff] }
 0x65d   : > { %6491 = vmatmul.mubr.msk.f32.vlgmr.msra.gmra.mrb[8].mxu1 %vm872_vm4, %v1217_v13  ;;  %v2052_v60 = vmul.f32 %v6866_v39, %v7380_v5  ;;  %v6868_v27 = vpop.eup %6867  ;;  %6645 = vmatpush3.bf16.msra.mxu0 %v6642_v28 }
 0x65e   : > { %6499 = vmatpush3.msra.mxu1 %v1386_v50  ;;  %6500 = vmatprep.mubr.msk.f32.mxu1 %vm6906_vm2, %v6905_v10  ;;  %v2262_v26 = vmul.f32 %v6868_v27, %v7385_v12  ;;  %v6870_v46 = vpop.eup %6869 }
 0x65f   : > { %6508 = vmatprep.subr.mxu1 %v6905_v10  ;;  %v2429_v35 = vmul.f32 %v6870_v46, %v7390_v21  ;;  %v6872_v49 = vpop.eup %6871  ;;  %6647 = vmatprep.subr.bf16.mxu0 %v6646_v33 }
 0x660   : > { %v2596_v12 = vmul.f32 %v6872_v49, %v7394_v62  ;;  %v6874_v51 = vpop.eup %6873 }
 0x661   : > { %6501 = vmatmul.mubr.msk.f32.vlgmr.msra.gmra.mrb[10].mxu1 %vm872_vm4, %v1384_v22  ;;  %v2763_v21 = vmul.f32 %v6874_v51, %v7399_v34  ;;  %v6876_v55 = vpop.eup %6875  ;;  %6649 = vmatpush3.bf16.msra.mxu0 %v6646_v33  ;;  %v3683_v33 = vld [vmem:[%s7066_s2 + $0x8] sm:$0xff] }
 0x662   : > { %6509 = vmatpush3.msra.mxu1 %v1553_v15  ;;  %6510 = vmatprep.mubr.msk.f32.mxu1 %vm6906_vm2, %v6905_v10  ;;  %v2930_v62 = vmul.f32 %v6876_v55, %v7404_v40 }
 0x663   : > { %6518 = vmatprep.subr.mxu1 %v6905_v10 }
 0x665   : > { %6511 = vmatmul.mubr.msk.f32.vlgmr.msra.gmra.mrb[12].mxu1 %vm872_vm4, %v1551_v44 }
 0x666   : > { %6519 = vmatpush3.msra.mxu1 %v1720_v8  ;;  %6520 = vmatprep.mubr.msk.f32.mxu1 %vm6906_vm2, %v6905_v10 }
 0x667   : > { %6528 = vmatprep.subr.mxu1 %v6905_v10 }
 0x669   : > { %6521 = vmatmul.mubr.msk.f32.vlgmr.msra.gmra.mrb[14].mxu1 %vm872_vm4, %v1718_v41 }
 0x66a   : > { %6529 = vmatpush3.msra.mxu1 %v1887_v38  ;;  %6530 = vmatprep.mubr.msk.f32.mxu1 %vm6906_vm2, %v6905_v10 }
 0x66b   : > { %6538 = vmatprep.subr.mxu1 %v6905_v10 }
 0x66d   : > { %6531 = vmatmul.mubr.msk.f32.vlgmr.msra.gmra.mrb[16].mxu1 %vm872_vm4, %v1885_v54 }
 0x66e   : > { %6539 = vmatpush3.msra.mxu1 %v2054_v43  ;;  %6540 = vmatprep.mubr.msk.f32.mxu1 %vm6906_vm2, %v6905_v10 }
 0x66f   : > { %6548 = vmatprep.subr.mxu1 %v6905_v10 }
 0x671   : > { %6541 = vmatmul.mubr.msk.f32.vlgmr.msra.gmra.mrb[18].mxu1 %vm872_vm4, %v2052_v60 }
 0x672   : > { %6550 = vmatprep.mubr.msk.f32.mxu1 %vm6906_vm2, %v6905_v10 }
 0x680   : > { %v3095_v1 = vpop.xlane.xlu1 %3094 }
 0x681   : > { %6877 = vrcp.f32 %v3095_v1 }
 0x684   : > { %v3262_v45 = vpop.xlane.xlu1 %3261 }
 0x685   : > { %6879 = vrcp.f32 %v3262_v45 }
 0x686   : > { %6881 = vrcp.f32 %v3429_v52 }
 0x688   : > { %v2264_v5 = vpop.permute.xlu1 %2263 }
 0x689   : > { %6549 = vmatpush3.msra.mxu1 %v2264_v5 }
 0x68a   : > { %6551 = vmatmul.mubr.msk.f32.vlgmr.msra.gmra.mrb[20].mxu1 %vm872_vm4, %v2262_v26  ;;  %6558 = vmatprep.subr.mxu1 %v6905_v10 }
 0x68b   : > { %6560 = vmatprep.mubr.msk.f32.mxu1 %vm6906_vm2, %v6905_v10  ;;  %v6878_v29 = vpop.eup %6877 }
 0x68c   : > { %v2431_v47 = vpop.permute.xlu1 %2430  ;;  %v3097_v34 = vmul.f32 %v6878_v29, %v7429_v2 }
 0x68d   : > { %6559 = vmatpush3.msra.mxu1 %v2431_v47 }
 0x68e   : > { %6561 = vmatmul.mubr.msk.f32.vlgmr.msra.gmra.mrb[22].mxu1 %vm872_vm4, %v2429_v35  ;;  %6568 = vmatprep.subr.mxu1 %v6905_v10 }
 0x68f   : > { %6570 = vmatprep.mubr.msk.f32.mxu1 %vm6906_vm2, %v6905_v10  ;;  %v6880_v59 = vpop.eup %6879 }
 0x690   : > { %v2598_v50 = vpop.permute.xlu1 %2597  ;;  %v3264_v40 = vmul.f32 %v6880_v59, %v7433_v48  ;;  %v6882_v61 = vpop.eup %6881 }
 0x691   : > { %6569 = vmatpush3.msra.mxu1 %v2598_v50  ;;  %v3431_v36 = vmul.f32 %v6882_v61, %v7414_v9 }
 0x692   : > { %6571 = vmatmul.mubr.msk.f32.vlgmr.msra.gmra.mrb[24].mxu1 %vm872_vm4, %v2596_v12  ;;  %6578 = vmatprep.subr.mxu1 %v6905_v10 }
 0x693   : > { %6580 = vmatprep.mubr.msk.f32.mxu1 %vm6906_vm2, %v6905_v10 }
 0x694   : > { %v2765_v25 = vpop.permute.xlu1 %2764 }
 0x695   : > { %6579 = vmatpush3.msra.mxu1 %v2765_v25 }
 0x696   : > { %6581 = vmatmul.mubr.msk.f32.vlgmr.msra.gmra.mrb[26].mxu1 %vm872_vm4, %v2763_v21  ;;  %6588 = vmatprep.subr.mxu1 %v6905_v10 }
 0x697   : > { %6590 = vmatprep.mubr.msk.f32.mxu1 %vm6906_vm2, %v6905_v10 }
 0x698   : > { %v2932_v56 = vpop.permute.xlu1 %2931 }
 0x699   : > { %6589 = vmatpush3.msra.mxu1 %v2932_v56 }
 0x69a   : > { %6591 = vmatmul.mubr.msk.f32.vlgmr.msra.gmra.mrb[28].mxu1 %vm872_vm4, %v2930_v62  ;;  %6598 = vmatprep.subr.mxu1 %v6905_v10 }
 0x69b   : > { %6599 = vmatpush3.msra.mxu1 %v3099_v17  ;;  %6600 = vmatprep.mubr.msk.f32.mxu1 %vm6906_vm2, %v6905_v10 }
 0x69c   : > { %v3266_v58 = vpop.permute.xlu1 %3265  ;;  %6608 = vmatprep.subr.mxu1 %v6905_v10 }
 0x69e   : > { %6601 = vmatmul.mubr.msk.f32.vlgmr.msra.gmra.mrb[30].mxu1 %vm872_vm4, %v3097_v34 }
 0x69f   : > { %6609 = vmatpush3.msra.mxu1 %v3266_v58  ;;  %6610 = vmatprep.mubr.msk.f32.mxu1 %vm6906_vm2, %v6905_v10 }
 0x6a0   : > { %v3433_v30 = vpop.permute.xlu1 %3432  ;;  %6618 = vmatprep.subr.mxu1 %v6905_v10 }
 0x6a2   : > { %6611 = vmatmul.mubr.msk.f32.vlgmr.msra.gmra.mrb[32].mxu1 %vm872_vm4, %v3264_v40 }
 0x6a3   : > { %6619 = vmatpush3.msra.mxu1 %v3433_v30  ;;  %6620 = vmatprep.mubr.msk.f32.mxu1 %vm6906_vm2, %v6905_v10 }
 0x6a6   : > { %6621 = vmatmul.mubr.msk.f32.vlgmr.msra.gmra.mrb[34].mxu1 %vm872_vm4, %v3431_v36 }
 0x72c   : > { %v1123_v63 = vpop.f32.mrb[6].mxu1 }
 0x72d   : > { %2130 = vrot.lane.b32.xlu1 %v1123_v63, %s6930_s30  ;;  %v6482_v0 = vpop.f32.mrb[7].mxu1 }
 0x730   : > { %v1290_v42 = vpop.f32.mrb[8].mxu1 }
 0x731   : > { %2134 = vrot.lane.b32.xlu1 %v1290_v42, %s6931_s14  ;;  %v6492_v2 = vpop.f32.mrb[9].mxu1 }
 0x732   : > { %v6015_v2 = vld [vmem:[%s7918_s0] ss:$0 sm:$0xff] }
 0x734   : > { %v1457_v4 = vpop.f32.mrb[10].mxu1 }
 0x735   : > { %2138 = vrot.lane.b32.xlu1 %v1457_v4, %s6932_s21  ;;  %v6502_v48 = vpop.f32.mrb[11].mxu1 }
 0x738   : > { %v1624_v6 = vpop.f32.mrb[12].mxu1 }
 0x739   : > { %2142 = vrot.lane.b32.xlu1 %v1624_v6, %s6933_s20  ;;  %v6512_v10 = vpop.f32.mrb[13].mxu1 }
 0x73c   : > { %v1791_v9 = vpop.f32.mrb[14].mxu1 }
 0x73d   : > { %2146 = vrot.lane.b32.xlu1 %v1791_v9, %s6934_s4  ;;  %v6522_v15 = vpop.f32.mrb[15].mxu1  ;;  %v6891_v9 = vld [vmem:[#allocation2 + $0x8] sm:$0xff] }
 0x740   : > { %v1958_v8 = vpop.f32.mrb[16].mxu1 }
 0x741   : > { %2150 = vrot.lane.b32.xlu1 %v1958_v8, %s6935_s1  ;;  %v6532_v19 = vpop.f32.mrb[17].mxu1  ;;  %v6892_v8 = vld [vmem:[#allocation2] sm:$0xff] }
 0x744   : > { %v2125_v7 = vpop.f32.mrb[18].mxu1 }
 0x745   : > { %v6542_v11 = vpop.f32.mrb[19].mxu1 }
 0x75d   : > { %v2335_v53 = vpop.f32.mrb[20].mxu1 }
 0x75e   : > { %v6552_v14 = vpop.f32.mrb[21].mxu1 }
 0x761   : > { %v2502_v16 = vpop.f32.mrb[22].mxu1 }
 0x762   : > { %3509 = vrot.lane.b32.xlu1 %v2502_v16, %s6930_s30  ;;  %v6562_v13 = vpop.f32.mrb[23].mxu1  ;;  %s7920_s30 = scalar_lea.vmem %s7889_s7, %s7035_s23 }
 0x765   : > { %v2669_v22 = vpop.f32.mrb[24].mxu1 }
 0x766   : > { %2154 = vrot.lane.b32.xlu1 %v2125_v7, %s6936_s28  ;;  %3513 = vrot.lane.b32.xlu0 %v2669_v22, %s6931_s14  ;;  %v6572_v44 = vpop.f32.mrb[25].mxu1  ;;  %s7921_s14 = scalar_lea.vmem %s7894_s12, %s7035_s23 }
 0x769   : > { %v2836_v41 = vpop.f32.mrb[26].mxu1 }
 0x76a   : > { %3517 = vrot.lane.b32.xlu0 %v2836_v41, %s6932_s21  ;;  %v6582_v3 = vpop.f32.mrb[27].mxu1  ;;  %v3690_v41 = vld [vmem:[%s7066_s2 + $0x40] sm:$0xff] }
 0x76b   : > { %v6021_v3 = vcombine.high %v3682_v32, %v3690_v41 }
 0x76d   : > { %v3003_v38 = vpop.f32.mrb[28].mxu1  ;;  %4219 = vmatprep.subr.bf16.mxu1 %v6021_v3  ;;  %v3688_v3 = vld [vmem:[%s7066_s2 + $0x30] sm:$0xff] }
 0x76e   : > { %3521 = vrot.lane.b32.xlu0 %v3003_v38, %s6933_s20  ;;  %v6592_v54 = vpop.f32.mrb[29].mxu1  ;;  %v3691_v38 = vld [vmem:[%s7066_s2 + $0x48] sm:$0xff] }
 0x76f   : > { %v6020_v54 = vcombine.low %v3682_v32, %v3690_v41 }
 0x771   : > { %v3170_v39 = vpop.f32.mrb[30].mxu1  ;;  %4220 = vmatpush1.bf16.msra.mxu1 %v6020_v54  ;;  %v3689_v54 = vld [vmem:[%s7066_s2 + $0x38] sm:$0xff] }
 0x772   : > { %3525 = vrot.lane.b32.xlu0 %v3170_v39, %s6934_s4  ;;  %v6602_v43 = vpop.f32.mrb[31].mxu1  ;;  %v6022_v39 = vcombine.low %v3683_v33, %v3691_v38  ;;  %s7922_s4 = scalar_lea.vmem %s7895_s13, %s7035_s23 }
 0x773   : > { %v6023_v43 = vcombine.high %v3683_v33, %v3691_v38  ;;  %v3696_v38 = vld [vmem:[%s7066_s2 + $0x70] sm:$0xff] }
 0x775   : > { %v3337_v60 = vpop.f32.mrb[32].mxu1  ;;  %4262 = vmatprep.subr.bf16.mxu0 %v6023_v43 }
 0x776   : > { %3529 = vrot.lane.b32.xlu0 %v3337_v60, %s6935_s1  ;;  %v6612_v1 = vpop.f32.mrb[33].mxu1  ;;  %v3698_v60 = vld [vmem:[%s7066_s2 + $0x80] sm:$0xff]  ;;  %s7923_s1 = sld [smem:[#allocation9_spill]] (!%p6191_p5) }
 0x777   : > { %v3706_v1 = vld [vmem:[%s7066_s2 + $0xc0] sm:$0xff] }
 0x779   : > { %v3504_v45 = vpop.f32.mrb[34].mxu1 }
 0x77a   : > { %3533 = vrot.lane.b32.xlu1 %v3504_v45, %s6936_s28  ;;  %v6622_v27 = vpop.f32.mrb[35].mxu1  ;;  %v3699_v45 = vld [vmem:[%s7066_s2 + $0x88] sm:$0xff] }
 0x77b   : > { %v6037_v27 = vcombine.high %v3698_v60, %v3706_v1 }
 0x77d   : > { %4221 = vmatprep.subr.bf16.mxu1 %v6037_v27  ;;  %v3704_v27 = vld [vmem:[%s7066_s2 + $0xb0] sm:$0xff] }
 0x79f   : > { %v2131_v26 = vpop.permute.xlu1 %2130 }
 0x7a0   : > { %v2157_v12 = vsel %vm791_vm3, %v7285_v18, %v2131_v26  ;;  %v3707_v26 = vld [vmem:[%s7066_s2 + $0xc8] sm:$0xff] }
 0x7a3   : > { %v2135_v5 = vpop.permute.xlu1 %2134 }
 0x7a4   : > { %v2158_v50 = vsel %vm872_vm4, %v2157_v12, %v2135_v5  ;;  %v6036_v5 = vcombine.low %v3698_v60, %v3706_v1  ;;  %v3685_v12 = vld [vmem:[%s7066_s2 + $0x18] sm:$0xff]  ;;  %v6033_v1 = vcombine.high %v3688_v3, %v3696_v38 }
 0x7a6   : > { %4222 = vmatpush1.bf16.msra.mxu1 %v6036_v5  ;;  %v3705_v5 = vld [vmem:[%s7066_s2 + $0xb8] sm:$0xff] }
 0x7a7   : > { %v2139_v46 = vpop.permute.xlu1 %2138 }
 0x7a8   : > { %v2160_v21 = vsel %vm2159_vm5, %v2158_v50, %v2139_v46  ;;  %v6038_v46 = vcombine.low %v3699_v45, %v3707_v26  ;;  %v6937_v50 = vmov 0  }
 0x7a9   : > { %4251 = vmatprep.mubr.bf16.mxu1 %v6937_v50 }
 0x7ab   : > { %v2143_v35 = vpop.permute.xlu1 %2142 }
 0x7ac   : > { %v2162_v52 = vsel %vm2161_vm6, %v2160_v21, %v2143_v35  ;;  %v6039_v35 = vcombine.high %v3699_v45, %v3707_v26  ;;  %v3693_v21 = vld [vmem:[%s7066_s2 + $0x58] sm:$0xff]  ;;  %v3712_v26 = vld [vmem:[%s7066_s2 + $0xf0] sm:$0xff] }
 0x7af   : > { %v2147_v47 = vpop.permute.xlu1 %2146 }
 0x7b0   : > { %v2164_v25 = vsel %vm2163_vm7, %v2162_v52, %v2147_v47  ;;  %v3684_v47 = vld [vmem:[%s7066_s2 + $0x10] sm:$0xff] }
 0x7b3   : > { %v2151_v49 = vpop.permute.xlu1 %2150 }
 0x7b4   : > { %v2166_v55 = vsel %vm2165_vm8, %v2164_v25, %v2151_v49  ;;  %v3692_v49 = vld [vmem:[%s7066_s2 + $0x50] sm:$0xff]  ;;  %v6026_v25 = vcombine.low %v3685_v12, %v3693_v21 }
 0x7b5   : > { %v6024_v52 = vcombine.low %v3684_v47, %v3692_v49 }
 0x7d4   : > { %v3510_v51 = vpop.permute.xlu1 %3509 }
 0x7d5   : > { %v3536_v58 = vsel %vm791_vm3, %v2335_v53, %v3510_v51  ;;  %v6025_v51 = vcombine.high %v3684_v47, %v3692_v49  ;;  %v6049_v49 = vcombine.high %v3704_v27, %v3712_v26 }
 0x7d7   : > { %4305 = vmatprep.subr.bf16.mxu1 %v6025_v51  ;;  %v6048_v51 = vcombine.low %v3704_v27, %v3712_v26 }
 0x7d8   : > { %v2155_v62 = vpop.permute.xlu1 %2154  ;;  %v3514_v56 = vpop.permute.xlu0 %3513 }
 0x7d9   : > { %v2168_v18 = vsel %vm2167_vm9, %v2166_v55, %v2155_v62  ;;  %v3537_v59 = vsel %vm872_vm4, %v3536_v58, %v3514_v56  ;;  %v6027_v55 = vcombine.high %v3685_v12, %v3693_v21 }
 0x7da   : > { %6631 = vmatprep.mubr.msk.f32.mxu0 %vm706_vm1, %v2168_v18 }
 0x7dc   : > { %v3518_v29 = vpop.permute.xlu0 %3517 }
 0x7dd   : > { %v3538_v40 = vsel %vm2159_vm5, %v3537_v59, %v3518_v29 }
 0x7e0   : > { %v3522_v17 = vpop.permute.xlu0 %3521 }
 0x7e1   : > { %v3539_v61 = vsel %vm2161_vm6, %v3538_v40, %v3522_v17  ;;  %v6018_v40 = vld [vmem:[%s7919_s24] ss:$0 sm:$0xff] }
 0x7e4   : > { %v3526_v34 = vpop.permute.xlu0 %3525 }
 0x7e5   : > { %v3540_v36 = vsel %vm2163_vm7, %v3539_v61, %v3526_v34 }
 0x7e8   : > { %v3530_v30 = vpop.permute.xlu0 %3529 }
 0x7e9   : > { %v3541_v63 = vsel %vm2165_vm8, %v3540_v36, %v3530_v30 }
 0x7ec   : > { %v3534_v0 = vpop.permute.xlu1 %3533 }
 0x7ed   : > { %v3542_v42 = vsel %vm2167_vm9, %v3541_v63, %v3534_v0  ;;  %v6019_v63 = vld [vmem:[%s7920_s30] ss:$0 sm:$0xff] }
 0x7ee   : > { %6632 = vmatmul.mubr.msk.f32.vlgmr.msra.gmra.mrb[30].mxu0 %vm706_vm1, %v3542_v42  ;;  %v3700_v42 = vld [vmem:[%s7066_s2 + $0x90] sm:$0xff] }
 0x7ef   : > { %4263 = vmatpush1.bf16.msra.mxu0 %v6022_v39  ;;  %4294 = vmatprep.mubr.bf16.mxu0 %v6937_v50  ;;  %v3697_v39 = vld [vmem:[%s7066_s2 + $0x78] sm:$0xff] }
 0x7f0   : > { %4264 = vmatprep.subr.bf16.mxu0 %v6039_v35  ;;  %v6035_v45 = vcombine.high %v3689_v54, %v3697_v39  ;;  %v6032_v35 = vcombine.low %v3688_v3, %v3696_v38  ;;  %v6034_v47 = vcombine.low %v3689_v54, %v3697_v39  ;;  %v3994_v39 = vsub.s32 4, %v7146_v23 }
 0x7f3   : > { %4265 = vmatpush1.bf16.msra.mxu0 %v6038_v46  ;;  %v3713_v46 = vld [vmem:[%s7066_s2 + $0xf8] sm:$0xff] }
 0x7f4   : > { %4348 = vmatprep.subr.bf16.mxu0 %v6027_v55  ;;  %v6051_v12 = vcombine.high %v3705_v5, %v3713_v46  ;;  %v6050_v21 = vcombine.low %v3705_v5, %v3713_v46  ;;  %v6693_v55 = vld [vmem:[%s7078_s16] sm:$0xff]  }
 0x8c1   : > { %v6633_v4 = vpop.f32.mrb[30].mxu0 }
 0x8c2   : > { %v3632_v48 = vadd.f32 %v6633_v4, %v6015_v2  ;;  %v3626_v6 = vpop.f32.mrb[31].mxu0  ;;  %v3701_v4 = vld [vmem:[%s7066_s2 + $0x98] sm:$0xff] }
 0x8c3   : > { %v3627_v10 = vadd.f32 %v6015_v2, %v3626_v6  ;;  %v3708_v2 = vld [vmem:[%s7066_s2 + $0xd0] sm:$0xff] }
 0x8c4   : > { %v3636_v15 = vadd.f32 %v6891_v9, %v3632_v48  ;;  %v3709_v48 = vld [vmem:[%s7066_s2 + $0xd8] sm:$0xff] }
 0x8c5   : > { %v3635_v19 = vadd.f32 %v6892_v8, %v3627_v10  ;;  %v6043_v8 = vcombine.high %v3701_v4, %v3709_v48 }
 0x8c6   : > { %v3642_v7 = vsel %vm706_vm1, %v3636_v15, 0.0 }
 0x8c7   : > { %3643 = vadd.xlane.f32.xlu1 %v3642_v7  ;;  %v3639_v11 = vsel %vm706_vm1, %v3635_v19, 0.0  ;;  %v3694_v7 = vld [vmem:[%s7066_s2 + $0x60] sm:$0xff] }
 0x8c8   : > { %3640 = vadd.xlane.f32.xlu0 %v3639_v11  ;;  %v3687_v11 = vld [vmem:[%s7066_s2 + $0x28] sm:$0xff] }
 0x954   : > { %v3644_v53 = vpop.xlane.xlu1 %3643 }
 0x955   : > { %v3647_v14 = vmul.f32 0.03125, %v3644_v53  ;;  %v3641_v16 = vpop.xlane.xlu0 %3640  ;;  %v3695_v53 = vld [vmem:[%s7066_s2 + $0x68] sm:$0xff] }
 0x956   : > { %v3646_v13 = vmul.f32 0.03125, %v3641_v16  ;;  %v6042_v16 = vcombine.low %v3701_v4, %v3709_v48  ;;  %v6030_v32 = vcombine.low %v3687_v11, %v3695_v53  ;;  %v6711_v4 = vld [vmem:[%s7078_s16 + $0x68] sm:$0xff]  }
 0x957   : > { %v3649_v20 = vsub.f32 %v3636_v15, %v3647_v14  ;;  %v6041_v15 = vcombine.high %v3700_v42, %v3708_v2  ;;  %v6040_v14 = vcombine.low %v3700_v42, %v3708_v2  ;;  %v6709_v42 = vld [vmem:[%s7078_s16 + $0x20] sm:$0xff]   ;;  %v6712_v48 = vld [vmem:[%s7078_s16 + $0xe8] sm:$0xff]  }
 0x958   : > { %v3648_v57 = vsub.f32 %v3635_v19, %v3646_v13  ;;  %v3686_v19 = vld [vmem:[%s7066_s2 + $0x20] sm:$0xff] }
 0x959   : > { %v3651_v44 = vmul.f32 %v3649_v20, %v3649_v20  ;;  %v6029_v13 = vcombine.high %v3686_v19, %v3694_v7  ;;  %v6710_v2 = vld [vmem:[%s7078_s16 + $0xa0] sm:$0xff]  }
 0x95a   : > { %v3650_v22 = vmul.f32 %v3648_v57, %v3648_v57 }
 0x95b   : > { %v3655_v31 = vsel %vm706_vm1, %v3651_v44, 0.0  ;;  %v3711_v44 = vld [vmem:[%s7066_s2 + $0xe8] sm:$0xff] }
 0x95c   : > { %v3652_v28 = vsel %vm706_vm1, %v3650_v22, 0.0  ;;  %v3710_v22 = vld [vmem:[%s7066_s2 + $0xe0] sm:$0xff] }
 0x95d   : > { %3653 = vadd.xlane.f32.xlu0 %v3652_v28  ;;  %v3703_v28 = vld [vmem:[%s7066_s2 + $0xa8] sm:$0xff] }
 0x95e   : > { %v6047_v33 = vcombine.high %v3703_v28, %v3711_v44  ;;  %v6046_v60 = vcombine.low %v3703_v28, %v3711_v44  ;;  %v7673_v28 = vld [vmem:[%s7072_s19 + $0x8] sm:$0xff] }
 0x961   : > { %3656 = vadd.xlane.f32.xlu0 %v3655_v31  ;;  %v6028_v31 = vcombine.low %v3686_v19, %v3694_v7  ;;  %v6716_v19 = vld [vmem:[%s7078_s16 + $0xf0] sm:$0xff]  }
 0x962   : > { %v6717_v7 = vld [vmem:[%s7078_s16 + $0x30] sm:$0xff]  }
 0x9ea   : > { %v3654_v62 = vpop.xlane.xlu0 %3653 }
 0x9eb   : > { %v3658_v56 = vmul.f32 0.03125, %v3654_v62  ;;  %v6694_v62 = vld [vmem:[%s7078_s16 + $0x80] sm:$0xff]  }
 0x9ed   : > { %v3660_v18 = vadd.f32 1e-05, %v3658_v56  ;;  %v6695_v56 = vld [vmem:[%s7078_s16 + $0x48] sm:$0xff]  }
 0x9ee   : > { %v3657_v29 = vpop.xlane.xlu0 %3656 }
 0x9ef   : > { %6883 = vrsqrt.f32 %v3660_v18  ;;  %v3659_v17 = vmul.f32 0.03125, %v3657_v29  ;;  %v6696_v18 = vld [vmem:[%s7078_s16 + $0xc8] sm:$0xff]  }
 0x9f0   : > { %v6698_v29 = vld [vmem:[%s7078_s16 + $0x88] sm:$0xff]  }
 0x9f1   : > { %v3661_v34 = vadd.f32 1e-05, %v3659_v17  ;;  %v6699_v17 = vld [vmem:[%s7078_s16 + $0x50] sm:$0xff]  }
 0x9f3   : > { %6885 = vrsqrt.f32 %v3661_v34  ;;  %v6700_v34 = vld [vmem:[%s7078_s16 + $0xd0] sm:$0xff]  }
 0x9f9   : > { %v6884_v58 = vpop.eup %6883 }
 0x9fa   : > { %v3664_v59 = vmul.f32 %v6884_v58, %v3648_v57  ;;  %v3702_v57 = vld [vmem:[%s7066_s2 + $0xa0] sm:$0xff]  ;;  %v6701_v58 = vld [vmem:[%s7078_s16 + $0x10] sm:$0xff]  }
 0x9fb   : > { %v6045_v41 = vcombine.high %v3702_v57, %v3710_v22  ;;  %v6044_v43 = vcombine.low %v3702_v57, %v3710_v22  ;;  %v6724_v57 = vld [vmem:[%s7078_s16 + $0x1c0] sm:$0xff]   ;;  %v4002_v22 = vsub.s32 6, %v7146_v23 }
 0x9fc   : > { %v3672_v61 = vmul.f32 %v6018_v40, %v3664_v59  ;;  %v6702_v59 = vld [vmem:[%s7078_s16 + $0x90] sm:$0xff]  }
 0x9fd   : > { %v6886_v30 = vpop.eup %6885  ;;  %v7676_v44 = vrot.slane %v7673_v28, %v4002_v22 }
 0x9fe   : > { %v3665_v36 = vmul.f32 %v6886_v30, %v3649_v20  ;;  %v7591_v6 = vadd.f32 %v6019_v63, %v3672_v61  ;;  %v6031_v20 = vcombine.high %v3687_v11, %v3695_v53  ;;  %v6704_v30 = vld [vmem:[%s7078_s16 + $0xd8] sm:$0xff]   ;;  %v6718_v11 = vld [vmem:[%s7078_s16 + $0xb0] sm:$0xff]  }
 0x9ff   : > { %v6705_v61 = vld [vmem:[%s7078_s16 + $0x18] sm:$0xff]  }
 0xa00   : > { %v3673_v0 = vmul.f32 %v6018_v40, %v3665_v36  ;;  %v6703_v40 = vld [vmem:[%s7078_s16 + $0x58] sm:$0xff]  }
 0xa01   : > { %v6706_v36 = vld [vmem:[%s7078_s16 + $0x98] sm:$0xff]  }
 0xa02   : > { %v7593_v10 = vadd.f32 %v6019_v63, %v3673_v0  ;;  %v6707_v63 = vld [vmem:[%s7078_s16 + $0x60] sm:$0xff]   ;;  %v6719_v53 = vld [vmem:[%s7078_s16 + $0x78] sm:$0xff]  }
 0xa03   : > { %v6708_v0 = vld [vmem:[%s7078_s16 + $0xe0] sm:$0xff]  }
 0xa04   : > { %v7597_v9 = vpack.c.bf16 %v7593_v10, %v7591_v6 }
 0xa06   : > { %6052 = vmatmul.mubr.msk.bf16.vlgmr.msra.gmra.mrb[36].mxu1 %vm706_vm1, %v7597_v9  ;;  %6053 = vmatmul.mubr.msk.bf16.vlgmr.msra.gmra.mrb[32].mxu0 %vm706_vm1, %v7597_v9 }
 0xa07   : > { %4306 = vmatpush1.bf16.msra.mxu1 %v6024_v52  ;;  %4349 = vmatpush1.bf16.msra.mxu0 %v6026_v25  ;;  %v6691_v52 = vld [vmem:[%s7078_s16 + $0x40] sm:$0xff]  }
 0xa08   : > { %4307 = vmatprep.subr.bf16.mxu1 %v6041_v15  ;;  %4350 = vmatprep.subr.bf16.mxu0 %v6043_v8  ;;  %v6692_v25 = vld [vmem:[%s7078_s16 + $0xc0] sm:$0xff]   ;;  %v6714_v15 = vld [vmem:[%s7078_s16 + $0xa8] sm:$0xff]   ;;  %v6715_v8 = vld [vmem:[%s7078_s16 + $0x70] sm:$0xff]  }
 0xa09   : > { %4337 = vmatprep.mubr.bf16.mxu1 %v6937_v50  ;;  %4380 = vmatprep.mubr.bf16.mxu0 %v6937_v50 }
 0xa0b   : > { %4308 = vmatpush1.bf16.msra.mxu1 %v6040_v14  ;;  %4351 = vmatpush1.bf16.msra.mxu0 %v6042_v16  ;;  %v6720_v14 = vld [vmem:[%s7078_s16 + $0xf8] sm:$0xff]  }
 0xa0c   : > { %4391 = vmatprep.subr.bf16.mxu1 %v6029_v13  ;;  %4434 = vmatprep.subr.bf16.mxu0 %v6031_v20  ;;  %v6721_v16 = vld [vmem:[%s7078_s16 + $0x38] sm:$0xff]   ;;  %v6723_v20 = vld [vmem:[%s7078_s16 + $0x140] sm:$0xff]  }
 0xa0d   : > { %v6722_v13 = vld [vmem:[%s7078_s16 + $0xb8] sm:$0xff]  }
 0xa0e   : > { %6054 = vmatmul.mubr.msk.bf16.vlgmr.msra.gmra.mrb[40].mxu1 %vm706_vm1, %v7597_v9  ;;  %6055 = vmatmul.mubr.msk.bf16.vlgmr.msra.gmra.mrb[36].mxu0 %vm706_vm1, %v7597_v9 }
 0xa0f   : > { %4392 = vmatpush1.bf16.msra.mxu1 %v6028_v31  ;;  %4435 = vmatpush1.bf16.msra.mxu0 %v6030_v32  ;;  %v3986_v31 = vsub.s32 2, %v7146_v23  ;;  %v3714_v32 = vld [vmem:[%s7072_s19] sm:$0xff] }
 0xa10   : > { %4393 = vmatprep.subr.bf16.mxu1 %v6045_v41  ;;  %4436 = vmatprep.subr.bf16.mxu0 %v6047_v33  ;;  %v3990_v41 = vsub.s32 3, %v7146_v23  ;;  %v3979_v33 = vrot.slane %v3714_v32, %v7149_v24  ;;  %v3983_v38 = vrot.slane %v3714_v32, %v7300_v37 }
 0xa11   : > { %4423 = vmatprep.mubr.bf16.mxu1 %v6937_v50  ;;  %4466 = vmatprep.mubr.bf16.mxu0 %v6937_v50  ;;  %v3987_v3 = vrot.slane %v3714_v32, %v3986_v31 }
 0xa12   : > { %v3991_v54 = vrot.slane %v3714_v32, %v3990_v41 }
 0xa13   : > { %4394 = vmatpush1.bf16.msra.mxu1 %v6044_v43  ;;  %4437 = vmatpush1.bf16.msra.mxu0 %v6046_v60 }
 0xa14   : > { %4477 = vmatprep.subr.bf16.mxu1 %v6033_v1  ;;  %4520 = vmatprep.subr.bf16.mxu0 %v6035_v45  ;;  %v3998_v1 = vsub.s32 5, %v7146_v23  ;;  %v4006_v45 = vsub.s32 7, %v7146_v23 }
 0xa16   : > { %6056 = vmatmul.mubr.msk.bf16.vlgmr.msra.gmra.mrb[44].mxu1 %vm706_vm1, %v7597_v9  ;;  %6057 = vmatmul.mubr.msk.bf16.vlgmr.msra.gmra.mrb[40].mxu0 %vm706_vm1, %v7597_v9 }
 0xa17   : > { %4478 = vmatpush1.bf16.msra.mxu1 %v6032_v35  ;;  %4521 = vmatpush1.bf16.msra.mxu0 %v6034_v47 }
 0xa18   : > { %4479 = vmatprep.subr.bf16.mxu1 %v6049_v49  ;;  %4522 = vmatprep.subr.bf16.mxu0 %v6051_v12 }
 0xa19   : > { %4509 = vmatprep.mubr.bf16.mxu1 %v6937_v50  ;;  %4552 = vmatprep.mubr.bf16.mxu0 %v6937_v50  ;;  %v6697_v50 = vld [vmem:[%s7078_s16 + $0x8] sm:$0xff]  }
 0xa1b   : > { %4480 = vmatpush1.bf16.msra.mxu1 %v6048_v51  ;;  %4523 = vmatpush1.bf16.msra.mxu0 %v6050_v21 }
 0xa1c   : > { %6276 = vmatprep.subr.bf16.mxu1 %v6691_v52  ;;  %6298 = vmatprep.subr.bf16.mxu0 %v6692_v25 }
 0xa1e   : > { %6058 = vmatmul.mubr.msk.bf16.vlgmr.msra.gmra.mrb[48].mxu1 %vm706_vm1, %v7597_v9  ;;  %6059 = vmatmul.mubr.msk.bf16.vlgmr.msra.gmra.mrb[44].mxu0 %vm706_vm1, %v7597_v9  ;;  %v6713_v9 = vld [vmem:[%s7078_s16 + $0x28] sm:$0xff]  }
 0xa1f   : > { %6277 = vmatpush3.bf16.msra.mxu1 %v6693_v55  ;;  %6299 = vmatpush3.bf16.msra.mxu0 %v6694_v62  ;;  %v3995_v55 = vrot.slane %v3714_v32, %v3994_v39  ;;  %v4003_v62 = vrot.slane %v3714_v32, %v4002_v22 }
 0xa20   : > { %6278 = vmatprep.subr.bf16.mxu1 %v6695_v56  ;;  %6300 = vmatprep.subr.bf16.mxu0 %v6696_v18 }
 0xa23   : > { %6279 = vmatpush3.bf16.msra.mxu1 %v6697_v50  ;;  %6301 = vmatpush3.bf16.msra.mxu0 %v6698_v29  ;;  %v3999_v50 = vrot.slane %v3714_v32, %v3998_v1  ;;  %v4007_v29 = vrot.slane %v3714_v32, %v4006_v45  ;;  %v4019_v32 = vrot.slane %v7673_v28, %v3986_v31 }
 0xa24   : > { %6280 = vmatprep.subr.bf16.mxu1 %v6699_v17  ;;  %6302 = vmatprep.subr.bf16.mxu0 %v6700_v34  ;;  %v4023_v31 = vrot.slane %v7673_v28, %v3990_v41 }
 0xa27   : > { %6281 = vmatpush3.bf16.msra.mxu1 %v6701_v58  ;;  %6303 = vmatpush3.bf16.msra.mxu0 %v6702_v59 }
 0xa28   : > { %6282 = vmatprep.subr.bf16.mxu1 %v6703_v40  ;;  %6304 = vmatprep.subr.bf16.mxu0 %v6704_v30 }
 0xa2b   : > { %6283 = vmatpush3.bf16.msra.mxu1 %v6705_v61  ;;  %6305 = vmatpush3.bf16.msra.mxu0 %v6706_v36 }
 0xa2c   : > { %6284 = vmatprep.subr.bf16.mxu1 %v6707_v63  ;;  %6306 = vmatprep.subr.bf16.mxu0 %v6708_v0 }
 0xa2f   : > { %6285 = vmatpush3.bf16.msra.mxu1 %v6709_v42  ;;  %6307 = vmatpush3.bf16.msra.mxu0 %v6710_v2 }
 0xa30   : > { %6286 = vmatprep.subr.bf16.mxu1 %v6711_v4  ;;  %6308 = vmatprep.subr.bf16.mxu0 %v6712_v48 }
 0xa33   : > { %6287 = vmatpush3.bf16.msra.mxu1 %v6713_v9  ;;  %6309 = vmatpush3.bf16.msra.mxu0 %v6714_v15  ;;  %v6725_v9 = vld [vmem:[%s7078_s16 + $0x100] sm:$0xff]  }
 0xa34   : > { %6288 = vmatprep.subr.bf16.mxu1 %v6715_v8  ;;  %6310 = vmatprep.subr.bf16.mxu0 %v6716_v19  ;;  %v6726_v15 = vld [vmem:[%s7078_s16 + $0x180] sm:$0xff]  }
 0xa37   : > { %6289 = vmatpush3.bf16.msra.mxu1 %v6717_v7  ;;  %6311 = vmatpush3.bf16.msra.mxu0 %v6718_v11 }
 0xa38   : > { %6290 = vmatprep.subr.bf16.mxu1 %v6719_v53  ;;  %6312 = vmatprep.subr.bf16.mxu0 %v6720_v14  ;;  %v6727_v53 = vld [vmem:[%s7078_s16 + $0x148] sm:$0xff]  }
 0xa39   : > { %v6728_v14 = vld [vmem:[%s7078_s16 + $0x1c8] sm:$0xff]  }
 0xa3b   : > { %6291 = vmatpush3.bf16.msra.mxu1 %v6721_v16  ;;  %6313 = vmatpush3.bf16.msra.mxu0 %v6722_v13  ;;  %v4011_v16 = vrot.slane %v7673_v28, %v7149_v24  ;;  %v4015_v24 = vrot.slane %v7673_v28, %v7300_v37  ;;  %v6732_v37 = vld [vmem:[%s7078_s16 + $0x1d0] sm:$0xff]  }
 0xa3c   : > { %6320 = vmatprep.subr.bf16.mxu1 %v6723_v20  ;;  %6342 = vmatprep.subr.bf16.mxu0 %v6724_v57 }
 0xad9   : > { %v4253_v43 = vpop.f32.mrb[36].mxu1  ;;  %v4296_v60 = vpop.f32.mrb[32].mxu0 }
 0xada   : > { %v4254_v27 = vadd.f32 %v4253_v43, %v3979_v33  ;;  %v4297_v26 = vadd.f32 %v4296_v60, %v3987_v3  ;;  %v4255_v5 = vpop.f32.mrb[37].mxu1  ;;  %v4298_v46 = vpop.f32.mrb[33].mxu0 }
 0xadb   : > { %v4256_v35 = vadd.f32 %v4255_v5, %v3983_v38  ;;  %v4299_v47 = vadd.f32 %v4298_v46, %v3991_v54  ;;  %v4257_v49 = vpop.f32.mrb[38].mxu1  ;;  %v4300_v12 = vpop.f32.mrb[34].mxu0 }
 0xadc   : > { %v4258_v51 = vadd.f32 %v4257_v49, %v3979_v33  ;;  %v4301_v21 = vadd.f32 %v4300_v12, %v3987_v3  ;;  %v4259_v52 = vpop.f32.mrb[39].mxu1  ;;  %v4302_v25 = vpop.f32.mrb[35].mxu0  ;;  %v4563_v17 = vmax.f32 %v4254_v27, 0.0  ;;  %v4565_v34 = vmax.f32 %v4297_v26, 0.0  ;;  %v6729_v27 = vld [vmem:[%s7078_s16 + $0x108] sm:$0xff]   ;;  %v6731_v49 = vld [vmem:[%s7078_s16 + $0x150] sm:$0xff]  }
 0xadd   : > { %v4260_v56 = vadd.f32 %v4259_v52, %v3983_v38  ;;  %v4303_v18 = vadd.f32 %v4302_v25, %v3991_v54  ;;  %v4564_v40 = vmax.f32 %v4256_v35, 0.0  ;;  %v4566_v30 = vmax.f32 %v4299_v47, 0.0  ;;  %v6730_v26 = vld [vmem:[%s7078_s16 + $0x188] sm:$0xff]  }
 0xade   : > { %v4579_v58 = vmax.f32 %v4258_v51, 0.0  ;;  %v4581_v59 = vmax.f32 %v4301_v21, 0.0 }
 0xadf   : > { %v4580_v61 = vmax.f32 %v4260_v56, 0.0  ;;  %v4582_v36 = vmax.f32 %v4303_v18, 0.0 }
 0xae0   : > { %v4595_v63 = vpack.c.bf16 %v4579_v58, %v4563_v17  ;;  %v4597_v0 = vpack.c.bf16 %v4581_v59, %v4565_v34 }
 0xae1   : > { %v4596_v42 = vpack.c.bf16 %v4580_v61, %v4564_v40  ;;  %v4598_v2 = vpack.c.bf16 %v4582_v36, %v4566_v30  ;;  %v4339_v4 = vpop.f32.mrb[40].mxu1  ;;  %v4382_v48 = vpop.f32.mrb[36].mxu0  ;;  %v6735_v40 = vld [vmem:[%s7078_s16 + $0x158] sm:$0xff]  }
 0xae2   : > { %v4340_v8 = vadd.f32 %v4339_v4, %v3995_v55  ;;  %v4383_v19 = vadd.f32 %v4382_v48, %v4003_v62  ;;  %v4341_v7 = vpop.f32.mrb[41].mxu1  ;;  %v4384_v11 = vpop.f32.mrb[37].mxu0  ;;  %v6736_v30 = vld [vmem:[%s7078_s16 + $0x1d8] sm:$0xff]  }
 0xae3   : > { %v4342_v13 = vadd.f32 %v4341_v7, %v3999_v50  ;;  %v4385_v20 = vadd.f32 %v4384_v11, %v4007_v29  ;;  %v4343_v57 = vpop.f32.mrb[42].mxu1  ;;  %v4386_v22 = vpop.f32.mrb[38].mxu0  ;;  %5417 = vmatprep.mubr.bf16.mxu1 %v4596_v42  ;;  %5458 = vmatprep.mubr.bf16.mxu0 %v4598_v2  ;;  %v6737_v7 = vld [vmem:[%s7078_s16 + $0x118] sm:$0xff]  }
 0xae4   : > { %v4344_v33 = vadd.f32 %v4343_v57, %v3995_v55  ;;  %v4387_v3 = vadd.f32 %v4386_v22, %v4003_v62  ;;  %v4345_v38 = vpop.f32.mrb[43].mxu1  ;;  %v4388_v54 = vpop.f32.mrb[39].mxu0  ;;  %5418 = vmatmul.mubr.bf16.vlgmr.msra.gmra.mrb[52].mxu1 %v4595_v63  ;;  %5459 = vmatmul.mubr.bf16.vlgmr.msra.gmra.mrb[48].mxu0 %v4597_v0  ;;  %v4567_v5 = vmax.f32 %v4340_v8, 0.0  ;;  %v4569_v46 = vmax.f32 %v4383_v19, 0.0  ;;  %v6738_v11 = vld [vmem:[%s7078_s16 + $0x198] sm:$0xff]  }
 0xae5   : > { %v4346_v43 = vadd.f32 %v4345_v38, %v3999_v50  ;;  %v4389_v60 = vadd.f32 %v4388_v54, %v4007_v29  ;;  %6321 = vmatpush3.bf16.msra.mxu1 %v6725_v9  ;;  %6343 = vmatpush3.bf16.msra.mxu0 %v6726_v15  ;;  %v4568_v12 = vmax.f32 %v4342_v13, 0.0  ;;  %v4570_v51 = vmax.f32 %v4385_v20, 0.0  ;;  %v6733_v50 = vld [vmem:[%s7078_s16 + $0x110] sm:$0xff]  }
 0xae6   : > { %v4583_v35 = vmax.f32 %v4344_v33, 0.0  ;;  %v4585_v47 = vmax.f32 %v4387_v3, 0.0  ;;  %6322 = vmatprep.subr.bf16.mxu1 %v6727_v53  ;;  %6344 = vmatprep.subr.bf16.mxu0 %v6728_v14  ;;  %v6734_v29 = vld [vmem:[%s7078_s16 + $0x190] sm:$0xff]   ;;  %v4027_v9 = vrot.slane %v7673_v28, %v3994_v39  ;;  %v4031_v15 = vrot.slane %v7673_v28, %v3998_v1  ;;  %v6739_v39 = vld [vmem:[%s7078_s16 + $0x160] sm:$0xff]  }
 0xae7   : > { %v4584_v21 = vmax.f32 %v4346_v43, 0.0  ;;  %v4586_v52 = vmax.f32 %v4389_v60, 0.0  ;;  %v4039_v53 = vrot.slane %v7673_v28, %v4006_v45  ;;  %v6740_v1 = vld [vmem:[%s7078_s16 + $0x1e0] sm:$0xff]  }
 0xae8   : > { %v7710_v25 = vpack.c.bf16 %v4583_v35, %v4567_v5  ;;  %v7712_v55 = vpack.c.bf16 %v4585_v47, %v4569_v46  ;;  %v6742_v43 = vld [vmem:[%s7078_s16 + $0x1a0] sm:$0xff]   ;;  %v6743_v5 = vld [vmem:[%s7078_s16 + $0x168] sm:$0xff]  }
 0xae9   : > { %v4600_v41 = vpack.c.bf16 %v4584_v21, %v4568_v12  ;;  %v4602_v62 = vpack.c.bf16 %v4586_v52, %v4570_v51  ;;  %6323 = vmatpush3.bf16.msra.mxu1 %v6729_v27  ;;  %6345 = vmatpush3.bf16.msra.mxu0 %v6730_v26  ;;  %v4425_v56 = vpop.f32.mrb[44].mxu1  ;;  %v4468_v18 = vpop.f32.mrb[40].mxu0  ;;  %v6744_v46 = vld [vmem:[%s7078_s16 + $0x1e8] sm:$0xff]  }
 0xaea   : > { %v4426_v17 = vadd.f32 %v4425_v56, %v4011_v16  ;;  %v4469_v34 = vadd.f32 %v4468_v18, %v4019_v32  ;;  %v4427_v58 = vpop.f32.mrb[45].mxu1  ;;  %v4470_v59 = vpop.f32.mrb[41].mxu0  ;;  %6324 = vmatprep.subr.bf16.mxu1 %v6731_v49  ;;  %6346 = vmatprep.subr.bf16.mxu0 %v6732_v37  ;;  %v6745_v56 = vld [vmem:[%s7078_s16 + $0x128] sm:$0xff]  }
 0xaeb   : > { %v4428_v61 = vadd.f32 %v4427_v58, %v4015_v24  ;;  %v4471_v36 = vadd.f32 %v4470_v59, %v4023_v31  ;;  %v4429_v63 = vpop.f32.mrb[46].mxu1  ;;  %v4472_v0 = vpop.f32.mrb[42].mxu0  ;;  %5499 = vmatprep.mubr.bf16.mxu1 %v4600_v41  ;;  %5540 = vmatprep.mubr.bf16.mxu0 %v4602_v62  ;;  %v6746_v18 = vld [vmem:[%s7078_s16 + $0x1a8] sm:$0xff]   ;;  %v6747_v58 = vld [vmem:[%s7078_s16 + $0x170] sm:$0xff]  }
 0xaec   : > { %v4430_v42 = vadd.f32 %v4429_v63, %v4011_v16  ;;  %v4473_v2 = vadd.f32 %v4472_v0, %v4019_v32  ;;  %v4431_v4 = vpop.f32.mrb[47].mxu1  ;;  %v4474_v48 = vpop.f32.mrb[43].mxu0  ;;  %v4571_v14 = vmax.f32 %v4426_v17, 0.0  ;;  %v4573_v16 = vmax.f32 %v4469_v34, 0.0 }
 0xaed   : > { %v4432_v8 = vadd.f32 %v4431_v4, %v4015_v24  ;;  %v4475_v19 = vadd.f32 %v4474_v48, %v4023_v31  ;;  %6325 = vmatpush3.bf16.msra.mxu1 %v6733_v50  ;;  %6347 = vmatpush3.bf16.msra.mxu0 %v6734_v29  ;;  %v4572_v57 = vmax.f32 %v4428_v61, 0.0  ;;  %v4574_v22 = vmax.f32 %v4471_v36, 0.0  ;;  %v6741_v24 = vld [vmem:[%s7078_s16 + $0x120] sm:$0xff]   ;;  %v6750_v4 = vld [vmem:[%s7078_s16 + $0x1b0] sm:$0xff]   ;;  %v6751_v48 = vld [vmem:[%s7078_s16 + $0x178] sm:$0xff]  }
 0xaee   : > { %v4587_v13 = vmax.f32 %v4430_v42, 0.0  ;;  %v4589_v20 = vmax.f32 %v4473_v2, 0.0  ;;  %6326 = vmatprep.subr.bf16.mxu1 %v6735_v40  ;;  %6348 = vmatprep.subr.bf16.mxu0 %v6736_v30  ;;  %v6749_v2 = vld [vmem:[%s7078_s16 + $0x130] sm:$0xff]  }
 0xaef   : > { %v4588_v32 = vmax.f32 %v4432_v8, 0.0  ;;  %v4590_v33 = vmax.f32 %v4475_v19, 0.0  ;;  %v6754_v8 = vld [vmem:[%s7078_s16 + $0x1b8] sm:$0xff]   ;;  %v6755_v19 = vld [vmem:[%s7078_s16 + $0x240] sm:$0xff]  }
 0xaf0   : > { %v7731_v3 = vpack.c.bf16 %v4587_v13, %v4571_v14  ;;  %v7733_v23 = vpack.c.bf16 %v4589_v20, %v4573_v16  ;;  %v6759_v14 = vld [vmem:[%s7078_s16 + $0x248] sm:$0xff]  }
 0xaf1   : > { %v7735_v28 = vpack.c.bf16 %v4588_v32, %v4572_v57  ;;  %v7737_v45 = vpack.c.bf16 %v4590_v33, %v4574_v22  ;;  %6327 = vmatpush3.bf16.msra.mxu1 %v6737_v7  ;;  %6349 = vmatpush3.bf16.msra.mxu0 %v6738_v11  ;;  %v4511_v38 = vpop.f32.mrb[48].mxu1  ;;  %v4554_v54 = vpop.f32.mrb[44].mxu0  ;;  %v6756_v7 = vld [vmem:[%s7078_s16 + $0x2c0] sm:$0xff]   ;;  %v6760_v16 = vld [vmem:[%s7078_s16 + $0x2c8] sm:$0xff]   ;;  %v6767_v57 = vld [vmem:[%s7078_s16 + $0x258] sm:$0xff]  }
 0xaf2   : > { %v4512_v60 = vadd.f32 %v4511_v38, %v4027_v9  ;;  %v4555_v27 = vadd.f32 %v4554_v54, %v7676_v44  ;;  %v4513_v26 = vpop.f32.mrb[49].mxu1  ;;  %v4556_v31 = vpop.f32.mrb[45].mxu0  ;;  %6328 = vmatprep.subr.bf16.mxu1 %v6739_v39  ;;  %6350 = vmatprep.subr.bf16.mxu0 %v6740_v1  ;;  %v6757_v11 = vld [vmem:[%s7078_s16 + $0x200] sm:$0xff]   ;;  %v6761_v13 = vld [vmem:[%s7078_s16 + $0x208] sm:$0xff]   ;;  %v6763_v39 = vld [vmem:[%s7078_s16 + $0x250] sm:$0xff]  }
 0xaf3   : > { %v4514_v35 = vadd.f32 %v4513_v26, %v4031_v15  ;;  %v4557_v47 = vadd.f32 %v4556_v31, %v4039_v53  ;;  %v4515_v49 = vpop.f32.mrb[50].mxu1  ;;  %v4558_v37 = vpop.f32.mrb[46].mxu0  ;;  %v6762_v20 = vld [vmem:[%s7078_s16 + $0x288] sm:$0xff]   ;;  %v6766_v1 = vld [vmem:[%s7078_s16 + $0x290] sm:$0xff]   ;;  %v6768_v22 = vld [vmem:[%s7078_s16 + $0x2d8] sm:$0xff]  }
 0xaf4   : > { %v4516_v12 = vadd.f32 %v4515_v49, %v4027_v9  ;;  %v4559_v51 = vadd.f32 %v4558_v37, %v7676_v44  ;;  %v4517_v21 = vpop.f32.mrb[51].mxu1  ;;  %v4560_v52 = vpop.f32.mrb[47].mxu0  ;;  %v4575_v50 = vmax.f32 %v4512_v60, 0.0  ;;  %v4577_v29 = vmax.f32 %v4555_v27, 0.0  ;;  %v6748_v44 = vld [vmem:[%s7078_s16 + $0x1f0] sm:$0xff]   ;;  %v6752_v9 = vld [vmem:[%s7078_s16 + $0x1f8] sm:$0xff]  }
 0xaf5   : > { %v4518_v41 = vadd.f32 %v4517_v21, %v4031_v15  ;;  %v4561_v62 = vadd.f32 %v4560_v52, %v4039_v53  ;;  %6329 = vmatpush3.bf16.msra.mxu1 %v6741_v24  ;;  %6351 = vmatpush3.bf16.msra.mxu0 %v6742_v43  ;;  %v4576_v59 = vmax.f32 %v4514_v35, 0.0  ;;  %v4578_v40 = vmax.f32 %v4557_v47, 0.0  ;;  %v6753_v15 = vld [vmem:[%s7078_s16 + $0x138] sm:$0xff]   ;;  %v6758_v53 = vld [vmem:[%s7078_s16 + $0x280] sm:$0xff]   ;;  %v6775_v24 = vld [vmem:[%s7078_s16 + $0x268] sm:$0xff]  }
 0xaf6   : > { %v4591_v17 = vmax.f32 %v4516_v12, 0.0  ;;  %v4593_v34 = vmax.f32 %v4559_v51, 0.0  ;;  %6330 = vmatprep.subr.bf16.mxu1 %v6743_v5  ;;  %6352 = vmatprep.subr.bf16.mxu0 %v6744_v46  ;;  %v6769_v32 = vld [vmem:[%s7078_s16 + $0x218] sm:$0xff]   ;;  %v6773_v38 = vld [vmem:[%s7078_s16 + $0x220] sm:$0xff]   ;;  %v6776_v43 = vld [vmem:[%s7078_s16 + $0x2e8] sm:$0xff]  }
 0xaf7   : > { %v4592_v30 = vmax.f32 %v4518_v41, 0.0  ;;  %v4594_v61 = vmax.f32 %v4561_v62, 0.0  ;;  %v6770_v33 = vld [vmem:[%s7078_s16 + $0x298] sm:$0xff]   ;;  %v6774_v54 = vld [vmem:[%s7078_s16 + $0x2a0] sm:$0xff]   ;;  %v6777_v60 = vld [vmem:[%s7078_s16 + $0x228] sm:$0xff]  }
 0xaf8   : > { %v7749_v36 = vpack.c.bf16 %v4591_v17, %v4575_v50  ;;  %v7751_v63 = vpack.c.bf16 %v4593_v34, %v4577_v29  ;;  %v6778_v27 = vld [vmem:[%s7078_s16 + $0x2a8] sm:$0xff]   ;;  %v6779_v26 = vld [vmem:[%s7078_s16 + $0x270] sm:$0xff]   ;;  %v6783_v35 = vld [vmem:[%s7078_s16 + $0x278] sm:$0xff]  }
 0xaf9   : > { %v7753_v0 = vpack.c.bf16 %v4592_v30, %v4576_v59  ;;  %v7755_v42 = vpack.c.bf16 %v4594_v61, %v4578_v40  ;;  %6331 = vmatpush3.bf16.msra.mxu1 %v6745_v56  ;;  %6353 = vmatpush3.bf16.msra.mxu0 %v6746_v18  ;;  %v6780_v31 = vld [vmem:[%s7078_s16 + $0x2f0] sm:$0xff]   ;;  %v6784_v47 = vld [vmem:[%s7078_s16 + $0x2f8] sm:$0xff]   ;;  %v6787_v12 = vld [vmem:[%s7078_s16 + $0x340] sm:$0xff]  }
 0xafa   : > { %6332 = vmatprep.subr.bf16.mxu1 %v6747_v58  ;;  %6354 = vmatprep.subr.bf16.mxu0 %v6748_v44  ;;  %v6781_v5 = vld [vmem:[%s7078_s16 + $0x230] sm:$0xff]   ;;  %v6785_v49 = vld [vmem:[%s7078_s16 + $0x238] sm:$0xff]   ;;  %v6788_v51 = vld [vmem:[%s7078_s16 + $0x3c0] sm:$0xff]  }
 0xafb   : > { %v6782_v46 = vld [vmem:[%s7078_s16 + $0x2b0] sm:$0xff]   ;;  %v6786_v37 = vld [vmem:[%s7078_s16 + $0x2b8] sm:$0xff]   ;;  %v6789_v21 = vld [vmem:[%s7078_s16 + $0x300] sm:$0xff]  }
 0xafc   : > { %v6790_v52 = vld [vmem:[%s7078_s16 + $0x380] sm:$0xff]   ;;  %v6791_v41 = vld [vmem:[%s7078_s16 + $0x348] sm:$0xff]   ;;  %v6795_v50 = vld [vmem:[%s7078_s16 + $0x350] sm:$0xff]  }
 0xafd   : > { %6333 = vmatpush3.bf16.msra.mxu1 %v6749_v2  ;;  %6355 = vmatpush3.bf16.msra.mxu0 %v6750_v4  ;;  %v6792_v62 = vld [vmem:[%s7078_s16 + $0x3c8] sm:$0xff]   ;;  %v6798_v29 = vld [vmem:[%s7078_s16 + $0x390] sm:$0xff]   ;;  %v6799_v17 = vld [vmem:[%s7078_s16 + $0x358] sm:$0xff]  }
 0xafe   : > { %6334 = vmatprep.subr.bf16.mxu1 %v6751_v48  ;;  %6356 = vmatprep.subr.bf16.mxu0 %v6752_v9  ;;  %v6793_v56 = vld [vmem:[%s7078_s16 + $0x308] sm:$0xff]   ;;  %v6800_v34 = vld [vmem:[%s7078_s16 + $0x3d8] sm:$0xff]   ;;  %v6803_v59 = vld [vmem:[%s7078_s16 + $0x360] sm:$0xff]  }
 0xaff   : > { %v6794_v18 = vld [vmem:[%s7078_s16 + $0x388] sm:$0xff]   ;;  %v6801_v58 = vld [vmem:[%s7078_s16 + $0x318] sm:$0xff]   ;;  %v6804_v40 = vld [vmem:[%s7078_s16 + $0x3e0] sm:$0xff]  }
 0xb00   : > { %v6802_v44 = vld [vmem:[%s7078_s16 + $0x398] sm:$0xff]   ;;  %v6805_v30 = vld [vmem:[%s7078_s16 + $0x320] sm:$0xff]   ;;  %v6809_v2 = vld [vmem:[%s7078_s16 + $0x328] sm:$0xff]  }
 0xb01   : > { %6335 = vmatpush3.bf16.msra.mxu1 %v6753_v15  ;;  %6357 = vmatpush3.bf16.msra.mxu0 %v6754_v8  ;;  %v6806_v61 = vld [vmem:[%s7078_s16 + $0x3a0] sm:$0xff]   ;;  %v6810_v4 = vld [vmem:[%s7078_s16 + $0x3a8] sm:$0xff]   ;;  %v6811_v48 = vld [vmem:[%s7078_s16 + $0x370] sm:$0xff]  }
 0xb02   : > { %6364 = vmatprep.subr.bf16.mxu1 %v6755_v19  ;;  %6386 = vmatprep.subr.bf16.mxu0 %v6756_v7  ;;  %v6812_v9 = vld [vmem:[%s7078_s16 + $0x3f0] sm:$0xff]   ;;  %v6815_v19 = vld [vmem:[%s7078_s16 + $0x378] sm:$0xff]  }
 0xb03   : > { %v6813_v15 = vld [vmem:[%s7078_s16 + $0x330] sm:$0xff]   ;;  %v6816_v7 = vld [vmem:[%s7078_s16 + $0x3f8] sm:$0xff]  }
 0xb04   : > { %5500 = vmatmul.mubr.bf16.vlgmr.msra.gmra.mrb[56].mxu1 %v7710_v25  ;;  %5541 = vmatmul.mubr.bf16.vlgmr.msra.gmra.mrb[52].mxu0 %v7712_v55  ;;  %v6764_v25 = vld [vmem:[%s7078_s16 + $0x2d0] sm:$0xff]  }
 0xb05   : > { %6365 = vmatpush3.bf16.msra.mxu1 %v6757_v11  ;;  %5581 = vmatprep.mubr.bf16.mxu1 %v7735_v28  ;;  %v6765_v55 = vld [vmem:[%s7078_s16 + $0x210] sm:$0xff]   ;;  %v6771_v28 = vld [vmem:[%s7078_s16 + $0x260] sm:$0xff]   ;;  %v6817_v11 = vld [vmem:[%s7078_s16 + $0x338] sm:$0xff]  }
 0xb06   : > { %6387 = vmatpush3.bf16.msra.mxu0 %v6758_v53  ;;  %5622 = vmatprep.mubr.bf16.mxu0 %v7737_v45  ;;  %v6772_v45 = vld [vmem:[%s7078_s16 + $0x2e0] sm:$0xff]   ;;  %v6814_v8 = vld [vmem:[%s7078_s16 + $0x3b0] sm:$0xff]   ;;  %v6818_v53 = vld [vmem:[%s7078_s16 + $0x3b8] sm:$0xff]  }
 0xb07   : > { %6366 = vmatprep.subr.bf16.mxu1 %v6759_v14  ;;  %6388 = vmatprep.subr.bf16.mxu0 %v6760_v16 }
 0xb09   : > { %6367 = vmatpush3.bf16.msra.mxu1 %v6761_v13  ;;  %v6060_v13 = vld [vmem:[%s675_s26] ss:$0 sm:$0xff] }
 0xb0a   : > { %6389 = vmatpush3.bf16.msra.mxu0 %v6762_v20  ;;  %6368 = vmatprep.subr.bf16.mxu1 %v6763_v39 }
 0xb0b   : > { %6390 = vmatprep.subr.bf16.mxu0 %v6764_v25 }
 0xb0d   : > { %6369 = vmatpush3.bf16.msra.mxu1 %v6765_v55 }
 0xb0e   : > { %6391 = vmatpush3.bf16.msra.mxu0 %v6766_v1  ;;  %6370 = vmatprep.subr.bf16.mxu1 %v6767_v57 }
 0xb0f   : > { %6392 = vmatprep.subr.bf16.mxu0 %v6768_v22 }
 0xb11   : > { %6371 = vmatpush3.bf16.msra.mxu1 %v6769_v32 }
 0xb12   : > { %6393 = vmatpush3.bf16.msra.mxu0 %v6770_v33  ;;  %6372 = vmatprep.subr.bf16.mxu1 %v6771_v28 }
 0xb13   : > { %6394 = vmatprep.subr.bf16.mxu0 %v6772_v45 }
 0xb15   : > { %6373 = vmatpush3.bf16.msra.mxu1 %v6773_v38 }
 0xb16   : > { %6395 = vmatpush3.bf16.msra.mxu0 %v6774_v54  ;;  %6374 = vmatprep.subr.bf16.mxu1 %v6775_v24 }
 0xb17   : > { %6396 = vmatprep.subr.bf16.mxu0 %v6776_v43 }
 0xb19   : > { %6375 = vmatpush3.bf16.msra.mxu1 %v6777_v60 }
 0xb1a   : > { %6397 = vmatpush3.bf16.msra.mxu0 %v6778_v27  ;;  %6376 = vmatprep.subr.bf16.mxu1 %v6779_v26 }
 0xb1b   : > { %6398 = vmatprep.subr.bf16.mxu0 %v6780_v31 }
 0xb1d   : > { %6377 = vmatpush3.bf16.msra.mxu1 %v6781_v5 }
 0xb1e   : > { %6399 = vmatpush3.bf16.msra.mxu0 %v6782_v46  ;;  %6378 = vmatprep.subr.bf16.mxu1 %v6783_v35 }
 0xb1f   : > { %6400 = vmatprep.subr.bf16.mxu0 %v6784_v47 }
 0xb21   : > { %6379 = vmatpush3.bf16.msra.mxu1 %v6785_v49 }
 0xb22   : > { %6401 = vmatpush3.bf16.msra.mxu0 %v6786_v37  ;;  %6408 = vmatprep.subr.bf16.mxu1 %v6787_v12 }
 0xb23   : > { %6430 = vmatprep.subr.bf16.mxu0 %v6788_v51 }
 0xb24   : > { %5582 = vmatmul.mubr.bf16.vlgmr.msra.gmra.mrb[60].mxu1 %v7731_v3  ;;  %v6796_v3 = vld [vmem:[%s7078_s16 + $0x3d0] sm:$0xff]  }
 0xb25   : > { %5623 = vmatmul.mubr.bf16.vlgmr.msra.gmra.mrb[56].mxu0 %v7733_v23  ;;  %6409 = vmatpush3.bf16.msra.mxu1 %v6789_v21  ;;  %v6797_v23 = vld [vmem:[%s7078_s16 + $0x310] sm:$0xff]  }
 0xb26   : > { %5663 = vmatprep.mubr.bf16.mxu1 %v7753_v0  ;;  %6431 = vmatpush3.bf16.msra.mxu0 %v6790_v52  ;;  %v6807_v0 = vld [vmem:[%s7078_s16 + $0x368] sm:$0xff]  }
 0xb27   : > { %5704 = vmatprep.mubr.bf16.mxu0 %v7755_v42  ;;  %6410 = vmatprep.subr.bf16.mxu1 %v6791_v41  ;;  %v6808_v42 = vld [vmem:[%s7078_s16 + $0x3e8] sm:$0xff]  }
 0xb28   : > { %6432 = vmatprep.subr.bf16.mxu0 %v6792_v62 }
 0xb29   : > { %6411 = vmatpush3.bf16.msra.mxu1 %v6793_v56 }
 0xb2a   : > { %6433 = vmatpush3.bf16.msra.mxu0 %v6794_v18  ;;  %6412 = vmatprep.subr.bf16.mxu1 %v6795_v50 }
 0xb2b   : > { %6434 = vmatprep.subr.bf16.mxu0 %v6796_v3 }
 0xb2d   : > { %6413 = vmatpush3.bf16.msra.mxu1 %v6797_v23 }
 0xb2e   : > { %6435 = vmatpush3.bf16.msra.mxu0 %v6798_v29  ;;  %6414 = vmatprep.subr.bf16.mxu1 %v6799_v17 }
 0xb2f   : > { %6436 = vmatprep.subr.bf16.mxu0 %v6800_v34 }
 0xb31   : > { %6415 = vmatpush3.bf16.msra.mxu1 %v6801_v58 }
 0xb32   : > { %6437 = vmatpush3.bf16.msra.mxu0 %v6802_v44  ;;  %6416 = vmatprep.subr.bf16.mxu1 %v6803_v59 }
 0xb33   : > { %6438 = vmatprep.subr.bf16.mxu0 %v6804_v40 }
 0xb35   : > { %6417 = vmatpush3.bf16.msra.mxu1 %v6805_v30 }
 0xb36   : > { %6439 = vmatpush3.bf16.msra.mxu0 %v6806_v61  ;;  %6418 = vmatprep.subr.bf16.mxu1 %v6807_v0 }
 0xb37   : > { %6440 = vmatprep.subr.bf16.mxu0 %v6808_v42 }
 0xb39   : > { %6419 = vmatpush3.bf16.msra.mxu1 %v6809_v2 }
 0xb3a   : > { %6441 = vmatpush3.bf16.msra.mxu0 %v6810_v4  ;;  %6420 = vmatprep.subr.bf16.mxu1 %v6811_v48 }
 0xb3b   : > { %6442 = vmatprep.subr.bf16.mxu0 %v6812_v9 }
 0xb3d   : > { %6421 = vmatpush3.bf16.msra.mxu1 %v6813_v15 }
 0xb3e   : > { %6443 = vmatpush3.bf16.msra.mxu0 %v6814_v8  ;;  %6422 = vmatprep.subr.bf16.mxu1 %v6815_v19 }
 0xb3f   : > { %6444 = vmatprep.subr.bf16.mxu0 %v6816_v7 }
 0xb41   : > { %6423 = vmatpush3.bf16.msra.mxu1 %v6817_v11 }
 0xb42   : > { %6445 = vmatpush3.bf16.msra.mxu0 %v6818_v53 }
 0xb44   : > { %5664 = vmatmul.mubr.bf16.vlgmr.msra.gmra.mrb[64].mxu1 %v7749_v36 }
 0xb45   : > { %5705 = vmatmul.mubr.bf16.vlgmr.msra.gmra.mrb[60].mxu0 %v7751_v63 }
 0xbb7   : > { %v6292_v14 = vpop.f32.mrb[52].mxu1  ;;  %v6314_v16 = vpop.f32.mrb[48].mxu0 }
 0xbb8   : > { %v6293_v20 = vpop.f32.mrb[53].mxu1  ;;  %v6315_v39 = vpop.f32.mrb[49].mxu0 }
 0xbb9   : > { %v6294_v25 = vadd.f32 %v6293_v20, %v6292_v14  ;;  %v6316_v55 = vadd.f32 %v6315_v39, %v6314_v16  ;;  %v6295_v1 = vpop.f32.mrb[54].mxu1  ;;  %v6317_v57 = vpop.f32.mrb[50].mxu0 }
 0xbba   : > { %v6296_v22 = vpop.f32.mrb[55].mxu1  ;;  %v6318_v32 = vpop.f32.mrb[51].mxu0 }
 0xbbb   : > { %v5420_v33 = vadd.f32 %v6294_v25, %v6060_v13  ;;  %v6297_v28 = vadd.f32 %v6296_v22, %v6295_v1  ;;  %v6319_v36 = vadd.f32 %v6318_v32, %v6317_v57 }
 0xbbd   : > { %v5461_v45 = vadd.f32 %v6316_v55, %v5420_v33  ;;  %v5423_v63 = vadd.f32 %v6297_v28, %v6060_v13 }
 0xbbf   : > { %v5464_v38 = vadd.f32 %v6319_v36, %v5423_v63 }
 0xbd7   : > { %v6336_v54 = vpop.f32.mrb[56].mxu1  ;;  %v6358_v24 = vpop.f32.mrb[52].mxu0 }
 0xbd8   : > { %v6337_v43 = vpop.f32.mrb[57].mxu1  ;;  %v6359_v60 = vpop.f32.mrb[53].mxu0 }
 0xbd9   : > { %v6338_v27 = vadd.f32 %v6337_v43, %v6336_v54  ;;  %v6360_v26 = vadd.f32 %v6359_v60, %v6358_v24  ;;  %v6339_v31 = vpop.f32.mrb[58].mxu1  ;;  %v6361_v5 = vpop.f32.mrb[54].mxu0 }
 0xbda   : > { %v6340_v46 = vpop.f32.mrb[59].mxu1  ;;  %v6362_v35 = vpop.f32.mrb[55].mxu0 }
 0xbdb   : > { %v5502_v47 = vadd.f32 %v6338_v27, %v5461_v45  ;;  %v6341_v49 = vadd.f32 %v6340_v46, %v6339_v31  ;;  %v6363_v37 = vadd.f32 %v6362_v35, %v6361_v5  ;;  %v6190_v46 = vld [vmem:[%s7922_s4] ss:$0 sm:$0xff] }
 0xbdd   : > { %v5543_v12 = vadd.f32 %v6360_v26, %v5502_v47  ;;  %v5505_v51 = vadd.f32 %v6341_v49, %v5464_v38  ;;  %v6189_v26 = vld [vmem:[%s7921_s14] ss:$0 sm:$0xff] }
 0xbdf   : > { %v5546_v21 = vadd.f32 %v6363_v37, %v5505_v51 }
 0xbf7   : > { %v6380_v52 = vpop.f32.mrb[60].mxu1 }
 0xbf8   : > { %v6402_v41 = vpop.f32.mrb[56].mxu0  ;;  %v6381_v62 = vpop.f32.mrb[61].mxu1 }
 0xbf9   : > { %v6382_v56 = vadd.f32 %v6381_v62, %v6380_v52  ;;  %v6403_v18 = vpop.f32.mrb[57].mxu0  ;;  %v6383_v50 = vpop.f32.mrb[62].mxu1 }
 0xbfa   : > { %v6404_v3 = vadd.f32 %v6403_v18, %v6402_v41  ;;  %v6405_v23 = vpop.f32.mrb[58].mxu0  ;;  %v6384_v29 = vpop.f32.mrb[63].mxu1 }
 0xbfb   : > { %v5584_v17 = vadd.f32 %v6382_v56, %v5543_v12  ;;  %v6385_v34 = vadd.f32 %v6384_v29, %v6383_v50  ;;  %v6406_v58 = vpop.f32.mrb[59].mxu0 }
 0xbfc   : > { %v6407_v44 = vadd.f32 %v6406_v58, %v6405_v23 }
 0xbfd   : > { %v5625_v59 = vadd.f32 %v6404_v3, %v5584_v17  ;;  %v5587_v40 = vadd.f32 %v6385_v34, %v5546_v21 }
 0xbff   : > { %v5628_v30 = vadd.f32 %v6407_v44, %v5587_v40 }
 0xc17   : > { %v6424_v61 = vpop.f32.mrb[64].mxu1 }
 0xc18   : > { %v6446_v0 = vpop.f32.mrb[60].mxu0  ;;  %v6425_v42 = vpop.f32.mrb[65].mxu1 }
 0xc19   : > { %v6426_v2 = vadd.f32 %v6425_v42, %v6424_v61  ;;  %v6447_v4 = vpop.f32.mrb[61].mxu0  ;;  %v6427_v48 = vpop.f32.mrb[66].mxu1 }
 0xc1a   : > { %v6448_v9 = vadd.f32 %v6447_v4, %v6446_v0  ;;  %v6449_v15 = vpop.f32.mrb[62].mxu0  ;;  %v6428_v8 = vpop.f32.mrb[67].mxu1  ;;  %v6192_v0 = vld [vmem:[%s7923_s1] ss:$0 sm:$0xff] (!%p6191_p5) }
 0xc1b   : > { %v5666_v19 = vadd.f32 %v6426_v2, %v5625_v59  ;;  %v6429_v7 = vadd.f32 %v6428_v8, %v6427_v48  ;;  %v6450_v11 = vpop.f32.mrb[63].mxu0  ;;  %v6193_v2 = vld [vmem:[%s7924_s27] ss:$0 sm:$0xff] (!%p6191_p5) }
 0xc1c   : > { %v6451_v53 = vadd.f32 %v6450_v11, %v6449_v15 }
 0xc1d   : > { %v5707_v14 = vadd.f32 %v6448_v9, %v5666_v19  ;;  %v5669_v16 = vadd.f32 %v6429_v7, %v5628_v30 }
 0xc1f   : > { %v5710_v13 = vadd.f32 %v6451_v53, %v5669_v16  ;;  %v5713_v20 = vadd.f32 %v5707_v14, %v7591_v6 }
 0xc21   : > { %v5717_v39 = vsel %vm706_vm1, %v5713_v20, 0.0  ;;  %v5714_v25 = vadd.f32 %v5710_v13, %v7593_v10 }
 0xc22   : > { %5718 = vadd.xlane.f32.xlu0 %v5717_v39 }
 0xc23   : > { %v5720_v55 = vsel %vm706_vm1, %v5714_v25, 0.0 }
 0xc24   : > { %5721 = vadd.xlane.f32.xlu1 %v5720_v55 }
 0xcaf   : > { %v5719_v1 = vpop.xlane.xlu0 %5718 }
 0xcb0   : > { %v5723_v57 = vmul.f32 0.03125, %v5719_v1 }
 0xcb1   : > { %v5722_v22 = vpop.xlane.xlu1 %5721 }
 0xcb2   : > { %v5725_v32 = vsub.f32 %v5713_v20, %v5723_v57  ;;  %v5724_v33 = vmul.f32 0.03125, %v5722_v22 }
 0xcb4   : > { %v5726_v28 = vsub.f32 %v5714_v25, %v5724_v33  ;;  %v5727_v36 = vmul.f32 %v5725_v32, %v5725_v32 }
 0xcb6   : > { %v5729_v45 = vsel %vm706_vm1, %v5727_v36, 0.0  ;;  %v5728_v63 = vmul.f32 %v5726_v28, %v5726_v28 }
 0xcb7   : > { %5730 = vadd.xlane.f32.xlu0 %v5729_v45 }
 0xcb8   : > { %v5732_v6 = vsel %vm706_vm1, %v5728_v63, 0.0 }
 0xcb9   : > { %5733 = vadd.xlane.f32.xlu1 %v5732_v6 }
 0xd44   : > { %v5731_v10 = vpop.xlane.xlu0 %5730 }
 0xd45   : > { %v5735_v38 = vmul.f32 0.03125, %v5731_v10 }
 0xd46   : > { %v5734_v54 = vpop.xlane.xlu1 %5733 }
 0xd47   : > { %v5737_v24 = vadd.f32 1e-05, %v5735_v38  ;;  %v5736_v43 = vmul.f32 0.03125, %v5734_v54 }
 0xd49   : > { %6887 = vrsqrt.f32 %v5737_v24  ;;  %v5738_v60 = vadd.f32 1e-05, %v5736_v43 }
 0xd4b   : > { %6889 = vrsqrt.f32 %v5738_v60 }
 0xd53   : > { %v6888_v27 = vpop.eup %6887 }
 0xd54   : > { %v5741_v31 = vmul.f32 %v6888_v27, %v5725_v32 }
 0xd55   : > { %v6890_v5 = vpop.eup %6889 }
 0xd56   : > { %v5749_v35 = vmul.f32 %v6189_v26, %v5741_v31  ;;  %v5742_v47 = vmul.f32 %v6890_v5, %v5726_v28  ;;  %5764 = sbr.rel (%p6191_p5) target bundleno = 3736 (0xe98), region = 92 }
 0xd58   : > { %v5757_v49 = vadd.f32 %v6190_v46, %v5749_v35  ;;  %v5750_v37 = vmul.f32 %v6189_v26, %v5742_v47 }
 0xd5a   : > { %5759 = vst.msk [vmem:[#allocation2] sm:$0xff] %vm706_vm1, %v5757_v49  ;;  %v5758_v12 = vadd.f32 %v6190_v46, %v5750_v37  ;;  %v5767_v51 = vsel (!%p6191_p5), %vm706_vm1, %v5757_v49, 0.0 }
 0xd5b   : > { %5768 = vadd.xlane.f32.xlu0 (!%p6191_p5), %v5767_v51 }
 0xd5c   : > { %5760 = vst.msk [vmem:[#allocation2 + $0x8] sm:$0xff] %vm706_vm1, %v5758_v12  ;;  %v5770_v21 = vsel (!%p6191_p5), %vm706_vm1, %v5758_v12, 0.0 }
 0xd5f   : > { %5771 = vadd.xlane.f32.xlu0 %v5770_v21 }
 0xde8   : > { %v5769_v52 = vpop.xlane.xlu0 %5768 }
 0xde9   : > { %v5773_v41 = vmul.f32 0.03125, %v5769_v52 }
 0xdeb   : > { %v5775_v62 = vsub.f32 %v5757_v49, %v5773_v41 }
 0xdec   : > { %v5772_v56 = vpop.xlane.xlu0 %5771 }
 0xded   : > { %v5774_v18 = vmul.f32 0.03125, %v5772_v56  ;;  %v5777_v50 = vmul.f32 %v5775_v62, %v5775_v62 }
 0xdef   : > { %v5776_v3 = vsub.f32 %v5758_v12, %v5774_v18  ;;  %v5779_v23 = vsel %vm706_vm1, %v5777_v50, 0.0 }
 0xdf0   : > { %5780 = vadd.xlane.f32.xlu1 %v5779_v23 }
 0xdf1   : > { %v5778_v29 = vmul.f32 %v5776_v3, %v5776_v3 }
 0xdf3   : > { %v5782_v17 = vsel %vm706_vm1, %v5778_v29, 0.0 }
 0xdf4   : > { %5783 = vadd.xlane.f32.xlu1 %v5782_v17 }
 0xe7d   : > { %v5781_v34 = vpop.xlane.xlu1 %5780 }
 0xe7e   : > { %v5785_v58 = vmul.f32 0.03125, %v5781_v34 }
 0xe80   : > { %v5787_v44 = vadd.f32 1e-05, %v5785_v58 }
 0xe81   : > { %v5784_v59 = vpop.xlane.xlu1 %5783 }
 0xe82   : > { %6893 = vrsqrt.f32 %v5787_v44  ;;  %v5786_v40 = vmul.f32 0.03125, %v5784_v59 }
 0xe84   : > { %v5788_v30 = vadd.f32 1e-05, %v5786_v40 }
 0xe86   : > { %6895 = vrsqrt.f32 %v5788_v30 }
 0xe8c   : > { %v6894_v61 = vpop.eup %6893 }
 0xe8d   : > { %v5791_v42 = vmul.f32 %v6894_v61, %v5775_v62 }
 0xe8f   : > { %v5799_v4 = vmul.f32 %v6192_v0, %v5791_v42 }
 0xe90   : > { %v6896_v48 = vpop.eup %6895 }
 0xe91   : > { %v5807_v9 = vadd.f32 %v6193_v2, %v5799_v4  ;;  %v5792_v15 = vmul.f32 %v6896_v48, %v5776_v3 }
 0xe93   : > { %5809 = vst.msk [vmem:[%s7925_s29] sm:$0xff] %vm706_vm1, %v5807_v9  ;;  %v5800_v8 = vmul.f32 %v6192_v0, %v5792_v15 }
 0xe95   : > { %v5808_v19 = vadd.f32 %v6193_v2, %v5800_v8 }
 0xe97   : > { %5810 = vst.msk [vmem:[%s7925_s29 + $0x8] sm:$0xff] %vm706_vm1, %v5808_v19 }
 0xe98 PF: > { %s7926_s8 = sld [smem:[#allocation3_spill]] }
 0xe9e   : > { %s26_s21 = sadd.s32 1, %s7926_s8  }
 0xe9f   : > { %p23_p6 = scmp.ge.s32.totalorder %s26_s21, 8  }
 0xea1   :  { %25 = sbr.rel (!%p23_p6) target bundleno = 9 (0x9), region = 151 }

// kernel: translation_model_forward.3
= control target key start
LH: loop header
LB: loop body
LE: loop exit
PB: predicated region body
PF: predicated region fallthrough
CT: control target
= control target key end

     0   :  { %s12511_s0 = inlined_call_operand.vmem [shape: f32[2,8], index: 0, kind: input, shape index: {}]   ;;  %s12512_s1 = inlined_call_operand.vmem [shape: f32[16,32], index: 1, kind: input, shape index: {}]   ;;  %s12513_s2 = inlined_call_operand.vmem [shape: f32[16,32], index: 2, kind: input, shape index: {}]   ;;  %s12514_s3 = inlined_call_operand.vmem [shape: f32[6,32,96], index: 3, kind: input, shape index: {}]   ;;  %s12515_s4 = inlined_call_operand.vmem [shape: f32[6,1,96], index: 4, kind: input, shape index: {}]   ;;  %s12516_s5 = inlined_call_operand.vmem [shape: f32[6,32,32], index: 5, kind: input, shape index: {}]   ;;  %s12517_s6 = inlined_call_operand.vmem [shape: f32[6,1,32], index: 6, kind: input, shape index: {}]   ;;  %s12518_s7 = inlined_call_operand.vmem [shape: f32[6,1,32], index: 7, kind: input, shape index: {}]   ;;  %s12519_s8 = inlined_call_operand.vmem [shape: f32[6,1,32], index: 8, kind: input, shape index: {}]   ;;  %s12520_s9 = inlined_call_operand.vmem [shape: f32[6,32,32], index: 9, kind: input, shape index: {}]   ;;  %s12521_s10 = inlined_call_operand.vmem [shape: f32[6,1,32], index: 10, kind: input, shape index: {}]   ;;  %s12522_s11 = inlined_call_operand.vmem [shape: f32[6,32,64], index: 11, kind: input, shape index: {}]   ;;  %s12523_s12 = inlined_call_operand.vmem [shape: f32[6,1,64], index: 12, kind: input, shape index: {}]   ;;  %s12524_s13 = inlined_call_operand.vmem [shape: f32[6,32,32], index: 13, kind: input, shape index: {}]   ;;  %s12525_s14 = inlined_call_operand.vmem [shape: f32[6,1,32], index: 14, kind: input, shape index: {}]   ;;  %s12526_s15 = inlined_call_operand.vmem [shape: f32[6,1,32], index: 15, kind: input, shape index: {}]   ;;  %s12527_s16 = inlined_call_operand.vmem [shape: f32[6,1,32], index: 16, kind: input, shape index: {}]   ;;  %s12528_s17 = inlined_call_operand.vmem [shape: bf16[6,32,2048], index: 17, kind: input, shape index: {}]   ;;  %s12529_s18 = inlined_call_operand.vmem [shape: f32[6,1,2048], index: 18, kind: input, shape index: {}]   ;;  %s12530_s19 = inlined_call_operand.vmem [shape: bf16[6,2048,32], index: 19, kind: input, shape index: {}]   ;;  %s12531_s20 = inlined_call_operand.vmem [shape: f32[6,1,32], index: 20, kind: input, shape index: {}]   ;;  %s12532_s21 = inlined_call_operand.vmem [shape: f32[6,1,32], index: 21, kind: input, shape index: {}]   ;;  %s12533_s22 = inlined_call_operand.vmem [shape: f32[6,1,32], index: 22, kind: input, shape index: {}]   ;;  %s12534_s23 = inlined_call_operand.vmem [shape: f32[1,32], index: 23, kind: input, shape index: {}]   ;;  %s12535_s24 = inlined_call_operand.vmem [shape: f32[1,32], index: 24, kind: input, shape index: {}]   ;;  %s12536_s25 = inlined_call_operand.hbm [shape: f32[16,32], index: 25, kind: output, shape index: {}]  }
   0x1   :  { %12566 = sst [smem:[#allocation9_spill]] %s12511_s0 }
   0x2   :  { %12567 = sst [smem:[#allocation10_spill]] %s12512_s1 }
   0x3   :  { %12568 = sst [smem:[#allocation11_spill]] %s12513_s2 }
   0x4   :  { %12569 = sst [smem:[#allocation12_spill]] %s12514_s3 }
   0x5   :  { %12570 = sst [smem:[#allocation13_spill]] %s12515_s4 }
   0x6   :  { %12571 = sst [smem:[#allocation14_spill]] %s12516_s5 }
   0x7   :  { %12572 = sst [smem:[#allocation15_spill]] %s12517_s6 }
   0x8   :  { %12573 = sst [smem:[#allocation16_spill]] %s12518_s7 }
   0x9   :  { %12574 = sst [smem:[#allocation17_spill]] %s12519_s8 }
   0xa   :  { %12575 = sst [smem:[#allocation18_spill]] %s12520_s9 }
   0xb   :  { %12576 = sst [smem:[#allocation19_spill]] %s12522_s11 }
   0xc   :  { %12577 = sst [smem:[#allocation20_spill]] %s12524_s13 }
   0xd   :  { %12578 = sst [smem:[#allocation21_spill]] %s12527_s16 }
   0xe   :  { %12579 = sst [smem:[#allocation22_spill]] %s12528_s17 }
   0xf   :  { %12580 = sst [smem:[#allocation23_spill]] %s12529_s18 }
  0x10   :  { %12581 = sst [smem:[#allocation24_spill]] %s12531_s20 }
  0x11   :  { %12582 = sst [smem:[#allocation25_spill]] %s12532_s21 }
  0x12   :  { %12583 = sst [smem:[#allocation26_spill]] %s12533_s22 }
  0x13   :  { %12584 = sst [smem:[#allocation27_spill]] %s12534_s23 }
  0x14   :  { %12585 = sst [smem:[#allocation28_spill]] %s12535_s24 }
  0x15   :  { %12586 = sst [smem:[#allocation29_spill]] %s12536_s25 }
  0x16   :  { %30 = vsyncpa [#allocation4], 0  ;;  %s11074_s29 = smov 0  }
  0x17 LB: > { %12587 = sst [smem:[#allocation6_spill]] %s10907_s29  ;;  %s11080_s2 = sadd.s32 4294967295, %s10907_s29   ;;  %s10907_s29 = sphi %s11074_s29, %s36_s29  }
  0x18   : > { %12588 = sst [smem:[#allocation7_spill]] %s11080_s2  ;;  %p9482_p0 = scmp.ge.s32.totalorder %s10907_s29, 1 }
  0x19   : > { %p848_p1 = scmp.lt.s32.totalorder %s10907_s29, 7 }
  0x1b   : > { %p849_p2 = pnand %p9482_p0, %p848_p1 }
  0x1d   : > { %852 = sbr.rel (%p849_p2) target bundleno = 5679 (0x162f), region = 120 }
  0x24   : > { %p981_p3 = scmp.lt.s32.totalorder %s11080_s2, 5  ;;  %s12590_s4 = sld [smem:[#allocation12_spill]] }
  0x25   : > { %s12592_s0 = sld [smem:[#allocation14_spill]]  ;;  %s12596_s20 = sld [smem:[#allocation18_spill]] }
  0x26   : > { %s11086_s6 = scalar_select %p981_p3, %s11080_s2, 5 }
  0x27   : > { %s12597_s11 = sld [smem:[#allocation19_spill]]  ;;  %s12598_s13 = sld [smem:[#allocation20_spill]] }
  0x28   : > { %s9792_s30 = sshll.u32 %s11086_s6, 5  ;;  %s9797_s2 = sshll.u32 %s11086_s6, 8 }
  0x29   : > { %s12600_s17 = sld [smem:[#allocation22_spill]]  ;;  %s12601_s18 = sld [smem:[#allocation23_spill]] }
  0x2a   : > { %s11096_s28 = scalar_lea.vmem %s12590_s4, %s9792_s30  ;;  %s9798_s4 = sshll.u32 %s11086_s6, 10 }
  0x2b   : > { %12591 = sst [smem:[#allocation8_spill]] %s11096_s28  ;;  %s11101_s29 = scalar_lea.vmem %s12592_s0, %s9792_s30 }
  0x2c   : > { %s11118_s9 = scalar_lea.vmem %s12596_s20, %s9792_s30  ;;  %s11166_s0 = scalar_lea.vmem %s12530_s19, %s9798_s4 }
  0x2d   : > { %s11127_s21 = scalar_lea.vmem %s12597_s11, %s9792_s30  ;;  %s11136_s28 = scalar_lea.vmem %s12598_s13, %s9792_s30 }
  0x2e   : > { %s9495_s30 = sshll.u32 %s11086_s6, 4 }
  0x2f   : > { %s11154_s7 = scalar_lea.vmem %s12600_s17, %s9797_s2  ;;  %s11160_s20 = scalar_lea.vmem %s12601_s18, %s9495_s30 }
  0x30   : > { %s12605_s30 = sld [smem:[#allocation7_spill]] }
  0x36   : > { %p9498_p4 = scmp.ne.s32.totalorder %s12605_s30, 0 }
  0x37   : > { %s12606_s5 = sld [smem:[#allocation10_spill]] (!%p9498_p4)  ;;  %vm1063_vm0 = vcmask (!%p9498_p4), 261120  }
  0x38   : > { %1060 = sbr.rel (%p9498_p4) target bundleno = 63 (0x3f), region = 124 }
  0x3d   : > { %v1061_v0 = vld [vmem:[%s12606_s5] sm:$0xff] (!%p9498_p4)  ;;  %v1062_v1 = vld [vmem:[%s12606_s5 + $0x8] sm:$0xff] (!%p9498_p4) }
  0x3e   : > { %1064 = vst.msk [vmem:[#allocation2] sm:$0xff] (!%p9498_p4), %vm1063_vm0, %v1061_v0  ;;  %1065 = vst.msk [vmem:[#allocation2 + $0x8] sm:$0xff] (!%p9498_p4), %vm1063_vm0, %v1062_v1 }
  0x3f PF: > { %s12607_s11 = sld [smem:[#allocation8_spill]]  ;;  %vm1088_vm1 = vcmask 261120   ;;  %v10909_v10 = vmov 0.0   ;;  %vm10910_vm2 = vmmov 0   ;;  %s12608_s17 = sld [smem:[#allocation13_spill]]  ;;  %vm1178_vm3 = vcmask 31744  }
  0x40   : > { %10144 = vmatprep.subr.mxu1 %v10909_v10  ;;  %10146 = vmatprep.mubr.msk.f32.mxu1 %vm10910_vm2, %v10909_v10  ;;  %s10911_s3 = smov 64   ;;  %s12550_s24 = smov 96   ;;  %v1071_v22 = vlaneseq  ;;  %vm1255_vm5 = vcmask 64512   ;;  %vm2542_vm6 = vcmask 97280   ;;  %vm2544_vm7 = vcmask 130048  }
  0x41   : > { %s10913_s25 = smov 92   ;;  %s10914_s22 = smov 124   ;;  %vm2546_vm8 = vcmask 162816   ;;  %vm2548_vm9 = vcmask 195584   ;;  %vm2550_vm10 = vcmask 228352  }
  0x42   : > { %s10915_s2 = smov 88   ;;  %s10916_s30 = smov 120   ;;  %v11238_v23 = vshrl.u32 %v1071_v22, 7  ;;  %v1074_v24 = vand.u32 127, %v1071_v22 }
  0x43   : > { %s10917_s8 = smov 116   ;;  %s12548_s13 = smov 84  }
  0x44   : > { %v11241_v25 = vsub.s32 0, %v11238_v23  ;;  %vm1075_vm4 = vcmp.gt.s32.totalorder %v1074_v24, %v11238_v23  ;;  %s12546_s16 = smov 72   ;;  %s10922_s4 = smov 108  }
  0x45   : > { %v1077_v2 = vld [vmem:[%s12607_s11] sm:$0xff]  ;;  %v1078_v3 = vld [vmem:[%s12607_s11 + $0x8] sm:$0xff]  ;;  %v1079_v4 = vld [vmem:[%s12607_s11 + $0x10] sm:$0xff]  ;;  %s12609_s18 = scalar_lea.vmem %s12608_s17, %s11086_s6  ;;  %v11252_v28 = vsel %vm1075_vm4, -1e+30, %v10909_v10  ;;  %s12544_s17 = smov 68  }
  0x46   : > { %v10508_v5 = vpack.c.bf16 %v1078_v3, %v1077_v2  ;;  %v1080_v6 = vld [vmem:[%s12607_s11 + $0x18] sm:$0xff]  ;;  %v1066_v7 = vld [vmem:[#allocation2] sm:$0xff]  ;;  %v1067_v9 = vld [vmem:[#allocation2 + $0x8] sm:$0xff]  ;;  %s12610_s11 = sld [smem:[#allocation9_spill]]  ;;  %s10923_s23 = smov 104  }
  0x47   : > { %v10512_v8 = vpack.c.bf16 %v1080_v6, %v1079_v4  ;;  %10141 = vmatprep.mubr.msk.f32.mxu0 %vm1088_vm1, %v1066_v7  ;;  %v9499_v11 = vld [vmem:[%s12609_s18] ss:$0 sm:$0xff]  ;;  %s10921_s18 = smov 112   ;;  %s10925_s26 = smov 80  }
  0x48   : > { %10509 = vmatprep.subr.bf16.mxu0 %v10508_v5  ;;  %s12552_s1 = smov 76   ;;  %s10927_s27 = smov 56  }
  0x49   : > { %10511 = vmatpush3.bf16.msra.mxu0 %v10508_v5 }
  0x4a   : > { %10513 = vmatprep.subr.bf16.mxu0 %v10512_v8 }
  0x4c   : > { %v11246_v26 = vld [vmem:[%s12610_s11] sm:$0x3]  ;;  %s10924_s11 = smov 100  }
  0x4d   : > { %10515 = vmatpush3.bf16.msra.mxu0 %v10512_v8  ;;  %v1173_v27 = vrot.slane %v11246_v26, %v11241_v25 }
  0x4e   : > { %10164 = vmatprep.subr.mxu0 %v10909_v10 }
  0x4f   : > { %v11255_v29 = vadd.f32 %v1173_v27, %v11252_v28 }
  0x50   : > { %10142 = vmatmul.mubr.msk.f32.vlgmr.msra.gmra.mrb[0].mxu0 %vm1088_vm1, %v1067_v9 }
  0x51   : > { %10166 = vmatprep.mubr.msk.f32.mxu0 %vm10910_vm2, %v10909_v10 }
 0x123   : > { %v10143_v12 = vpop.f32.mrb[0].mxu0 }
 0x124   : > { %v11204_v13 = vadd.f32 %v10143_v12, %v9499_v11  ;;  %v1161_v14 = vpop.f32.mrb[1].mxu0 }
 0x125   : > { %v11206_v15 = vadd.f32 %v9499_v11, %v1161_v14 }
 0x127   : > { %1267 = vrot.lane.b32.xlu1 %v11206_v15, %s10911_s3  ;;  %1176 = vrot.lane.b32.xlu0 %v11206_v15, %s12550_s24 }
 0x12b   : > { %1345 = vrot.lane.b32.xlu1 %v11206_v15, %s10913_s25 }
 0x12f   : > { %1343 = vrot.lane.b32.xlu1 %v11206_v15, %s10914_s22 }
 0x133   : > { %1512 = vrot.lane.b32.xlu1 %v11206_v15, %s10915_s2 }
 0x137   : > { %1510 = vrot.lane.b32.xlu1 %v11206_v15, %s10916_s30 }
 0x13b   : > { %1677 = vrot.lane.b32.xlu1 %v11206_v15, %s10917_s8 }
 0x199   : > { %v1268_v16 = vpop.permute.xlu1 %1267  ;;  %v1177_v17 = vpop.permute.xlu0 %1176 }
 0x19a   : > { %10145 = vmatpush3.xpose.msk.msra.mxu1 %vm1178_vm3, %v1177_v17 }
 0x19b   : > { %10149 = vmatprep.subr.mxu1 %v10909_v10 }
 0x19d   : > { %v11224_v18 = vpop.permute.xlu1 %1345  ;;  %10147 = vmatmul.mubr.msk.f32.vlgmr.msra.gmra.mrb[0].mxu1 %vm1178_vm3, %v11206_v15 }
 0x19e   : > { %10150 = vmatpush3.msra.mxu1 %v1268_v16  ;;  %10151 = vmatprep.mubr.msk.f32.mxu1 %vm10910_vm2, %v10909_v10 }
 0x19f   : > { %10154 = vmatprep.subr.mxu1 %v10909_v10 }
 0x1a1   : > { %v11231_v19 = vpop.permute.xlu1 %1343 }
 0x1a5   : > { %v1513_v20 = vpop.permute.xlu1 %1512 }
 0x1a6   : > { %10165 = vmatpush3.xpose.msk.msra.mxu0 %vm1178_vm3, %v1513_v20 }
 0x1a7   : > { %10174 = vmatprep.subr.mxu0 %v10909_v10 }
 0x1a9   : > { %v1511_v21 = vpop.permute.xlu1 %1510 }
 0x1aa   : > { %10167 = vmatmul.mubr.msk.f32.vlgmr.msra.gmra.mrb[2].mxu0 %vm1178_vm3, %v1511_v21 }
 0x1ab   : > { %10176 = vmatprep.mubr.msk.f32.mxu0 %vm10910_vm2, %v10909_v10 }
 0x1ad   : > { %v1678_v44 = vpop.permute.xlu1 %1677 }
 0x270   : > { %v1249_v30 = vpop.f32.mrb[0].mxu1 }
 0x271   : > { %v1253_v31 = vmul.f32 0.5, %v1249_v30  ;;  %v10148_v32 = vpop.f32.mrb[1].mxu1 }
 0x273   : > { %v1254_v33 = vadd.f32 %v1253_v31, %v11255_v29 }
 0x275   : > { %v1256_v34 = vsel %vm1255_vm5, %v1254_v33, -inf }
 0x276   : > { %1257 = vmax.xlane.f32.xlu0 %v1256_v34 }
 0x27d   : > { %v1584_v35 = vpop.f32.mrb[2].mxu0 }
 0x27e   : > { %v10168_v36 = vpop.f32.mrb[3].mxu0  ;;  %v1588_v37 = vmul.f32 0.5, %v1584_v35  ;;  %v11404_v35 = vsub.s32 1, %v11238_v23 }
 0x280   : > { %v11282_v38 = vadd.f32 %v1588_v37, %v11255_v29 }
 0x282   : > { %v1590_v39 = vsel %vm1255_vm5, %v11282_v38, -inf }
 0x28c   : > { %1679 = vrot.lane.b32.xlu0 %v11206_v15, %s12548_s13 }
 0x290   : > { %2180 = vrot.lane.b32.xlu0 %v11206_v15, %s12546_s16 }
 0x294   : > { %2347 = vrot.lane.b32.xlu0 %v11206_v15, %s12544_s17 }
 0x298   : > { %2558 = vrot.lane.b32.xlu0 %v11204_v13, %s12550_s24  ;;  %s10931_s24 = smov 44  }
 0x29c   : > { %2723 = vrot.lane.b32.xlu0 %v11204_v13, %s10914_s22 }
 0x2a0   : > { %2890 = vrot.lane.b32.xlu0 %v11204_v13, %s10916_s30 }
 0x2a4   : > { %3057 = vrot.lane.b32.xlu0 %v11204_v13, %s10917_s8 }
 0x2a8   : > { %3224 = vrot.lane.b32.xlu0 %v11204_v13, %s10921_s18 }
 0x2ac   : > { %3391 = vrot.lane.b32.xlu0 %v11204_v13, %s10922_s4 }
 0x2b0   : > { %3558 = vrot.lane.b32.xlu0 %v11204_v13, %s10923_s23 }
 0x2b4   : > { %3725 = vrot.lane.b32.xlu0 %v11204_v13, %s10924_s11 }
 0x2d3   : > { %1591 = vmax.xlane.f32.xlu0 %v1590_v39 }
 0x303   : > { %v1258_v40 = vpop.xlane.xlu0 %1257 }
 0x304   : > { %v1259_v41 = vsub.f32 %v1254_v33, %v1258_v40 }
 0x306   : > { %v1260_v42 = vmul.f32 1.442695, %v1259_v41 }
 0x307   : > { %v1680_v43 = vpop.permute.xlu0 %1679 }
 0x308   : > { %10725 = vpow2.f32 %v1260_v42  ;;  %10175 = vmatpush3.xpose.msk.msra.mxu0 %vm1178_vm3, %v1680_v43  ;;  %v2555_v42 = vrot.slane %v11246_v26, %v11404_v35 }
 0x309   : > { %10184 = vmatprep.subr.mxu0 %v10909_v10 }
 0x30b   : > { %10177 = vmatmul.mubr.msk.f32.vlgmr.msra.gmra.mrb[4].mxu0 %vm1178_vm3, %v1678_v44  ;;  %v2181_v48 = vpop.permute.xlu0 %2180 }
 0x30c   : > { %10186 = vmatprep.mubr.msk.f32.mxu0 %vm10910_vm2, %v10909_v10 }
 0x30f   : > { %v2348_v50 = vpop.permute.xlu0 %2347 }
 0x312   : > { %v10726_v45 = vpop.eup %10725 }
 0x313   : > { %v1262_v46 = vsel %vm1255_vm5, %v10726_v45, 0.0  ;;  %v2559_v55 = vpop.permute.xlu0 %2558 }
 0x314   : > { %1263 = vadd.xlane.f32.xlu1 %v1262_v46 }
 0x317   : > { %v2724_v57 = vpop.permute.xlu0 %2723 }
 0x31b   : > { %v2891_v60 = vpop.permute.xlu0 %2890 }
 0x31f   : > { %v3058_v62 = vpop.permute.xlu0 %3057 }
 0x323   : > { %v3225_v1 = vpop.permute.xlu0 %3224 }
 0x325   : > { %1846 = vrot.lane.b32.xlu1 %v11206_v15, %s10925_s26 }
 0x327   : > { %v3392_v3 = vpop.permute.xlu0 %3391 }
 0x329   : > { %1844 = vrot.lane.b32.xlu1 %v11206_v15, %s10921_s18 }
 0x32b   : > { %v3559_v6 = vpop.permute.xlu0 %3558 }
 0x32d   : > { %2013 = vrot.lane.b32.xlu1 %v11206_v15, %s12552_s1 }
 0x32f   : > { %v3726_v8 = vpop.permute.xlu0 %3725 }
 0x331   : > { %2011 = vrot.lane.b32.xlu1 %v11206_v15, %s10922_s4 }
 0x335   : > { %2178 = vrot.lane.b32.xlu1 %v11206_v15, %s10923_s23 }
 0x339   : > { %2345 = vrot.lane.b32.xlu1 %v11206_v15, %s10924_s11 }
 0x33d   : > { %2725 = vrot.lane.b32.xlu1 %v11204_v13, %s10913_s25 }
 0x341   : > { %2892 = vrot.lane.b32.xlu1 %v11204_v13, %s10915_s2 }
 0x345   : > { %3059 = vrot.lane.b32.xlu1 %v11204_v13, %s12548_s13  ;;  %s10930_s13 = smov 48  }
 0x349   : > { %3226 = vrot.lane.b32.xlu1 %v11204_v13, %s10925_s26 }
 0x34d   : > { %3393 = vrot.lane.b32.xlu1 %v11204_v13, %s12552_s1  ;;  %s10932_s1 = smov 36  }
 0x351   : > { %3560 = vrot.lane.b32.xlu1 %v11204_v13, %s12546_s16  ;;  %s10929_s16 = smov 60  }
 0x355   : > { %3727 = vrot.lane.b32.xlu1 %v11204_v13, %s12544_s17  ;;  %s10928_s17 = smov 52  }
 0x3a1   : > { %v1264_v47 = vpop.xlane.xlu1 %1263 }
 0x3a2   : > { %10727 = vrcp.f32 %v1264_v47 }
 0x3a5   : > { %v1847_v49 = vpop.permute.xlu1 %1846 }
 0x3a6   : > { %10185 = vmatpush3.xpose.msk.msra.mxu0 %vm1178_vm3, %v1847_v49 }
 0x3a7   : > { %10194 = vmatprep.subr.mxu0 %v10909_v10 }
 0x3a9   : > { %v1845_v51 = vpop.permute.xlu1 %1844 }
 0x3aa   : > { %10187 = vmatmul.mubr.msk.f32.vlgmr.msra.gmra.mrb[6].mxu0 %vm1178_vm3, %v1845_v51 }
 0x3ab   : > { %10196 = vmatprep.mubr.msk.f32.mxu0 %vm10910_vm2, %v10909_v10 }
 0x3ac   : > { %v10728_v52 = vpop.eup %10727 }
 0x3ad   : > { %v2014_v53 = vpop.permute.xlu1 %2013  ;;  %v1266_v54 = vmul.f32 %v10728_v52, %v10726_v45 }
 0x3ae   : > { %10195 = vmatpush3.xpose.msk.msra.mxu0 %vm1178_vm3, %v2014_v53 }
 0x3af   : > { %10152 = vmatmul.mubr.msk.f32.vlgmr.msra.gmra.mrb[2].mxu1 %vm1255_vm5, %v1266_v54  ;;  %10204 = vmatprep.subr.mxu0 %v10909_v10 }
 0x3b0   : > { %10155 = vmatpush3.xpose.msk.msra.mxu1 %vm1178_vm3, %v11224_v18  ;;  %10156 = vmatprep.mubr.msk.f32.mxu1 %vm10910_vm2, %v10909_v10 }
 0x3b1   : > { %v2012_v56 = vpop.permute.xlu1 %2011  ;;  %10159 = vmatprep.subr.mxu1 %v10909_v10 }
 0x3b2   : > { %10197 = vmatmul.mubr.msk.f32.vlgmr.msra.gmra.mrb[8].mxu0 %vm1178_vm3, %v2012_v56 }
 0x3b3   : > { %10205 = vmatpush3.xpose.msk.msra.mxu0 %vm1178_vm3, %v2181_v48  ;;  %10157 = vmatmul.mubr.msk.f32.vlgmr.msra.gmra.mrb[4].mxu1 %vm1178_vm3, %v11231_v19  ;;  %v2556_v48 = vadd.f32 %v2555_v42, %v11252_v28 }
 0x3b4   : > { %10206 = vmatprep.mubr.msk.f32.mxu0 %vm10910_vm2, %v10909_v10  ;;  %10214 = vmatprep.subr.mxu0 %v10909_v10 }
 0x3b5   : > { %v2179_v58 = vpop.permute.xlu1 %2178  ;;  %10161 = vmatprep.mubr.msk.f32.mxu1 %vm10910_vm2, %v10909_v10 }
 0x3b6   : > { %10207 = vmatmul.mubr.msk.f32.vlgmr.msra.gmra.mrb[10].mxu0 %vm1178_vm3, %v2179_v58 }
 0x3b7   : > { %10215 = vmatpush3.xpose.msk.msra.mxu0 %vm1178_vm3, %v2348_v50  ;;  %10216 = vmatprep.mubr.msk.f32.mxu0 %vm10910_vm2, %v10909_v10 }
 0x3b8   : > { %10224 = vmatprep.subr.mxu0 %v10909_v10 }
 0x3b9   : > { %v2346_v59 = vpop.permute.xlu1 %2345 }
 0x3ba   : > { %10217 = vmatmul.mubr.msk.f32.vlgmr.msra.gmra.mrb[12].mxu0 %vm1178_vm3, %v2346_v59 }
 0x3bb   : > { %10225 = vmatpush3.xpose.msk.msra.mxu0 %vm1178_vm3, %v2559_v55  ;;  %10226 = vmatprep.mubr.msk.f32.mxu0 %vm10910_vm2, %v10909_v10 }
 0x3bc   : > { %10234 = vmatprep.subr.mxu0 %v10909_v10 }
 0x3bd   : > { %v2726_v61 = vpop.permute.xlu1 %2725 }
 0x3be   : > { %10227 = vmatmul.mubr.msk.f32.vlgmr.msra.gmra.mrb[14].mxu0 %vm1178_vm3, %v11204_v13 }
 0x3bf   : > { %10235 = vmatpush3.xpose.msk.msra.mxu0 %vm1178_vm3, %v2726_v61  ;;  %10236 = vmatprep.mubr.msk.f32.mxu0 %vm10910_vm2, %v10909_v10 }
 0x3c0   : > { %10244 = vmatprep.subr.mxu0 %v10909_v10 }
 0x3c1   : > { %v2893_v63 = vpop.permute.xlu1 %2892 }
 0x3c2   : > { %10237 = vmatmul.mubr.msk.f32.vlgmr.msra.gmra.mrb[16].mxu0 %vm1178_vm3, %v2724_v57 }
 0x3c3   : > { %10245 = vmatpush3.xpose.msk.msra.mxu0 %vm1178_vm3, %v2893_v63  ;;  %10246 = vmatprep.mubr.msk.f32.mxu0 %vm10910_vm2, %v10909_v10 }
 0x3c4   : > { %10254 = vmatprep.subr.mxu0 %v10909_v10 }
 0x3c5   : > { %v3060_v0 = vpop.permute.xlu1 %3059 }
 0x3c6   : > { %10247 = vmatmul.mubr.msk.f32.vlgmr.msra.gmra.mrb[18].mxu0 %vm1178_vm3, %v2891_v60 }
 0x3c7   : > { %10255 = vmatpush3.xpose.msk.msra.mxu0 %vm1178_vm3, %v3060_v0  ;;  %10256 = vmatprep.mubr.msk.f32.mxu0 %vm10910_vm2, %v10909_v10 }
 0x3c8   : > { %10264 = vmatprep.subr.mxu0 %v10909_v10 }
 0x3c9   : > { %v3227_v2 = vpop.permute.xlu1 %3226 }
 0x3ca   : > { %10257 = vmatmul.mubr.msk.f32.vlgmr.msra.gmra.mrb[20].mxu0 %vm1178_vm3, %v3058_v62 }
 0x3cb   : > { %10265 = vmatpush3.xpose.msk.msra.mxu0 %vm1178_vm3, %v3227_v2  ;;  %10266 = vmatprep.mubr.msk.f32.mxu0 %vm10910_vm2, %v10909_v10 }
 0x3cc   : > { %10274 = vmatprep.subr.mxu0 %v10909_v10 }
 0x3cd   : > { %v3394_v4 = vpop.permute.xlu1 %3393 }
 0x3ce   : > { %10267 = vmatmul.mubr.msk.f32.vlgmr.msra.gmra.mrb[22].mxu0 %vm1178_vm3, %v3225_v1 }
 0x3cf   : > { %10275 = vmatpush3.xpose.msk.msra.mxu0 %vm1178_vm3, %v3394_v4  ;;  %10276 = vmatprep.mubr.msk.f32.mxu0 %vm10910_vm2, %v10909_v10 }
 0x3d0   : > { %10284 = vmatprep.subr.mxu0 %v10909_v10 }
 0x3d1   : > { %v3561_v5 = vpop.permute.xlu1 %3560 }
 0x3d2   : > { %10277 = vmatmul.mubr.msk.f32.vlgmr.msra.gmra.mrb[24].mxu0 %vm1178_vm3, %v3392_v3 }
 0x3d3   : > { %10285 = vmatpush3.xpose.msk.msra.mxu0 %vm1178_vm3, %v3561_v5  ;;  %10286 = vmatprep.mubr.msk.f32.mxu0 %vm10910_vm2, %v10909_v10 }
 0x3d4   : > { %10294 = vmatprep.subr.mxu0 %v10909_v10 }
 0x3d5   : > { %v3728_v7 = vpop.permute.xlu1 %3727 }
 0x3d6   : > { %10287 = vmatmul.mubr.msk.f32.vlgmr.msra.gmra.mrb[26].mxu0 %vm1178_vm3, %v3559_v6 }
 0x3d7   : > { %10295 = vmatpush3.xpose.msk.msra.mxu0 %vm1178_vm3, %v3728_v7  ;;  %10296 = vmatprep.mubr.msk.f32.mxu0 %vm10910_vm2, %v10909_v10 }
 0x3da   : > { %10297 = vmatmul.mubr.msk.f32.vlgmr.msra.gmra.mrb[28].mxu0 %vm1178_vm3, %v3726_v8 }
 0x3de   : > { %v1751_v9 = vpop.f32.mrb[4].mxu0 }
 0x3df   : > { %v1755_v11 = vmul.f32 0.5, %v1751_v9  ;;  %v10178_v12 = vpop.f32.mrb[5].mxu0 }
 0x3e1   : > { %v11387_v14 = vadd.f32 %v1755_v11, %v11255_v29 }
 0x3e3   : > { %v1757_v16 = vsel %vm1255_vm5, %v11387_v14, -inf }
 0x3e4   : > { %1758 = vmax.xlane.f32.xlu0 %v1757_v16 }
 0x47d   : > { %v1918_v17 = vpop.f32.mrb[6].mxu0 }
 0x47e   : > { %v1922_v18 = vmul.f32 0.5, %v1918_v17  ;;  %v10188_v19 = vpop.f32.mrb[7].mxu0 }
 0x480   : > { %v11392_v20 = vadd.f32 %v1922_v18, %v11255_v29 }
 0x482   : > { %v11394_v21 = vpop.f32.mrb[2].mxu1  ;;  %v1924_v22 = vsel %vm1255_vm5, %v11392_v20, -inf }
 0x483   : > { %1925 = vmax.xlane.f32.xlu1 %v1924_v22  ;;  %v10153_v24 = vpop.f32.mrb[3].mxu1 }
 0x485   : > { %v2085_v27 = vpop.f32.mrb[8].mxu0 }
 0x486   : > { %v2089_v30 = vmul.f32 0.5, %v2085_v27  ;;  %v11398_v31 = vpop.f32.mrb[4].mxu1  ;;  %v10198_v32 = vpop.f32.mrb[9].mxu0 }
 0x487   : > { %v10158_v33 = vpop.f32.mrb[5].mxu1 }
 0x488   : > { %v11401_v34 = vadd.f32 %v2089_v30, %v11255_v29 }
 0x489   : > { %v2252_v36 = vpop.f32.mrb[10].mxu0 }
 0x48a   : > { %v2256_v37 = vmul.f32 0.5, %v2252_v36  ;;  %v10208_v39 = vpop.f32.mrb[11].mxu0  ;;  %v2091_v40 = vsel %vm1255_vm5, %v11401_v34, -inf }
 0x48b   : > { %2092 = vmax.xlane.f32.xlu0 %v2091_v40  ;;  %v1592_v39 = vpop.xlane.xlu0 %1591 }
 0x48c   : > { %v11409_v41 = vadd.f32 %v2256_v37, %v11255_v29 }
 0x48d   : > { %v2419_v43 = vpop.f32.mrb[12].mxu0 }
 0x48e   : > { %v2423_v44 = vmul.f32 0.5, %v2419_v43  ;;  %v10218_v45 = vpop.f32.mrb[13].mxu0  ;;  %v2258_v46 = vsel %vm1255_vm5, %v11409_v41, -inf  ;;  %v1593_v43 = vsub.f32 %v11282_v38, %v1592_v39 }
 0x48f   : > { %2259 = vmax.xlane.f32.xlu1 %v2258_v46  ;;  %v1759_v40 = vpop.xlane.xlu0 %1758 }
 0x490   : > { %v11416_v47 = vadd.f32 %v2423_v44, %v11255_v29  ;;  %v1760_v42 = vsub.f32 %v11387_v14, %v1759_v40  ;;  %v1594_v45 = vmul.f32 1.442695, %v1593_v43  ;;  %v1421_v40 = vmul.f32 0.5, %v11398_v31 }
 0x491   : > { %v2630_v49 = vpop.f32.mrb[14].mxu0 }
 0x492   : > { %v2634_v50 = vmul.f32 0.5, %v2630_v49  ;;  %v10228_v51 = vpop.f32.mrb[15].mxu0  ;;  %v2425_v52 = vsel %vm1255_vm5, %v11416_v47, -inf  ;;  %v1761_v44 = vmul.f32 1.442695, %v1760_v42 }
 0x493   : > { %2426 = vmax.xlane.f32.xlu0 %v2425_v52 }
 0x494   : > { %v11421_v26 = vadd.f32 %v2634_v50, %v2556_v48  ;;  %10729 = vpow2.f32 %v1761_v44  ;;  %v1422_v44 = vadd.f32 %v1421_v40, %v11255_v29 }
 0x495   : > { %v2797_v53 = vpop.f32.mrb[16].mxu0  ;;  %10731 = vpow2.f32 %v1594_v45 }
 0x496   : > { %v2801_v54 = vmul.f32 0.5, %v2797_v53  ;;  %v10238_v55 = vpop.f32.mrb[17].mxu0  ;;  %v2636_v56 = vsel %vm1255_vm5, %v11421_v26, -inf  ;;  %v1423_v31 = vsel %vm1255_vm5, %v1422_v44, -inf }
 0x497   : > { %2637 = vmax.xlane.f32.xlu1 %v2636_v56 }
 0x498   : > { %v11425_v57 = vadd.f32 %v2801_v54, %v2556_v48 }
 0x499   : > { %v2964_v58 = vpop.f32.mrb[18].mxu0 }
 0x49a   : > { %v2968_v28 = vmul.f32 0.5, %v2964_v58  ;;  %v10248_v59 = vpop.f32.mrb[19].mxu0  ;;  %v2803_v60 = vsel %vm1255_vm5, %v11425_v57, -inf }
 0x49b   : > { %2804 = vmax.xlane.f32.xlu0 %v2803_v60 }
 0x49c   : > { %v11429_v61 = vadd.f32 %v2968_v28, %v2556_v48 }
 0x49d   : > { %v3131_v62 = vpop.f32.mrb[20].mxu0 }
 0x49e   : > { %v3135_v63 = vmul.f32 0.5, %v3131_v62  ;;  %v10258_v0 = vpop.f32.mrb[21].mxu0  ;;  %v2970_v1 = vsel %vm1255_vm5, %v11429_v61, -inf  ;;  %v11463_v46 = vpop.eup %10729 }
 0x49f   : > { %2971 = vmax.xlane.f32.xlu1 %v2970_v1  ;;  %v11467_v49 = vpop.eup %10731 }
 0x4a0   : > { %v11433_v2 = vadd.f32 %v3135_v63, %v2556_v48  ;;  %v1596_v50 = vsel %vm1255_vm5, %v11467_v49, 0.0 }
 0x4a1   : > { %v3298_v3 = vpop.f32.mrb[22].mxu0 }
 0x4a2   : > { %v3302_v4 = vmul.f32 0.5, %v3298_v3  ;;  %v10268_v5 = vpop.f32.mrb[23].mxu0  ;;  %v3137_v6 = vsel %vm1255_vm5, %v11433_v2, -inf }
 0x4a3   : > { %3138 = vmax.xlane.f32.xlu0 %v3137_v6 }
 0x4a4   : > { %v11437_v7 = vadd.f32 %v3302_v4, %v2556_v48 }
 0x4a5   : > { %v3465_v8 = vpop.f32.mrb[24].mxu0 }
 0x4a6   : > { %v3469_v9 = vmul.f32 0.5, %v3465_v8  ;;  %v10278_v11 = vpop.f32.mrb[25].mxu0  ;;  %v3304_v12 = vsel %vm1255_vm5, %v11437_v7, -inf }
 0x4a7   : > { %3305 = vmax.xlane.f32.xlu1 %v3304_v12 }
 0x4a8   : > { %v11441_v16 = vadd.f32 %v3469_v9, %v2556_v48 }
 0x4a9   : > { %v3632_v17 = vpop.f32.mrb[26].mxu0 }
 0x4aa   : > { %v3636_v18 = vmul.f32 0.5, %v3632_v17  ;;  %v10288_v19 = vpop.f32.mrb[27].mxu0  ;;  %v3471_v22 = vsel %vm1255_vm5, %v11441_v16, -inf }
 0x4ab   : > { %3472 = vmax.xlane.f32.xlu0 %v3471_v22 }
 0x4ac   : > { %v11445_v24 = vadd.f32 %v3636_v18, %v2556_v48 }
 0x4ad   : > { %v3799_v27 = vpop.f32.mrb[28].mxu0 }
 0x4ae   : > { %v3803_v30 = vmul.f32 0.5, %v3799_v27  ;;  %v10298_v32 = vpop.f32.mrb[29].mxu0  ;;  %v3638_v33 = vsel %vm1255_vm5, %v11445_v24, -inf }
 0x4af   : > { %3639 = vmax.xlane.f32.xlu1 %v3638_v33 }
 0x4b0   : > { %v11449_v36 = vadd.f32 %v3803_v30, %v2556_v48  ;;  %v1763_v48 = vsel %vm1255_vm5, %v11463_v46, 0.0 }
 0x4b2   : > { %v3805_v37 = vsel %vm1255_vm5, %v11449_v36, -inf }
 0x4b3   : > { %3806 = vmax.xlane.f32.xlu0 %v3805_v37 }
 0x4c0   : > { %1601 = vrot.lane.b32.xlu1 %v11206_v15, %s10927_s27 }
 0x4c4   : > { %1768 = vrot.lane.b32.xlu1 %v11206_v15, %s10928_s17 }
 0x4c9   : > { %1434 = vrot.lane.b32.xlu0 %v11206_v15, %s10929_s16 }
 0x4cd   : > { %1935 = vrot.lane.b32.xlu0 %v11206_v15, %s10930_s13 }
 0x4e8   : > { %1764 = vadd.xlane.f32.xlu1 %v1763_v48 }
 0x4ec   : > { %1597 = vadd.xlane.f32.xlu0 %v1596_v50 }
 0x510   : > { %v1926_v51 = vpop.xlane.xlu1 %1925 }
 0x511   : > { %v1927_v14 = vsub.f32 %v11392_v20, %v1926_v51 }
 0x513   : > { %v1928_v38 = vmul.f32 1.442695, %v1927_v14 }
 0x515   : > { %10733 = vpow2.f32 %v1928_v38 }
 0x518   : > { %v2093_v52 = vpop.xlane.xlu0 %2092 }
 0x519   : > { %v2094_v53 = vsub.f32 %v11401_v34, %v2093_v52 }
 0x51b   : > { %v2095_v54 = vmul.f32 1.442695, %v2094_v53 }
 0x51c   : > { %v2260_v55 = vpop.xlane.xlu1 %2259 }
 0x51d   : > { %10735 = vpow2.f32 %v2095_v54  ;;  %v2261_v56 = vsub.f32 %v11409_v41, %v2260_v55 }
 0x51f   : > { %v11474_v58 = vpop.eup %10733  ;;  %v2262_v28 = vmul.f32 1.442695, %v2261_v56 }
 0x520   : > { %v2427_v59 = vpop.xlane.xlu0 %2426  ;;  %v1930_v60 = vsel %vm1255_vm5, %v11474_v58, 0.0 }
 0x521   : > { %10737 = vpow2.f32 %v2262_v28  ;;  %v2428_v20 = vsub.f32 %v11416_v47, %v2427_v59  ;;  %1931 = vadd.xlane.f32.xlu0 %v1930_v60 }
 0x523   : > { %v2429_v62 = vmul.f32 1.442695, %v2428_v20 }
 0x524   : > { %v2638_v63 = vpop.xlane.xlu1 %2637 }
 0x525   : > { %10739 = vpow2.f32 %v2429_v62  ;;  %v2639_v34 = vsub.f32 %v11421_v26, %v2638_v63 }
 0x527   : > { %v11480_v0 = vpop.eup %10735  ;;  %v2640_v1 = vmul.f32 1.442695, %v2639_v34 }
 0x528   : > { %v2805_v41 = vpop.xlane.xlu0 %2804  ;;  %v2097_v3 = vsel %vm1255_vm5, %v11480_v0, 0.0 }
 0x529   : > { %10741 = vpow2.f32 %v2640_v1  ;;  %v2806_v4 = vsub.f32 %v11425_v57, %v2805_v41  ;;  %2098 = vadd.xlane.f32.xlu1 %v2097_v3 }
 0x52b   : > { %v11485_v5 = vpop.eup %10737  ;;  %v2807_v47 = vmul.f32 1.442695, %v2806_v4 }
 0x52c   : > { %v2972_v6 = vpop.xlane.xlu1 %2971  ;;  %v2264_v8 = vsel %vm1255_vm5, %v11485_v5, 0.0 }
 0x52d   : > { %10743 = vpow2.f32 %v2807_v47  ;;  %v2973_v26 = vsub.f32 %v11429_v61, %v2972_v6  ;;  %2265 = vadd.xlane.f32.xlu0 %v2264_v8 }
 0x52f   : > { %v11490_v9 = vpop.eup %10739  ;;  %v2974_v11 = vmul.f32 1.442695, %v2973_v26 }
 0x530   : > { %v3139_v12 = vpop.xlane.xlu0 %3138  ;;  %v2431_v17 = vsel %vm1255_vm5, %v11490_v9, 0.0 }
 0x531   : > { %10745 = vpow2.f32 %v2974_v11  ;;  %v3140_v57 = vsub.f32 %v11433_v2, %v3139_v12  ;;  %2432 = vadd.xlane.f32.xlu1 %v2431_v17 }
 0x533   : > { %v11495_v18 = vpop.eup %10741  ;;  %v3141_v19 = vmul.f32 1.442695, %v3140_v57 }
 0x534   : > { %v3306_v22 = vpop.xlane.xlu1 %3305  ;;  %v2642_v27 = vsel %vm1255_vm5, %v11495_v18, 0.0 }
 0x535   : > { %10747 = vpow2.f32 %v3141_v19  ;;  %v3307_v61 = vsub.f32 %v11437_v7, %v3306_v22  ;;  %2643 = vadd.xlane.f32.xlu1 %v2642_v27 }
 0x537   : > { %v11500_v30 = vpop.eup %10743  ;;  %v3308_v32 = vmul.f32 1.442695, %v3307_v61 }
 0x538   : > { %v2809_v33 = vsel %vm1255_vm5, %v11500_v30, 0.0  ;;  %v3473_v37 = vpop.xlane.xlu0 %3472 }
 0x539   : > { %10749 = vpow2.f32 %v3308_v32  ;;  %2810 = vadd.xlane.f32.xlu0 %v2809_v33  ;;  %v3474_v41 = vsub.f32 %v11441_v16, %v3473_v37 }
 0x53b   : > { %v11504_v2 = vpop.eup %10745  ;;  %v3475_v3 = vmul.f32 1.442695, %v3474_v41 }
 0x53c   : > { %v2976_v39 = vsel %vm1255_vm5, %v11504_v2, 0.0  ;;  %v3640_v52 = vpop.xlane.xlu1 %3639 }
 0x53d   : > { %2977 = vadd.xlane.f32.xlu1 %v2976_v39  ;;  %v3641_v4 = vsub.f32 %v11445_v24, %v3640_v52 }
 0x53f   : > { %v11509_v42 = vpop.eup %10747  ;;  %v3642_v47 = vmul.f32 1.442695, %v3641_v4 }
 0x540   : > { %v3807_v7 = vpop.xlane.xlu0 %3806  ;;  %v3143_v43 = vsel %vm1255_vm5, %v11509_v42, 0.0  ;;  %v1602_v53 = vpop.permute.xlu1 %1601 }
 0x541   : > { %3144 = vadd.xlane.f32.xlu1 %v3143_v43  ;;  %v3808_v29 = vsub.f32 %v11449_v36, %v3807_v7 }
 0x543   : > { %v11514_v45 = vpop.eup %10749  ;;  %v3809_v51 = vmul.f32 1.442695, %v3808_v29 }
 0x544   : > { %v1435_v48 = vpop.permute.xlu0 %1434  ;;  %v3310_v50 = vsel %vm1255_vm5, %v11514_v45, 0.0  ;;  %v1769_v54 = vpop.permute.xlu1 %1768 }
 0x545   : > { %3311 = vadd.xlane.f32.xlu0 %v3310_v50  ;;  %10160 = vmatpush3.msra.mxu1 %v1435_v48  ;;  %10751 = vpow2.f32 %v3809_v51 }
 0x546   : > { %1424 = vmax.xlane.f32.xlu1 %v1423_v31  ;;  %10169 = vmatprep.subr.mxu1 %v10909_v10 }
 0x54f   : > { %v11524_v14 = vpop.eup %10751 }
 0x550   : > { %v3811_v38 = vsel %vm1255_vm5, %v11524_v14, 0.0 }
 0x557   : > { %2102 = vrot.lane.b32.xlu1 %v11206_v15, %s10931_s24 }
 0x55b   : > { %2436 = vrot.lane.b32.xlu0 %v11206_v15, %s10932_s1 }
 0x575   : > { %v1765_v55 = vpop.xlane.xlu1 %1764 }
 0x57a   : > { %3812 = vadd.xlane.f32.xlu0 %v3811_v38 }
 0x590   : > { %3482 = vrot.lane.b32.xlu0 %v11204_v13, %s10931_s24  ;;  %s10933_s24 = smov 40  }
 0x5b6   : > { %v2099_v56 = vpop.xlane.xlu1 %2098 }
 0x5be   : > { %v2433_v28 = vpop.xlane.xlu1 %2432 }
 0x5c2   : > { %v11529_v59 = vpop.xlane.xlu1 %2643 }
 0x5ca   : > { %v11531_v60 = vpop.xlane.xlu1 %2977 }
 0x5ce   : > { %v11533_v36 = vpop.xlane.xlu1 %3144 }
 0x5d3   : > { %v1425_v20 = vpop.xlane.xlu1 %1424 }
 0x5d4   : > { %v1426_v62 = vsub.f32 %v1422_v44, %v1425_v20 }
 0x5d6   : > { %v1427_v63 = vmul.f32 1.442695, %v1426_v62 }
 0x5d7   : > { %v2103_v16 = vpop.permute.xlu1 %2102 }
 0x5d8   : > { %10753 = vpow2.f32 %v1427_v63 }
 0x5d9   : > { %10755 = vpow2.f32 %v3475_v3 }
 0x5da   : > { %10757 = vpow2.f32 %v3642_v47 }
 0x5e2   : > { %v10754_v34 = vpop.eup %10753 }
 0x5e3   : > { %v1429_v1 = vsel %vm1255_vm5, %v10754_v34, 0.0  ;;  %v11539_v6 = vpop.eup %10755 }
 0x5e4   : > { %1430 = vadd.xlane.f32.xlu1 %v1429_v1  ;;  %v3477_v8 = vsel %vm1255_vm5, %v11539_v6, 0.0  ;;  %v11543_v26 = vpop.eup %10757 }
 0x5e5   : > { %v3644_v11 = vsel %vm1255_vm5, %v11543_v26, 0.0 }
 0x5f5   : > { %2269 = vrot.lane.b32.xlu1 %v11206_v15, %s10933_s24  ;;  %v1936_v15 = vpop.permute.xlu0 %1935 }
 0x5f9   : > { %v1598_v24 = vpop.xlane.xlu0 %1597 }
 0x5fd   : > { %v1932_v17 = vpop.xlane.xlu0 %1931 }
 0x619   : > { %3478 = vadd.xlane.f32.xlu1 %v3477_v8 }
 0x61d   : > { %3645 = vadd.xlane.f32.xlu1 %v3644_v11 }
 0x62e   : > { %2647 = vrot.lane.b32.xlu1 %v11204_v13, %s10911_s3  ;;  %s12562_s3 = smov 12  }
 0x632   : > { %2814 = vrot.lane.b32.xlu1 %v11204_v13, %s10929_s16  ;;  %s12558_s16 = smov 20  }
 0x636   : > { %2981 = vrot.lane.b32.xlu1 %v11204_v13, %s10927_s27  ;;  %s10934_s27 = smov 4  }
 0x63a   : > { %3148 = vrot.lane.b32.xlu1 %v11204_v13, %s10928_s17  ;;  %s12556_s17 = smov 24  }
 0x63e   : > { %3315 = vrot.lane.b32.xlu1 %v11204_v13, %s10930_s13  ;;  %s12560_s13 = smov 16  }
 0x642   : > { %3649 = vrot.lane.b32.xlu1 %v11204_v13, %s10933_s24  ;;  %s12554_s24 = smov 28  }
 0x646   : > { %3816 = vrot.lane.b32.xlu1 %v11204_v13, %s10932_s1  ;;  %v2266_v13 = vpop.xlane.xlu0 %2265  ;;  %s12564_s1 = smov 8  }
 0x671   : > { %v1431_v12 = vpop.xlane.xlu1 %1430 }
 0x672   : > { %10759 = vrcp.f32 %v1431_v12 }
 0x673   : > { %10761 = vrcp.f32 %v1598_v24 }
 0x674   : > { %10763 = vrcp.f32 %v1765_v55 }
 0x675   : > { %10765 = vrcp.f32 %v1932_v17  ;;  %v2270_v43 = vpop.permute.xlu1 %2269 }
 0x676   : > { %10767 = vrcp.f32 %v2099_v56 }
 0x677   : > { %10769 = vrcp.f32 %v2266_v13 }
 0x678   : > { %10771 = vrcp.f32 %v2433_v28 }
 0x679   : > { %10773 = vrcp.f32 %v11529_v59 }
 0x67c   : > { %v10760_v57 = vpop.eup %10759 }
 0x67d   : > { %v1433_v19 = vmul.f32 %v10760_v57, %v10754_v34  ;;  %v10762_v22 = vpop.eup %10761 }
 0x67e   : > { %v1600_v27 = vmul.f32 %v10762_v22, %v11467_v49  ;;  %v10764_v61 = vpop.eup %10763  ;;  %v2811_v49 = vpop.xlane.xlu0 %2810 }
 0x67f   : > { %10162 = vmatmul.mubr.msk.f32.vlgmr.msra.gmra.mrb[6].mxu1 %vm1255_vm5, %v1433_v19  ;;  %v1767_v32 = vmul.f32 %v10764_v61, %v11463_v46  ;;  %v10766_v33 = vpop.eup %10765  ;;  %10775 = vrcp.f32 %v2811_v49  ;;  %v3927_v61 = vld [vmem:[%s11101_s29] sm:$0xff] }
 0x680   : > { %10170 = vmatpush3.msra.mxu1 %v1602_v53  ;;  %10171 = vmatprep.mubr.msk.f32.mxu1 %vm10910_vm2, %v10909_v10  ;;  %v1934_v37 = vmul.f32 %v10766_v33, %v11474_v58  ;;  %v10768_v39 = vpop.eup %10767  ;;  %10777 = vrcp.f32 %v11531_v60 }
 0x681   : > { %10179 = vmatprep.subr.mxu1 %v10909_v10  ;;  %v2101_v40 = vmul.f32 %v10768_v39, %v11480_v0  ;;  %v10770_v7 = vpop.eup %10769  ;;  %10779 = vrcp.f32 %v11533_v36  ;;  %v3929_v39 = vld [vmem:[%s11101_s29 + $0x10] sm:$0xff] }
 0x682   : > { %v3312_v46 = vpop.xlane.xlu0 %3311  ;;  %v2268_v58 = vmul.f32 %v10770_v7, %v11485_v5  ;;  %v10772_v44 = vpop.eup %10771 }
 0x683   : > { %10172 = vmatmul.mubr.msk.f32.vlgmr.msra.gmra.mrb[8].mxu1 %vm1255_vm5, %v1600_v27  ;;  %v2435_v0 = vmul.f32 %v10772_v44, %v11490_v9  ;;  %v10774_v31 = vpop.eup %10773  ;;  %10781 = vrcp.f32 %v3312_v46  ;;  %v3930_v46 = vld [vmem:[%s11101_s29 + $0x18] sm:$0xff] }
 0x684   : > { %10180 = vmatpush3.msra.mxu1 %v1769_v54  ;;  %10181 = vmatprep.mubr.msk.f32.mxu1 %vm10910_vm2, %v10909_v10  ;;  %v2646_v9 = vmul.f32 %v10774_v31, %v11495_v18  ;;  %v10520_v7 = vpack.c.bf16 %v3930_v46, %v3929_v39 }
 0x685   : > { %10189 = vmatprep.subr.mxu1 %v10909_v10 }
 0x686   : > { %v2437_v48 = vpop.permute.xlu0 %2436 }
 0x687   : > { %10182 = vmatmul.mubr.msk.f32.vlgmr.msra.gmra.mrb[10].mxu1 %vm1255_vm5, %v1767_v32  ;;  %v3928_v32 = vld [vmem:[%s11101_s29 + $0x8] sm:$0xff]  ;;  %s12615_s29 = sld [smem:[#allocation16_spill]] }
 0x688   : > { %10190 = vmatpush3.msra.mxu1 %v1936_v15  ;;  %10191 = vmatprep.mubr.msk.f32.mxu1 %vm10910_vm2, %v10909_v10  ;;  %v10516_v49 = vpack.c.bf16 %v3928_v32, %v3927_v61  ;;  %v4161_v32 = vld [vmem:[%s11127_s21 + $0x18] sm:$0xff] }
 0x689   : > { %10199 = vmatprep.subr.mxu1 %v10909_v10  ;;  %v10776_v51 = vpop.eup %10775 }
 0x68a   : > { %v2813_v52 = vmul.f32 %v10776_v51, %v11500_v30  ;;  %v10778_v53 = vpop.eup %10777  ;;  %v3813_v30 = vpop.xlane.xlu0 %3812  ;;  %10517 = vmatprep.subr.bf16.mxu0 %v10516_v49 }
 0x68b   : > { %10192 = vmatmul.mubr.msk.f32.vlgmr.msra.gmra.mrb[12].mxu1 %vm1255_vm5, %v1934_v37  ;;  %v2980_v54 = vmul.f32 %v10778_v53, %v11504_v2  ;;  %v10780_v55 = vpop.eup %10779  ;;  %10519 = vmatpush3.bf16.msra.mxu0 %v10516_v49 }
 0x68c   : > { %10200 = vmatpush3.msra.mxu1 %v2103_v16  ;;  %10201 = vmatprep.mubr.msk.f32.mxu1 %vm10910_vm2, %v10909_v10  ;;  %v3147_v28 = vmul.f32 %v10780_v55, %v11509_v42 }
 0x68d   : > { %10209 = vmatprep.subr.mxu1 %v10909_v10  ;;  %v10782_v59 = vpop.eup %10781  ;;  %10521 = vmatprep.subr.bf16.mxu0 %v10520_v7 }
 0x68e   : > { %v3314_v60 = vmul.f32 %v10782_v59, %v11514_v45  ;;  %v3483_v20 = vpop.permute.xlu0 %3482 }
 0x68f   : > { %10202 = vmatmul.mubr.msk.f32.vlgmr.msra.gmra.mrb[14].mxu1 %vm1255_vm5, %v2101_v40  ;;  %10523 = vmatpush3.bf16.msra.mxu0 %v10520_v7 }
 0x690   : > { %10210 = vmatpush3.msra.mxu1 %v2270_v43  ;;  %10211 = vmatprep.mubr.msk.f32.mxu1 %vm10910_vm2, %v10909_v10 }
 0x691   : > { %10219 = vmatprep.subr.mxu1 %v10909_v10 }
 0x693   : > { %10212 = vmatmul.mubr.msk.f32.vlgmr.msra.gmra.mrb[16].mxu1 %vm1255_vm5, %v2268_v58 }
 0x694   : > { %10220 = vmatpush3.msra.mxu1 %v2437_v48  ;;  %10221 = vmatprep.mubr.msk.f32.mxu1 %vm10910_vm2, %v10909_v10 }
 0x695   : > { %10229 = vmatprep.subr.mxu1 %v10909_v10 }
 0x697   : > { %10222 = vmatmul.mubr.msk.f32.vlgmr.msra.gmra.mrb[18].mxu1 %vm1255_vm5, %v2435_v0 }
 0x698   : > { %10231 = vmatprep.mubr.msk.f32.mxu1 %vm10910_vm2, %v10909_v10 }
 0x6a6   : > { %v3479_v5 = vpop.xlane.xlu1 %3478 }
 0x6a7   : > { %10783 = vrcp.f32 %v3479_v5 }
 0x6aa   : > { %v3646_v50 = vpop.xlane.xlu1 %3645 }
 0x6ab   : > { %10785 = vrcp.f32 %v3646_v50 }
 0x6ac   : > { %10787 = vrcp.f32 %v3813_v30 }
 0x6ae   : > { %v2648_v29 = vpop.permute.xlu1 %2647 }
 0x6af   : > { %10230 = vmatpush3.msra.mxu1 %v2648_v29 }
 0x6b0   : > { %10232 = vmatmul.mubr.msk.f32.vlgmr.msra.gmra.mrb[20].mxu1 %vm1255_vm5, %v2646_v9  ;;  %10239 = vmatprep.subr.mxu1 %v10909_v10 }
 0x6b1   : > { %10241 = vmatprep.mubr.msk.f32.mxu1 %vm10910_vm2, %v10909_v10  ;;  %v10784_v36 = vpop.eup %10783 }
 0x6b2   : > { %v2815_v38 = vpop.permute.xlu1 %2814  ;;  %v3481_v62 = vmul.f32 %v10784_v36, %v11539_v6 }
 0x6b3   : > { %10240 = vmatpush3.msra.mxu1 %v2815_v38 }
 0x6b4   : > { %10242 = vmatmul.mubr.msk.f32.vlgmr.msra.gmra.mrb[22].mxu1 %vm1255_vm5, %v2813_v52  ;;  %10249 = vmatprep.subr.mxu1 %v10909_v10 }
 0x6b5   : > { %10251 = vmatprep.mubr.msk.f32.mxu1 %vm10910_vm2, %v10909_v10  ;;  %v10786_v63 = vpop.eup %10785 }
 0x6b6   : > { %v2982_v18 = vpop.permute.xlu1 %2981  ;;  %v3648_v34 = vmul.f32 %v10786_v63, %v11543_v26  ;;  %v10788_v1 = vpop.eup %10787 }
 0x6b7   : > { %10250 = vmatpush3.msra.mxu1 %v2982_v18  ;;  %v3815_v41 = vmul.f32 %v10788_v1, %v11524_v14 }
 0x6b8   : > { %10252 = vmatmul.mubr.msk.f32.vlgmr.msra.gmra.mrb[24].mxu1 %vm1255_vm5, %v2980_v54  ;;  %10259 = vmatprep.subr.mxu1 %v10909_v10 }
 0x6b9   : > { %10261 = vmatprep.mubr.msk.f32.mxu1 %vm10910_vm2, %v10909_v10 }
 0x6ba   : > { %v3149_v56 = vpop.permute.xlu1 %3148 }
 0x6bb   : > { %10260 = vmatpush3.msra.mxu1 %v3149_v56 }
 0x6bc   : > { %10262 = vmatmul.mubr.msk.f32.vlgmr.msra.gmra.mrb[26].mxu1 %vm1255_vm5, %v3147_v28  ;;  %10269 = vmatprep.subr.mxu1 %v10909_v10 }
 0x6bd   : > { %10271 = vmatprep.mubr.msk.f32.mxu1 %vm10910_vm2, %v10909_v10 }
 0x6be   : > { %v3316_v2 = vpop.permute.xlu1 %3315 }
 0x6bf   : > { %10270 = vmatpush3.msra.mxu1 %v3316_v2 }
 0x6c0   : > { %10272 = vmatmul.mubr.msk.f32.vlgmr.msra.gmra.mrb[28].mxu1 %vm1255_vm5, %v3314_v60  ;;  %10279 = vmatprep.subr.mxu1 %v10909_v10 }
 0x6c1   : > { %10280 = vmatpush3.msra.mxu1 %v3483_v20  ;;  %10281 = vmatprep.mubr.msk.f32.mxu1 %vm10910_vm2, %v10909_v10 }
 0x6c2   : > { %v3650_v42 = vpop.permute.xlu1 %3649  ;;  %10289 = vmatprep.subr.mxu1 %v10909_v10 }
 0x6c4   : > { %10282 = vmatmul.mubr.msk.f32.vlgmr.msra.gmra.mrb[30].mxu1 %vm1255_vm5, %v3481_v62 }
 0x6c5   : > { %10290 = vmatpush3.msra.mxu1 %v3650_v42  ;;  %10291 = vmatprep.mubr.msk.f32.mxu1 %vm10910_vm2, %v10909_v10 }
 0x6c6   : > { %v3817_v45 = vpop.permute.xlu1 %3816  ;;  %10299 = vmatprep.subr.mxu1 %v10909_v10 }
 0x6c8   : > { %10292 = vmatmul.mubr.msk.f32.vlgmr.msra.gmra.mrb[32].mxu1 %vm1255_vm5, %v3648_v34 }
 0x6c9   : > { %10300 = vmatpush3.msra.mxu1 %v3817_v45  ;;  %10301 = vmatprep.mubr.msk.f32.mxu1 %vm10910_vm2, %v10909_v10 }
 0x6cc   : > { %10302 = vmatmul.mubr.msk.f32.vlgmr.msra.gmra.mrb[34].mxu1 %vm1255_vm5, %v3815_v41 }
 0x752   : > { %v1506_v3 = vpop.f32.mrb[6].mxu1 }
 0x753   : > { %2513 = vrot.lane.b32.xlu1 %v1506_v3, %s10934_s27  ;;  %v10163_v4 = vpop.f32.mrb[7].mxu1 }
 0x756   : > { %v1673_v47 = vpop.f32.mrb[8].mxu1 }
 0x757   : > { %2517 = vrot.lane.b32.xlu1 %v1673_v47, %s12564_s1  ;;  %v10173_v6 = vpop.f32.mrb[9].mxu1 }
 0x75a   : > { %v1840_v8 = vpop.f32.mrb[10].mxu1 }
 0x75b   : > { %2521 = vrot.lane.b32.xlu1 %v1840_v8, %s12562_s3  ;;  %v10183_v26 = vpop.f32.mrb[11].mxu1 }
 0x75e   : > { %v2007_v11 = vpop.f32.mrb[12].mxu1 }
 0x75f   : > { %2525 = vrot.lane.b32.xlu1 %v2007_v11, %s12560_s13  ;;  %v10193_v14 = vpop.f32.mrb[13].mxu1 }
 0x762   : > { %v2174_v15 = vpop.f32.mrb[14].mxu1 }
 0x763   : > { %2529 = vrot.lane.b32.xlu1 %v2174_v15, %s12558_s16  ;;  %v10203_v16 = vpop.f32.mrb[15].mxu1 }
 0x764   : > { %v10865_v16 = vld [vmem:[#allocation2 + $0x8] sm:$0xff] }
 0x766   : > { %v2341_v24 = vpop.f32.mrb[16].mxu1 }
 0x767   : > { %2533 = vrot.lane.b32.xlu1 %v2341_v24, %s12556_s17  ;;  %v10213_v12 = vpop.f32.mrb[17].mxu1 }
 0x768   : > { %v10866_v12 = vld [vmem:[#allocation2] sm:$0xff] }
 0x76a   : > { %v2508_v17 = vpop.f32.mrb[18].mxu1 }
 0x76b   : > { %v10223_v57 = vpop.f32.mrb[19].mxu1 }
 0x783   : > { %v2719_v19 = vpop.f32.mrb[20].mxu1 }
 0x784   : > { %v10233_v22 = vpop.f32.mrb[21].mxu1 }
 0x785   : > { %v4158_v22 = vld [vmem:[%s11127_s21] sm:$0xff] }
 0x787   : > { %v2886_v13 = vpop.f32.mrb[22].mxu1 }
 0x788   : > { %3893 = vrot.lane.b32.xlu1 %v2886_v13, %s10934_s27  ;;  %v10243_v27 = vpop.f32.mrb[23].mxu1  ;;  %v4159_v13 = vld [vmem:[%s11127_s21 + $0x8] sm:$0xff] }
 0x789   : > { %v4160_v27 = vld [vmem:[%s11127_s21 + $0x10] sm:$0xff]  ;;  %v10532_v61 = vpack.c.bf16 %v4159_v13, %v4158_v22  ;;  %s12616_s21 = scalar_lea.vmem %s12615_s29, %s11086_s6  ;;  %s12621_s29 = smov 96  }
 0x78a   : > { %v10536_v49 = vpack.c.bf16 %v4161_v32, %v4160_v27 }
 0x78b   : > { %v3053_v33 = vpop.f32.mrb[24].mxu1  ;;  %10533 = vmatprep.subr.bf16.mxu0 %v10532_v61 }
 0x78c   : > { %2537 = vrot.lane.b32.xlu1 %v2508_v17, %s12554_s24  ;;  %3897 = vrot.lane.b32.xlu0 %v3053_v33, %s12564_s1  ;;  %v10253_v37 = vpop.f32.mrb[25].mxu1 }
 0x78f   : > { %v3220_v40 = vpop.f32.mrb[26].mxu1 }
 0x790   : > { %3901 = vrot.lane.b32.xlu0 %v3220_v40, %s12562_s3  ;;  %v10263_v43 = vpop.f32.mrb[27].mxu1  ;;  %s12617_s3 = sld [smem:[#allocation17_spill]] }
 0x793   : > { %v3387_v58 = vpop.f32.mrb[28].mxu1 }
 0x794   : > { %3905 = vrot.lane.b32.xlu0 %v3387_v58, %s12560_s13  ;;  %v10273_v44 = vpop.f32.mrb[29].mxu1 }
 0x796   : > { %s12618_s1 = scalar_lea.vmem %s12617_s3, %s11086_s6  ;;  %s12619_s3 = smov 76  }
 0x797   : > { %v3554_v48 = vpop.f32.mrb[30].mxu1 }
 0x798   : > { %3909 = vrot.lane.b32.xlu0 %v3554_v48, %s12558_s16  ;;  %v10283_v0 = vpop.f32.mrb[31].mxu1 }
 0x79b   : > { %v3721_v5 = vpop.f32.mrb[32].mxu1 }
 0x79c   : > { %3913 = vrot.lane.b32.xlu0 %v3721_v5, %s12556_s17  ;;  %v10293_v50 = vpop.f32.mrb[33].mxu1  ;;  %s12611_s17 = sld [smem:[#allocation15_spill]] }
 0x79d   : > { %v4066_v50 = vld [vmem:[%s11118_s9] sm:$0xff] }
 0x79f   : > { %v3888_v31 = vpop.f32.mrb[34].mxu1 }
 0x7a0   : > { %3917 = vrot.lane.b32.xlu1 %v3888_v31, %s12554_s24  ;;  %v10303_v29 = vpop.f32.mrb[35].mxu1  ;;  %s12613_s24 = sld [smem:[#allocation11_spill]]  ;;  %v4067_v31 = vld [vmem:[%s11118_s9 + $0x8] sm:$0xff] }
 0x7a1   : > { %v4068_v29 = vld [vmem:[%s11118_s9 + $0x10] sm:$0xff] }
 0x7a2   : > { %s12612_s16 = scalar_lea.vmem %s12611_s17, %s11086_s6  ;;  %s12620_s17 = scalar_lea.vmem %s12521_s10, %s11086_s6 }
 0x7a3   : > { %v9550_v8 = vld [vmem:[%s12612_s16] ss:$0 sm:$0xff]  ;;  %s12614_s16 = scalar_lea.vmem %s12523_s12, %s11086_s6 }
 0x7a6   : > { %v1068_v33 = vld [vmem:[%s12613_s24] sm:$0xff]  ;;  %v1069_v37 = vld [vmem:[%s12613_s24 + $0x8] sm:$0xff] }
 0x7c5   : > { %v2514_v9 = vpop.permute.xlu1 %2513 }
 0x7c6   : > { %v2540_v54 = vsel %vm1178_vm3, %v11394_v21, %v2514_v9  ;;  %v10524_v9 = vpack.c.bf16 %v4067_v31, %v4066_v50 }
 0x7c8   : > { %10525 = vmatprep.subr.bf16.mxu1 %v10524_v9 }
 0x7c9   : > { %v2518_v51 = vpop.permute.xlu1 %2517  ;;  %10527 = vmatpush3.bf16.msra.mxu1 %v10524_v9 }
 0x7ca   : > { %v2541_v55 = vsel %vm1255_vm5, %v2540_v54, %v2518_v51  ;;  %v4069_v51 = vld [vmem:[%s11118_s9 + $0x18] sm:$0xff]  ;;  %s12633_s9 = sld [smem:[#allocation21_spill]] }
 0x7cd   : > { %v2522_v38 = vpop.permute.xlu1 %2521 }
 0x7ce   : > { %v2543_v56 = vsel %vm2542_vm6, %v2541_v55, %v2522_v38  ;;  %v10528_v38 = vpack.c.bf16 %v4069_v51, %v4068_v29 }
 0x7d0   : > { %10529 = vmatprep.subr.bf16.mxu1 %v10528_v38 }
 0x7d1   : > { %v2526_v52 = vpop.permute.xlu1 %2525  ;;  %10531 = vmatpush3.bf16.msra.mxu1 %v10528_v38 }
 0x7d2   : > { %v2545_v28 = vsel %vm2544_vm7, %v2543_v56, %v2526_v52  ;;  %10337 = vmatprep.subr.mxu1 %v10909_v10  ;;  %v9558_v52 = vld [vmem:[%s12614_s16] ss:$0 sm:$0xff]  ;;  %s12632_s16 = scalar_lea.vmem %s12526_s15, %s11086_s6 }
 0x7d5   : > { %v2530_v53 = vpop.permute.xlu1 %2529 }
 0x7d6   : > { %v2547_v59 = vsel %vm2546_vm8, %v2545_v28, %v2530_v53 }
 0x7d9   : > { %v2534_v18 = vpop.permute.xlu1 %2533 }
 0x7da   : > { %v2549_v2 = vsel %vm2548_vm9, %v2547_v59, %v2534_v18 }
 0x7fa   : > { %v3894_v30 = vpop.permute.xlu1 %3893 }
 0x7fb   : > { %v3920_v63 = vsel %vm1178_vm3, %v2719_v19, %v3894_v30 }
 0x7fe   : > { %v2538_v60 = vpop.permute.xlu1 %2537  ;;  %v3898_v36 = vpop.permute.xlu0 %3897 }
 0x7ff   : > { %v2551_v21 = vsel %vm2550_vm10, %v2549_v2, %v2538_v60  ;;  %v3921_v45 = vsel %vm1255_vm5, %v3920_v63, %v3898_v36 }
 0x800   : > { %10312 = vmatprep.mubr.msk.f32.mxu0 %vm1088_vm1, %v2551_v21  ;;  %v9553_v21 = vld [vmem:[%s12616_s21] ss:$0 sm:$0xff]  ;;  %s12622_s21 = smov 84  }
 0x802   : > { %v3902_v20 = vpop.permute.xlu0 %3901 }
 0x803   : > { %v3922_v34 = vsel %vm2542_vm6, %v3921_v45, %v3902_v20 }
 0x806   : > { %v3906_v42 = vpop.permute.xlu0 %3905 }
 0x807   : > { %v3923_v41 = vsel %vm2544_vm7, %v3922_v34, %v3906_v42  ;;  %v9554_v42 = vld [vmem:[%s12618_s1] ss:$0 sm:$0xff] }
 0x80a   : > { %v3910_v62 = vpop.permute.xlu0 %3909 }
 0x80b   : > { %v3924_v3 = vsel %vm2546_vm8, %v3923_v41, %v3910_v62 }
 0x80e   : > { %v3914_v1 = vpop.permute.xlu0 %3913 }
 0x80f   : > { %v3925_v4 = vsel %vm2548_vm9, %v3924_v3, %v3914_v1 }
 0x812   : > { %v3918_v47 = vpop.permute.xlu1 %3917 }
 0x813   : > { %v3926_v6 = vsel %vm2550_vm10, %v3925_v4, %v3918_v47  ;;  %v9555_v4 = vld [vmem:[%s12620_s17] ss:$0 sm:$0xff]  ;;  %s12634_s17 = scalar_lea.vmem %s12633_s9, %s11086_s6 }
 0x814   : > { %10313 = vmatmul.mubr.msk.f32.vlgmr.msra.gmra.mrb[30].mxu0 %vm1088_vm1, %v3926_v6 }
 0x815   : > { %10334 = vmatprep.mubr.msk.f32.mxu0 %vm1088_vm1, %v1068_v33  ;;  %10535 = vmatpush3.bf16.msra.mxu0 %v10532_v61 }
 0x816   : > { %10537 = vmatprep.subr.bf16.mxu0 %v10536_v49 }
 0x819   : > { %10539 = vmatpush3.bf16.msra.mxu0 %v10536_v49 }
 0x81a   : > { %10347 = vmatprep.subr.mxu0 %v10909_v10 }
 0x81c   : > { %10335 = vmatmul.mubr.msk.f32.vlgmr.msra.gmra.mrb[32].mxu0 %vm1088_vm1, %v1069_v37 }
 0x81d   : > { %10349 = vmatprep.mubr.msk.f32.mxu0 %vm10910_vm2, %v10909_v10 }
 0x8e7   : > { %v10314_v26 = vpop.f32.mrb[30].mxu0 }
 0x8e8   : > { %v4016_v11 = vadd.f32 %v10314_v26, %v9550_v8  ;;  %v4010_v14 = vpop.f32.mrb[31].mxu0 }
 0x8e9   : > { %v4011_v15 = vadd.f32 %v9550_v8, %v4010_v14 }
 0x8ea   : > { %v4020_v24 = vadd.f32 %v10865_v16, %v4016_v11 }
 0x8eb   : > { %v4019_v17 = vadd.f32 %v10866_v12, %v4011_v15 }
 0x8ec   : > { %v4026_v57 = vsel %vm1088_vm1, %v4020_v24, 0.0 }
 0x8ed   : > { %4027 = vadd.xlane.f32.xlu1 %v4026_v57  ;;  %v4023_v19 = vsel %vm1088_vm1, %v4019_v17, 0.0 }
 0x8ee   : > { %4024 = vadd.xlane.f32.xlu0 %v4023_v19 }
 0x8ef   : > { %v10336_v53 = vpop.f32.mrb[32].mxu0 }
 0x8f0   : > { %v4241_v18 = vpop.f32.mrb[33].mxu0  ;;  %v11716_v55 = vadd.f32 %v10336_v53, %v9558_v52 }
 0x8f1   : > { %v11702_v54 = vadd.f32 %v9558_v52, %v4241_v18 }
 0x8fe   : > { %4582 = vrot.lane.b32.xlu1 %v11702_v54, %s10916_s30 }
 0x97a   : > { %v4028_v39 = vpop.xlane.xlu1 %4027 }
 0x97b   : > { %v4031_v46 = vmul.f32 0.03125, %v4028_v39  ;;  %v4025_v40 = vpop.xlane.xlu0 %4024 }
 0x97c   : > { %v4030_v7 = vmul.f32 0.03125, %v4025_v40 }
 0x97d   : > { %v4033_v43 = vsub.f32 %v4020_v24, %v4031_v46 }
 0x97e   : > { %v4032_v58 = vsub.f32 %v4019_v17, %v4030_v7  ;;  %v4583_v15 = vpop.permute.xlu1 %4582 }
 0x97f   : > { %v4035_v0 = vmul.f32 %v4033_v43, %v4033_v43 }
 0x980   : > { %v4034_v44 = vmul.f32 %v4032_v58, %v4032_v58 }
 0x981   : > { %v4039_v5 = vsel %vm1088_vm1, %v4035_v0, 0.0 }
 0x982   : > { %v4036_v48 = vsel %vm1088_vm1, %v4034_v44, 0.0 }
 0x983   : > { %4037 = vadd.xlane.f32.xlu0 %v4036_v48 }
 0x987   : > { %4040 = vadd.xlane.f32.xlu0 %v4039_v5 }
 0x99d   : > { %4416 = vrot.lane.b32.xlu0 %v11702_v54, %s10914_s22 }
 0x9a1   : > { %4748 = vrot.lane.b32.xlu0 %v11702_v54, %s10917_s8 }
 0x9a5   : > { %4914 = vrot.lane.b32.xlu0 %v11702_v54, %s10921_s18 }
 0x9a9   : > { %5080 = vrot.lane.b32.xlu0 %v11702_v54, %s10922_s4 }
 0x9ad   : > { %5246 = vrot.lane.b32.xlu0 %v11702_v54, %s10923_s23 }
 0x9b1   : > { %5412 = vrot.lane.b32.xlu0 %v11702_v54, %s10924_s11 }
 0x9b5   : > { %5777 = vrot.lane.b32.xlu0 %v11716_v55, %s10914_s22 }
 0x9b9   : > { %5943 = vrot.lane.b32.xlu0 %v11716_v55, %s10916_s30 }
 0x9bd   : > { %6109 = vrot.lane.b32.xlu0 %v11716_v55, %s10917_s8 }
 0x9c1   : > { %6275 = vrot.lane.b32.xlu0 %v11716_v55, %s10921_s18 }
 0x9c5   : > { %6441 = vrot.lane.b32.xlu0 %v11716_v55, %s10922_s4 }
 0x9c9   : > { %6607 = vrot.lane.b32.xlu0 %v11716_v55, %s10923_s23 }
 0x9cd   : > { %6773 = vrot.lane.b32.xlu0 %v11716_v55, %s10924_s11 }
 0x9d1   : > { %4504 = vrot.lane.b32.xlu0 %v11702_v54, %s10913_s25 }
 0x9d5   : > { %4670 = vrot.lane.b32.xlu0 %v11702_v54, %s10915_s2 }
 0x9d9   : > { %5002 = vrot.lane.b32.xlu0 %v11702_v54, %s10925_s26 }
 0x9dd   : > { %5168 = vrot.lane.b32.xlu0 %v11702_v54, %s12619_s3 }
 0xa10   : > { %v4038_v30 = vpop.xlane.xlu0 %4037 }
 0xa11   : > { %v4042_v56 = vmul.f32 0.03125, %v4038_v30 }
 0xa13   : > { %v4044_v28 = vadd.f32 1e-05, %v4042_v56 }
 0xa14   : > { %v4041_v59 = vpop.xlane.xlu0 %4040 }
 0xa15   : > { %10789 = vrsqrt.f32 %v4044_v28  ;;  %v4043_v2 = vmul.f32 0.03125, %v4041_v59 }
 0xa17   : > { %v4045_v60 = vadd.f32 1e-05, %v4043_v2 }
 0xa18   : > { %v4417_v3 = vpop.permute.xlu0 %4416 }
 0xa19   : > { %10791 = vrsqrt.f32 %v4045_v60  ;;  %10348 = vmatpush3.xpose.msk.msra.mxu0 %vm1178_vm3, %v4417_v3 }
 0xa1a   : > { %10357 = vmatprep.subr.mxu0 %v10909_v10 }
 0xa1c   : > { %v4749_v11 = vpop.permute.xlu0 %4748 }
 0xa1f   : > { %v10790_v36 = vpop.eup %10789 }
 0xa20   : > { %v4048_v20 = vmul.f32 %v10790_v36, %v4032_v58  ;;  %v4915_v14 = vpop.permute.xlu0 %4914 }
 0xa22   : > { %v4056_v62 = vmul.f32 %v9553_v21, %v4048_v20 }
 0xa23   : > { %v10792_v63 = vpop.eup %10791 }
 0xa24   : > { %v4049_v45 = vmul.f32 %v10792_v63, %v4033_v43  ;;  %v11748_v34 = vadd.f32 %v9554_v42, %v4056_v62  ;;  %v5081_v16 = vpop.permute.xlu0 %5080 }
 0xa26   : > { %v4057_v1 = vmul.f32 %v9553_v21, %v4049_v45  ;;  %10323 = vmatprep.mubr.msk.f32.mxu1 %vm1088_vm1, %v11748_v34 }
 0xa28   : > { %v11754_v41 = vadd.f32 %v9554_v42, %v4057_v1  ;;  %v5247_v17 = vpop.permute.xlu0 %5246 }
 0xa2a   : > { %10324 = vmatmul.mubr.msk.f32.vlgmr.msra.gmra.mrb[36].mxu1 %vm1088_vm1, %v11754_v41 }
 0xa2b   : > { %10338 = vmatpush3.xpose.msk.msra.mxu1 %vm1178_vm3, %v11702_v54  ;;  %10339 = vmatprep.mubr.msk.f32.mxu1 %vm10910_vm2, %v10909_v10 }
 0xa2c   : > { %10342 = vmatprep.subr.mxu1 %v10909_v10  ;;  %v5413_v19 = vpop.permute.xlu0 %5412 }
 0xa30   : > { %v5778_v27 = vpop.permute.xlu0 %5777 }
 0xa34   : > { %v5944_v32 = vpop.permute.xlu0 %5943 }
 0xa38   : > { %v6110_v37 = vpop.permute.xlu0 %6109 }
 0xa3c   : > { %v6276_v46 = vpop.permute.xlu0 %6275 }
 0xa40   : > { %v6442_v43 = vpop.permute.xlu0 %6441 }
 0xa44   : > { %v6608_v44 = vpop.permute.xlu0 %6607 }
 0xa48   : > { %v6774_v5 = vpop.permute.xlu0 %6773 }
 0xafd   : > { %v10325_v47 = vpop.f32.mrb[36].mxu1 }
 0xafe   : > { %v4149_v6 = vpop.f32.mrb[37].mxu1  ;;  %v4155_v26 = vadd.f32 %v10325_v47, %v9555_v4 }
 0xaff   : > { %v4150_v8 = vadd.f32 %v9555_v4, %v4149_v6 }
 0xb01   : > { %4414 = vrot.lane.b32.xlu1 %v4150_v8, %s10914_s22  ;;  %10340 = vmatmul.mubr.msk.f32.vlgmr.msra.gmra.mrb[38].mxu1 %vm1178_vm3, %v4150_v8 }
 0xb02   : > { %10344 = vmatprep.mubr.msk.f32.mxu1 %vm10910_vm2, %v10909_v10 }
 0xb05   : > { %4580 = vrot.lane.b32.xlu1 %v4150_v8, %s10916_s30 }
 0xb09   : > { %4746 = vrot.lane.b32.xlu1 %v4150_v8, %s10917_s8 }
 0xb0d   : > { %4912 = vrot.lane.b32.xlu1 %v4150_v8, %s10921_s18 }
 0xb11   : > { %5078 = vrot.lane.b32.xlu1 %v4150_v8, %s10922_s4 }
 0xb15   : > { %5244 = vrot.lane.b32.xlu1 %v4150_v8, %s10923_s23 }
 0xb19   : > { %5410 = vrot.lane.b32.xlu1 %v4150_v8, %s10924_s11 }
 0xb1d   : > { %5775 = vrot.lane.b32.xlu1 %v4155_v26, %s10914_s22  ;;  %s12623_s22 = smov 72  }
 0xb21   : > { %5941 = vrot.lane.b32.xlu1 %v4155_v26, %s10916_s30  ;;  %s12624_s30 = smov 68  }
 0xb25   : > { %6107 = vrot.lane.b32.xlu1 %v4155_v26, %s10917_s8  ;;  %s12628_s8 = smov 20  }
 0xb29   : > { %6273 = vrot.lane.b32.xlu1 %v4155_v26, %s10921_s18  ;;  %s12629_s18 = smov 24  }
 0xb2d   : > { %6439 = vrot.lane.b32.xlu1 %v4155_v26, %s10922_s4  ;;  %s12630_s4 = smov 28  }
 0xb31   : > { %6605 = vrot.lane.b32.xlu1 %v4155_v26, %s10923_s23 }
 0xb35   : > { %6771 = vrot.lane.b32.xlu1 %v4155_v26, %s10924_s11  ;;  %s12631_s11 = scalar_lea.vmem %s12525_s14, %s11086_s6 }
 0xb39   : > { %4338 = vrot.lane.b32.xlu1 %v11702_v54, %s12621_s29 }
 0xb3d   : > { %4836 = vrot.lane.b32.xlu1 %v11702_v54, %s12622_s21 }
 0xb73   : > { %v4415_v24 = vpop.permute.xlu1 %4414 }
 0xb74   : > { %10350 = vmatmul.mubr.msk.f32.vlgmr.msra.gmra.mrb[34].mxu0 %vm1178_vm3, %v4415_v24 }
 0xb75   : > { %10358 = vmatpush3.xpose.msk.msra.mxu0 %vm1178_vm3, %v4583_v15  ;;  %10359 = vmatprep.mubr.msk.f32.mxu0 %vm10910_vm2, %v10909_v10 }
 0xb76   : > { %10367 = vmatprep.subr.mxu0 %v10909_v10 }
 0xb77   : > { %v4581_v12 = vpop.permute.xlu1 %4580 }
 0xb78   : > { %10360 = vmatmul.mubr.msk.f32.vlgmr.msra.gmra.mrb[36].mxu0 %vm1178_vm3, %v4581_v12 }
 0xb79   : > { %10368 = vmatpush3.xpose.msk.msra.mxu0 %vm1178_vm3, %v4749_v11  ;;  %10369 = vmatprep.mubr.msk.f32.mxu0 %vm10910_vm2, %v10909_v10 }
 0xb7a   : > { %10377 = vmatprep.subr.mxu0 %v10909_v10 }
 0xb7b   : > { %v4747_v57 = vpop.permute.xlu1 %4746 }
 0xb7c   : > { %10370 = vmatmul.mubr.msk.f32.vlgmr.msra.gmra.mrb[38].mxu0 %vm1178_vm3, %v4747_v57 }
 0xb7d   : > { %10378 = vmatpush3.xpose.msk.msra.mxu0 %vm1178_vm3, %v4915_v14  ;;  %10379 = vmatprep.mubr.msk.f32.mxu0 %vm10910_vm2, %v10909_v10 }
 0xb7e   : > { %10387 = vmatprep.subr.mxu0 %v10909_v10 }
 0xb7f   : > { %v4913_v22 = vpop.permute.xlu1 %4912 }
 0xb80   : > { %10380 = vmatmul.mubr.msk.f32.vlgmr.msra.gmra.mrb[40].mxu0 %vm1178_vm3, %v4913_v22 }
 0xb81   : > { %10388 = vmatpush3.xpose.msk.msra.mxu0 %vm1178_vm3, %v5081_v16  ;;  %10389 = vmatprep.mubr.msk.f32.mxu0 %vm10910_vm2, %v10909_v10 }
 0xb82   : > { %10397 = vmatprep.subr.mxu0 %v10909_v10 }
 0xb83   : > { %v5079_v13 = vpop.permute.xlu1 %5078 }
 0xb84   : > { %10390 = vmatmul.mubr.msk.f32.vlgmr.msra.gmra.mrb[42].mxu0 %vm1178_vm3, %v5079_v13 }
 0xb85   : > { %10398 = vmatpush3.xpose.msk.msra.mxu0 %vm1178_vm3, %v5247_v17  ;;  %10399 = vmatprep.mubr.msk.f32.mxu0 %vm10910_vm2, %v10909_v10 }
 0xb86   : > { %10407 = vmatprep.subr.mxu0 %v10909_v10 }
 0xb87   : > { %v5245_v61 = vpop.permute.xlu1 %5244 }
 0xb88   : > { %10400 = vmatmul.mubr.msk.f32.vlgmr.msra.gmra.mrb[44].mxu0 %vm1178_vm3, %v5245_v61 }
 0xb89   : > { %10408 = vmatpush3.xpose.msk.msra.mxu0 %vm1178_vm3, %v5413_v19  ;;  %10409 = vmatprep.mubr.msk.f32.mxu0 %vm10910_vm2, %v10909_v10 }
 0xb8a   : > { %10417 = vmatprep.subr.mxu0 %v10909_v10 }
 0xb8b   : > { %v5411_v33 = vpop.permute.xlu1 %5410 }
 0xb8c   : > { %10410 = vmatmul.mubr.msk.f32.vlgmr.msra.gmra.mrb[46].mxu0 %vm1178_vm3, %v5411_v33 }
 0xb8d   : > { %10418 = vmatpush3.xpose.msk.msra.mxu0 %vm1178_vm3, %v11716_v55  ;;  %10419 = vmatprep.mubr.msk.f32.mxu0 %vm10910_vm2, %v10909_v10 }
 0xb8e   : > { %10427 = vmatprep.subr.mxu0 %v10909_v10 }
 0xb8f   : > { %v5776_v49 = vpop.permute.xlu1 %5775 }
 0xb90   : > { %10420 = vmatmul.mubr.msk.f32.vlgmr.msra.gmra.mrb[48].mxu0 %vm1178_vm3, %v4155_v26 }
 0xb91   : > { %10428 = vmatpush3.xpose.msk.msra.mxu0 %vm1178_vm3, %v5778_v27  ;;  %10429 = vmatprep.mubr.msk.f32.mxu0 %vm10910_vm2, %v10909_v10 }
 0xb92   : > { %10437 = vmatprep.subr.mxu0 %v10909_v10 }
 0xb93   : > { %v5942_v39 = vpop.permute.xlu1 %5941 }
 0xb94   : > { %10430 = vmatmul.mubr.msk.f32.vlgmr.msra.gmra.mrb[50].mxu0 %vm1178_vm3, %v5776_v49 }
 0xb95   : > { %10438 = vmatpush3.xpose.msk.msra.mxu0 %vm1178_vm3, %v5944_v32  ;;  %10439 = vmatprep.mubr.msk.f32.mxu0 %vm10910_vm2, %v10909_v10 }
 0xb96   : > { %10447 = vmatprep.subr.mxu0 %v10909_v10 }
 0xb97   : > { %v6108_v40 = vpop.permute.xlu1 %6107 }
 0xb98   : > { %10440 = vmatmul.mubr.msk.f32.vlgmr.msra.gmra.mrb[52].mxu0 %vm1178_vm3, %v5942_v39 }
 0xb99   : > { %10448 = vmatpush3.xpose.msk.msra.mxu0 %vm1178_vm3, %v6110_v37  ;;  %10449 = vmatprep.mubr.msk.f32.mxu0 %vm10910_vm2, %v10909_v10 }
 0xb9a   : > { %10457 = vmatprep.subr.mxu0 %v10909_v10 }
 0xb9b   : > { %v6274_v7 = vpop.permute.xlu1 %6273 }
 0xb9c   : > { %10450 = vmatmul.mubr.msk.f32.vlgmr.msra.gmra.mrb[54].mxu0 %vm1178_vm3, %v6108_v40 }
 0xb9d   : > { %10458 = vmatpush3.xpose.msk.msra.mxu0 %vm1178_vm3, %v6276_v46  ;;  %10459 = vmatprep.mubr.msk.f32.mxu0 %vm10910_vm2, %v10909_v10 }
 0xb9e   : > { %10467 = vmatprep.subr.mxu0 %v10909_v10 }
 0xb9f   : > { %v6440_v58 = vpop.permute.xlu1 %6439 }
 0xba0   : > { %10460 = vmatmul.mubr.msk.f32.vlgmr.msra.gmra.mrb[56].mxu0 %vm1178_vm3, %v6274_v7 }
 0xba1   : > { %10468 = vmatpush3.xpose.msk.msra.mxu0 %vm1178_vm3, %v6442_v43  ;;  %10469 = vmatprep.mubr.msk.f32.mxu0 %vm10910_vm2, %v10909_v10 }
 0xba2   : > { %10477 = vmatprep.subr.mxu0 %v10909_v10 }
 0xba3   : > { %v6606_v48 = vpop.permute.xlu1 %6605 }
 0xba4   : > { %10470 = vmatmul.mubr.msk.f32.vlgmr.msra.gmra.mrb[58].mxu0 %vm1178_vm3, %v6440_v58  ;;  %v11913_v58 = vpop.permute.xlu0 %4504 }
 0xba5   : > { %10478 = vmatpush3.xpose.msk.msra.mxu0 %vm1178_vm3, %v6608_v44  ;;  %10479 = vmatprep.mubr.msk.f32.mxu0 %vm10910_vm2, %v10909_v10 }
 0xba6   : > { %10487 = vmatprep.subr.mxu0 %v10909_v10 }
 0xba7   : > { %v6772_v0 = vpop.permute.xlu1 %6771 }
 0xba8   : > { %10480 = vmatmul.mubr.msk.f32.vlgmr.msra.gmra.mrb[60].mxu0 %vm1178_vm3, %v6606_v48 }
 0xba9   : > { %10488 = vmatpush3.xpose.msk.msra.mxu0 %vm1178_vm3, %v6774_v5  ;;  %10489 = vmatprep.mubr.msk.f32.mxu0 %vm10910_vm2, %v10909_v10 }
 0xbab   : > { %v4339_v50 = vpop.permute.xlu1 %4338 }
 0xbac   : > { %10343 = vmatpush3.msra.mxu1 %v4339_v50  ;;  %10490 = vmatmul.mubr.msk.f32.vlgmr.msra.gmra.mrb[62].mxu0 %vm1178_vm3, %v6772_v0  ;;  %v11915_v0 = vpop.permute.xlu0 %4670 }
 0xbad   : > { %10352 = vmatprep.subr.mxu1 %v10909_v10 }
 0xbd4   : > { %v4322_v31 = vpop.f32.mrb[38].mxu1 }
 0xbd5   : > { %v11865_v29 = vmul.f32 0.5, %v4322_v31  ;;  %v10341_v9 = vpop.f32.mrb[39].mxu1 }
 0xbd7   : > { %v4327_v51 = vsel %vm1255_vm5, %v11865_v29, -inf }
 0xbd8   : > { %4328 = vmax.xlane.f32.xlu0 %v4327_v51  ;;  %v11917_v51 = vpop.permute.xlu0 %5002 }
 0xc47   : > { %v4488_v38 = vpop.f32.mrb[34].mxu0 }
 0xc48   : > { %v11869_v52 = vmul.f32 0.5, %v4488_v38  ;;  %v10351_v53 = vpop.f32.mrb[35].mxu0  ;;  %v11923_v38 = vpop.permute.xlu0 %5168 }
 0xc4a   : > { %v4493_v18 = vsel %vm1255_vm5, %v11869_v52, -inf }
 0xc4b   : > { %4494 = vmax.xlane.f32.xlu1 %v4493_v18  ;;  %v4654_v30 = vpop.f32.mrb[36].mxu0 }
 0xc4c   : > { %v11873_v56 = vmul.f32 0.5, %v4654_v30  ;;  %v10361_v28 = vpop.f32.mrb[37].mxu0 }
 0xc4e   : > { %v4659_v59 = vsel %vm1255_vm5, %v11873_v56, -inf }
 0xc4f   : > { %v4820_v2 = vpop.f32.mrb[38].mxu0  ;;  %4660 = vmax.xlane.f32.xlu0 %v4659_v59 }
 0xc50   : > { %v11877_v60 = vmul.f32 0.5, %v4820_v2  ;;  %v10371_v36 = vpop.f32.mrb[39].mxu0 }
 0xc52   : > { %v4825_v21 = vsel %vm1255_vm5, %v11877_v60, -inf }
 0xc53   : > { %v4986_v20 = vpop.f32.mrb[40].mxu0  ;;  %4826 = vmax.xlane.f32.xlu0 %v4825_v21 }
 0xc54   : > { %v11881_v42 = vmul.f32 0.5, %v4986_v20  ;;  %v10381_v62 = vpop.f32.mrb[41].mxu0 }
 0xc56   : > { %v4991_v63 = vsel %vm1255_vm5, %v11881_v42, -inf }
 0xc57   : > { %v5152_v45 = vpop.f32.mrb[42].mxu0  ;;  %4992 = vmax.xlane.f32.xlu0 %v4991_v63 }
 0xc58   : > { %v11885_v1 = vmul.f32 0.5, %v5152_v45  ;;  %v10391_v3 = vpop.f32.mrb[43].mxu0  ;;  %v11946_v45 = vpop.permute.xlu1 %4836 }
 0xc5a   : > { %v5157_v4 = vsel %vm1255_vm5, %v11885_v1, -inf }
 0xc5b   : > { %5158 = vmax.xlane.f32.xlu1 %v5157_v4  ;;  %v5318_v47 = vpop.f32.mrb[44].mxu0 }
 0xc5c   : > { %v11889_v6 = vmul.f32 0.5, %v5318_v47  ;;  %v10401_v8 = vpop.f32.mrb[45].mxu0 }
 0xc5e   : > { %v5323_v26 = vsel %vm1255_vm5, %v11889_v6, -inf }
 0xc5f   : > { %v5484_v11 = vpop.f32.mrb[46].mxu0  ;;  %5324 = vmax.xlane.f32.xlu0 %v5323_v26 }
 0xc60   : > { %v11893_v14 = vmul.f32 0.5, %v5484_v11  ;;  %v10411_v15 = vpop.f32.mrb[47].mxu0 }
 0xc62   : > { %v5489_v16 = vsel %vm1255_vm5, %v11893_v14, -inf }
 0xc63   : > { %5490 = vmax.xlane.f32.xlu1 %v5489_v16  ;;  %v5683_v24 = vpop.f32.mrb[48].mxu0 }
 0xc64   : > { %v11897_v12 = vmul.f32 0.5, %v5683_v24  ;;  %v10421_v17 = vpop.f32.mrb[49].mxu0 }
 0xc65   : > { %v4329_v53 = vpop.xlane.xlu0 %4328 }
 0xc66   : > { %v5688_v57 = vsel %vm1255_vm5, %v11897_v12, -inf  ;;  %v4330_v18 = vsub.f32 %v11865_v29, %v4329_v53 }
 0xc67   : > { %v5849_v19 = vpop.f32.mrb[50].mxu0  ;;  %5689 = vmax.xlane.f32.xlu0 %v5688_v57 }
 0xc68   : > { %v11901_v22 = vmul.f32 0.5, %v5849_v19  ;;  %v10431_v13 = vpop.f32.mrb[51].mxu0  ;;  %v4331_v30 = vmul.f32 1.442695, %v4330_v18 }
 0xc6a   : > { %v5854_v27 = vsel %vm1255_vm5, %v11901_v22, -inf  ;;  %10793 = vpow2.f32 %v4331_v30 }
 0xc6b   : > { %5855 = vmax.xlane.f32.xlu1 %v5854_v27  ;;  %v6015_v61 = vpop.f32.mrb[52].mxu0 }
 0xc6c   : > { %v11905_v32 = vmul.f32 0.5, %v6015_v61  ;;  %v10441_v33 = vpop.f32.mrb[53].mxu0 }
 0xc6e   : > { %v6020_v49 = vsel %vm1255_vm5, %v11905_v32, -inf }
 0xc6f   : > { %v6181_v37 = vpop.f32.mrb[54].mxu0  ;;  %6021 = vmax.xlane.f32.xlu0 %v6020_v49 }
 0xc70   : > { %v11909_v39 = vmul.f32 0.5, %v6181_v37  ;;  %v10451_v46 = vpop.f32.mrb[55].mxu0 }
 0xc72   : > { %v6186_v40 = vsel %vm1255_vm5, %v11909_v39, -inf }
 0xc73   : > { %6187 = vmax.xlane.f32.xlu1 %v6186_v40  ;;  %v6347_v7 = vpop.f32.mrb[56].mxu0 }
 0xc74   : > { %v10461_v43 = vpop.f32.mrb[57].mxu0  ;;  %v11926_v28 = vpop.eup %10793  ;;  %v11928_v59 = vmul.f32 0.5, %v6347_v7 }
 0xc75   : > { %v4333_v36 = vsel %vm1255_vm5, %v11926_v28, 0.0 }
 0xc76   : > { %v6352_v29 = vsel %vm1255_vm5, %v11928_v59, -inf }
 0xc77   : > { %v6513_v44 = vpop.f32.mrb[58].mxu0 }
 0xc78   : > { %v10471_v48 = vpop.f32.mrb[59].mxu0  ;;  %v11930_v2 = vmul.f32 0.5, %v6513_v44 }
 0xc7a   : > { %v6518_v20 = vsel %vm1255_vm5, %v11930_v2, -inf }
 0xc7b   : > { %v6679_v5 = vpop.f32.mrb[60].mxu0 }
 0xc7c   : > { %v10481_v50 = vpop.f32.mrb[61].mxu0  ;;  %v11934_v21 = vmul.f32 0.5, %v6679_v5 }
 0xc7e   : > { %v6684_v63 = vsel %vm1255_vm5, %v11934_v21, -inf }
 0xc7f   : > { %v6845_v31 = vpop.f32.mrb[62].mxu0 }
 0xc80   : > { %v10491_v9 = vpop.f32.mrb[63].mxu0 }
 0xc84   : > { %5334 = vrot.lane.b32.xlu1 %v11702_v54, %s12623_s22 }
 0xc85   : > { %5500 = vrot.lane.b32.xlu0 %v11702_v54, %s12624_s30  ;;  %v11936_v54 = vmul.f32 0.5, %v6845_v31 }
 0xc87   : > { %v6850_v62 = vsel %vm1255_vm5, %v11936_v54, -inf }
 0xca4   : > { %4334 = vadd.xlane.f32.xlu0 %v4333_v36 }
 0xca8   : > { %6519 = vmax.xlane.f32.xlu1 %v6518_v20  ;;  %6353 = vmax.xlane.f32.xlu0 %v6352_v29 }
 0xcac   : > { %6851 = vmax.xlane.f32.xlu1 %v6850_v62  ;;  %6685 = vmax.xlane.f32.xlu0 %v6684_v63 }
 0xcd8   : > { %v4495_v3 = vpop.xlane.xlu1 %4494 }
 0xcd9   : > { %v4496_v4 = vsub.f32 %v11869_v52, %v4495_v3 }
 0xcdb   : > { %v4497_v47 = vmul.f32 1.442695, %v4496_v4 }
 0xcdc   : > { %v4661_v8 = vpop.xlane.xlu0 %4660 }
 0xcdd   : > { %10795 = vpow2.f32 %v4497_v47  ;;  %v4662_v26 = vsub.f32 %v11873_v56, %v4661_v8 }
 0xcdf   : > { %v4663_v11 = vmul.f32 1.442695, %v4662_v26 }
 0xce0   : > { %v4827_v15 = vpop.xlane.xlu0 %4826 }
 0xce1   : > { %10797 = vpow2.f32 %v4663_v11  ;;  %v4828_v16 = vsub.f32 %v11877_v60, %v4827_v15 }
 0xce3   : > { %v4829_v24 = vmul.f32 1.442695, %v4828_v16 }
 0xce4   : > { %v4993_v17 = vpop.xlane.xlu0 %4992 }
 0xce5   : > { %10799 = vpow2.f32 %v4829_v24  ;;  %v4994_v57 = vsub.f32 %v11881_v42, %v4993_v17 }
 0xce7   : > { %v11952_v19 = vpop.eup %10795  ;;  %v4995_v13 = vmul.f32 1.442695, %v4994_v57 }
 0xce8   : > { %v5159_v27 = vpop.xlane.xlu1 %5158  ;;  %v4499_v52 = vsel %vm1255_vm5, %v11952_v19, 0.0 }
 0xce9   : > { %10801 = vpow2.f32 %v4995_v13  ;;  %v5160_v56 = vsub.f32 %v11885_v1, %v5159_v27  ;;  %4500 = vadd.xlane.f32.xlu1 %v4499_v52 }
 0xceb   : > { %v11957_v61 = vpop.eup %10797  ;;  %v5161_v33 = vmul.f32 1.442695, %v5160_v56 }
 0xcec   : > { %v4665_v60 = vsel %vm1255_vm5, %v11957_v61, 0.0  ;;  %v5325_v7 = vpop.xlane.xlu0 %5324 }
 0xced   : > { %10803 = vpow2.f32 %v5161_v33  ;;  %4666 = vadd.xlane.f32.xlu0 %v4665_v60  ;;  %v5326_v31 = vsub.f32 %v11889_v6, %v5325_v7 }
 0xcef   : > { %v11961_v42 = vpop.eup %10799  ;;  %v5327_v18 = vmul.f32 1.442695, %v5326_v31 }
 0xcf0   : > { %v4831_v49 = vsel %vm1255_vm5, %v11961_v42, 0.0  ;;  %v5491_v43 = vpop.xlane.xlu1 %5490 }
 0xcf1   : > { %4832 = vadd.xlane.f32.xlu1 %v4831_v49  ;;  %v5492_v30 = vsub.f32 %v11893_v14, %v5491_v43 }
 0xcf3   : > { %v11965_v37 = vpop.eup %10801  ;;  %v5493_v20 = vmul.f32 1.442695, %v5492_v30 }
 0xcf4   : > { %v4997_v1 = vsel %vm1255_vm5, %v11965_v37, 0.0  ;;  %v5690_v44 = vpop.xlane.xlu0 %5689 }
 0xcf5   : > { %4998 = vadd.xlane.f32.xlu0 %v4997_v1  ;;  %v5691_v5 = vsub.f32 %v11897_v12, %v5690_v44 }
 0xcf7   : > { %v11969_v46 = vpop.eup %10803  ;;  %v5692_v9 = vmul.f32 1.442695, %v5691_v5 }
 0xcf8   : > { %v5163_v40 = vsel %vm1255_vm5, %v11969_v46, 0.0  ;;  %v5856_v48 = vpop.xlane.xlu1 %5855 }
 0xcf9   : > { %5164 = vadd.xlane.f32.xlu1 %v5163_v40  ;;  %10805 = vpow2.f32 %v5692_v9  ;;  %v5857_v29 = vsub.f32 %v11901_v22, %v5856_v48 }
 0xcfa   : > { %10807 = vpow2.f32 %v5327_v18 }
 0xcfb   : > { %v5858_v63 = vmul.f32 1.442695, %v5857_v29 }
 0xcfc   : > { %v6022_v62 = vpop.xlane.xlu0 %6021 }
 0xcfd   : > { %v6023_v12 = vsub.f32 %v11905_v32, %v6022_v62 }
 0xcff   : > { %v6024_v6 = vmul.f32 1.442695, %v6023_v12 }
 0xd00   : > { %v6188_v50 = vpop.xlane.xlu1 %6187  ;;  %v11991_v4 = vpop.permute.xlu0 %5500 }
 0xd01   : > { %v6189_v53 = vsub.f32 %v11909_v39, %v6188_v50 }
 0xd03   : > { %v6190_v36 = vmul.f32 1.442695, %v6189_v53  ;;  %v11987_v3 = vpop.eup %10805 }
 0xd04   : > { %v11989_v39 = vpop.eup %10807  ;;  %v5694_v14 = vsel %vm1255_vm5, %v11987_v3, 0.0  ;;  %v11997_v22 = vpop.permute.xlu1 %5334 }
 0xd05   : > { %10809 = vpow2.f32 %v6190_v36  ;;  %v5329_v32 = vsel %vm1255_vm5, %v11989_v39, 0.0 }
 0xd06   : > { %10811 = vpow2.f32 %v5493_v20 }
 0xd07   : > { %10813 = vpow2.f32 %v5858_v63 }
 0xd08   : > { %10815 = vpow2.f32 %v6024_v6 }
 0xd0a   : > { %5699 = vrot.lane.b32.xlu1 %v11716_v55, %s12621_s29  ;;  %s12635_s29 = sld [smem:[#allocation24_spill]] }
 0xd0b   : > { %5865 = vrot.lane.b32.xlu0 %v11716_v55, %s10913_s25  ;;  %s12626_s25 = smov 12  }
 0xd0f   : > { %6031 = vrot.lane.b32.xlu0 %v11716_v55, %s10915_s2  ;;  %v11995_v47 = vpop.eup %10809  ;;  %s12627_s2 = smov 16  }
 0xd10   : > { %v6192_v26 = vsel %vm1255_vm5, %v11995_v47, 0.0  ;;  %v12003_v11 = vpop.eup %10811 }
 0xd11   : > { %v5495_v16 = vsel %vm1255_vm5, %v12003_v11, 0.0  ;;  %v12007_v24 = vpop.eup %10813 }
 0xd12   : > { %v5860_v27 = vsel %vm1255_vm5, %v12007_v24, 0.0  ;;  %v12012_v52 = vpop.eup %10815 }
 0xd13   : > { %6197 = vrot.lane.b32.xlu0 %v11716_v55, %s12622_s21  ;;  %v6026_v1 = vsel %vm1255_vm5, %v12012_v52, 0.0  ;;  %s12636_s21 = scalar_lea.vmem %s12635_s29, %s11086_s6 }
 0xd2e   : > { %5695 = vadd.xlane.f32.xlu1 %v5694_v14 }
 0xd31   : > { %v4335_v8 = vpop.xlane.xlu0 %4334 }
 0xd32   : > { %10817 = vrcp.f32 %v4335_v8  ;;  %5330 = vadd.xlane.f32.xlu0 %v5329_v32  ;;  %6193 = vadd.xlane.f32.xlu1 %v6192_v26 }
 0xd35   : > { %v6520_v15 = vpop.xlane.xlu1 %6519 }
 0xd36   : > { %v6521_v17 = vsub.f32 %v11930_v2, %v6520_v15  ;;  %5496 = vadd.xlane.f32.xlu0 %v5495_v16 }
 0xd38   : > { %v6522_v57 = vmul.f32 1.442695, %v6521_v17 }
 0xd39   : > { %v6852_v13 = vpop.xlane.xlu1 %6851 }
 0xd3a   : > { %10819 = vpow2.f32 %v6522_v57  ;;  %v6853_v56 = vsub.f32 %v11936_v54, %v6852_v13  ;;  %5861 = vadd.xlane.f32.xlu0 %v5860_v27 }
 0xd3c   : > { %v10818_v33 = vpop.eup %10817  ;;  %v6854_v60 = vmul.f32 1.442695, %v6853_v56 }
 0xd3d   : > { %v4337_v49 = vmul.f32 %v10818_v33, %v11926_v28 }
 0xd3e   : > { %10821 = vpow2.f32 %v6854_v60  ;;  %6027 = vadd.xlane.f32.xlu0 %v6026_v1 }
 0xd3f   : > { %10345 = vmatmul.mubr.msk.f32.vlgmr.msra.gmra.mrb[40].mxu1 %vm1255_vm5, %v4337_v49 }
 0xd40   : > { %10353 = vmatpush3.msra.mxu1 %v11913_v58  ;;  %10354 = vmatprep.mubr.msk.f32.mxu1 %vm10910_vm2, %v10909_v10  ;;  %v6354_v58 = vpop.xlane.xlu0 %6353 }
 0xd41   : > { %10362 = vmatprep.subr.mxu1 %v10909_v10  ;;  %v6355_v7 = vsub.f32 %v11928_v59, %v6354_v58 }
 0xd43   : > { %v6356_v44 = vmul.f32 1.442695, %v6355_v7 }
 0xd44   : > { %v12023_v2 = vpop.eup %10819  ;;  %v6686_v43 = vpop.xlane.xlu0 %6685 }
 0xd45   : > { %v6524_v54 = vsel %vm1255_vm5, %v12023_v2, 0.0  ;;  %v6687_v48 = vsub.f32 %v11934_v21, %v6686_v43  ;;  %10823 = vpow2.f32 %v6356_v44 }
 0xd46   : > { %6525 = vadd.xlane.f32.xlu1 %v6524_v54 }
 0xd47   : > { %v6688_v5 = vmul.f32 1.442695, %v6687_v48 }
 0xd48   : > { %v12027_v28 = vpop.eup %10821 }
 0xd49   : > { %v6856_v40 = vsel %vm1255_vm5, %v12027_v28, 0.0  ;;  %10825 = vpow2.f32 %v6688_v5 }
 0xd4a   : > { %6857 = vadd.xlane.f32.xlu1 %v6856_v40 }
 0xd4f   : > { %v12037_v50 = vpop.eup %10823 }
 0xd50   : > { %v6358_v31 = vsel %vm1255_vm5, %v12037_v50, 0.0 }
 0xd53   : > { %v12041_v9 = vpop.eup %10825 }
 0xd54   : > { %6363 = vrot.lane.b32.xlu0 %v11716_v55, %s10925_s26  ;;  %v6690_v18 = vsel %vm1255_vm5, %v12041_v9, 0.0  ;;  %s12625_s26 = smov 8  }
 0xd5b   : > { %6529 = vrot.lane.b32.xlu1 %v11716_v55, %s12619_s3 }
 0xd73   : > { %6359 = vadd.xlane.f32.xlu0 %v6358_v31 }
 0xd76   : > { %v4501_v53 = vpop.xlane.xlu1 %4500 }
 0xd77   : > { %10827 = vrcp.f32 %v4501_v53  ;;  %6691 = vadd.xlane.f32.xlu0 %v6690_v18 }
 0xd7a   : > { %v4667_v59 = vpop.xlane.xlu0 %4666 }
 0xd7b   : > { %10829 = vrcp.f32 %v4667_v59 }
 0xd7e   : > { %v4833_v21 = vpop.xlane.xlu1 %4832 }
 0xd7f   : > { %10831 = vrcp.f32 %v4833_v21 }
 0xd81   : > { %v10828_v30 = vpop.eup %10827 }
 0xd82   : > { %v4503_v36 = vmul.f32 %v10828_v30, %v11952_v19  ;;  %v4999_v20 = vpop.xlane.xlu0 %4998 }
 0xd83   : > { %10833 = vrcp.f32 %v4999_v20 }
 0xd84   : > { %10355 = vmatmul.mubr.msk.f32.vlgmr.msra.gmra.mrb[42].mxu1 %vm1255_vm5, %v4503_v36 }
 0xd85   : > { %v10830_v29 = vpop.eup %10829  ;;  %10363 = vmatpush3.msra.mxu1 %v11915_v0  ;;  %10364 = vmatprep.mubr.msk.f32.mxu1 %vm10910_vm2, %v10909_v10 }
 0xd86   : > { %v4669_v62 = vmul.f32 %v10830_v29, %v11957_v61  ;;  %v5165_v63 = vpop.xlane.xlu1 %5164  ;;  %10372 = vmatprep.subr.mxu1 %v10909_v10 }
 0xd87   : > { %10835 = vrcp.f32 %v5165_v63 }
 0xd88   : > { %10365 = vmatmul.mubr.msk.f32.vlgmr.msra.gmra.mrb[44].mxu1 %vm1255_vm5, %v4669_v62 }
 0xd89   : > { %v10832_v12 = vpop.eup %10831  ;;  %10373 = vmatpush3.msra.mxu1 %v11946_v45  ;;  %10374 = vmatprep.mubr.msk.f32.mxu1 %vm10910_vm2, %v10909_v10 }
 0xd8a   : > { %v4835_v19 = vmul.f32 %v10832_v12, %v11961_v42  ;;  %10382 = vmatprep.subr.mxu1 %v10909_v10  ;;  %v5700_v6 = vpop.permute.xlu1 %5699 }
 0xd8c   : > { %10375 = vmatmul.mubr.msk.f32.vlgmr.msra.gmra.mrb[46].mxu1 %vm1255_vm5, %v4835_v19 }
 0xd8d   : > { %v10834_v0 = vpop.eup %10833  ;;  %10383 = vmatpush3.msra.mxu1 %v11917_v51  ;;  %6695 = vrot.lane.b32.xlu0 %v11716_v55, %s12623_s22 }
 0xd8e   : > { %v5001_v61 = vmul.f32 %v10834_v0, %v11965_v37  ;;  %10384 = vmatprep.mubr.msk.f32.mxu1 %vm10910_vm2, %v10909_v10  ;;  %10392 = vmatprep.subr.mxu1 %v10909_v10 }
 0xd90   : > { %10385 = vmatmul.mubr.msk.f32.vlgmr.msra.gmra.mrb[48].mxu1 %vm1255_vm5, %v5001_v61 }
 0xd91   : > { %v10836_v45 = vpop.eup %10835  ;;  %10393 = vmatpush3.msra.mxu1 %v11923_v38  ;;  %6861 = vrot.lane.b32.xlu0 %v11716_v55, %s12624_s30  ;;  %v5866_v38 = vpop.permute.xlu0 %5865  ;;  %s12637_s30 = sld [smem:[#allocation25_spill]] }
 0xd92   : > { %v5167_v51 = vmul.f32 %v10836_v45, %v11969_v46  ;;  %10394 = vmatprep.mubr.msk.f32.mxu1 %vm10910_vm2, %v10909_v10  ;;  %10402 = vmatprep.subr.mxu1 %v10909_v10 }
 0xd94   : > { %10395 = vmatmul.mubr.msk.f32.vlgmr.msra.gmra.mrb[50].mxu1 %vm1255_vm5, %v5167_v51 }
 0xd95   : > { %10403 = vmatpush3.msra.mxu1 %v11997_v22  ;;  %10404 = vmatprep.mubr.msk.f32.mxu1 %vm10910_vm2, %v10909_v10  ;;  %v6032_v42 = vpop.permute.xlu0 %6031 }
 0xd96   : > { %10412 = vmatprep.subr.mxu1 %v10909_v10 }
 0xd99   : > { %v6198_v37 = vpop.permute.xlu0 %6197 }
 0xdbb   : > { %v5696_v14 = vpop.xlane.xlu1 %5695 }
 0xdbf   : > { %v5331_v55 = vpop.xlane.xlu0 %5330  ;;  %v6194_v17 = vpop.xlane.xlu1 %6193 }
 0xdc0   : > { %10837 = vrcp.f32 %v5331_v55  ;;  %v6972_v55 = vld [vmem:[%s11136_s28] sm:$0xff] }
 0xdc3   : > { %v5497_v46 = vpop.xlane.xlu0 %5496 }
 0xdc4   : > { %10839 = vrcp.f32 %v5497_v46 }
 0xdc5   : > { %10841 = vrcp.f32 %v5696_v14  ;;  %v6974_v14 = vld [vmem:[%s11136_s28 + $0x10] sm:$0xff] }
 0xdc7   : > { %v5862_v8 = vpop.xlane.xlu0 %5861 }
 0xdc8   : > { %10843 = vrcp.f32 %v5862_v8  ;;  %v6975_v8 = vld [vmem:[%s11136_s28 + $0x18] sm:$0xff] }
 0xdca   : > { %v10838_v32 = vpop.eup %10837 }
 0xdcb   : > { %v5333_v22 = vmul.f32 %v10838_v32, %v11989_v39  ;;  %v6028_v26 = vpop.xlane.xlu0 %6027  ;;  %v10544_v32 = vpack.c.bf16 %v6975_v8, %v6974_v14  ;;  %v7119_v8 = vld [vmem:[%s11154_s7 + $0x48] sm:$0xff] }
 0xdcc   : > { %10845 = vrcp.f32 %v6028_v26 }
 0xdcd   : > { %10405 = vmatmul.mubr.msk.f32.vlgmr.msra.gmra.mrb[52].mxu1 %vm1255_vm5, %v5333_v22  ;;  %10847 = vrcp.f32 %v6194_v17 }
 0xdce   : > { %v10840_v15 = vpop.eup %10839  ;;  %10413 = vmatpush3.msra.mxu1 %v11991_v4  ;;  %10414 = vmatprep.mubr.msk.f32.mxu1 %vm10910_vm2, %v10909_v10 }
 0xdcf   : > { %v5499_v16 = vmul.f32 %v10840_v15, %v12003_v11  ;;  %10422 = vmatprep.subr.mxu1 %v10909_v10  ;;  %v10842_v57 = vpop.eup %10841  ;;  %v6364_v56 = vpop.permute.xlu0 %6363 }
 0xdd0   : > { %v5698_v39 = vmul.f32 %v10842_v57, %v11987_v3 }
 0xdd1   : > { %10415 = vmatmul.mubr.msk.f32.vlgmr.msra.gmra.mrb[54].mxu1 %vm1255_vm5, %v5499_v16 }
 0xdd2   : > { %10423 = vmatpush3.msra.mxu1 %v5700_v6  ;;  %10424 = vmatprep.mubr.msk.f32.mxu1 %vm10910_vm2, %v10909_v10  ;;  %v10844_v11 = vpop.eup %10843  ;;  %v6973_v6 = vld [vmem:[%s11136_s28 + $0x8] sm:$0xff] }
 0xdd3   : > { %10432 = vmatprep.subr.mxu1 %v10909_v10  ;;  %v5864_v4 = vmul.f32 %v10844_v11, %v12007_v24  ;;  %v10540_v46 = vpack.c.bf16 %v6973_v6, %v6972_v55  ;;  %v7110_v55 = vld [vmem:[%s11154_s7] sm:$0xff] }
 0xdd4   : > { %v7118_v6 = vld [vmem:[%s11154_s7 + $0x40] sm:$0xff] }
 0xdd5   : > { %10425 = vmatmul.mubr.msk.f32.vlgmr.msra.gmra.mrb[56].mxu1 %vm1255_vm5, %v5698_v39  ;;  %10541 = vmatprep.subr.bf16.mxu0 %v10540_v46  ;;  %v9615_v14 = vcombine.high %v7110_v55, %v7118_v6 }
 0xdd6   : > { %10433 = vmatpush3.msra.mxu1 %v5866_v38  ;;  %10434 = vmatprep.mubr.msk.f32.mxu1 %vm10910_vm2, %v10909_v10  ;;  %v10846_v13 = vpop.eup %10845 }
 0xdd7   : > { %10442 = vmatprep.subr.mxu1 %v10909_v10  ;;  %v6030_v3 = vmul.f32 %v10846_v13, %v12012_v52  ;;  %v10848_v27 = vpop.eup %10847  ;;  %v6526_v52 = vpop.xlane.xlu1 %6525  ;;  %10543 = vmatpush3.bf16.msra.mxu0 %v10540_v46  ;;  %v7111_v46 = vld [vmem:[%s11154_s7 + $0x8] sm:$0xff] }
 0xdd8   : > { %v6196_v24 = vmul.f32 %v10848_v27, %v11995_v47  ;;  %10545 = vmatprep.subr.bf16.mxu0 %v10544_v32 }
 0xdd9   : > { %10435 = vmatmul.mubr.msk.f32.vlgmr.msra.gmra.mrb[58].mxu1 %vm1255_vm5, %v5864_v4 }
 0xdda   : > { %10443 = vmatpush3.msra.mxu1 %v6032_v42  ;;  %10444 = vmatprep.mubr.msk.f32.mxu1 %vm10910_vm2, %v10909_v10 }
 0xddb   : > { %10452 = vmatprep.subr.mxu1 %v10909_v10  ;;  %v6858_v49 = vpop.xlane.xlu1 %6857  ;;  %10547 = vmatpush3.bf16.msra.mxu0 %v10544_v32  ;;  %v9614_v32 = vcombine.low %v7110_v55, %v7118_v6 }
 0xddd   : > { %10445 = vmatmul.mubr.msk.f32.vlgmr.msra.gmra.mrb[60].mxu1 %vm1255_vm5, %v6030_v3 }
 0xdde   : > { %10453 = vmatpush3.msra.mxu1 %v6198_v37  ;;  %10454 = vmatprep.mubr.msk.f32.mxu1 %vm10910_vm2, %v10909_v10 }
 0xddf   : > { %10462 = vmatprep.subr.mxu1 %v10909_v10  ;;  %v6530_v40 = vpop.permute.xlu1 %6529 }
 0xde1   : > { %10455 = vmatmul.mubr.msk.f32.vlgmr.msra.gmra.mrb[62].mxu1 %vm1255_vm5, %v6196_v24 }
 0xde2   : > { %10463 = vmatpush3.msra.mxu1 %v6364_v56  ;;  %10464 = vmatprep.mubr.msk.f32.mxu1 %vm10910_vm2, %v10909_v10 }
 0xde3   : > { %10472 = vmatprep.subr.mxu1 %v10909_v10 }
 0xe00   : > { %v6360_v33 = vpop.xlane.xlu0 %6359 }
 0xe01   : > { %10849 = vrcp.f32 %v6360_v33 }
 0xe02   : > { %10851 = vrcp.f32 %v6526_v52 }
 0xe04   : > { %v6692_v60 = vpop.xlane.xlu0 %6691 }
 0xe05   : > { %10853 = vrcp.f32 %v6692_v60 }
 0xe06   : > { %10855 = vrcp.f32 %v6858_v49 }
 0xe08   : > { %v6696_v7 = vpop.permute.xlu0 %6695 }
 0xe0b   : > { %v10850_v1 = vpop.eup %10849 }
 0xe0c   : > { %v6362_v47 = vmul.f32 %v10850_v1, %v12037_v50  ;;  %v10852_v54 = vpop.eup %10851  ;;  %v6862_v31 = vpop.permute.xlu0 %6861 }
 0xe0d   : > { %v6528_v58 = vmul.f32 %v10852_v54, %v12023_v2 }
 0xe0e   : > { %10465 = vmatmul.mubr.msk.f32.vlgmr.msra.gmra.mrb[64].mxu1 %vm1255_vm5, %v6362_v47 }
 0xe0f   : > { %10473 = vmatpush3.msra.mxu1 %v6530_v40  ;;  %10474 = vmatprep.mubr.msk.f32.mxu1 %vm10910_vm2, %v10909_v10  ;;  %v10854_v43 = vpop.eup %10853 }
 0xe10   : > { %10482 = vmatprep.subr.mxu1 %v10909_v10  ;;  %v6694_v5 = vmul.f32 %v10854_v43, %v12041_v9  ;;  %v10856_v50 = vpop.eup %10855 }
 0xe11   : > { %v6860_v2 = vmul.f32 %v10856_v50, %v12027_v28 }
 0xe12   : > { %v12116_v44 = vpop.f32.mrb[40].mxu1  ;;  %10475 = vmatmul.mubr.msk.f32.vlgmr.msra.gmra.mrb[66].mxu1 %vm1255_vm5, %v6528_v58 }
 0xe13   : > { %10483 = vmatpush3.msra.mxu1 %v6696_v7  ;;  %v10346_v48 = vpop.f32.mrb[41].mxu1  ;;  %10484 = vmatprep.mubr.msk.f32.mxu1 %vm10910_vm2, %v10909_v10 }
 0xe14   : > { %10492 = vmatprep.subr.mxu1 %v10909_v10 }
 0xe16   : > { %10485 = vmatmul.mubr.msk.f32.vlgmr.msra.gmra.mrb[68].mxu1 %vm1255_vm5, %v6694_v5 }
 0xe17   : > { %10493 = vmatpush3.msra.mxu1 %v6862_v31  ;;  %10494 = vmatprep.mubr.msk.f32.mxu1 %vm10910_vm2, %v10909_v10 }
 0xe18   : > { %7647 = vmatprep.subr.bf16.mxu1 %v9615_v14  ;;  %v7116_v14 = vld [vmem:[%s11154_s7 + $0x30] sm:$0xff] }
 0xe1a   : > { %10495 = vmatmul.mubr.msk.f32.vlgmr.msra.gmra.mrb[70].mxu1 %vm1255_vm5, %v6860_v2 }
 0xe1b   : > { %7648 = vmatpush1.bf16.msra.mxu1 %v9614_v32  ;;  %v7117_v32 = vld [vmem:[%s11154_s7 + $0x38] sm:$0xff] }
 0xe57   : > { %v4576_v53 = vpop.f32.mrb[42].mxu1 }
 0xe58   : > { %5577 = vrot.lane.b32.xlu0 %v4576_v53, %s10934_s27  ;;  %v10356_v18 = vpop.f32.mrb[43].mxu1 }
 0xe5b   : > { %v4742_v59 = vpop.f32.mrb[44].mxu1 }
 0xe5c   : > { %5581 = vrot.lane.b32.xlu0 %v4742_v59, %s12625_s26  ;;  %v10366_v9 = vpop.f32.mrb[45].mxu1 }
 0xe5f   : > { %v4908_v21 = vpop.f32.mrb[46].mxu1 }
 0xe60   : > { %5585 = vrot.lane.b32.xlu1 %v4908_v21, %s12626_s25  ;;  %v10376_v30 = vpop.f32.mrb[47].mxu1 }
 0xe61   : > { %v9609_v30 = vld [vmem:[%s12631_s11] ss:$0 sm:$0xff] }
 0xe63   : > { %v5074_v36 = vpop.f32.mrb[48].mxu1 }
 0xe64   : > { %5589 = vrot.lane.b32.xlu1 %v5074_v36, %s12627_s2  ;;  %v10386_v10 = vpop.f32.mrb[49].mxu1 }
 0xe67   : > { %v5240_v20 = vpop.f32.mrb[50].mxu1 }
 0xe68   : > { %5593 = vrot.lane.b32.xlu1 %v5240_v20, %s12628_s8  ;;  %v10396_v28 = vpop.f32.mrb[51].mxu1 }
 0xea0   : > { %v5406_v29 = vpop.f32.mrb[52].mxu1 }
 0xea1   : > { %5597 = vrot.lane.b32.xlu1 %v5406_v29, %s12629_s18  ;;  %v10406_v62 = vpop.f32.mrb[53].mxu1 }
 0xea4   : > { %v5572_v63 = vpop.f32.mrb[54].mxu1 }
 0xea5   : > { %5601 = vrot.lane.b32.xlu1 %v5572_v63, %s12630_s4  ;;  %v10416_v12 = vpop.f32.mrb[55].mxu1 }
 0xea8   : > { %v5771_v19 = vpop.f32.mrb[56].mxu1 }
 0xea9   : > { %v10426_v0 = vpop.f32.mrb[57].mxu1 }
 0xeac   : > { %v5937_v61 = vpop.f32.mrb[58].mxu1 }
 0xead   : > { %6938 = vrot.lane.b32.xlu0 %v5937_v61, %s10934_s27  ;;  %v10436_v45 = vpop.f32.mrb[59].mxu1 }
 0xeb0   : > { %v6103_v51 = vpop.f32.mrb[60].mxu1 }
 0xeb1   : > { %6942 = vrot.lane.b32.xlu0 %v6103_v51, %s12625_s26  ;;  %v10446_v38 = vpop.f32.mrb[61].mxu1  ;;  %s12638_s26 = scalar_lea.vmem %s12637_s30, %s11086_s6 }
 0xeb4   : > { %v6269_v42 = vpop.f32.mrb[62].mxu1 }
 0xeb5   : > { %6946 = vrot.lane.b32.xlu0 %v6269_v42, %s12626_s25  ;;  %v10456_v37 = vpop.f32.mrb[63].mxu1 }
 0xeca   : > { %v5578_v3 = vpop.permute.xlu0 %5577 }
 0xecb   : > { %v5604_v56 = vsel %vm1178_vm3, %v12116_v44, %v5578_v3  ;;  %v7112_v3 = vld [vmem:[%s11154_s7 + $0x10] sm:$0xff] }
 0xece   : > { %v5582_v24 = vpop.permute.xlu0 %5581 }
 0xecf   : > { %v5605_v52 = vsel %vm1255_vm5, %v5604_v56, %v5582_v24  ;;  %v7113_v24 = vld [vmem:[%s11154_s7 + $0x18] sm:$0xff]  ;;  %v10941_v56 = vmov 0  }
 0xed0   : > { %7679 = vmatprep.mubr.bf16.mxu1 %v10941_v56 }
 0xed2   : > { %v5586_v4 = vpop.permute.xlu1 %5585 }
 0xed3   : > { %v5606_v60 = vsel %vm2542_vm6, %v5605_v52, %v5586_v4 }
 0xed6   : > { %v5590_v13 = vpop.permute.xlu1 %5589 }
 0xed7   : > { %v5607_v49 = vsel %vm2544_vm7, %v5606_v60, %v5590_v13  ;;  %v7121_v60 = vld [vmem:[%s11154_s7 + $0x58] sm:$0xff] }
 0xeda   : > { %v5594_v27 = vpop.permute.xlu1 %5593 }
 0xedb   : > { %v5608_v1 = vsel %vm2546_vm8, %v5607_v49, %v5594_v27  ;;  %v7120_v27 = vld [vmem:[%s11154_s7 + $0x50] sm:$0xff]  ;;  %v9620_v49 = vcombine.low %v7113_v24, %v7121_v60 }
 0xedc   : > { %v9618_v52 = vcombine.low %v7112_v3, %v7120_v27 }
 0xee1   : > { %v6435_v22 = vpop.f32.mrb[64].mxu1 }
 0xee2   : > { %6950 = vrot.lane.b32.xlu0 %v6435_v22, %s12627_s2  ;;  %v10466_v26 = vpop.f32.mrb[65].mxu1  ;;  %v9616_v22 = vcombine.low %v7111_v46, %v7119_v8 }
 0xee3   : > { %v9617_v26 = vcombine.high %v7111_v46, %v7119_v8  ;;  %v7124_v8 = vld [vmem:[%s11154_s7 + $0x70] sm:$0xff] }
 0xee5   : > { %v6601_v15 = vpop.f32.mrb[66].mxu1  ;;  %7690 = vmatprep.subr.bf16.mxu0 %v9617_v26 }
 0xee6   : > { %6954 = vrot.lane.b32.xlu0 %v6601_v15, %s12628_s8  ;;  %v10476_v16 = vpop.f32.mrb[67].mxu1  ;;  %v7126_v15 = vld [vmem:[%s11154_s7 + $0x80] sm:$0xff]  ;;  %s12639_s8 = sld [smem:[#allocation26_spill]] }
 0xee7   : > { %v7134_v16 = vld [vmem:[%s11154_s7 + $0xc0] sm:$0xff] }
 0xee9   : > { %v6767_v17 = vpop.f32.mrb[68].mxu1 }
 0xeea   : > { %6958 = vrot.lane.b32.xlu0 %v6767_v17, %s12629_s18  ;;  %v10486_v57 = vpop.f32.mrb[69].mxu1  ;;  %v7127_v17 = vld [vmem:[%s11154_s7 + $0x88] sm:$0xff] }
 0xeeb   : > { %v9631_v57 = vcombine.high %v7126_v15, %v7134_v16 }
 0xeec   : > { %s12640_s18 = scalar_lea.vmem %s12639_s8, %s11086_s6 }
 0xeed   : > { %v6933_v39 = vpop.f32.mrb[70].mxu1  ;;  %7649 = vmatprep.subr.bf16.mxu1 %v9631_v57  ;;  %v7132_v57 = vld [vmem:[%s11154_s7 + $0xb0] sm:$0xff] }
 0xeee   : > { %6962 = vrot.lane.b32.xlu1 %v6933_v39, %s12630_s4  ;;  %v10496_v11 = vpop.f32.mrb[71].mxu1  ;;  %v7135_v39 = vld [vmem:[%s11154_s7 + $0xc8] sm:$0xff]  ;;  %s12641_s4 = sld [smem:[#allocation7_spill]] }
 0xeef   : > { %v9630_v11 = vcombine.low %v7126_v15, %v7134_v16  ;;  %v9632_v4 = vcombine.low %v7127_v17, %v7135_v39  ;;  %v9633_v13 = vcombine.high %v7127_v17, %v7135_v39  ;;  %v9627_v16 = vcombine.high %v7116_v14, %v7124_v8  ;;  %v7140_v39 = vld [vmem:[%s11154_s7 + $0xf0] sm:$0xff] }
 0xef1   : > { %7650 = vmatpush1.bf16.msra.mxu1 %v9630_v11  ;;  %v7133_v11 = vld [vmem:[%s11154_s7 + $0xb8] sm:$0xff] }
 0xef4   : > { %p9785_p5 = scmp.ne.s32.totalorder %s12641_s4, 5 }
 0xef5   : > { %s12642_s23 = sld [smem:[#allocation27_spill]] (!%p9785_p5)  ;;  %s12643_s13 = sld [smem:[#allocation28_spill]] (!%p9785_p5) }
 0xf13   : > { %v5598_v33 = vpop.permute.xlu1 %5597 }
 0xf14   : > { %v5609_v47 = vsel %vm2548_vm9, %v5608_v1, %v5598_v33  ;;  %v9619_v33 = vcombine.high %v7112_v3, %v7120_v27  ;;  %v9621_v1 = vcombine.high %v7113_v24, %v7121_v60  ;;  %v9643_v27 = vcombine.high %v7132_v57, %v7140_v39  ;;  %v10597_v60 = vld [vmem:[%s11166_s0 + $0x40] sm:$0xff]  }
 0xf16   : > { %7733 = vmatprep.subr.bf16.mxu1 %v9619_v33 }
 0xf17   : > { %v5602_v54 = vpop.permute.xlu1 %5601 }
 0xf18   : > { %v5610_v40 = vsel %vm2550_vm10, %v5609_v47, %v5602_v54 }
 0xf19   : > { %10505 = vmatprep.mubr.msk.f32.mxu0 %vm1088_vm1, %v5610_v40 }
 0xf1f   : > { %v6939_v58 = vpop.permute.xlu0 %6938 }
 0xf20   : > { %v6965_v5 = vsel %vm1178_vm3, %v5771_v19, %v6939_v58 }
 0xf23   : > { %v6943_v7 = vpop.permute.xlu0 %6942 }
 0xf24   : > { %v6966_v50 = vsel %vm1255_vm5, %v6965_v5, %v6943_v7  ;;  %v9612_v5 = vld [vmem:[%s12632_s16] ss:$0 sm:$0xff] }
 0xf27   : > { %v6947_v43 = vpop.permute.xlu0 %6946 }
 0xf28   : > { %v6967_v31 = vsel %vm2542_vm6, %v6966_v50, %v6947_v43 }
 0xf54   : > { %v6951_v44 = vpop.permute.xlu0 %6950 }
 0xf55   : > { %v6968_v53 = vsel %vm2544_vm7, %v6967_v31, %v6951_v44 }
 0xf58   : > { %v6955_v48 = vpop.permute.xlu0 %6954 }
 0xf59   : > { %v6969_v18 = vsel %vm2546_vm8, %v6968_v53, %v6955_v48  ;;  %v9613_v53 = vld [vmem:[%s12634_s17] ss:$0 sm:$0xff] }
 0xf5c   : > { %v6959_v2 = vpop.permute.xlu0 %6958 }
 0xf5d   : > { %v6970_v59 = vsel %vm2548_vm9, %v6969_v18, %v6959_v2 }
 0xf60   : > { %v6963_v9 = vpop.permute.xlu1 %6962 }
 0xf61   : > { %v6971_v21 = vsel %vm2550_vm10, %v6970_v59, %v6963_v9  ;;  %v7128_v59 = vld [vmem:[%s11154_s7 + $0x90] sm:$0xff] }
 0xf62   : > { %10506 = vmatmul.mubr.msk.f32.vlgmr.msra.gmra.mrb[64].mxu0 %vm1088_vm1, %v6971_v21  ;;  %v7136_v9 = vld [vmem:[%s11154_s7 + $0xd0] sm:$0xff]  ;;  %v7129_v21 = vld [vmem:[%s11154_s7 + $0x98] sm:$0xff] }
 0xf63   : > { %7691 = vmatpush1.bf16.msra.mxu0 %v9616_v22  ;;  %7722 = vmatprep.mubr.bf16.mxu0 %v10941_v56  ;;  %v7125_v22 = vld [vmem:[%s11154_s7 + $0x78] sm:$0xff] }
 0xf64   : > { %7692 = vmatprep.subr.bf16.mxu0 %v9633_v13  ;;  %v9629_v17 = vcombine.high %v7117_v32, %v7125_v22  ;;  %v9626_v13 = vcombine.low %v7116_v14, %v7124_v8  ;;  %v9628_v3 = vcombine.low %v7117_v32, %v7125_v22  ;;  %v7422_v22 = vsub.s32 4, %v11238_v23 }
 0xf67   : > { %7693 = vmatpush1.bf16.msra.mxu0 %v9632_v4  ;;  %v7141_v4 = vld [vmem:[%s11154_s7 + $0xf8] sm:$0xff] }
 0xf68   : > { %7776 = vmatprep.subr.bf16.mxu0 %v9621_v1  ;;  %v9645_v24 = vcombine.high %v7133_v11, %v7141_v4  ;;  %v9644_v33 = vcombine.low %v7133_v11, %v7141_v4  ;;  %v10599_v1 = vld [vmem:[%s11166_s0] sm:$0xff]  }
0x1035   : > { %v10507_v36 = vpop.f32.mrb[64].mxu0 }
0x1036   : > { %v7061_v10 = vadd.f32 %v10507_v36, %v9609_v30  ;;  %v7055_v20 = vpop.f32.mrb[65].mxu0 }
0x1037   : > { %v7056_v28 = vadd.f32 %v9609_v30, %v7055_v20  ;;  %v7137_v30 = vld [vmem:[%s11154_s7 + $0xd8] sm:$0xff] }
0x1038   : > { %v7065_v29 = vadd.f32 %v7061_v10, %v11754_v41 }
0x1039   : > { %v7064_v62 = vadd.f32 %v7056_v28, %v11748_v34  ;;  %v9635_v28 = vcombine.high %v7128_v59, %v7136_v9 }
0x103a   : > { %v7071_v63 = vsel %vm1088_vm1, %v7065_v29, 0.0 }
0x103b   : > { %7072 = vadd.xlane.f32.xlu1 %v7071_v63  ;;  %v7068_v12 = vsel %vm1088_vm1, %v7064_v62, 0.0  ;;  %v7122_v63 = vld [vmem:[%s11154_s7 + $0x60] sm:$0xff] }
0x103c   : > { %7069 = vadd.xlane.f32.xlu0 %v7068_v12  ;;  %v7115_v12 = vld [vmem:[%s11154_s7 + $0x28] sm:$0xff] }
0x10c8   : > { %v7073_v19 = vpop.xlane.xlu1 %7072 }
0x10c9   : > { %v7075_v0 = vmul.f32 0.03125, %v7073_v19  ;;  %v7070_v61 = vpop.xlane.xlu0 %7069  ;;  %v7123_v19 = vld [vmem:[%s11154_s7 + $0x68] sm:$0xff] }
0x10ca   : > { %v7074_v45 = vmul.f32 0.03125, %v7070_v61  ;;  %v9636_v61 = vcombine.low %v7129_v21, %v7137_v30  ;;  %v9624_v55 = vcombine.low %v7115_v12, %v7123_v19 }
0x10cb   : > { %v7077_v51 = vsub.f32 %v7065_v29, %v7075_v0  ;;  %v9637_v29 = vcombine.high %v7129_v21, %v7137_v30  ;;  %v9634_v0 = vcombine.low %v7128_v59, %v7136_v9  ;;  %v10615_v59 = vld [vmem:[%s11166_s0 + $0x20] sm:$0xff]   ;;  %v10617_v21 = vld [vmem:[%s11166_s0 + $0x68] sm:$0xff]  }
0x10cc   : > { %v7076_v38 = vsub.f32 %v7064_v62, %v7074_v45  ;;  %v7114_v62 = vld [vmem:[%s11154_s7 + $0x20] sm:$0xff]  ;;  %v10618_v30 = vld [vmem:[%s11166_s0 + $0xe8] sm:$0xff]  }
0x10cd   : > { %v7079_v34 = vmul.f32 %v7077_v51, %v7077_v51  ;;  %v9623_v45 = vcombine.high %v7114_v62, %v7122_v63  ;;  %v10616_v9 = vld [vmem:[%s11166_s0 + $0xa0] sm:$0xff]  }
0x10ce   : > { %v7078_v42 = vmul.f32 %v7076_v38, %v7076_v38 }
0x10cf   : > { %v7083_v37 = vsel %vm1088_vm1, %v7079_v34, 0.0  ;;  %v7139_v34 = vld [vmem:[%s11154_s7 + $0xe8] sm:$0xff] }
0x10d0   : > { %v7080_v41 = vsel %vm1088_vm1, %v7078_v42, 0.0  ;;  %v7138_v42 = vld [vmem:[%s11154_s7 + $0xe0] sm:$0xff] }
0x10d1   : > { %7081 = vadd.xlane.f32.xlu0 %v7080_v41  ;;  %v7131_v41 = vld [vmem:[%s11154_s7 + $0xa8] sm:$0xff] }
0x10d2   : > { %v9641_v46 = vcombine.high %v7131_v41, %v7139_v34  ;;  %v9640_v15 = vcombine.low %v7131_v41, %v7139_v34  ;;  %v12284_v41 = vld [vmem:[%s11160_s20 + $0x8] sm:$0xff] }
0x10d5   : > { %7084 = vadd.xlane.f32.xlu0 %v7083_v37  ;;  %v9622_v37 = vcombine.low %v7114_v62, %v7122_v63  ;;  %v10622_v62 = vld [vmem:[%s11166_s0 + $0xf0] sm:$0xff]  }
0x10d6   : > { %v10623_v63 = vld [vmem:[%s11166_s0 + $0x30] sm:$0xff]  }
0x115e   : > { %v7082_v47 = vpop.xlane.xlu0 %7081 }
0x115f   : > { %v7086_v54 = vmul.f32 0.03125, %v7082_v47  ;;  %v10600_v47 = vld [vmem:[%s11166_s0 + $0x80] sm:$0xff]  }
0x1161   : > { %v7088_v40 = vadd.f32 1e-05, %v7086_v54  ;;  %v10601_v54 = vld [vmem:[%s11166_s0 + $0x48] sm:$0xff]  }
0x1162   : > { %v7085_v58 = vpop.xlane.xlu0 %7084 }
0x1163   : > { %10857 = vrsqrt.f32 %v7088_v40  ;;  %v7087_v7 = vmul.f32 0.03125, %v7085_v58  ;;  %v10602_v40 = vld [vmem:[%s11166_s0 + $0xc8] sm:$0xff]  }
0x1164   : > { %v10604_v58 = vld [vmem:[%s11166_s0 + $0x88] sm:$0xff]  }
0x1165   : > { %v7089_v43 = vadd.f32 1e-05, %v7087_v7  ;;  %v10605_v7 = vld [vmem:[%s11166_s0 + $0x50] sm:$0xff]  }
0x1167   : > { %10859 = vrsqrt.f32 %v7089_v43  ;;  %v10606_v43 = vld [vmem:[%s11166_s0 + $0xd0] sm:$0xff]  }
0x116d   : > { %v10858_v44 = vpop.eup %10857 }
0x116e   : > { %v7092_v48 = vmul.f32 %v10858_v44, %v7076_v38  ;;  %v7130_v38 = vld [vmem:[%s11154_s7 + $0xa0] sm:$0xff]  ;;  %v10607_v44 = vld [vmem:[%s11166_s0 + $0x10] sm:$0xff]  }
0x116f   : > { %v9639_v6 = vcombine.high %v7130_v38, %v7138_v42  ;;  %v9638_v26 = vcombine.low %v7130_v38, %v7138_v42  ;;  %v10630_v38 = vld [vmem:[%s11166_s0 + $0x1c0] sm:$0xff]   ;;  %v7430_v42 = vsub.s32 6, %v11238_v23 }
0x1170   : > { %v7100_v31 = vmul.f32 %v9612_v5, %v7092_v48  ;;  %v10608_v48 = vld [vmem:[%s11166_s0 + $0x90] sm:$0xff]  }
0x1171   : > { %v10860_v50 = vpop.eup %10859  ;;  %v12287_v34 = vrot.slane %v12284_v41, %v7430_v42 }
0x1172   : > { %v7093_v2 = vmul.f32 %v10860_v50, %v7077_v51  ;;  %v12202_v36 = vadd.f32 %v9613_v53, %v7100_v31  ;;  %v9625_v51 = vcombine.high %v7115_v12, %v7123_v19  ;;  %v10610_v50 = vld [vmem:[%s11166_s0 + $0xd8] sm:$0xff]   ;;  %v10624_v12 = vld [vmem:[%s11166_s0 + $0xb0] sm:$0xff]  }
0x1173   : > { %v10611_v31 = vld [vmem:[%s11166_s0 + $0x18] sm:$0xff]  }
0x1174   : > { %v7101_v18 = vmul.f32 %v9612_v5, %v7093_v2  ;;  %v10609_v5 = vld [vmem:[%s11166_s0 + $0x58] sm:$0xff]  }
0x1175   : > { %v10612_v2 = vld [vmem:[%s11166_s0 + $0x98] sm:$0xff]  }
0x1176   : > { %v12204_v10 = vadd.f32 %v9613_v53, %v7101_v18  ;;  %v10613_v53 = vld [vmem:[%s11166_s0 + $0x60] sm:$0xff]   ;;  %v10625_v19 = vld [vmem:[%s11166_s0 + $0x78] sm:$0xff]  }
0x1177   : > { %v10614_v18 = vld [vmem:[%s11166_s0 + $0xe0] sm:$0xff]  }
0x1178   : > { %v12208_v20 = vpack.c.bf16 %v12204_v10, %v12202_v36 }
0x117a   : > { %9646 = vmatmul.mubr.msk.bf16.vlgmr.msra.gmra.mrb[72].mxu1 %vm1088_vm1, %v12208_v20  ;;  %9647 = vmatmul.mubr.msk.bf16.vlgmr.msra.gmra.mrb[68].mxu0 %vm1088_vm1, %v12208_v20 }
0x117b   : > { %7734 = vmatpush1.bf16.msra.mxu1 %v9618_v52  ;;  %7777 = vmatpush1.bf16.msra.mxu0 %v9620_v49  ;;  %v9642_v52 = vcombine.low %v7132_v57, %v7140_v39  ;;  %v10598_v49 = vld [vmem:[%s11166_s0 + $0xc0] sm:$0xff]  }
0x117c   : > { %7735 = vmatprep.subr.bf16.mxu1 %v9635_v28  ;;  %7778 = vmatprep.subr.bf16.mxu0 %v9637_v29  ;;  %v10620_v28 = vld [vmem:[%s11166_s0 + $0xa8] sm:$0xff]   ;;  %v10621_v29 = vld [vmem:[%s11166_s0 + $0x70] sm:$0xff]  }
0x117d   : > { %7765 = vmatprep.mubr.bf16.mxu1 %v10941_v56  ;;  %7808 = vmatprep.mubr.bf16.mxu0 %v10941_v56 }
0x117f   : > { %7736 = vmatpush1.bf16.msra.mxu1 %v9634_v0  ;;  %7779 = vmatpush1.bf16.msra.mxu0 %v9636_v61  ;;  %v10626_v0 = vld [vmem:[%s11166_s0 + $0xf8] sm:$0xff]  }
0x1180   : > { %7819 = vmatprep.subr.bf16.mxu1 %v9623_v45  ;;  %7862 = vmatprep.subr.bf16.mxu0 %v9625_v51  ;;  %v10627_v61 = vld [vmem:[%s11166_s0 + $0x38] sm:$0xff]   ;;  %v10629_v51 = vld [vmem:[%s11166_s0 + $0x140] sm:$0xff]  }
0x1181   : > { %v10628_v45 = vld [vmem:[%s11166_s0 + $0xb8] sm:$0xff]  }
0x1182   : > { %9648 = vmatmul.mubr.msk.bf16.vlgmr.msra.gmra.mrb[76].mxu1 %vm1088_vm1, %v12208_v20  ;;  %9649 = vmatmul.mubr.msk.bf16.vlgmr.msra.gmra.mrb[72].mxu0 %vm1088_vm1, %v12208_v20 }
0x1183   : > { %7820 = vmatpush1.bf16.msra.mxu1 %v9622_v37  ;;  %7863 = vmatpush1.bf16.msra.mxu0 %v9624_v55  ;;  %v7414_v37 = vsub.s32 2, %v11238_v23  ;;  %v7142_v55 = vld [vmem:[%s11160_s20] sm:$0xff] }
0x1184   : > { %7821 = vmatprep.subr.bf16.mxu1 %v9639_v6  ;;  %7864 = vmatprep.subr.bf16.mxu0 %v9641_v46  ;;  %v7418_v6 = vsub.s32 3, %v11238_v23  ;;  %v7407_v46 = vrot.slane %v7142_v55, %v11241_v25  ;;  %v7411_v8 = vrot.slane %v7142_v55, %v11404_v35 }
0x1185   : > { %7851 = vmatprep.mubr.bf16.mxu1 %v10941_v56  ;;  %7894 = vmatprep.mubr.bf16.mxu0 %v10941_v56  ;;  %v7415_v14 = vrot.slane %v7142_v55, %v7414_v37 }
0x1186   : > { %v7419_v32 = vrot.slane %v7142_v55, %v7418_v6 }
0x1187   : > { %7822 = vmatpush1.bf16.msra.mxu1 %v9638_v26  ;;  %7865 = vmatpush1.bf16.msra.mxu0 %v9640_v15 }
0x1188   : > { %7905 = vmatprep.subr.bf16.mxu1 %v9627_v16  ;;  %7948 = vmatprep.subr.bf16.mxu0 %v9629_v17  ;;  %v7426_v16 = vsub.s32 5, %v11238_v23  ;;  %v7434_v17 = vsub.s32 7, %v11238_v23 }
0x118a   : > { %9650 = vmatmul.mubr.msk.bf16.vlgmr.msra.gmra.mrb[80].mxu1 %vm1088_vm1, %v12208_v20  ;;  %9651 = vmatmul.mubr.msk.bf16.vlgmr.msra.gmra.mrb[76].mxu0 %vm1088_vm1, %v12208_v20 }
0x118b   : > { %7906 = vmatpush1.bf16.msra.mxu1 %v9626_v13  ;;  %7949 = vmatpush1.bf16.msra.mxu0 %v9628_v3 }
0x118c   : > { %7907 = vmatprep.subr.bf16.mxu1 %v9643_v27  ;;  %7950 = vmatprep.subr.bf16.mxu0 %v9645_v24 }
0x118d   : > { %7937 = vmatprep.mubr.bf16.mxu1 %v10941_v56  ;;  %7980 = vmatprep.mubr.bf16.mxu0 %v10941_v56  ;;  %v10603_v56 = vld [vmem:[%s11166_s0 + $0x8] sm:$0xff]  }
0x118f   : > { %7908 = vmatpush1.bf16.msra.mxu1 %v9642_v52  ;;  %7951 = vmatpush1.bf16.msra.mxu0 %v9644_v33 }
0x1190   : > { %9957 = vmatprep.subr.bf16.mxu1 %v10597_v60  ;;  %9979 = vmatprep.subr.bf16.mxu0 %v10598_v49 }
0x1192   : > { %9652 = vmatmul.mubr.msk.bf16.vlgmr.msra.gmra.mrb[84].mxu1 %vm1088_vm1, %v12208_v20  ;;  %9653 = vmatmul.mubr.msk.bf16.vlgmr.msra.gmra.mrb[80].mxu0 %vm1088_vm1, %v12208_v20  ;;  %v10619_v20 = vld [vmem:[%s11166_s0 + $0x28] sm:$0xff]  }
0x1193   : > { %9958 = vmatpush3.bf16.msra.mxu1 %v10599_v1  ;;  %9980 = vmatpush3.bf16.msra.mxu0 %v10600_v47  ;;  %v7423_v1 = vrot.slane %v7142_v55, %v7422_v22  ;;  %v7431_v47 = vrot.slane %v7142_v55, %v7430_v42 }
0x1194   : > { %9959 = vmatprep.subr.bf16.mxu1 %v10601_v54  ;;  %9981 = vmatprep.subr.bf16.mxu0 %v10602_v40 }
0x1197   : > { %9960 = vmatpush3.bf16.msra.mxu1 %v10603_v56  ;;  %9982 = vmatpush3.bf16.msra.mxu0 %v10604_v58  ;;  %v7427_v56 = vrot.slane %v7142_v55, %v7426_v16  ;;  %v7435_v58 = vrot.slane %v7142_v55, %v7434_v17  ;;  %v7447_v55 = vrot.slane %v12284_v41, %v7414_v37 }
0x1198   : > { %9961 = vmatprep.subr.bf16.mxu1 %v10605_v7  ;;  %9983 = vmatprep.subr.bf16.mxu0 %v10606_v43  ;;  %v7451_v37 = vrot.slane %v12284_v41, %v7418_v6 }
0x119b   : > { %9962 = vmatpush3.bf16.msra.mxu1 %v10607_v44  ;;  %9984 = vmatpush3.bf16.msra.mxu0 %v10608_v48 }
0x119c   : > { %9963 = vmatprep.subr.bf16.mxu1 %v10609_v5  ;;  %9985 = vmatprep.subr.bf16.mxu0 %v10610_v50 }
0x119f   : > { %9964 = vmatpush3.bf16.msra.mxu1 %v10611_v31  ;;  %9986 = vmatpush3.bf16.msra.mxu0 %v10612_v2 }
0x11a0   : > { %9965 = vmatprep.subr.bf16.mxu1 %v10613_v53  ;;  %9987 = vmatprep.subr.bf16.mxu0 %v10614_v18 }
0x11a3   : > { %9966 = vmatpush3.bf16.msra.mxu1 %v10615_v59  ;;  %9988 = vmatpush3.bf16.msra.mxu0 %v10616_v9 }
0x11a4   : > { %9967 = vmatprep.subr.bf16.mxu1 %v10617_v21  ;;  %9989 = vmatprep.subr.bf16.mxu0 %v10618_v30 }
0x11a7   : > { %9968 = vmatpush3.bf16.msra.mxu1 %v10619_v20  ;;  %9990 = vmatpush3.bf16.msra.mxu0 %v10620_v28  ;;  %v10631_v20 = vld [vmem:[%s11166_s0 + $0x100] sm:$0xff]  }
0x11a8   : > { %9969 = vmatprep.subr.bf16.mxu1 %v10621_v29  ;;  %9991 = vmatprep.subr.bf16.mxu0 %v10622_v62  ;;  %v10632_v28 = vld [vmem:[%s11166_s0 + $0x180] sm:$0xff]  }
0x11ab   : > { %9970 = vmatpush3.bf16.msra.mxu1 %v10623_v63  ;;  %9992 = vmatpush3.bf16.msra.mxu0 %v10624_v12 }
0x11ac   : > { %9971 = vmatprep.subr.bf16.mxu1 %v10625_v19  ;;  %9993 = vmatprep.subr.bf16.mxu0 %v10626_v0  ;;  %v10633_v19 = vld [vmem:[%s11166_s0 + $0x148] sm:$0xff]  }
0x11ad   : > { %v10634_v0 = vld [vmem:[%s11166_s0 + $0x1c8] sm:$0xff]  }
0x11af   : > { %9972 = vmatpush3.bf16.msra.mxu1 %v10627_v61  ;;  %9994 = vmatpush3.bf16.msra.mxu0 %v10628_v45  ;;  %v7439_v61 = vrot.slane %v12284_v41, %v11241_v25  ;;  %v7443_v25 = vrot.slane %v12284_v41, %v11404_v35  ;;  %v10638_v35 = vld [vmem:[%s11166_s0 + $0x1d0] sm:$0xff]  }
0x11b0   : > { %10001 = vmatprep.subr.bf16.mxu1 %v10629_v51  ;;  %10023 = vmatprep.subr.bf16.mxu0 %v10630_v38 }
0x124d   : > { %v7681_v26 = vpop.f32.mrb[72].mxu1  ;;  %v7724_v15 = vpop.f32.mrb[68].mxu0 }
0x124e   : > { %v7682_v57 = vadd.f32 %v7681_v26, %v7407_v46  ;;  %v7725_v39 = vadd.f32 %v7724_v15, %v7415_v14  ;;  %v7683_v11 = vpop.f32.mrb[73].mxu1  ;;  %v7726_v4 = vpop.f32.mrb[69].mxu0 }
0x124f   : > { %v7684_v13 = vadd.f32 %v7683_v11, %v7411_v8  ;;  %v7727_v3 = vadd.f32 %v7726_v4, %v7419_v32  ;;  %v7685_v27 = vpop.f32.mrb[74].mxu1  ;;  %v7728_v24 = vpop.f32.mrb[70].mxu0 }
0x1250   : > { %v7686_v52 = vadd.f32 %v7685_v27, %v7407_v46  ;;  %v7729_v33 = vadd.f32 %v7728_v24, %v7415_v14  ;;  %v7687_v60 = vpop.f32.mrb[75].mxu1  ;;  %v7730_v49 = vpop.f32.mrb[71].mxu0  ;;  %v7991_v7 = vmax.f32 %v7682_v57, 0.0  ;;  %v7993_v43 = vmax.f32 %v7725_v39, 0.0  ;;  %v10635_v57 = vld [vmem:[%s11166_s0 + $0x108] sm:$0xff]   ;;  %v10637_v27 = vld [vmem:[%s11166_s0 + $0x150] sm:$0xff]  }
0x1251   : > { %v7688_v54 = vadd.f32 %v7687_v60, %v7411_v8  ;;  %v7731_v40 = vadd.f32 %v7730_v49, %v7419_v32  ;;  %v7992_v5 = vmax.f32 %v7684_v13, 0.0  ;;  %v7994_v50 = vmax.f32 %v7727_v3, 0.0  ;;  %v10636_v39 = vld [vmem:[%s11166_s0 + $0x188] sm:$0xff]  }
0x1252   : > { %v8007_v44 = vmax.f32 %v7686_v52, 0.0  ;;  %v8009_v48 = vmax.f32 %v7729_v33, 0.0 }
0x1253   : > { %v8008_v31 = vmax.f32 %v7688_v54, 0.0  ;;  %v8010_v2 = vmax.f32 %v7731_v40, 0.0 }
0x1254   : > { %v8023_v53 = vpack.c.bf16 %v8007_v44, %v7991_v7  ;;  %v8025_v18 = vpack.c.bf16 %v8009_v48, %v7993_v43 }
0x1255   : > { %v8024_v59 = vpack.c.bf16 %v8008_v31, %v7992_v5  ;;  %v8026_v9 = vpack.c.bf16 %v8010_v2, %v7994_v50  ;;  %v7767_v21 = vpop.f32.mrb[76].mxu1  ;;  %v7810_v30 = vpop.f32.mrb[72].mxu0  ;;  %v10641_v5 = vld [vmem:[%s11166_s0 + $0x158] sm:$0xff]  }
0x1256   : > { %v7768_v29 = vadd.f32 %v7767_v21, %v7423_v1  ;;  %v7811_v62 = vadd.f32 %v7810_v30, %v7431_v47  ;;  %v7769_v63 = vpop.f32.mrb[77].mxu1  ;;  %v7812_v12 = vpop.f32.mrb[73].mxu0  ;;  %v10642_v50 = vld [vmem:[%s11166_s0 + $0x1d8] sm:$0xff]  }
0x1257   : > { %v7770_v45 = vadd.f32 %v7769_v63, %v7427_v56  ;;  %v7813_v51 = vadd.f32 %v7812_v12, %v7435_v58  ;;  %v7771_v38 = vpop.f32.mrb[78].mxu1  ;;  %v7814_v42 = vpop.f32.mrb[74].mxu0  ;;  %8845 = vmatprep.mubr.bf16.mxu1 %v8024_v59  ;;  %8886 = vmatprep.mubr.bf16.mxu0 %v8026_v9  ;;  %v10643_v63 = vld [vmem:[%s11166_s0 + $0x118] sm:$0xff]  }
0x1258   : > { %v7772_v46 = vadd.f32 %v7771_v38, %v7423_v1  ;;  %v7815_v14 = vadd.f32 %v7814_v42, %v7431_v47  ;;  %v7773_v8 = vpop.f32.mrb[79].mxu1  ;;  %v7816_v32 = vpop.f32.mrb[75].mxu0  ;;  %8846 = vmatmul.mubr.bf16.vlgmr.msra.gmra.mrb[88].mxu1 %v8023_v53  ;;  %8887 = vmatmul.mubr.bf16.vlgmr.msra.gmra.mrb[84].mxu0 %v8025_v18  ;;  %v7995_v11 = vmax.f32 %v7768_v29, 0.0  ;;  %v7997_v4 = vmax.f32 %v7811_v62, 0.0  ;;  %v10644_v12 = vld [vmem:[%s11166_s0 + $0x198] sm:$0xff]  }
0x1259   : > { %v7774_v26 = vadd.f32 %v7773_v8, %v7427_v56  ;;  %v7817_v15 = vadd.f32 %v7816_v32, %v7435_v58  ;;  %10002 = vmatpush3.bf16.msra.mxu1 %v10631_v20  ;;  %10024 = vmatpush3.bf16.msra.mxu0 %v10632_v28  ;;  %v7996_v24 = vmax.f32 %v7770_v45, 0.0  ;;  %v7998_v52 = vmax.f32 %v7813_v51, 0.0  ;;  %v10639_v56 = vld [vmem:[%s11166_s0 + $0x110] sm:$0xff]  }
0x125a   : > { %v8011_v13 = vmax.f32 %v7772_v46, 0.0  ;;  %v8013_v3 = vmax.f32 %v7815_v14, 0.0  ;;  %10003 = vmatprep.subr.bf16.mxu1 %v10633_v19  ;;  %10025 = vmatprep.subr.bf16.mxu0 %v10634_v0  ;;  %v10640_v58 = vld [vmem:[%s11166_s0 + $0x190] sm:$0xff]   ;;  %v7455_v20 = vrot.slane %v12284_v41, %v7422_v22  ;;  %v7459_v28 = vrot.slane %v12284_v41, %v7426_v16  ;;  %v10645_v22 = vld [vmem:[%s11166_s0 + $0x160] sm:$0xff]  }
0x125b   : > { %v8012_v33 = vmax.f32 %v7774_v26, 0.0  ;;  %v8014_v60 = vmax.f32 %v7817_v15, 0.0  ;;  %v7467_v19 = vrot.slane %v12284_v41, %v7434_v17  ;;  %v10646_v16 = vld [vmem:[%s11166_s0 + $0x1e0] sm:$0xff]  }
0x125c   : > { %v12321_v49 = vpack.c.bf16 %v8011_v13, %v7995_v11  ;;  %v12323_v1 = vpack.c.bf16 %v8013_v3, %v7997_v4  ;;  %v10648_v26 = vld [vmem:[%s11166_s0 + $0x1a0] sm:$0xff]   ;;  %v10649_v11 = vld [vmem:[%s11166_s0 + $0x168] sm:$0xff]  }
0x125d   : > { %v8028_v6 = vpack.c.bf16 %v8012_v33, %v7996_v24  ;;  %v8030_v47 = vpack.c.bf16 %v8014_v60, %v7998_v52  ;;  %10004 = vmatpush3.bf16.msra.mxu1 %v10635_v57  ;;  %10026 = vmatpush3.bf16.msra.mxu0 %v10636_v39  ;;  %v7853_v54 = vpop.f32.mrb[80].mxu1  ;;  %v7896_v40 = vpop.f32.mrb[76].mxu0  ;;  %v10650_v4 = vld [vmem:[%s11166_s0 + $0x1e8] sm:$0xff]  }
0x125e   : > { %v7854_v7 = vadd.f32 %v7853_v54, %v7439_v61  ;;  %v7897_v43 = vadd.f32 %v7896_v40, %v7447_v55  ;;  %v7855_v44 = vpop.f32.mrb[81].mxu1  ;;  %v7898_v48 = vpop.f32.mrb[77].mxu0  ;;  %10005 = vmatprep.subr.bf16.mxu1 %v10637_v27  ;;  %10027 = vmatprep.subr.bf16.mxu0 %v10638_v35  ;;  %v10651_v54 = vld [vmem:[%s11166_s0 + $0x128] sm:$0xff]  }
0x125f   : > { %v7856_v31 = vadd.f32 %v7855_v44, %v7443_v25  ;;  %v7899_v2 = vadd.f32 %v7898_v48, %v7451_v37  ;;  %v7857_v53 = vpop.f32.mrb[82].mxu1  ;;  %v7900_v18 = vpop.f32.mrb[78].mxu0  ;;  %8927 = vmatprep.mubr.bf16.mxu1 %v8028_v6  ;;  %8968 = vmatprep.mubr.bf16.mxu0 %v8030_v47  ;;  %v10652_v40 = vld [vmem:[%s11166_s0 + $0x1a8] sm:$0xff]   ;;  %v10653_v44 = vld [vmem:[%s11166_s0 + $0x170] sm:$0xff]  }
0x1260   : > { %v7858_v59 = vadd.f32 %v7857_v53, %v7439_v61  ;;  %v7901_v9 = vadd.f32 %v7900_v18, %v7447_v55  ;;  %v7859_v21 = vpop.f32.mrb[83].mxu1  ;;  %v7902_v30 = vpop.f32.mrb[79].mxu0  ;;  %v7999_v0 = vmax.f32 %v7854_v7, 0.0  ;;  %v8001_v61 = vmax.f32 %v7897_v43, 0.0 }
0x1261   : > { %v7860_v29 = vadd.f32 %v7859_v21, %v7443_v25  ;;  %v7903_v62 = vadd.f32 %v7902_v30, %v7451_v37  ;;  %10006 = vmatpush3.bf16.msra.mxu1 %v10639_v56  ;;  %10028 = vmatpush3.bf16.msra.mxu0 %v10640_v58  ;;  %v8000_v38 = vmax.f32 %v7856_v31, 0.0  ;;  %v8002_v42 = vmax.f32 %v7899_v2, 0.0  ;;  %v10647_v25 = vld [vmem:[%s11166_s0 + $0x120] sm:$0xff]   ;;  %v10656_v21 = vld [vmem:[%s11166_s0 + $0x1b0] sm:$0xff]   ;;  %v10657_v30 = vld [vmem:[%s11166_s0 + $0x178] sm:$0xff]  }
0x1262   : > { %v8015_v45 = vmax.f32 %v7858_v59, 0.0  ;;  %v8017_v51 = vmax.f32 %v7901_v9, 0.0  ;;  %10007 = vmatprep.subr.bf16.mxu1 %v10641_v5  ;;  %10029 = vmatprep.subr.bf16.mxu0 %v10642_v50  ;;  %v10655_v9 = vld [vmem:[%s11166_s0 + $0x130] sm:$0xff]  }
0x1263   : > { %v8016_v55 = vmax.f32 %v7860_v29, 0.0  ;;  %v8018_v46 = vmax.f32 %v7903_v62, 0.0  ;;  %v10660_v29 = vld [vmem:[%s11166_s0 + $0x1b8] sm:$0xff]   ;;  %v10661_v62 = vld [vmem:[%s11166_s0 + $0x240] sm:$0xff]  }
0x1264   : > { %v12342_v14 = vpack.c.bf16 %v8015_v45, %v7999_v0  ;;  %v12344_v23 = vpack.c.bf16 %v8017_v51, %v8001_v61  ;;  %v10665_v0 = vld [vmem:[%s11166_s0 + $0x248] sm:$0xff]  }
0x1265   : > { %v12346_v41 = vpack.c.bf16 %v8016_v55, %v8000_v38  ;;  %v12348_v17 = vpack.c.bf16 %v8018_v46, %v8002_v42  ;;  %10008 = vmatpush3.bf16.msra.mxu1 %v10643_v63  ;;  %10030 = vmatpush3.bf16.msra.mxu0 %v10644_v12  ;;  %v7939_v8 = vpop.f32.mrb[84].mxu1  ;;  %v7982_v32 = vpop.f32.mrb[80].mxu0  ;;  %v10662_v63 = vld [vmem:[%s11166_s0 + $0x2c0] sm:$0xff]   ;;  %v10666_v61 = vld [vmem:[%s11166_s0 + $0x2c8] sm:$0xff]   ;;  %v10673_v38 = vld [vmem:[%s11166_s0 + $0x258] sm:$0xff]  }
0x1266   : > { %v7940_v15 = vadd.f32 %v7939_v8, %v7455_v20  ;;  %v7983_v57 = vadd.f32 %v7982_v32, %v12287_v34  ;;  %v7941_v39 = vpop.f32.mrb[85].mxu1  ;;  %v7984_v37 = vpop.f32.mrb[81].mxu0  ;;  %10009 = vmatprep.subr.bf16.mxu1 %v10645_v22  ;;  %10031 = vmatprep.subr.bf16.mxu0 %v10646_v16  ;;  %v10663_v12 = vld [vmem:[%s11166_s0 + $0x200] sm:$0xff]   ;;  %v10667_v45 = vld [vmem:[%s11166_s0 + $0x208] sm:$0xff]   ;;  %v10669_v22 = vld [vmem:[%s11166_s0 + $0x250] sm:$0xff]  }
0x1267   : > { %v7942_v13 = vadd.f32 %v7941_v39, %v7459_v28  ;;  %v7985_v3 = vadd.f32 %v7984_v37, %v7467_v19  ;;  %v7943_v27 = vpop.f32.mrb[86].mxu1  ;;  %v7986_v35 = vpop.f32.mrb[82].mxu0  ;;  %v10668_v51 = vld [vmem:[%s11166_s0 + $0x288] sm:$0xff]   ;;  %v10672_v16 = vld [vmem:[%s11166_s0 + $0x290] sm:$0xff]   ;;  %v10674_v42 = vld [vmem:[%s11166_s0 + $0x2d8] sm:$0xff]  }
0x1268   : > { %v7944_v24 = vadd.f32 %v7943_v27, %v7455_v20  ;;  %v7987_v52 = vadd.f32 %v7986_v35, %v12287_v34  ;;  %v7945_v33 = vpop.f32.mrb[87].mxu1  ;;  %v7988_v60 = vpop.f32.mrb[83].mxu0  ;;  %v8003_v56 = vmax.f32 %v7940_v15, 0.0  ;;  %v8005_v58 = vmax.f32 %v7983_v57, 0.0  ;;  %v10654_v34 = vld [vmem:[%s11166_s0 + $0x1f0] sm:$0xff]   ;;  %v10658_v20 = vld [vmem:[%s11166_s0 + $0x1f8] sm:$0xff]  }
0x1269   : > { %v7946_v6 = vadd.f32 %v7945_v33, %v7459_v28  ;;  %v7989_v47 = vadd.f32 %v7988_v60, %v7467_v19  ;;  %10010 = vmatpush3.bf16.msra.mxu1 %v10647_v25  ;;  %10032 = vmatpush3.bf16.msra.mxu0 %v10648_v26  ;;  %v8004_v48 = vmax.f32 %v7942_v13, 0.0  ;;  %v8006_v5 = vmax.f32 %v7985_v3, 0.0  ;;  %v10659_v28 = vld [vmem:[%s11166_s0 + $0x138] sm:$0xff]   ;;  %v10664_v19 = vld [vmem:[%s11166_s0 + $0x280] sm:$0xff]   ;;  %v10681_v25 = vld [vmem:[%s11166_s0 + $0x268] sm:$0xff]  }
0x126a   : > { %v8019_v7 = vmax.f32 %v7944_v24, 0.0  ;;  %v8021_v43 = vmax.f32 %v7987_v52, 0.0  ;;  %10011 = vmatprep.subr.bf16.mxu1 %v10649_v11  ;;  %10033 = vmatprep.subr.bf16.mxu0 %v10650_v4  ;;  %v10675_v55 = vld [vmem:[%s11166_s0 + $0x218] sm:$0xff]   ;;  %v10679_v8 = vld [vmem:[%s11166_s0 + $0x220] sm:$0xff]   ;;  %v10682_v26 = vld [vmem:[%s11166_s0 + $0x2e8] sm:$0xff]  }
0x126b   : > { %v8020_v50 = vmax.f32 %v7946_v6, 0.0  ;;  %v8022_v31 = vmax.f32 %v7989_v47, 0.0  ;;  %v10676_v46 = vld [vmem:[%s11166_s0 + $0x298] sm:$0xff]   ;;  %v10680_v32 = vld [vmem:[%s11166_s0 + $0x2a0] sm:$0xff]   ;;  %v10683_v15 = vld [vmem:[%s11166_s0 + $0x228] sm:$0xff]  }
0x126c   : > { %v12360_v2 = vpack.c.bf16 %v8019_v7, %v8003_v56  ;;  %v12362_v53 = vpack.c.bf16 %v8021_v43, %v8005_v58  ;;  %v10684_v57 = vld [vmem:[%s11166_s0 + $0x2a8] sm:$0xff]   ;;  %v10685_v39 = vld [vmem:[%s11166_s0 + $0x270] sm:$0xff]   ;;  %v10689_v13 = vld [vmem:[%s11166_s0 + $0x278] sm:$0xff]  }
0x126d   : > { %v12364_v18 = vpack.c.bf16 %v8020_v50, %v8004_v48  ;;  %v12366_v59 = vpack.c.bf16 %v8022_v31, %v8006_v5  ;;  %10012 = vmatpush3.bf16.msra.mxu1 %v10651_v54  ;;  %10034 = vmatpush3.bf16.msra.mxu0 %v10652_v40  ;;  %v10686_v37 = vld [vmem:[%s11166_s0 + $0x2f0] sm:$0xff]   ;;  %v10690_v3 = vld [vmem:[%s11166_s0 + $0x2f8] sm:$0xff]   ;;  %v10693_v24 = vld [vmem:[%s11166_s0 + $0x340] sm:$0xff]  }
0x126e   : > { %10013 = vmatprep.subr.bf16.mxu1 %v10653_v44  ;;  %10035 = vmatprep.subr.bf16.mxu0 %v10654_v34  ;;  %v10687_v11 = vld [vmem:[%s11166_s0 + $0x230] sm:$0xff]   ;;  %v10691_v27 = vld [vmem:[%s11166_s0 + $0x238] sm:$0xff]   ;;  %v10694_v52 = vld [vmem:[%s11166_s0 + $0x3c0] sm:$0xff]  }
0x126f   : > { %v10688_v4 = vld [vmem:[%s11166_s0 + $0x2b0] sm:$0xff]   ;;  %v10692_v35 = vld [vmem:[%s11166_s0 + $0x2b8] sm:$0xff]   ;;  %v10695_v33 = vld [vmem:[%s11166_s0 + $0x300] sm:$0xff]  }
0x1270   : > { %v10696_v60 = vld [vmem:[%s11166_s0 + $0x380] sm:$0xff]   ;;  %v10697_v6 = vld [vmem:[%s11166_s0 + $0x348] sm:$0xff]   ;;  %v10701_v56 = vld [vmem:[%s11166_s0 + $0x350] sm:$0xff]  }
0x1271   : > { %10014 = vmatpush3.bf16.msra.mxu1 %v10655_v9  ;;  %10036 = vmatpush3.bf16.msra.mxu0 %v10656_v21  ;;  %v10698_v47 = vld [vmem:[%s11166_s0 + $0x3c8] sm:$0xff]   ;;  %v10704_v58 = vld [vmem:[%s11166_s0 + $0x390] sm:$0xff]   ;;  %v10705_v7 = vld [vmem:[%s11166_s0 + $0x358] sm:$0xff]  }
0x1272   : > { %10015 = vmatprep.subr.bf16.mxu1 %v10657_v30  ;;  %10037 = vmatprep.subr.bf16.mxu0 %v10658_v20  ;;  %v10699_v54 = vld [vmem:[%s11166_s0 + $0x308] sm:$0xff]   ;;  %v10706_v43 = vld [vmem:[%s11166_s0 + $0x3d8] sm:$0xff]   ;;  %v10709_v48 = vld [vmem:[%s11166_s0 + $0x360] sm:$0xff]  }
0x1273   : > { %v10700_v40 = vld [vmem:[%s11166_s0 + $0x388] sm:$0xff]   ;;  %v10707_v44 = vld [vmem:[%s11166_s0 + $0x318] sm:$0xff]   ;;  %v10710_v5 = vld [vmem:[%s11166_s0 + $0x3e0] sm:$0xff]  }
0x1274   : > { %v10708_v34 = vld [vmem:[%s11166_s0 + $0x398] sm:$0xff]   ;;  %v10711_v50 = vld [vmem:[%s11166_s0 + $0x320] sm:$0xff]   ;;  %v10715_v9 = vld [vmem:[%s11166_s0 + $0x328] sm:$0xff]  }
0x1275   : > { %10016 = vmatpush3.bf16.msra.mxu1 %v10659_v28  ;;  %10038 = vmatpush3.bf16.msra.mxu0 %v10660_v29  ;;  %v10712_v31 = vld [vmem:[%s11166_s0 + $0x3a0] sm:$0xff]   ;;  %v10716_v21 = vld [vmem:[%s11166_s0 + $0x3a8] sm:$0xff]   ;;  %v10717_v30 = vld [vmem:[%s11166_s0 + $0x370] sm:$0xff]  }
0x1276   : > { %10045 = vmatprep.subr.bf16.mxu1 %v10661_v62  ;;  %10067 = vmatprep.subr.bf16.mxu0 %v10662_v63  ;;  %v10718_v20 = vld [vmem:[%s11166_s0 + $0x3f0] sm:$0xff]   ;;  %v10721_v62 = vld [vmem:[%s11166_s0 + $0x378] sm:$0xff]  }
0x1277   : > { %v10719_v28 = vld [vmem:[%s11166_s0 + $0x330] sm:$0xff]   ;;  %v10722_v63 = vld [vmem:[%s11166_s0 + $0x3f8] sm:$0xff]  }
0x1278   : > { %8928 = vmatmul.mubr.bf16.vlgmr.msra.gmra.mrb[92].mxu1 %v12321_v49  ;;  %8969 = vmatmul.mubr.bf16.vlgmr.msra.gmra.mrb[88].mxu0 %v12323_v1  ;;  %v10670_v49 = vld [vmem:[%s11166_s0 + $0x2d0] sm:$0xff]  }
0x1279   : > { %10046 = vmatpush3.bf16.msra.mxu1 %v10663_v12  ;;  %9009 = vmatprep.mubr.bf16.mxu1 %v12346_v41  ;;  %v10671_v1 = vld [vmem:[%s11166_s0 + $0x210] sm:$0xff]   ;;  %v10677_v41 = vld [vmem:[%s11166_s0 + $0x260] sm:$0xff]   ;;  %v10723_v12 = vld [vmem:[%s11166_s0 + $0x338] sm:$0xff]  }
0x127a   : > { %10068 = vmatpush3.bf16.msra.mxu0 %v10664_v19  ;;  %9050 = vmatprep.mubr.bf16.mxu0 %v12348_v17  ;;  %v10678_v17 = vld [vmem:[%s11166_s0 + $0x2e0] sm:$0xff]   ;;  %v10720_v29 = vld [vmem:[%s11166_s0 + $0x3b0] sm:$0xff]   ;;  %v10724_v19 = vld [vmem:[%s11166_s0 + $0x3b8] sm:$0xff]  }
0x127b   : > { %10047 = vmatprep.subr.bf16.mxu1 %v10665_v0  ;;  %10069 = vmatprep.subr.bf16.mxu0 %v10666_v61 }
0x127d   : > { %10048 = vmatpush3.bf16.msra.mxu1 %v10667_v45  ;;  %v9654_v45 = vld [vmem:[%s12636_s21] ss:$0 sm:$0xff] }
0x127e   : > { %10070 = vmatpush3.bf16.msra.mxu0 %v10668_v51  ;;  %10049 = vmatprep.subr.bf16.mxu1 %v10669_v22 }
0x127f   : > { %10071 = vmatprep.subr.bf16.mxu0 %v10670_v49 }
0x1281   : > { %10050 = vmatpush3.bf16.msra.mxu1 %v10671_v1 }
0x1282   : > { %10072 = vmatpush3.bf16.msra.mxu0 %v10672_v16  ;;  %10051 = vmatprep.subr.bf16.mxu1 %v10673_v38 }
0x1283   : > { %10073 = vmatprep.subr.bf16.mxu0 %v10674_v42 }
0x1285   : > { %10052 = vmatpush3.bf16.msra.mxu1 %v10675_v55 }
0x1286   : > { %10074 = vmatpush3.bf16.msra.mxu0 %v10676_v46  ;;  %10053 = vmatprep.subr.bf16.mxu1 %v10677_v41 }
0x1287   : > { %10075 = vmatprep.subr.bf16.mxu0 %v10678_v17 }
0x1289   : > { %10054 = vmatpush3.bf16.msra.mxu1 %v10679_v8 }
0x128a   : > { %10076 = vmatpush3.bf16.msra.mxu0 %v10680_v32  ;;  %10055 = vmatprep.subr.bf16.mxu1 %v10681_v25 }
0x128b   : > { %10077 = vmatprep.subr.bf16.mxu0 %v10682_v26 }
0x128d   : > { %10056 = vmatpush3.bf16.msra.mxu1 %v10683_v15 }
0x128e   : > { %10078 = vmatpush3.bf16.msra.mxu0 %v10684_v57  ;;  %10057 = vmatprep.subr.bf16.mxu1 %v10685_v39 }
0x128f   : > { %10079 = vmatprep.subr.bf16.mxu0 %v10686_v37 }
0x1291   : > { %10058 = vmatpush3.bf16.msra.mxu1 %v10687_v11 }
0x1292   : > { %10080 = vmatpush3.bf16.msra.mxu0 %v10688_v4  ;;  %10059 = vmatprep.subr.bf16.mxu1 %v10689_v13 }
0x1293   : > { %10081 = vmatprep.subr.bf16.mxu0 %v10690_v3 }
0x1295   : > { %10060 = vmatpush3.bf16.msra.mxu1 %v10691_v27 }
0x1296   : > { %10082 = vmatpush3.bf16.msra.mxu0 %v10692_v35  ;;  %10089 = vmatprep.subr.bf16.mxu1 %v10693_v24 }
0x1297   : > { %10111 = vmatprep.subr.bf16.mxu0 %v10694_v52 }
0x1298   : > { %9010 = vmatmul.mubr.bf16.vlgmr.msra.gmra.mrb[96].mxu1 %v12342_v14  ;;  %v10702_v14 = vld [vmem:[%s11166_s0 + $0x3d0] sm:$0xff]  }
0x1299   : > { %9051 = vmatmul.mubr.bf16.vlgmr.msra.gmra.mrb[92].mxu0 %v12344_v23  ;;  %10090 = vmatpush3.bf16.msra.mxu1 %v10695_v33  ;;  %v10703_v23 = vld [vmem:[%s11166_s0 + $0x310] sm:$0xff]  }
0x129a   : > { %9091 = vmatprep.mubr.bf16.mxu1 %v12364_v18  ;;  %10112 = vmatpush3.bf16.msra.mxu0 %v10696_v60  ;;  %v10713_v18 = vld [vmem:[%s11166_s0 + $0x368] sm:$0xff]  }
0x129b   : > { %9132 = vmatprep.mubr.bf16.mxu0 %v12366_v59  ;;  %10091 = vmatprep.subr.bf16.mxu1 %v10697_v6  ;;  %v10714_v59 = vld [vmem:[%s11166_s0 + $0x3e8] sm:$0xff]  }
0x129c   : > { %10113 = vmatprep.subr.bf16.mxu0 %v10698_v47 }
0x129d   : > { %10092 = vmatpush3.bf16.msra.mxu1 %v10699_v54 }
0x129e   : > { %10114 = vmatpush3.bf16.msra.mxu0 %v10700_v40  ;;  %10093 = vmatprep.subr.bf16.mxu1 %v10701_v56 }
0x129f   : > { %10115 = vmatprep.subr.bf16.mxu0 %v10702_v14 }
0x12a1   : > { %10094 = vmatpush3.bf16.msra.mxu1 %v10703_v23 }
0x12a2   : > { %10116 = vmatpush3.bf16.msra.mxu0 %v10704_v58  ;;  %10095 = vmatprep.subr.bf16.mxu1 %v10705_v7 }
0x12a3   : > { %10117 = vmatprep.subr.bf16.mxu0 %v10706_v43 }
0x12a5   : > { %10096 = vmatpush3.bf16.msra.mxu1 %v10707_v44 }
0x12a6   : > { %10118 = vmatpush3.bf16.msra.mxu0 %v10708_v34  ;;  %10097 = vmatprep.subr.bf16.mxu1 %v10709_v48 }
0x12a7   : > { %10119 = vmatprep.subr.bf16.mxu0 %v10710_v5 }
0x12a9   : > { %10098 = vmatpush3.bf16.msra.mxu1 %v10711_v50 }
0x12aa   : > { %10120 = vmatpush3.bf16.msra.mxu0 %v10712_v31  ;;  %10099 = vmatprep.subr.bf16.mxu1 %v10713_v18 }
0x12ab   : > { %10121 = vmatprep.subr.bf16.mxu0 %v10714_v59 }
0x12ad   : > { %10100 = vmatpush3.bf16.msra.mxu1 %v10715_v9 }
0x12ae   : > { %10122 = vmatpush3.bf16.msra.mxu0 %v10716_v21  ;;  %10101 = vmatprep.subr.bf16.mxu1 %v10717_v30 }
0x12af   : > { %10123 = vmatprep.subr.bf16.mxu0 %v10718_v20 }
0x12b1   : > { %10102 = vmatpush3.bf16.msra.mxu1 %v10719_v28 }
0x12b2   : > { %10124 = vmatpush3.bf16.msra.mxu0 %v10720_v29  ;;  %10103 = vmatprep.subr.bf16.mxu1 %v10721_v62 }
0x12b3   : > { %10125 = vmatprep.subr.bf16.mxu0 %v10722_v63 }
0x12b5   : > { %10104 = vmatpush3.bf16.msra.mxu1 %v10723_v12 }
0x12b6   : > { %10126 = vmatpush3.bf16.msra.mxu0 %v10724_v19 }
0x12b8   : > { %9092 = vmatmul.mubr.bf16.vlgmr.msra.gmra.mrb[100].mxu1 %v12360_v2 }
0x12b9   : > { %9133 = vmatmul.mubr.bf16.vlgmr.msra.gmra.mrb[96].mxu0 %v12362_v53 }
0x132b   : > { %v9973_v0 = vpop.f32.mrb[88].mxu1  ;;  %v9995_v61 = vpop.f32.mrb[84].mxu0 }
0x132c   : > { %v9974_v51 = vpop.f32.mrb[89].mxu1  ;;  %v9996_v22 = vpop.f32.mrb[85].mxu0 }
0x132d   : > { %v9975_v49 = vadd.f32 %v9974_v51, %v9973_v0  ;;  %v9997_v1 = vadd.f32 %v9996_v22, %v9995_v61  ;;  %v9976_v16 = vpop.f32.mrb[90].mxu1  ;;  %v9998_v38 = vpop.f32.mrb[86].mxu0 }
0x132e   : > { %v9977_v42 = vpop.f32.mrb[91].mxu1  ;;  %v9999_v55 = vpop.f32.mrb[87].mxu0 }
0x132f   : > { %v8848_v46 = vadd.f32 %v9975_v49, %v9654_v45  ;;  %v9978_v41 = vadd.f32 %v9977_v42, %v9976_v16  ;;  %v10000_v2 = vadd.f32 %v9999_v55, %v9998_v38 }
0x1331   : > { %v8889_v17 = vadd.f32 %v9997_v1, %v8848_v46  ;;  %v8851_v53 = vadd.f32 %v9978_v41, %v9654_v45 }
0x1333   : > { %v8892_v8 = vadd.f32 %v10000_v2, %v8851_v53 }
0x134b   : > { %v10017_v32 = vpop.f32.mrb[92].mxu1  ;;  %v10039_v25 = vpop.f32.mrb[88].mxu0 }
0x134c   : > { %v10018_v26 = vpop.f32.mrb[93].mxu1  ;;  %v10040_v15 = vpop.f32.mrb[89].mxu0 }
0x134d   : > { %v10019_v57 = vadd.f32 %v10018_v26, %v10017_v32  ;;  %v10041_v39 = vadd.f32 %v10040_v15, %v10039_v25  ;;  %v10020_v37 = vpop.f32.mrb[94].mxu1  ;;  %v10042_v11 = vpop.f32.mrb[90].mxu0 }
0x134e   : > { %v10021_v4 = vpop.f32.mrb[95].mxu1  ;;  %v10043_v13 = vpop.f32.mrb[91].mxu0 }
0x134f   : > { %v8930_v3 = vadd.f32 %v10019_v57, %v8889_v17  ;;  %v10022_v27 = vadd.f32 %v10021_v4, %v10020_v37  ;;  %v10044_v35 = vadd.f32 %v10043_v13, %v10042_v11  ;;  %v9784_v4 = vld [vmem:[%s12640_s18] ss:$0 sm:$0xff] }
0x1351   : > { %v8971_v24 = vadd.f32 %v10041_v39, %v8930_v3  ;;  %v8933_v52 = vadd.f32 %v10022_v27, %v8892_v8  ;;  %v9783_v39 = vld [vmem:[%s12638_s26] ss:$0 sm:$0xff] }
0x1353   : > { %v8974_v33 = vadd.f32 %v10044_v35, %v8933_v52 }
0x136b   : > { %v10061_v60 = vpop.f32.mrb[96].mxu1 }
0x136c   : > { %v10083_v6 = vpop.f32.mrb[92].mxu0  ;;  %v10062_v47 = vpop.f32.mrb[97].mxu1 }
0x136d   : > { %v10063_v54 = vadd.f32 %v10062_v47, %v10061_v60  ;;  %v10084_v40 = vpop.f32.mrb[93].mxu0  ;;  %v10064_v56 = vpop.f32.mrb[98].mxu1 }
0x136e   : > { %v10085_v14 = vadd.f32 %v10084_v40, %v10083_v6  ;;  %v10086_v23 = vpop.f32.mrb[94].mxu0  ;;  %v10065_v58 = vpop.f32.mrb[99].mxu1 }
0x136f   : > { %v9012_v7 = vadd.f32 %v10063_v54, %v8971_v24  ;;  %v10066_v43 = vadd.f32 %v10065_v58, %v10064_v56  ;;  %v10087_v44 = vpop.f32.mrb[95].mxu0 }
0x1370   : > { %v10088_v34 = vadd.f32 %v10087_v44, %v10086_v23 }
0x1371   : > { %v9053_v48 = vadd.f32 %v10085_v14, %v9012_v7  ;;  %v9015_v5 = vadd.f32 %v10066_v43, %v8974_v33 }
0x1373   : > { %v9056_v50 = vadd.f32 %v10088_v34, %v9015_v5 }
0x138b   : > { %v10105_v31 = vpop.f32.mrb[100].mxu1 }
0x138c   : > { %v10127_v18 = vpop.f32.mrb[96].mxu0  ;;  %v10106_v59 = vpop.f32.mrb[101].mxu1 }
0x138d   : > { %v10107_v9 = vadd.f32 %v10106_v59, %v10105_v31  ;;  %v10128_v21 = vpop.f32.mrb[97].mxu0  ;;  %v10108_v30 = vpop.f32.mrb[102].mxu1 }
0x138e   : > { %v10129_v20 = vadd.f32 %v10128_v21, %v10127_v18  ;;  %v10130_v28 = vpop.f32.mrb[98].mxu0  ;;  %v10109_v29 = vpop.f32.mrb[103].mxu1  ;;  %v9786_v18 = vld [vmem:[%s12642_s23] ss:$0 sm:$0xff] (!%p9785_p5) }
0x138f   : > { %v9094_v62 = vadd.f32 %v10107_v9, %v9053_v48  ;;  %v10110_v63 = vadd.f32 %v10109_v29, %v10108_v30  ;;  %v10131_v12 = vpop.f32.mrb[99].mxu0  ;;  %v9787_v9 = vld [vmem:[%s12643_s13] ss:$0 sm:$0xff] (!%p9785_p5) }
0x1390   : > { %v10132_v19 = vadd.f32 %v10131_v12, %v10130_v28 }
0x1391   : > { %v9135_v0 = vadd.f32 %v10129_v20, %v9094_v62  ;;  %v9097_v61 = vadd.f32 %v10110_v63, %v9056_v50 }
0x1393   : > { %v9138_v45 = vadd.f32 %v10132_v19, %v9097_v61  ;;  %v9141_v51 = vadd.f32 %v9135_v0, %v12202_v36 }
0x1395   : > { %v9145_v22 = vsel %vm1088_vm1, %v9141_v51, 0.0  ;;  %v9142_v49 = vadd.f32 %v9138_v45, %v12204_v10 }
0x1396   : > { %9146 = vadd.xlane.f32.xlu1 %v9145_v22 }
0x1397   : > { %v9148_v1 = vsel %vm1088_vm1, %v9142_v49, 0.0 }
0x1398   : > { %9149 = vadd.xlane.f32.xlu0 %v9148_v1 }
0x1423   : > { %v9147_v16 = vpop.xlane.xlu1 %9146 }
0x1424   : > { %v9151_v38 = vmul.f32 0.03125, %v9147_v16 }
0x1425   : > { %v9150_v42 = vpop.xlane.xlu0 %9149 }
0x1426   : > { %v9153_v55 = vsub.f32 %v9141_v51, %v9151_v38  ;;  %v9152_v46 = vmul.f32 0.03125, %v9150_v42 }
0x1428   : > { %v9154_v41 = vsub.f32 %v9142_v49, %v9152_v46  ;;  %v9155_v2 = vmul.f32 %v9153_v55, %v9153_v55 }
0x142a   : > { %v9157_v17 = vsel %vm1088_vm1, %v9155_v2, 0.0  ;;  %v9156_v53 = vmul.f32 %v9154_v41, %v9154_v41 }
0x142b   : > { %9158 = vadd.xlane.f32.xlu1 %v9157_v17 }
0x142c   : > { %v9160_v36 = vsel %vm1088_vm1, %v9156_v53, 0.0 }
0x142d   : > { %9161 = vadd.xlane.f32.xlu0 %v9160_v36 }
0x14b8   : > { %v9159_v10 = vpop.xlane.xlu1 %9158 }
0x14b9   : > { %v9163_v8 = vmul.f32 0.03125, %v9159_v10 }
0x14ba   : > { %v9162_v32 = vpop.xlane.xlu0 %9161 }
0x14bb   : > { %v9165_v25 = vadd.f32 1e-05, %v9163_v8  ;;  %v9164_v26 = vmul.f32 0.03125, %v9162_v32 }
0x14bd   : > { %10861 = vrsqrt.f32 %v9165_v25  ;;  %v9166_v15 = vadd.f32 1e-05, %v9164_v26 }
0x14bf   : > { %10863 = vrsqrt.f32 %v9166_v15 }
0x14c7   : > { %v10862_v57 = vpop.eup %10861 }
0x14c8   : > { %v9169_v37 = vmul.f32 %v10862_v57, %v9153_v55 }
0x14c9   : > { %v10864_v11 = vpop.eup %10863 }
0x14ca   : > { %v9177_v13 = vmul.f32 %v9783_v39, %v9169_v37  ;;  %v9170_v3 = vmul.f32 %v10864_v11, %v9154_v41  ;;  %9192 = sbr.rel (%p9785_p5) target bundleno = 5644 (0x160c), region = 128 }
0x14cc   : > { %v9185_v27 = vadd.f32 %v9784_v4, %v9177_v13  ;;  %v9178_v35 = vmul.f32 %v9783_v39, %v9170_v3 }
0x14ce   : > { %9187 = vst.msk [vmem:[#allocation2] sm:$0xff] %vm1088_vm1, %v9185_v27  ;;  %v9186_v24 = vadd.f32 %v9784_v4, %v9178_v35  ;;  %v9195_v52 = vsel (!%p9785_p5), %vm1088_vm1, %v9185_v27, 0.0 }
0x14cf   : > { %9196 = vadd.xlane.f32.xlu0 (!%p9785_p5), %v9195_v52 }
0x14d0   : > { %9188 = vst.msk [vmem:[#allocation2 + $0x8] sm:$0xff] %vm1088_vm1, %v9186_v24  ;;  %v9198_v33 = vsel (!%p9785_p5), %vm1088_vm1, %v9186_v24, 0.0 }
0x14d3   : > { %9199 = vadd.xlane.f32.xlu0 %v9198_v33 }
0x155c   : > { %v9197_v60 = vpop.xlane.xlu0 %9196 }
0x155d   : > { %v9201_v6 = vmul.f32 0.03125, %v9197_v60 }
0x155f   : > { %v9203_v47 = vsub.f32 %v9185_v27, %v9201_v6 }
0x1560   : > { %v9200_v54 = vpop.xlane.xlu0 %9199 }
0x1561   : > { %v9202_v40 = vmul.f32 0.03125, %v9200_v54  ;;  %v9205_v56 = vmul.f32 %v9203_v47, %v9203_v47 }
0x1563   : > { %v9204_v14 = vsub.f32 %v9186_v24, %v9202_v40  ;;  %v9207_v23 = vsel %vm1088_vm1, %v9205_v56, 0.0 }
0x1564   : > { %9208 = vadd.xlane.f32.xlu1 %v9207_v23 }
0x1565   : > { %v9206_v58 = vmul.f32 %v9204_v14, %v9204_v14 }
0x1567   : > { %v9210_v7 = vsel %vm1088_vm1, %v9206_v58, 0.0 }
0x1568   : > { %9211 = vadd.xlane.f32.xlu1 %v9210_v7 }
0x15f1   : > { %v9209_v43 = vpop.xlane.xlu1 %9208 }
0x15f2   : > { %v9213_v44 = vmul.f32 0.03125, %v9209_v43 }
0x15f4   : > { %v9215_v34 = vadd.f32 1e-05, %v9213_v44 }
0x15f5   : > { %v9212_v48 = vpop.xlane.xlu1 %9211 }
0x15f6   : > { %10867 = vrsqrt.f32 %v9215_v34  ;;  %v9214_v5 = vmul.f32 0.03125, %v9212_v48 }
0x15f8   : > { %v9216_v50 = vadd.f32 1e-05, %v9214_v5 }
0x15fa   : > { %10869 = vrsqrt.f32 %v9216_v50 }
0x1600   : > { %v10868_v31 = vpop.eup %10867 }
0x1601   : > { %v9219_v59 = vmul.f32 %v10868_v31, %v9203_v47 }
0x1603   : > { %v9227_v21 = vmul.f32 %v9786_v18, %v9219_v59 }
0x1604   : > { %v10870_v30 = vpop.eup %10869 }
0x1605   : > { %v9235_v20 = vadd.f32 %v9787_v9, %v9227_v21  ;;  %v9220_v28 = vmul.f32 %v10870_v30, %v9204_v14 }
0x1607   : > { %9237 = vst.msk [vmem:[#allocation3] sm:$0xff] %vm1088_vm1, %v9235_v20  ;;  %v9228_v29 = vmul.f32 %v9786_v18, %v9220_v28 }
0x1609   : > { %v9236_v62 = vadd.f32 %v9787_v9, %v9228_v29 }
0x160b   : > { %9238 = vst.msk [vmem:[#allocation3 + $0x8] sm:$0xff] %vm1088_vm1, %v9236_v62 }
0x160c PF: > { %s12644_s16 = sld [smem:[#allocation7_spill]]  ;;  %s10942_s3 = smov [#allocation3]  }
0x160d   : > { %s9245_s1 = sshll.u32 %s10942_s3, 4  ;;  %s9246_s1 = int_to_ptr.vmem [resolvable:$true] %s9245_s1 }
0x160e   : > { %s10871_s9 = scalar_lea.vmem %s9246_s1, 256  ;;  %p10878_p10 = scmp.lt.s32.totalorder %s9246_s1, %s9246_s1 }
0x160f   : > { %p10872_p7 = scmp.ne.s32.totalorder %s9246_s1, %s10871_s9  ;;  %p10879_p11 = scmp.lt.s32.totalorder %s10871_s9, %s10871_s9 }
0x1611   : > { %p10880_p12 = por %p10879_p11, %p10878_p10 }
0x1612   : > { %p10552_p6 = scmp.eq.s32.totalorder %s12644_s16, 5 }
0x1614   : > { %p10873_p8 = pnand %p10872_p7, %p10552_p6 }
0x1616   : > { %p10874_p9 = pneg %p10873_p8 }
0x1618   : > { %p10881_p13 = pnand %p10880_p12, %p10874_p9 }
0x161a   : > { %10884 = shalt.err (!%p10881_p13)
}
0x161b   : > { %s12645_s20 = sld [smem:[#allocation29_spill]] }
0x1621   : > { %s10885_s29 = scalar_lea.hbm %s12645_s20, 256 }
0x1622   : > { %p10886_p0 = scmp.ne.s32.totalorder %s12645_s20, %s10885_s29  ;;  %p10891_p3 = scmp.lt.u32.totalorder %s10885_s29, %s12645_s20 }
0x1624   : > { %p10887_p1 = pnand %p10886_p0, %p10552_p6 }
0x1626   : > { %p10888_p2 = pneg %p10887_p1 }
0x1628   : > { %p10893_p4 = pnand %p10891_p3, %p10888_p2 }
0x162a   : > { %10896 = shalt.err (!%p10893_p4)
}
0x162b   : > { %s10943_s26 = smov 128   ;;  %s12646_s25 = smov 8  }
0x162c   : > { %10549 = dma.vmem_to_hbm [thread:$0]  (%p10552_p6), %s9246_s1, 256, %s12645_s20, [#allocation4], %s10943_s26, %s10943_s26, %s12646_s25  }
0x162d   : > { %10902 = dma.done.wait (%p10552_p6), [#allocation4], 256  }
0x162e   : > { %10904 = vsyncadd (%p10552_p6), [#allocation4], 4294967040 }
0x162f PF: > { %s12647_s18 = sld [smem:[#allocation6_spill]] }
0x1635   : > { %s36_s29 = sadd.s32 1, %s12647_s18  }
0x1636   : > { %p33_p5 = scmp.ge.s32.totalorder %s36_s29, 8  }
0x1638   :  { %35 = sbr.rel (!%p33_p5) target bundleno = 23 (0x17), region = 212 }
0x163f   :  { %9261 = vsyncpa [#allocation4], 1 }
0x1640   :  { %9263 = vsyncpa [#allocation4 + $0x1], 1 }

</bundles_post_ra>
